<compile_context>
chip_gen: v5e
topology: v5e:2x2
jax: 0.10.0
libtpu: 0.0.40
codegen_flags: <defaults>
</compile_context>

<pallas_src>
import functools

import jax
import jax.numpy as jnp
from jax import lax
from jax.experimental import pallas as pl
from jax.experimental.pallas import tpu as pltpu

BN_EPS = 1e-5
LANE = 128                       # output channels padded to a multiple of this
VMEM_LIMIT_BYTES = 48 * 1024 * 1024


def _round_up(x, m):
    return (x + m - 1) // m * m


def _compiler_params():
    return pltpu.CompilerParams(
        dimension_semantics=("parallel",),
        vmem_limit_bytes=VMEM_LIMIT_BYTES,
    )


# ---------------------------------------------------------------------------
# Shared kernel helper: write conv output (bf16) + BN partial statistics.
# Partials are [sum, centered sum-of-squares] per tile, computed from the f32
# accumulator (robust Chan merge happens in the wrapper).
# ---------------------------------------------------------------------------
def _emit_out_and_stats(y_f32, y_ref, st_ref, ho, wo):
    cp = y_f32.shape[-1]
    s = jnp.sum(y_f32, axis=0, keepdims=True)                 # (1, Cp)
    mean = s * (1.0 / (ho * wo))
    d = y_f32 - mean
    ssq = jnp.sum(d * d, axis=0, keepdims=True)               # (1, Cp)
    st_ref[0:1, 0:1, :] = s.reshape(1, 1, cp)                 # two plain stores,
    st_ref[0:1, 1:2, :] = ssq.reshape(1, 1, cp)               # no concat+reshape
    y_ref[...] = y_f32.reshape(1, ho, wo, cp).astype(y_ref.dtype)


# ---------------------------------------------------------------------------
# Kernel A: conv1 (3x3, stride) [+ fused 1x1 shortcut conv] + BN partials.
# Input is the halo-padded NHWC activation (parity-split for stride 2); the
# 9-tap patch is assembled in VMEM and contracted in one long-K MXU matmul.
# Grid: (N,) "parallel".
# ---------------------------------------------------------------------------
def _conv1_kernel(*refs, stride, ho, wo, has_sc):
    if has_sc:
        x_ref, w_ref, ws_ref, y_ref, st_ref, ys_ref, sts_ref = refs
    else:
        x_ref, w_ref, y_ref, st_ref = refs

    xv = x_ref[...]                                           # (1, G, Hs, Ws, Cin_p)
    cin_p = xv.shape[-1]
    taps = []
    for di in range(3):
        for dj in range(3):
            g = (di % stride) * stride + (dj % stride)
            r0, c0 = di // stride, dj // stride
            t = xv[0, g, r0:r0 + ho, c0:c0 + wo, :]           # (ho, wo, cin_p)
            taps.append(t.reshape(ho * wo, cin_p))
    patch = jnp.concatenate(taps, axis=-1)                    # (M, 9*cin_p) bf16
    y = jnp.dot(patch, w_ref[...], preferred_element_type=jnp.float32)
    _emit_out_and_stats(y, y_ref, st_ref, ho, wo)

    if has_sc:
        # 1x1-conv shortcut input == the center tap (index 4, already in VMEM).
        ys = jnp.dot(taps[4], ws_ref[...], preferred_element_type=jnp.float32)
        _emit_out_and_stats(ys, ys_ref, sts_ref, ho, wo)


# ---------------------------------------------------------------------------
# Kernel B: bn1 affine + ReLU (fused, h1 never hits HBM) -> zero-halo in VMEM
# scratch -> 3x3 conv2 (stride 1) as one long-K matmul + BN partials.
# Grid: (N,) "parallel".
# ---------------------------------------------------------------------------
def _conv2_fused_kernel(y1_ref, sc_ref, sh_ref, w_ref, y_ref, st_ref, pad_ref,
                        *, ho, wo):
    cp = y1_ref.shape[-1]
    h = y1_ref[...][0].astype(jnp.float32)                    # (ho, wo, cp)
    h = h * sc_ref[...].reshape(1, 1, cp) + sh_ref[...].reshape(1, 1, cp)
    h = jnp.maximum(h, 0.0).astype(pad_ref.dtype)

    pad_ref[...] = jnp.zeros(pad_ref.shape, pad_ref.dtype)    # zero halo
    pad_ref[1:ho + 1, 1:wo + 1, :] = h

    taps = []
    for di in range(3):
        for dj in range(3):
            taps.append(pad_ref[di:di + ho, dj:dj + wo, :].reshape(ho * wo, cp))
    patch = jnp.concatenate(taps, axis=-1)                    # (M, 9*cp) bf16
    y = jnp.dot(patch, w_ref[...], preferred_element_type=jnp.float32)
    _emit_out_and_stats(y, y_ref, st_ref, ho, wo)


# ---------------------------------------------------------------------------
# Kernel C: folded bn2 affine + folded shortcut-BN on residual + add + ReLU.
# out = relu(y2*sc2 + sh2 + r*rsc + rsh).   Grid: (N,) "parallel".
# ---------------------------------------------------------------------------
def _bn_residual_relu_kernel(y_ref, sc_ref, sh_ref, r_ref, rsc_ref, rsh_ref, o_ref):
    cp = y_ref.shape[-1]
    sc = sc_ref[...].reshape(1, 1, 1, cp)
    sh = sh_ref[...].reshape(1, 1, 1, cp)
    rsc = rsc_ref[...].reshape(1, 1, 1, cp)
    rsh = rsh_ref[...].reshape(1, 1, 1, cp)
    out = y_ref[...].astype(jnp.float32) * sc + sh
    out = out + r_ref[...].astype(jnp.float32) * rsc + rsh
    o_ref[...] = jnp.maximum(out, 0.0).astype(o_ref.dtype)


# ---------------------------------------------------------------------------
# pallas_call wrappers.
# ---------------------------------------------------------------------------
def conv1_pallas(xg, w, ws=None, *, stride, ho, wo):
    n, g, hs, wsp, cin_p = xg.shape
    k, cp = w.shape
    has_sc = ws is not None

    in_specs = [
        pl.BlockSpec((1, g, hs, wsp, cin_p), lambda i: (i, 0, 0, 0, 0)),
        pl.BlockSpec((k, cp), lambda i: (0, 0)),        # weights, VMEM-resident
    ]
    args = [xg, w]
    out_shapes = [jax.ShapeDtypeStruct((n, ho, wo, cp), jnp.bfloat16),
                  jax.ShapeDtypeStruct((n, 2, cp), jnp.float32)]
    out_specs = [pl.BlockSpec((1, ho, wo, cp), lambda i: (i, 0, 0, 0)),
                 pl.BlockSpec((1, 2, cp), lambda i: (i, 0, 0))]
    if has_sc:
        in_specs.append(pl.BlockSpec(ws.shape, lambda i: (0, 0)))
        args.append(ws)
        out_shapes += [jax.ShapeDtypeStruct((n, ho, wo, cp), jnp.bfloat16),
                       jax.ShapeDtypeStruct((n, 2, cp), jnp.float32)]
        out_specs += [pl.BlockSpec((1, ho, wo, cp), lambda i: (i, 0, 0, 0)),
                      pl.BlockSpec((1, 2, cp), lambda i: (i, 0, 0))]

    kernel = functools.partial(_conv1_kernel, stride=stride, ho=ho, wo=wo,
                               has_sc=has_sc)
    return pl.pallas_call(
        kernel,
        grid=(n,),
        in_specs=in_specs,
        out_specs=tuple(out_specs),
        out_shape=tuple(out_shapes),
        compiler_params=_compiler_params(),
    )(*args)


def conv2_fused_pallas(y1, sc1, sh1, w2, *, ho, wo):
    n, _, _, cp = y1.shape
    k = w2.shape[0]
    kernel = functools.partial(_conv2_fused_kernel, ho=ho, wo=wo)
    return pl.pallas_call(
        kernel,
        grid=(n,),
        in_specs=[pl.BlockSpec((1, ho, wo, cp), lambda i: (i, 0, 0, 0)),
                  pl.BlockSpec((1, cp), lambda i: (0, 0)),
                  pl.BlockSpec((1, cp), lambda i: (0, 0)),
                  pl.BlockSpec((k, cp), lambda i: (0, 0))],
        out_specs=(pl.BlockSpec((1, ho, wo, cp), lambda i: (i, 0, 0, 0)),
                   pl.BlockSpec((1, 2, cp), lambda i: (i, 0, 0))),
        out_shape=(jax.ShapeDtypeStruct((n, ho, wo, cp), jnp.bfloat16),
                   jax.ShapeDtypeStruct((n, 2, cp), jnp.float32)),
        scratch_shapes=[pltpu.VMEM((ho + 2, wo + 2, cp), jnp.bfloat16)],
        compiler_params=_compiler_params(),
    )(y1, sc1, sh1, w2)


def bn_residual_relu_pallas(y2, sc2, sh2, res, rsc, rsh, *, out_dtype=jnp.bfloat16):
    n, ho, wo, cp = y2.shape
    big = pl.BlockSpec((1, ho, wo, cp), lambda i: (i, 0, 0, 0))
    vec = pl.BlockSpec((1, cp), lambda i: (0, 0))
    return pl.pallas_call(
        _bn_residual_relu_kernel,
        grid=(n,),
        in_specs=[big, vec, vec, big, vec, vec],
        out_specs=big,
        out_shape=jax.ShapeDtypeStruct((n, ho, wo, cp), out_dtype),
        compiler_params=_compiler_params(),
    )(y2, sc2, sh2, res, rsc, rsh)


# ---------------------------------------------------------------------------
# XLA-side glue: halo/parity prep, weight re-layout, Chan-merge BN folding.
# ---------------------------------------------------------------------------
def _split_stride_grids(xp, stride, ho, wo):
    """(N,H+2,W+2,C) padded input -> (N, stride*stride, Hs, Ws, C) parity grids.

    Grid (qi,qj) holds xp[:, qi::stride, qj::stride, :]; tap (di,dj) of a
    stride-s 3x3 conv is the contiguous slice
    grids[:, (di%s)*s + dj%s, di//s : di//s+ho, dj//s : dj//s+wo, :].
    """
    if stride == 1:
        return xp[:, None]
    hs, ws = ho + 1, wo + 1
    grids = []
    for qi in range(stride):
        for qj in range(stride):
            g = xp[:, qi::stride, qj::stride, :][:, :hs, :ws, :]
            pad_h, pad_w = hs - g.shape[1], ws - g.shape[2]
            if pad_h or pad_w:
                g = jnp.pad(g, ((0, 0), (0, pad_h), (0, pad_w), (0, 0)))
            grids.append(g)
    return jnp.stack(grids, axis=1)


def _conv3x3_w_to_mat(w_oihw, cin_p, cout_p):
    cout, cin = w_oihw.shape[0], w_oihw.shape[1]
    w = jnp.transpose(w_oihw, (2, 3, 1, 0))                   # (3,3,cin,cout)
    w = jnp.pad(w, ((0, 0), (0, 0), (0, cin_p - cin), (0, cout_p - cout)))
    return w.reshape(9 * cin_p, cout_p).astype(jnp.bfloat16)  # tap-major rows


def _conv1x1_w_to_mat(w_oihw, cin_p, cout_p):
    cout, cin = w_oihw.shape[0], w_oihw.shape[1]
    w = jnp.transpose(w_oihw[:, :, 0, 0], (1, 0))             # (cin, cout)
    w = jnp.pad(w, ((0, cin_p - cin), (0, cout_p - cout)))
    return w.astype(jnp.bfloat16)


def _bn_scale_shift(stats, tile_count, gamma, beta, cp, eps=BN_EPS):
    """Chan-merge per-tile [sum, centered ssq]; fold BN into (scale, shift)."""
    s = stats[:, 0, :]                                        # (T, Cp)
    m2 = stats[:, 1, :]                                       # (T, Cp)
    n_t = float(tile_count)
    total = n_t * stats.shape[0]
    mean = jnp.sum(s, axis=0) / total
    tile_mean = s / n_t
    var = (jnp.sum(m2, axis=0)
           + n_t * jnp.sum(jnp.square(tile_mean - mean[None, :]), axis=0)) / total
    var = jnp.maximum(var, 0.0)                               # biased variance
    g = jnp.pad(gamma, (0, cp - gamma.shape[0]), constant_values=1.0)
    b = jnp.pad(beta, (0, cp - beta.shape[0]))
    scale = g * lax.rsqrt(var + eps)
    shift = b - mean * scale
    return scale.reshape(1, cp), shift.reshape(1, cp)


# ---------------------------------------------------------------------------
# BasicBlock parameters + forward.
# ---------------------------------------------------------------------------
def init_basic_block_params(key, in_planes, planes, stride):
    ks = jax.random.split(key, 10)
    p = {
        "conv1_w": 0.1 * jax.random.normal(ks[0], (planes, in_planes, 3, 3), jnp.float32),
        "conv2_w": 0.1 * jax.random.normal(ks[1], (planes, planes, 3, 3), jnp.float32),
        "bn1_gamma": 1.0 + 0.1 * jax.random.normal(ks[2], (planes,), jnp.float32),
        "bn1_beta": 0.1 * jax.random.normal(ks[3], (planes,), jnp.float32),
        "bn2_gamma": 1.0 + 0.1 * jax.random.normal(ks[4], (planes,), jnp.float32),
        "bn2_beta": 0.1 * jax.random.normal(ks[5], (planes,), jnp.float32),
    }
    if stride != 1 or in_planes != planes:
        p["sc_w"] = 0.1 * jax.random.normal(ks[6], (planes, in_planes, 1, 1), jnp.float32)
        p["sc_gamma"] = 1.0 + 0.1 * jax.random.normal(ks[7], (planes,), jnp.float32)
        p["sc_beta"] = 0.1 * jax.random.normal(ks[8], (planes,), jnp.float32)
    return p


def basic_block_forward(x_nchw, params, in_planes, planes, stride):
    # Public I/O is NCHW f32 (PyTorch). Internally: bf16 NHWC, channels padded
    # to a lane-dense multiple of 128.
    x = jnp.transpose(x_nchw, (0, 2, 3, 1)).astype(jnp.float32)      # NHWC
    n, h, w, _ = x.shape
    has_sc = (stride != 1) or (in_planes != planes)
    cin_p = _round_up(in_planes, 16)
    cp = _round_up(planes, LANE)
    ho = (h - 1) // stride + 1
    wo = (w - 1) // stride + 1

    # halo + channel padding + bf16 cast, then parity split for the stride.
    xp = jnp.pad(x, ((0, 0), (1, 1), (1, 1), (0, cin_p - in_planes))
                 ).astype(jnp.bfloat16)
    xg = _split_stride_grids(xp, stride, ho, wo)

    # ---- conv1 (3x3, stride) [+ fused 1x1 shortcut conv], per-image matmul
    w1 = _conv3x3_w_to_mat(params["conv1_w"], cin_p, cp)
    if has_sc:
        ws = _conv1x1_w_to_mat(params["sc_w"], cin_p, cp)
        y1, st1, ys, sts = conv1_pallas(xg, w1, ws, stride=stride, ho=ho, wo=wo)
    else:
        y1, st1 = conv1_pallas(xg, w1, stride=stride, ho=ho, wo=wo)

    # ---- fold bn1; bn1 affine + ReLU are applied inside the conv2 kernel
    sc1, sh1 = _bn_scale_shift(st1, ho * wo, params["bn1_gamma"],
                               params["bn1_beta"], cp)

    # ---- conv2 (3x3, stride 1) fused with bn1+relu+halo
    w2 = _conv3x3_w_to_mat(params["conv2_w"], cp, cp)
    y2, st2 = conv2_fused_pallas(y1, sc1, sh1, w2, ho=ho, wo=wo)
    sc2, sh2 = _bn_scale_shift(st2, ho * wo, params["bn2_gamma"],
                               params["bn2_beta"], cp)

    # ---- residual term, expressed as r*rsc + rsh (bf16 data, f32 affine)
    if has_sc:
        res = ys
        rsc, rsh = _bn_scale_shift(sts, ho * wo, params["sc_gamma"],
                                   params["sc_beta"], cp)
    else:
        res = jnp.pad(x, ((0, 0), (0, 0), (0, 0), (0, cp - in_planes))
                      ).astype(jnp.bfloat16)
        rsc = jnp.ones((1, cp), jnp.float32)
        rsh = jnp.zeros((1, cp), jnp.float32)

    # ---- bn2 + residual + relu fused; bf16 lane-dense output
    out = bn_residual_relu_pallas(y2, sc2, sh2, res, rsc, rsh)
    out = out[:, :, :, :planes].astype(jnp.float32)
    return jnp.transpose(out, (0, 3, 1, 2))                   # back to NCHW


# ---------------------------------------------------------------------------
# Pure-JAX f32 reference for verification.
# ---------------------------------------------------------------------------
def _ref_conv(x, w, stride, pad):
    return lax.conv_general_dilated(
        x, w, (stride, stride), [(pad, pad), (pad, pad)],
        dimension_numbers=("NCHW", "OIHW", "NCHW"),
        precision=lax.Precision.HIGHEST,
    )


def _ref_bn(x, gamma, beta, eps=BN_EPS):
    mean = jnp.mean(x, axis=(0, 2, 3), keepdims=True)
    var = jnp.mean(jnp.square(x - mean), axis=(0, 2, 3), keepdims=True)
    xhat = (x - mean) * lax.rsqrt(var + eps)
    return xhat * gamma.reshape(1, -1, 1, 1) + beta.reshape(1, -1, 1, 1)


def ref_forward(x, params, in_planes, planes, stride):
    out = jax.nn.relu(_ref_bn(_ref_conv(x, params["conv1_w"], stride, 1),
                              params["bn1_gamma"], params["bn1_beta"]))
    out = _ref_bn(_ref_conv(out, params["conv2_w"], 1, 1),
                  params["bn2_gamma"], params["bn2_beta"])
    if stride != 1 or in_planes != planes:
        sc = _ref_bn(_ref_conv(x, params["sc_w"], stride, 0),
                     params["sc_gamma"], params["sc_beta"])
    else:
        sc = x
    return jax.nn.relu(out + sc)


if __name__ == "__main__":
    key = jax.random.PRNGKey(0)
    kx, kp = jax.random.split(key)

    x = jax.random.normal(kx, (2, 4, 16, 16), jnp.float32)    # NCHW, like PyTorch

    configs = [
        dict(in_planes=4, planes=4, stride=1),    # identity shortcut path
        dict(in_planes=4, planes=8, stride=2),    # conv1x1 + BN shortcut path
    ]

    fwd = jax.jit(basic_block_forward,
                  static_argnames=("in_planes", "planes", "stride"))

    for i, cfg in enumerate(configs):
        params = init_basic_block_params(jax.random.fold_in(kp, i), **cfg)
        y = jax.block_until_ready(fwd(x, params, **cfg))
        y_ref = ref_forward(x, params, **cfg)
        assert y.shape == y_ref.shape, (y.shape, y_ref.shape)
        err = jnp.abs(y - y_ref)
        max_err = float(jnp.max(err))
        mean_err = float(jnp.mean(err))
        # bf16 MXU operands + bf16-stored intermediates vs f32-HIGHEST reference
        # (post-BN values are O(1)).
        assert max_err < 1.2e-1 and mean_err < 2e-2, (cfg, max_err, mean_err)

    print("KERNEL_OK")
</pallas_src>

<mosaic_0001>
module attributes {stable_mosaic.version = 11 : i64} {
  func.func @_conv1_kernel(%arg0: i32, %arg1: memref<1x1x18x18x16xbf16, #tpu.memory_space<vmem>>, %arg2: memref<144x128xbf16, #tpu.memory_space<vmem>>, %arg3: memref<1x16x16x128xbf16, #tpu.memory_space<vmem>>, %arg4: memref<1x2x128xf32, #tpu.memory_space<vmem>>) attributes {dimension_semantics = [#tpu.dimension_semantics<parallel>], iteration_bounds = array<i64: 2>, scalar_prefetch = 0 : i64, scratch_operands = 0 : i64, tpu.core_type = #tpu.core_type<tc>, window_params = [{transform_indices = @transform_0, window_bounds = array<i64: 1, 1, 18, 18, 16>}, {pipeline_mode = #tpu.pipeline_mode<synchronous>, transform_indices = @transform_1, window_bounds = array<i64: 144, 128>}, {transform_indices = @transform_2, window_bounds = array<i64: 1, 16, 16, 128>}, {transform_indices = @transform_3, window_bounds = array<i64: 1, 2, 128>}]} {
    %c0 = arith.constant 0 : index
    %c0_0 = arith.constant 0 : index
    %c0_1 = arith.constant 0 : index
    %c0_2 = arith.constant 0 : index
    %c0_3 = arith.constant 0 : index
    %0 = vector.load %arg1[%c0, %c0_0, %c0_1, %c0_2, %c0_3] : memref<1x1x18x18x16xbf16, #tpu.memory_space<vmem>>, vector<1x1x18x18x16xbf16>
    %1 = vector.extract_strided_slice %0 {offsets = [0, 0, 0, 0, 0], sizes = [1, 1, 16, 16, 16], strides = [1, 1, 1, 1, 1]} : vector<1x1x18x18x16xbf16> to vector<1x1x16x16x16xbf16>
    %2 = vector.shape_cast %1 : vector<1x1x16x16x16xbf16> to vector<16x16x16xbf16>
    %3 = vector.shape_cast %2 : vector<16x16x16xbf16> to vector<256x16xbf16>
    %4 = vector.extract_strided_slice %0 {offsets = [0, 0, 0, 1, 0], sizes = [1, 1, 16, 16, 16], strides = [1, 1, 1, 1, 1]} : vector<1x1x18x18x16xbf16> to vector<1x1x16x16x16xbf16>
    %5 = vector.shape_cast %4 : vector<1x1x16x16x16xbf16> to vector<16x16x16xbf16>
    %6 = vector.shape_cast %5 : vector<16x16x16xbf16> to vector<256x16xbf16>
    %7 = vector.extract_strided_slice %0 {offsets = [0, 0, 0, 2, 0], sizes = [1, 1, 16, 16, 16], strides = [1, 1, 1, 1, 1]} : vector<1x1x18x18x16xbf16> to vector<1x1x16x16x16xbf16>
    %8 = vector.shape_cast %7 : vector<1x1x16x16x16xbf16> to vector<16x16x16xbf16>
    %9 = vector.shape_cast %8 : vector<16x16x16xbf16> to vector<256x16xbf16>
    %10 = vector.extract_strided_slice %0 {offsets = [0, 0, 1, 0, 0], sizes = [1, 1, 16, 16, 16], strides = [1, 1, 1, 1, 1]} : vector<1x1x18x18x16xbf16> to vector<1x1x16x16x16xbf16>
    %11 = vector.shape_cast %10 : vector<1x1x16x16x16xbf16> to vector<16x16x16xbf16>
    %12 = vector.shape_cast %11 : vector<16x16x16xbf16> to vector<256x16xbf16>
    %13 = vector.extract_strided_slice %0 {offsets = [0, 0, 1, 1, 0], sizes = [1, 1, 16, 16, 16], strides = [1, 1, 1, 1, 1]} : vector<1x1x18x18x16xbf16> to vector<1x1x16x16x16xbf16>
    %14 = vector.shape_cast %13 : vector<1x1x16x16x16xbf16> to vector<16x16x16xbf16>
    %15 = vector.shape_cast %14 : vector<16x16x16xbf16> to vector<256x16xbf16>
    %16 = vector.extract_strided_slice %0 {offsets = [0, 0, 1, 2, 0], sizes = [1, 1, 16, 16, 16], strides = [1, 1, 1, 1, 1]} : vector<1x1x18x18x16xbf16> to vector<1x1x16x16x16xbf16>
    %17 = vector.shape_cast %16 : vector<1x1x16x16x16xbf16> to vector<16x16x16xbf16>
    %18 = vector.shape_cast %17 : vector<16x16x16xbf16> to vector<256x16xbf16>
    %19 = vector.extract_strided_slice %0 {offsets = [0, 0, 2, 0, 0], sizes = [1, 1, 16, 16, 16], strides = [1, 1, 1, 1, 1]} : vector<1x1x18x18x16xbf16> to vector<1x1x16x16x16xbf16>
    %20 = vector.shape_cast %19 : vector<1x1x16x16x16xbf16> to vector<16x16x16xbf16>
    %21 = vector.shape_cast %20 : vector<16x16x16xbf16> to vector<256x16xbf16>
    %22 = vector.extract_strided_slice %0 {offsets = [0, 0, 2, 1, 0], sizes = [1, 1, 16, 16, 16], strides = [1, 1, 1, 1, 1]} : vector<1x1x18x18x16xbf16> to vector<1x1x16x16x16xbf16>
    %23 = vector.shape_cast %22 : vector<1x1x16x16x16xbf16> to vector<16x16x16xbf16>
    %24 = vector.shape_cast %23 : vector<16x16x16xbf16> to vector<256x16xbf16>
    %25 = vector.extract_strided_slice %0 {offsets = [0, 0, 2, 2, 0], sizes = [1, 1, 16, 16, 16], strides = [1, 1, 1, 1, 1]} : vector<1x1x18x18x16xbf16> to vector<1x1x16x16x16xbf16>
    %26 = vector.shape_cast %25 : vector<1x1x16x16x16xbf16> to vector<16x16x16xbf16>
    %27 = vector.shape_cast %26 : vector<16x16x16xbf16> to vector<256x16xbf16>
    %28 = tpu.concatenate %3, %6, %9, %12, %15, %18, %21, %24, %27 in 1 : vector<256x16xbf16>, vector<256x16xbf16>, vector<256x16xbf16>, vector<256x16xbf16>, vector<256x16xbf16>, vector<256x16xbf16>, vector<256x16xbf16>, vector<256x16xbf16>, vector<256x16xbf16> -> vector<256x144xbf16>
    %c0_4 = arith.constant 0 : index
    %c0_5 = arith.constant 0 : index
    %29 = vector.load %arg2[%c0_4, %c0_5] : memref<144x128xbf16, #tpu.memory_space<vmem>>, vector<144x128xbf16>
    %cst = arith.constant dense<0.000000e+00> : vector<256x128xf32>
    %30 = tpu.matmul %28, %29, %cst {dimension_numbers = #tpu.dot_dimension_numbers<[1], [0], [0], [1], [0, 0, 1, 1], [], []>} : vector<256x144xbf16>, vector<144x128xbf16>, vector<256x128xf32> -> vector<256x128xf32>
    %cst_6 = arith.constant dense<0.000000e+00> : vector<128xf32>
    %31 = vector.multi_reduction <add>, %30, %cst_6 [0] : vector<256x128xf32> to vector<128xf32>
    %32 = vector.shape_cast %31 : vector<128xf32> to vector<1x128xf32>
    %cst_7 = arith.constant 3.906250e-03 : f32
    %33 = vector.broadcast %cst_7 : f32 to vector<1x128xf32>
    %34 = arith.mulf %32, %33 : vector<1x128xf32>
    %35 = vector.broadcast %34 : vector<1x128xf32> to vector<256x128xf32>
    %36 = arith.subf %30, %35 : vector<256x128xf32>
    %37 = arith.mulf %36, %36 : vector<256x128xf32>
    %cst_8 = arith.constant dense<0.000000e+00> : vector<128xf32>
    %38 = vector.multi_reduction <add>, %37, %cst_8 [0] : vector<256x128xf32> to vector<128xf32>
    %39 = vector.shape_cast %38 : vector<128xf32> to vector<1x128xf32>
    %40 = vector.shape_cast %32 : vector<1x128xf32> to vector<1x1x128xf32>
    %c0_9 = arith.constant 0 : index
    %c0_10 = arith.constant 0 : index
    %c0_11 = arith.constant 0 : index
    %41 = vector.load %arg4[%c0_9, %c0_10, %c0_11] : memref<1x2x128xf32, #tpu.memory_space<vmem>>, vector<1x1x128xf32>
    tpu.vector_store %arg4[%c0_9, %c0_10, %c0_11], %40 {strides = array<i32>} : memref<1x2x128xf32, #tpu.memory_space<vmem>>, vector<1x1x128xf32>,
    %42 = vector.shape_cast %39 : vector<1x128xf32> to vector<1x1x128xf32>
    %c0_12 = arith.constant 0 : index
    %c1 = arith.constant 1 : index
    %c0_13 = arith.constant 0 : index
    %43 = vector.load %arg4[%c0_12, %c1, %c0_13] : memref<1x2x128xf32, #tpu.memory_space<vmem>>, vector<1x1x128xf32>
    tpu.vector_store %arg4[%c0_12, %c1, %c0_13], %42 {strides = array<i32>} : memref<1x2x128xf32, #tpu.memory_space<vmem>>, vector<1x1x128xf32>,
    %44 = vector.shape_cast %30 : vector<256x128xf32> to vector<1x16x16x128xf32>
    %45 = arith.truncf %44 : vector<1x16x16x128xf32> to vector<1x16x16x128xbf16>
    %c0_14 = arith.constant 0 : index
    %c0_15 = arith.constant 0 : index
    %c0_16 = arith.constant 0 : index
    %c0_17 = arith.constant 0 : index
    %46 = vector.load %arg3[%c0_14, %c0_15, %c0_16, %c0_17] : memref<1x16x16x128xbf16, #tpu.memory_space<vmem>>, vector<1x16x16x128xbf16>
    tpu.vector_store %arg3[%c0_14, %c0_15, %c0_16, %c0_17], %45 {strides = array<i32>} : memref<1x16x16x128xbf16, #tpu.memory_space<vmem>>, vector<1x16x16x128xbf16>,
    return
  }
  func.func @transform_0(%arg0: i32) -> (i32, i32, i32, i32, i32) {
    %c0_i32 = arith.constant 0 : i32
    %c0_i32_0 = arith.constant 0 : i32
    %c0_i32_1 = arith.constant 0 : i32
    %c0_i32_2 = arith.constant 0 : i32
    %c0_i32_3 = arith.constant 0 : i32
    return %arg0, %c0_i32, %c0_i32_0, %c0_i32_1, %c0_i32_2 : i32, i32, i32, i32, i32
  }
  func.func @transform_1(%arg0: i32) -> (i32, i32) {
    %c0_i32 = arith.constant 0 : i32
    %c0_i32_0 = arith.constant 0 : i32
    %c0_i32_1 = arith.constant 0 : i32
    return %c0_i32, %c0_i32_0 : i32, i32
  }
  func.func @transform_2(%arg0: i32) -> (i32, i32, i32, i32) {
    %c0_i32 = arith.constant 0 : i32
    %c0_i32_0 = arith.constant 0 : i32
    %c0_i32_1 = arith.constant 0 : i32
    %c0_i32_2 = arith.constant 0 : i32
    return %arg0, %c0_i32, %c0_i32_0, %c0_i32_1 : i32, i32, i32, i32
  }
  func.func @transform_3(%arg0: i32) -> (i32, i32, i32) {
    %c0_i32 = arith.constant 0 : i32
    %c0_i32_0 = arith.constant 0 : i32
    %c0_i32_1 = arith.constant 0 : i32
    return %arg0, %c0_i32, %c0_i32_0 : i32, i32, i32
  }
}

module attributes {stable_mosaic.version = 11 : i64} {
  func.func @_conv2_fused_kernel(%arg0: i32, %arg1: memref<1x16x16x128xbf16, #tpu.memory_space<vmem>>, %arg2: memref<1x128xf32, #tpu.memory_space<vmem>>, %arg3: memref<1x128xf32, #tpu.memory_space<vmem>>, %arg4: memref<1152x128xbf16, #tpu.memory_space<vmem>>, %arg5: memref<1x16x16x128xbf16, #tpu.memory_space<vmem>>, %arg6: memref<1x2x128xf32, #tpu.memory_space<vmem>>, %arg7: memref<18x18x128xbf16, #tpu.memory_space<vmem>>) attributes {dimension_semantics = [#tpu.dimension_semantics<parallel>], iteration_bounds = array<i64: 2>, scalar_prefetch = 0 : i64, scratch_operands = 1 : i64, tpu.core_type = #tpu.core_type<tc>, window_params = [{transform_indices = @transform_0, window_bounds = array<i64: 1, 16, 16, 128>}, {pipeline_mode = #tpu.pipeline_mode<synchronous>, transform_indices = @transform_1, window_bounds = array<i64: 1, 128>}, {pipeline_mode = #tpu.pipeline_mode<synchronous>, transform_indices = @transform_2, window_bounds = array<i64: 1, 128>}, {pipeline_mode = #tpu.pipeline_mode<synchronous>, transform_indices = @transform_3, window_bounds = array<i64: 1152, 128>}, {transform_indices = @transform_4, window_bounds = array<i64: 1, 16, 16, 128>}, {transform_indices = @transform_5, window_bounds = array<i64: 1, 2, 128>}]} {
    %c0 = arith.constant 0 : index
    %c0_0 = arith.constant 0 : index
    %c0_1 = arith.constant 0 : index
    %c0_2 = arith.constant 0 : index
    %0 = vector.load %arg1[%c0, %c0_0, %c0_1, %c0_2] : memref<1x16x16x128xbf16, #tpu.memory_space<vmem>>, vector<1x16x16x128xbf16>
    %1 = vector.shape_cast %0 : vector<1x16x16x128xbf16> to vector<16x16x128xbf16>
    %2 = arith.extf %1 : vector<16x16x128xbf16> to vector<16x16x128xf32>
    %c0_3 = arith.constant 0 : index
    %c0_4 = arith.constant 0 : index
    %3 = vector.load %arg2[%c0_3, %c0_4] : memref<1x128xf32, #tpu.memory_space<vmem>>, vector<1x128xf32>
    %4 = vector.shape_cast %3 : vector<1x128xf32> to vector<1x1x128xf32>
    %5 = vector.broadcast %4 : vector<1x1x128xf32> to vector<16x16x128xf32>
    %6 = arith.mulf %2, %5 : vector<16x16x128xf32>
    %c0_5 = arith.constant 0 : index
    %c0_6 = arith.constant 0 : index
    %7 = vector.load %arg3[%c0_5, %c0_6] : memref<1x128xf32, #tpu.memory_space<vmem>>, vector<1x128xf32>
    %8 = vector.shape_cast %7 : vector<1x128xf32> to vector<1x1x128xf32>
    %9 = vector.broadcast %8 : vector<1x1x128xf32> to vector<16x16x128xf32>
    %10 = arith.addf %6, %9 : vector<16x16x128xf32>
    %cst = arith.constant 0.000000e+00 : f32
    %11 = vector.broadcast %cst : f32 to vector<16x16x128xf32>
    %12 = arith.maximumf %10, %11 : vector<16x16x128xf32>
    %13 = arith.truncf %12 : vector<16x16x128xf32> to vector<16x16x128xbf16>
    %cst_7 = arith.constant 0.000000e+00 : bf16
    %14 = vector.broadcast %cst_7 : bf16 to vector<18x18x128xbf16>
    %c0_8 = arith.constant 0 : index
    %c0_9 = arith.constant 0 : index
    %c0_10 = arith.constant 0 : index
    %15 = vector.load %arg7[%c0_8, %c0_9, %c0_10] : memref<18x18x128xbf16, #tpu.memory_space<vmem>>, vector<18x18x128xbf16>
    tpu.vector_store %arg7[%c0_8, %c0_9, %c0_10], %14 {strides = array<i32>} : memref<18x18x128xbf16, #tpu.memory_space<vmem>>, vector<18x18x128xbf16>,
    %c1 = arith.constant 1 : index
    %c1_11 = arith.constant 1 : index
    %c0_12 = arith.constant 0 : index
    %16 = vector.load %arg7[%c1, %c1_11, %c0_12] : memref<18x18x128xbf16, #tpu.memory_space<vmem>>, vector<16x16x128xbf16>
    tpu.vector_store %arg7[%c1, %c1_11, %c0_12], %13 {strides = array<i32>} : memref<18x18x128xbf16, #tpu.memory_space<vmem>>, vector<16x16x128xbf16>,
    %c0_13 = arith.constant 0 : index
    %c0_14 = arith.constant 0 : index
    %c0_15 = arith.constant 0 : index
    %17 = vector.load %arg7[%c0_13, %c0_14, %c0_15] : memref<18x18x128xbf16, #tpu.memory_space<vmem>>, vector<16x16x128xbf16>
    %18 = vector.shape_cast %17 : vector<16x16x128xbf16> to vector<256x128xbf16>
    %c0_16 = arith.constant 0 : index
    %c1_17 = arith.constant 1 : index
    %c0_18 = arith.constant 0 : index
    %19 = vector.load %arg7[%c0_16, %c1_17, %c0_18] : memref<18x18x128xbf16, #tpu.memory_space<vmem>>, vector<16x16x128xbf16>
    %20 = vector.shape_cast %19 : vector<16x16x128xbf16> to vector<256x128xbf16>
    %c0_19 = arith.constant 0 : index
    %c2 = arith.constant 2 : index
    %c0_20 = arith.constant 0 : index
    %21 = vector.load %arg7[%c0_19, %c2, %c0_20] : memref<18x18x128xbf16, #tpu.memory_space<vmem>>, vector<16x16x128xbf16>
    %22 = vector.shape_cast %21 : vector<16x16x128xbf16> to vector<256x128xbf16>
    %c1_21 = arith.constant 1 : index
    %c0_22 = arith.constant 0 : index
    %c0_23 = arith.constant 0 : index
    %23 = vector.load %arg7[%c1_21, %c0_22, %c0_23] : memref<18x18x128xbf16, #tpu.memory_space<vmem>>, vector<16x16x128xbf16>
    %24 = vector.shape_cast %23 : vector<16x16x128xbf16> to vector<256x128xbf16>
    %c1_24 = arith.constant 1 : index
    %c1_25 = arith.constant 1 : index
    %c0_26 = arith.constant 0 : index
    %25 = vector.load %arg7[%c1_24, %c1_25, %c0_26] : memref<18x18x128xbf16, #tpu.memory_space<vmem>>, vector<16x16x128xbf16>
    %26 = vector.shape_cast %25 : vector<16x16x128xbf16> to vector<256x128xbf16>
    %c1_27 = arith.constant 1 : index
    %c2_28 = arith.constant 2 : index
    %c0_29 = arith.constant 0 : index
    %27 = vector.load %arg7[%c1_27, %c2_28, %c0_29] : memref<18x18x128xbf16, #tpu.memory_space<vmem>>, vector<16x16x128xbf16>
    %28 = vector.shape_cast %27 : vector<16x16x128xbf16> to vector<256x128xbf16>
    %c2_30 = arith.constant 2 : index
    %c0_31 = arith.constant 0 : index
    %c0_32 = arith.constant 0 : index
    %29 = vector.load %arg7[%c2_30, %c0_31, %c0_32] : memref<18x18x128xbf16, #tpu.memory_space<vmem>>, vector<16x16x128xbf16>
    %30 = vector.shape_cast %29 : vector<16x16x128xbf16> to vector<256x128xbf16>
    %c2_33 = arith.constant 2 : index
    %c1_34 = arith.constant 1 : index
    %c0_35 = arith.constant 0 : index
    %31 = vector.load %arg7[%c2_33, %c1_34, %c0_35] : memref<18x18x128xbf16, #tpu.memory_space<vmem>>, vector<16x16x128xbf16>
    %32 = vector.shape_cast %31 : vector<16x16x128xbf16> to vector<256x128xbf16>
    %c2_36 = arith.constant 2 : index
    %c2_37 = arith.constant 2 : index
    %c0_38 = arith.constant 0 : index
    %33 = vector.load %arg7[%c2_36, %c2_37, %c0_38] : memref<18x18x128xbf16, #tpu.memory_space<vmem>>, vector<16x16x128xbf16>
    %34 = vector.shape_cast %33 : vector<16x16x128xbf16> to vector<256x128xbf16>
    %35 = tpu.concatenate %18, %20, %22, %24, %26, %28, %30, %32, %34 in 1 : vector<256x128xbf16>, vector<256x128xbf16>, vector<256x128xbf16>, vector<256x128xbf16>, vector<256x128xbf16>, vector<256x128xbf16>, vector<256x128xbf16>, vector<256x128xbf16>, vector<256x128xbf16> -> vector<256x1152xbf16>
    %c0_39 = arith.constant 0 : index
    %c0_40 = arith.constant 0 : index
    %36 = vector.load %arg4[%c0_39, %c0_40] : memref<1152x128xbf16, #tpu.memory_space<vmem>>, vector<1152x128xbf16>
    %cst_41 = arith.constant dense<0.000000e+00> : vector<256x128xf32>
    %37 = tpu.matmul %35, %36, %cst_41 {dimension_numbers = #tpu.dot_dimension_numbers<[1], [0], [0], [1], [0, 0, 1, 1], [], []>} : vector<256x1152xbf16>, vector<1152x128xbf16>, vector<256x128xf32> -> vector<256x128xf32>
    %cst_42 = arith.constant dense<0.000000e+00> : vector<128xf32>
    %38 = vector.multi_reduction <add>, %37, %cst_42 [0] : vector<256x128xf32> to vector<128xf32>
    %39 = vector.shape_cast %38 : vector<128xf32> to vector<1x128xf32>
    %cst_43 = arith.constant 3.906250e-03 : f32
    %40 = vector.broadcast %cst_43 : f32 to vector<1x128xf32>
    %41 = arith.mulf %39, %40 : vector<1x128xf32>
    %42 = vector.broadcast %41 : vector<1x128xf32> to vector<256x128xf32>
    %43 = arith.subf %37, %42 : vector<256x128xf32>
    %44 = arith.mulf %43, %43 : vector<256x128xf32>
    %cst_44 = arith.constant dense<0.000000e+00> : vector<128xf32>
    %45 = vector.multi_reduction <add>, %44, %cst_44 [0] : vector<256x128xf32> to vector<128xf32>
    %46 = vector.shape_cast %45 : vector<128xf32> to vector<1x128xf32>
    %47 = vector.shape_cast %39 : vector<1x128xf32> to vector<1x1x128xf32>
    %c0_45 = arith.constant 0 : index
    %c0_46 = arith.constant 0 : index
    %c0_47 = arith.constant 0 : index
    %48 = vector.load %arg6[%c0_45, %c0_46, %c0_47] : memref<1x2x128xf32, #tpu.memory_space<vmem>>, vector<1x1x128xf32>
    tpu.vector_store %arg6[%c0_45, %c0_46, %c0_47], %47 {strides = array<i32>} : memref<1x2x128xf32, #tpu.memory_space<vmem>>, vector<1x1x128xf32>,
    %49 = vector.shape_cast %46 : vector<1x128xf32> to vector<1x1x128xf32>
    %c0_48 = arith.constant 0 : index
    %c1_49 = arith.constant 1 : index
    %c0_50 = arith.constant 0 : index
    %50 = vector.load %arg6[%c0_48, %c1_49, %c0_50] : memref<1x2x128xf32, #tpu.memory_space<vmem>>, vector<1x1x128xf32>
    tpu.vector_store %arg6[%c0_48, %c1_49, %c0_50], %49 {strides = array<i32>} : memref<1x2x128xf32, #tpu.memory_space<vmem>>, vector<1x1x128xf32>,
    %51 = vector.shape_cast %37 : vector<256x128xf32> to vector<1x16x16x128xf32>
    %52 = arith.truncf %51 : vector<1x16x16x128xf32> to vector<1x16x16x128xbf16>
    %c0_51 = arith.constant 0 : index
    %c0_52 = arith.constant 0 : index
    %c0_53 = arith.constant 0 : index
    %c0_54 = arith.constant 0 : index
    %53 = vector.load %arg5[%c0_51, %c0_52, %c0_53, %c0_54] : memref<1x16x16x128xbf16, #tpu.memory_space<vmem>>, vector<1x16x16x128xbf16>
    tpu.vector_store %arg5[%c0_51, %c0_52, %c0_53, %c0_54], %52 {strides = array<i32>} : memref<1x16x16x128xbf16, #tpu.memory_space<vmem>>, vector<1x16x16x128xbf16>,
    return
  }
  func.func @transform_0(%arg0: i32) -> (i32, i32, i32, i32) {
    %c0_i32 = arith.constant 0 : i32
    %c0_i32_0 = arith.constant 0 : i32
    %c0_i32_1 = arith.constant 0 : i32
    %c0_i32_2 = arith.constant 0 : i32
    return %arg0, %c0_i32, %c0_i32_0, %c0_i32_1 : i32, i32, i32, i32
  }
  func.func @transform_1(%arg0: i32) -> (i32, i32) {
    %c0_i32 = arith.constant 0 : i32
    %c0_i32_0 = arith.constant 0 : i32
    %c0_i32_1 = arith.constant 0 : i32
    return %c0_i32, %c0_i32_0 : i32, i32
  }
  func.func @transform_2(%arg0: i32) -> (i32, i32) {
    %c0_i32 = arith.constant 0 : i32
    %c0_i32_0 = arith.constant 0 : i32
    %c0_i32_1 = arith.constant 0 : i32
    return %c0_i32, %c0_i32_0 : i32, i32
  }
  func.func @transform_3(%arg0: i32) -> (i32, i32) {
    %c0_i32 = arith.constant 0 : i32
    %c0_i32_0 = arith.constant 0 : i32
    %c0_i32_1 = arith.constant 0 : i32
    return %c0_i32, %c0_i32_0 : i32, i32
  }
  func.func @transform_4(%arg0: i32) -> (i32, i32, i32, i32) {
    %c0_i32 = arith.constant 0 : i32
    %c0_i32_0 = arith.constant 0 : i32
    %c0_i32_1 = arith.constant 0 : i32
    %c0_i32_2 = arith.constant 0 : i32
    return %arg0, %c0_i32, %c0_i32_0, %c0_i32_1 : i32, i32, i32, i32
  }
  func.func @transform_5(%arg0: i32) -> (i32, i32, i32) {
    %c0_i32 = arith.constant 0 : i32
    %c0_i32_0 = arith.constant 0 : i32
    %c0_i32_1 = arith.constant 0 : i32
    return %arg0, %c0_i32, %c0_i32_0 : i32, i32, i32
  }
}

module attributes {stable_mosaic.version = 11 : i64} {
  func.func @_bn_residual_relu_kernel(%arg0: i32, %arg1: memref<1x16x16x128xbf16, #tpu.memory_space<vmem>>, %arg2: memref<1x128xf32, #tpu.memory_space<vmem>>, %arg3: memref<1x128xf32, #tpu.memory_space<vmem>>, %arg4: memref<1x16x16x128xbf16, #tpu.memory_space<vmem>>, %arg5: memref<1x128xf32, #tpu.memory_space<vmem>>, %arg6: memref<1x128xf32, #tpu.memory_space<vmem>>, %arg7: memref<1x16x16x128xbf16, #tpu.memory_space<vmem>>) attributes {dimension_semantics = [#tpu.dimension_semantics<parallel>], iteration_bounds = array<i64: 2>, scalar_prefetch = 0 : i64, scratch_operands = 0 : i64, tpu.core_type = #tpu.core_type<tc>, window_params = [{transform_indices = @transform_0, window_bounds = array<i64: 1, 16, 16, 128>}, {pipeline_mode = #tpu.pipeline_mode<synchronous>, transform_indices = @transform_1, window_bounds = array<i64: 1, 128>}, {pipeline_mode = #tpu.pipeline_mode<synchronous>, transform_indices = @transform_2, window_bounds = array<i64: 1, 128>}, {transform_indices = @transform_3, window_bounds = array<i64: 1, 16, 16, 128>}, {pipeline_mode = #tpu.pipeline_mode<synchronous>, transform_indices = @transform_4, window_bounds = array<i64: 1, 128>}, {pipeline_mode = #tpu.pipeline_mode<synchronous>, transform_indices = @transform_5, window_bounds = array<i64: 1, 128>}, {transform_indices = @transform_6, window_bounds = array<i64: 1, 16, 16, 128>}]} {
    %c0 = arith.constant 0 : index
    %c0_0 = arith.constant 0 : index
    %0 = vector.load %arg2[%c0, %c0_0] : memref<1x128xf32, #tpu.memory_space<vmem>>, vector<1x128xf32>
    %1 = vector.shape_cast %0 : vector<1x128xf32> to vector<1x1x1x128xf32>
    %c0_1 = arith.constant 0 : index
    %c0_2 = arith.constant 0 : index
    %2 = vector.load %arg3[%c0_1, %c0_2] : memref<1x128xf32, #tpu.memory_space<vmem>>, vector<1x128xf32>
    %3 = vector.shape_cast %2 : vector<1x128xf32> to vector<1x1x1x128xf32>
    %c0_3 = arith.constant 0 : index
    %c0_4 = arith.constant 0 : index
    %4 = vector.load %arg5[%c0_3, %c0_4] : memref<1x128xf32, #tpu.memory_space<vmem>>, vector<1x128xf32>
    %5 = vector.shape_cast %4 : vector<1x128xf32> to vector<1x1x1x128xf32>
    %c0_5 = arith.constant 0 : index
    %c0_6 = arith.constant 0 : index
    %6 = vector.load %arg6[%c0_5, %c0_6] : memref<1x128xf32, #tpu.memory_space<vmem>>, vector<1x128xf32>
    %7 = vector.shape_cast %6 : vector<1x128xf32> to vector<1x1x1x128xf32>
    %c0_7 = arith.constant 0 : index
    %c0_8 = arith.constant 0 : index
    %c0_9 = arith.constant 0 : index
    %c0_10 = arith.constant 0 : index
    %8 = vector.load %arg1[%c0_7, %c0_8, %c0_9, %c0_10] : memref<1x16x16x128xbf16, #tpu.memory_space<vmem>>, vector<1x16x16x128xbf16>
    %9 = arith.extf %8 : vector<1x16x16x128xbf16> to vector<1x16x16x128xf32>
    %10 = vector.broadcast %1 : vector<1x1x1x128xf32> to vector<1x16x16x128xf32>
    %11 = arith.mulf %9, %10 : vector<1x16x16x128xf32>
    %12 = vector.broadcast %3 : vector<1x1x1x128xf32> to vector<1x16x16x128xf32>
    %13 = arith.addf %11, %12 : vector<1x16x16x128xf32>
    %c0_11 = arith.constant 0 : index
    %c0_12 = arith.constant 0 : index
    %c0_13 = arith.constant 0 : index
    %c0_14 = arith.constant 0 : index
    %14 = vector.load %arg4[%c0_11, %c0_12, %c0_13, %c0_14] : memref<1x16x16x128xbf16, #tpu.memory_space<vmem>>, vector<1x16x16x128xbf16>
    %15 = arith.extf %14 : vector<1x16x16x128xbf16> to vector<1x16x16x128xf32>
    %16 = vector.broadcast %5 : vector<1x1x1x128xf32> to vector<1x16x16x128xf32>
    %17 = arith.mulf %15, %16 : vector<1x16x16x128xf32>
    %18 = arith.addf %13, %17 : vector<1x16x16x128xf32>
    %19 = vector.broadcast %7 : vector<1x1x1x128xf32> to vector<1x16x16x128xf32>
    %20 = arith.addf %18, %19 : vector<1x16x16x128xf32>
    %cst = arith.constant 0.000000e+00 : f32
    %21 = vector.broadcast %cst : f32 to vector<1x16x16x128xf32>
    %22 = arith.maximumf %20, %21 : vector<1x16x16x128xf32>
    %23 = arith.truncf %22 : vector<1x16x16x128xf32> to vector<1x16x16x128xbf16>
    %c0_15 = arith.constant 0 : index
    %c0_16 = arith.constant 0 : index
    %c0_17 = arith.constant 0 : index
    %c0_18 = arith.constant 0 : index
    %24 = vector.load %arg7[%c0_15, %c0_16, %c0_17, %c0_18] : memref<1x16x16x128xbf16, #tpu.memory_space<vmem>>, vector<1x16x16x128xbf16>
    tpu.vector_store %arg7[%c0_15, %c0_16, %c0_17, %c0_18], %23 {strides = array<i32>} : memref<1x16x16x128xbf16, #tpu.memory_space<vmem>>, vector<1x16x16x128xbf16>,
    return
  }
  func.func @transform_0(%arg0: i32) -> (i32, i32, i32, i32) {
    %c0_i32 = arith.constant 0 : i32
    %c0_i32_0 = arith.constant 0 : i32
    %c0_i32_1 = arith.constant 0 : i32
    %c0_i32_2 = arith.constant 0 : i32
    return %arg0, %c0_i32, %c0_i32_0, %c0_i32_1 : i32, i32, i32, i32
  }
  func.func @transform_1(%arg0: i32) -> (i32, i32) {
    %c0_i32 = arith.constant 0 : i32
    %c0_i32_0 = arith.constant 0 : i32
    %c0_i32_1 = arith.constant 0 : i32
    return %c0_i32, %c0_i32_0 : i32, i32
  }
  func.func @transform_2(%arg0: i32) -> (i32, i32) {
    %c0_i32 = arith.constant 0 : i32
    %c0_i32_0 = arith.constant 0 : i32
    %c0_i32_1 = arith.constant 0 : i32
    return %c0_i32, %c0_i32_0 : i32, i32
  }
  func.func @transform_3(%arg0: i32) -> (i32, i32, i32, i32) {
    %c0_i32 = arith.constant 0 : i32
    %c0_i32_0 = arith.constant 0 : i32
    %c0_i32_1 = arith.constant 0 : i32
    %c0_i32_2 = arith.constant 0 : i32
    return %arg0, %c0_i32, %c0_i32_0, %c0_i32_1 : i32, i32, i32, i32
  }
  func.func @transform_4(%arg0: i32) -> (i32, i32) {
    %c0_i32 = arith.constant 0 : i32
    %c0_i32_0 = arith.constant 0 : i32
    %c0_i32_1 = arith.constant 0 : i32
    return %c0_i32, %c0_i32_0 : i32, i32
  }
  func.func @transform_5(%arg0: i32) -> (i32, i32) {
    %c0_i32 = arith.constant 0 : i32
    %c0_i32_0 = arith.constant 0 : i32
    %c0_i32_1 = arith.constant 0 : i32
    return %c0_i32, %c0_i32_0 : i32, i32
  }
  func.func @transform_6(%arg0: i32) -> (i32, i32, i32, i32) {
    %c0_i32 = arith.constant 0 : i32
    %c0_i32_0 = arith.constant 0 : i32
    %c0_i32_1 = arith.constant 0 : i32
    %c0_i32_2 = arith.constant 0 : i32
    return %arg0, %c0_i32, %c0_i32_0, %c0_i32_1 : i32, i32, i32, i32
  }
}

</mosaic_0001>

<bundles_post_ra>
// kernel: basic_block_forward.5
= control target key start
LH: loop header
LB: loop body
LE: loop exit
PB: predicated region body
PF: predicated region fallthrough
CT: control target
= control target key end

     0   :  { %s1063_s21 = smov 0   ;;  %s1290_s0 = inlined_call_operand.vmem [shape: bf16[2,16,16,128], index: 0, kind: input, shape index: {}]   ;;  %s1291_s1 = inlined_call_operand.vmem [shape: f32[1,128], index: 1, kind: input, shape index: {}]   ;;  %s1292_s2 = inlined_call_operand.vmem [shape: f32[1,128], index: 2, kind: input, shape index: {}]   ;;  %s1293_s3 = inlined_call_operand.vmem [shape: bf16[2,16,16,128], index: 3, kind: input, shape index: {}]   ;;  %s1294_s4 = inlined_call_operand.vmem [shape: f32[1,128], index: 4, kind: input, shape index: {}]   ;;  %s1295_s5 = inlined_call_operand.vmem [shape: f32[1,128], index: 5, kind: input, shape index: {}]   ;;  %s1296_s6 = inlined_call_operand.vmem [shape: bf16[2,16,16,128], index: 6, kind: output, shape index: {}]  }
   0x1 LB: > { %s739_s22 = sadd.s32 4294967295, %s1026_s21   ;;  %p743_p0 = scmp.ge.s32.totalorder %s1026_s21, 1  ;;  %s1026_s21 = sphi %s1063_s21, %s16_s21  }
   0x2   : > { %p222_p1 = scmp.lt.s32.totalorder %s1026_s21, 3 }
   0x4   : > { %p223_p2 = pnand %p743_p0, %p222_p1 }
   0x5   : > { %p257_p3 = scmp.lt.s32.totalorder (!%p223_p2), %s739_s22, 1 }
   0x6   : > { %226 = sbr.rel (%p223_p2) target bundleno = 91 (0x5b), region = 44 }
   0xb   : > { %s1298_s22 = smov (!%p257_p3, %s739_s22), 1  ;;  %v1088_v0 = vld [vmem:[%s1291_s1] ss:$0 sm:$0xff] }
   0xc   : > { %s1071_s23 = sshll.u32 %s1298_s22, 7  ;;  %v1093_v1 = vld [vmem:[%s1294_s4] ss:$0 sm:$0xff] }
   0xd   : > { %s1077_s26 = scalar_lea.vmem %s1290_s0, %s1071_s23  ;;  %s1083_s29 = scalar_lea.vmem %s1293_s3, %s1071_s23  ;;  %v1101_v7 = vld [vmem:[%s1292_s2] ss:$0 sm:$0xff] }
   0xe   : > { %v756_v2 = vld [vmem:[%s1077_s26] sm:$0xff]   ;;  %v963_v4 = vld [vmem:[%s1077_s26 + $0x8] sm:$0xff]   ;;  %v964_v15 = vld [vmem:[%s1077_s26 + $0x10] sm:$0xff]   ;;  %s1139_s16 = scalar_lea.vmem %s1296_s6, %s1071_s23 }
   0xf   : > { %v820_v3 = vld [vmem:[%s1083_s29] sm:$0xff]   ;;  %v757_v5 = vunpack.c.l.bf16 %v756_v2  ;;  %v758_v6 = vunpack.c.h.bf16 %v756_v2  ;;  %v978_v10 = vld [vmem:[%s1083_s29 + $0x8] sm:$0xff]   ;;  %v761_v11 = vunpack.c.l.bf16 %v963_v4  ;;  %v762_v12 = vunpack.c.h.bf16 %v963_v4  ;;  %v979_v20 = vld [vmem:[%s1083_s29 + $0x10] sm:$0xff]  }
  0x10   : > { %v821_v8 = vunpack.c.l.bf16 %v820_v3  ;;  %v822_v9 = vunpack.c.h.bf16 %v820_v3  ;;  %v825_v13 = vunpack.c.l.bf16 %v978_v10  ;;  %v826_v14 = vunpack.c.h.bf16 %v978_v10  ;;  %v1119_v27 = vld [vmem:[%s1295_s5] ss:$0 sm:$0xff]  ;;  %v965_v38 = vld [vmem:[%s1077_s26 + $0x18] sm:$0xff]  }
  0x11   : > { %v343_v16 = vmul.f32 %v1088_v0, %v757_v5  ;;  %v344_v17 = vmul.f32 %v1088_v0, %v758_v6  ;;  %v345_v21 = vmul.f32 %v1088_v0, %v761_v11  ;;  %v346_v22 = vmul.f32 %v1088_v0, %v762_v12  ;;  %v980_v51 = vld [vmem:[%s1083_s29 + $0x18] sm:$0xff]   ;;  %v966_v60 = vld [vmem:[%s1077_s26 + $0x20] sm:$0xff]  }
  0x12   : > { %v477_v18 = vmul.f32 %v1093_v1, %v821_v8  ;;  %v478_v19 = vmul.f32 %v1093_v1, %v822_v9  ;;  %v479_v23 = vmul.f32 %v1093_v1, %v825_v13  ;;  %v480_v24 = vmul.f32 %v1093_v1, %v826_v14  ;;  %v981_v3 = vld [vmem:[%s1083_s29 + $0x20] sm:$0xff]   ;;  %v967_v9 = vld [vmem:[%s1077_s26 + $0x28] sm:$0xff]  }
  0x13   : > { %v378_v25 = vadd.f32 %v1101_v7, %v343_v16  ;;  %v379_v26 = vadd.f32 %v1101_v7, %v344_v17  ;;  %v765_v28 = vunpack.c.l.bf16 %v964_v15  ;;  %v766_v29 = vunpack.c.h.bf16 %v964_v15 }
  0x14   : > { %v380_v30 = vadd.f32 %v1101_v7, %v345_v21  ;;  %v381_v31 = vadd.f32 %v1101_v7, %v346_v22  ;;  %v829_v32 = vunpack.c.l.bf16 %v979_v20  ;;  %v830_v33 = vunpack.c.h.bf16 %v979_v20  ;;  %v982_v22 = vld [vmem:[%s1083_s29 + $0x28] sm:$0xff]  }
  0x15   : > { %v509_v34 = vadd.f32 %v477_v18, %v378_v25  ;;  %v510_v35 = vadd.f32 %v478_v19, %v379_v26  ;;  %v347_v36 = vmul.f32 %v1088_v0, %v765_v28  ;;  %v348_v37 = vmul.f32 %v1088_v0, %v766_v29 }
  0x16   : > { %v511_v39 = vadd.f32 %v479_v23, %v380_v30  ;;  %v512_v40 = vadd.f32 %v480_v24, %v381_v31  ;;  %v481_v41 = vmul.f32 %v1093_v1, %v829_v32  ;;  %v482_v42 = vmul.f32 %v1093_v1, %v830_v33 }
  0x17   : > { %v544_v43 = vadd.f32 %v1119_v27, %v509_v34  ;;  %v545_v44 = vadd.f32 %v1119_v27, %v510_v35  ;;  %v382_v45 = vadd.f32 %v1101_v7, %v347_v36  ;;  %v383_v46 = vadd.f32 %v1101_v7, %v348_v37  ;;  %v968_v36 = vld [vmem:[%s1077_s26 + $0x30] sm:$0xff]  }
  0x18   : > { %v546_v47 = vadd.f32 %v1119_v27, %v511_v39  ;;  %v547_v48 = vadd.f32 %v1119_v27, %v512_v40  ;;  %v769_v49 = vunpack.c.l.bf16 %v965_v38  ;;  %v770_v50 = vunpack.c.h.bf16 %v965_v38 }
  0x19   : > { %v576_v52 = vmax.f32 %v544_v43, 0.0  ;;  %v577_v53 = vmax.f32 %v545_v44, 0.0  ;;  %v513_v54 = vadd.f32 %v481_v41, %v382_v45  ;;  %v514_v55 = vadd.f32 %v482_v42, %v383_v46  ;;  %v983_v41 = vld [vmem:[%s1083_s29 + $0x30] sm:$0xff]  }
  0x1a   : > { %v578_v56 = vmax.f32 %v546_v47, 0.0  ;;  %v579_v57 = vmax.f32 %v547_v48, 0.0  ;;  %v349_v58 = vmul.f32 %v1088_v0, %v769_v49  ;;  %v350_v59 = vmul.f32 %v1088_v0, %v770_v50 }
  0x1b   : > { %v886_v61 = vpack.c.bf16 %v577_v53, %v576_v52  ;;  %v548_v62 = vadd.f32 %v1119_v27, %v513_v54  ;;  %v549_v63 = vadd.f32 %v1119_v27, %v514_v55  ;;  %v833_v2 = vunpack.c.l.bf16 %v980_v51  ;;  %v969_v54 = vld [vmem:[%s1077_s26 + $0x38] sm:$0xff]  }
  0x1c   : > { %v891_v4 = vpack.c.bf16 %v579_v57, %v578_v56  ;;  %v384_v5 = vadd.f32 %v1101_v7, %v349_v58  ;;  %v385_v6 = vadd.f32 %v1101_v7, %v350_v59  ;;  %v834_v8 = vunpack.c.h.bf16 %v980_v51 }
  0x1d   : > { %887 = vst [vmem:[%s1139_s16] sm:$0xff] %v886_v61   ;;  %v580_v10 = vmax.f32 %v548_v62, 0.0  ;;  %v581_v11 = vmax.f32 %v549_v63, 0.0  ;;  %v483_v12 = vmul.f32 %v1093_v1, %v833_v2  ;;  %v773_v13 = vunpack.c.l.bf16 %v966_v60  ;;  %v984_v63 = vld [vmem:[%s1083_s29 + $0x38] sm:$0xff]  }
  0x1e   : > { %993 = vst [vmem:[%s1139_s16 + $0x8] sm:$0xff] %v891_v4   ;;  %v484_v14 = vmul.f32 %v1093_v1, %v834_v8  ;;  %v774_v15 = vunpack.c.h.bf16 %v966_v60  ;;  %v837_v16 = vunpack.c.l.bf16 %v981_v3  ;;  %v838_v17 = vunpack.c.h.bf16 %v981_v3 }
  0x1f   : > { %v896_v18 = vpack.c.bf16 %v581_v11, %v580_v10  ;;  %v515_v19 = vadd.f32 %v483_v12, %v384_v5  ;;  %v351_v20 = vmul.f32 %v1088_v0, %v773_v13  ;;  %v777_v21 = vunpack.c.l.bf16 %v967_v9 }
  0x20   : > { %v516_v23 = vadd.f32 %v484_v14, %v385_v6  ;;  %v352_v24 = vmul.f32 %v1088_v0, %v774_v15  ;;  %v485_v25 = vmul.f32 %v1093_v1, %v837_v16  ;;  %v486_v26 = vmul.f32 %v1093_v1, %v838_v17  ;;  %v970_v6 = vld [vmem:[%s1077_s26 + $0x40] sm:$0xff]  }
  0x21   : > { %994 = vst [vmem:[%s1139_s16 + $0x10] sm:$0xff] %v896_v18   ;;  %v550_v28 = vadd.f32 %v1119_v27, %v515_v19  ;;  %v386_v29 = vadd.f32 %v1101_v7, %v351_v20  ;;  %v778_v30 = vunpack.c.h.bf16 %v967_v9  ;;  %v353_v31 = vmul.f32 %v1088_v0, %v777_v21  ;;  %v985_v20 = vld [vmem:[%s1083_s29 + $0x40] sm:$0xff]  }
  0x22   : > { %v551_v32 = vadd.f32 %v1119_v27, %v516_v23  ;;  %v387_v33 = vadd.f32 %v1101_v7, %v352_v24  ;;  %v841_v34 = vunpack.c.l.bf16 %v982_v22  ;;  %v842_v35 = vunpack.c.h.bf16 %v982_v22 }
  0x23   : > { %v582_v37 = vmax.f32 %v550_v28, 0.0  ;;  %v517_v38 = vadd.f32 %v485_v25, %v386_v29  ;;  %v354_v39 = vmul.f32 %v1088_v0, %v778_v30  ;;  %v388_v40 = vadd.f32 %v1101_v7, %v353_v31  ;;  %v971_v30 = vld [vmem:[%s1077_s26 + $0x48] sm:$0xff]  }
  0x24   : > { %v583_v42 = vmax.f32 %v551_v32, 0.0  ;;  %v518_v43 = vadd.f32 %v486_v26, %v387_v33  ;;  %v487_v44 = vmul.f32 %v1093_v1, %v841_v34  ;;  %v488_v45 = vmul.f32 %v1093_v1, %v842_v35 }
  0x25   : > { %v552_v46 = vadd.f32 %v1119_v27, %v517_v38  ;;  %v389_v47 = vadd.f32 %v1101_v7, %v354_v39  ;;  %v781_v48 = vunpack.c.l.bf16 %v968_v36  ;;  %v782_v49 = vunpack.c.h.bf16 %v968_v36 }
  0x26   : > { %v901_v50 = vpack.c.bf16 %v583_v42, %v582_v37  ;;  %v553_v51 = vadd.f32 %v1119_v27, %v518_v43  ;;  %v519_v52 = vadd.f32 %v487_v44, %v388_v40  ;;  %v845_v53 = vunpack.c.l.bf16 %v983_v41  ;;  %v986_v43 = vld [vmem:[%s1083_s29 + $0x48] sm:$0xff]  }
  0x27   : > { %v584_v55 = vmax.f32 %v552_v46, 0.0  ;;  %v520_v56 = vadd.f32 %v488_v45, %v389_v47  ;;  %v355_v57 = vmul.f32 %v1088_v0, %v781_v48  ;;  %v356_v58 = vmul.f32 %v1088_v0, %v782_v49  ;;  %v972_v48 = vld [vmem:[%s1077_s26 + $0x50] sm:$0xff]  }
  0x28   : > { %995 = vst [vmem:[%s1139_s16 + $0x18] sm:$0xff] %v901_v50   ;;  %v585_v59 = vmax.f32 %v553_v51, 0.0  ;;  %v554_v60 = vadd.f32 %v1119_v27, %v519_v52  ;;  %v846_v61 = vunpack.c.h.bf16 %v983_v41  ;;  %v489_v62 = vmul.f32 %v1093_v1, %v845_v53 }
  0x29   : > { %v555_v2 = vadd.f32 %v1119_v27, %v520_v56  ;;  %v390_v3 = vadd.f32 %v1101_v7, %v355_v57  ;;  %v391_v4 = vadd.f32 %v1101_v7, %v356_v58  ;;  %v785_v5 = vunpack.c.l.bf16 %v969_v54 }
  0x2a   : > { %v906_v8 = vpack.c.bf16 %v585_v59, %v584_v55  ;;  %v586_v9 = vmax.f32 %v554_v60, 0.0  ;;  %v490_v10 = vmul.f32 %v1093_v1, %v846_v61  ;;  %v786_v11 = vunpack.c.h.bf16 %v969_v54  ;;  %v987_v61 = vld [vmem:[%s1083_s29 + $0x50] sm:$0xff]  }
  0x2b   : > { %v587_v12 = vmax.f32 %v555_v2, 0.0  ;;  %v521_v13 = vadd.f32 %v489_v62, %v390_v3  ;;  %v357_v14 = vmul.f32 %v1088_v0, %v785_v5  ;;  %v849_v15 = vunpack.c.l.bf16 %v984_v63 }
  0x2c   : > { %996 = vst [vmem:[%s1139_s16 + $0x20] sm:$0xff] %v906_v8   ;;  %v522_v16 = vadd.f32 %v490_v10, %v391_v4  ;;  %v358_v17 = vmul.f32 %v1088_v0, %v786_v11  ;;  %v850_v18 = vunpack.c.h.bf16 %v984_v63  ;;  %v789_v19 = vunpack.c.l.bf16 %v970_v6  ;;  %v973_v4 = vld [vmem:[%s1077_s26 + $0x58] sm:$0xff]  }
  0x2d   : > { %v911_v21 = vpack.c.bf16 %v587_v12, %v586_v9  ;;  %v556_v22 = vadd.f32 %v1119_v27, %v521_v13  ;;  %v392_v23 = vadd.f32 %v1101_v7, %v357_v14  ;;  %v491_v24 = vmul.f32 %v1093_v1, %v849_v15 }
  0x2e   : > { %v557_v25 = vadd.f32 %v1119_v27, %v522_v16  ;;  %v393_v26 = vadd.f32 %v1101_v7, %v358_v17  ;;  %v492_v28 = vmul.f32 %v1093_v1, %v850_v18  ;;  %v790_v29 = vunpack.c.h.bf16 %v970_v6  ;;  %v988_v18 = vld [vmem:[%s1083_s29 + $0x58] sm:$0xff]  }
  0x2f   : > { %997 = vst [vmem:[%s1139_s16 + $0x28] sm:$0xff] %v911_v21   ;;  %v588_v31 = vmax.f32 %v556_v22, 0.0  ;;  %v523_v32 = vadd.f32 %v491_v24, %v392_v23  ;;  %v359_v33 = vmul.f32 %v1088_v0, %v789_v19  ;;  %v853_v34 = vunpack.c.l.bf16 %v985_v20 }
  0x30   : > { %v589_v35 = vmax.f32 %v557_v25, 0.0  ;;  %v524_v36 = vadd.f32 %v492_v28, %v393_v26  ;;  %v360_v37 = vmul.f32 %v1088_v0, %v790_v29  ;;  %v854_v38 = vunpack.c.h.bf16 %v985_v20  ;;  %v974_v28 = vld [vmem:[%s1077_s26 + $0x60] sm:$0xff]  }
  0x31   : > { %v558_v39 = vadd.f32 %v1119_v27, %v523_v32  ;;  %v394_v40 = vadd.f32 %v1101_v7, %v359_v33  ;;  %v493_v41 = vmul.f32 %v1093_v1, %v853_v34  ;;  %v793_v42 = vunpack.c.l.bf16 %v971_v30 }
  0x32   : > { %v916_v44 = vpack.c.bf16 %v589_v35, %v588_v31  ;;  %v559_v45 = vadd.f32 %v1119_v27, %v524_v36  ;;  %v395_v46 = vadd.f32 %v1101_v7, %v360_v37  ;;  %v494_v47 = vmul.f32 %v1093_v1, %v854_v38  ;;  %v989_v37 = vld [vmem:[%s1083_s29 + $0x60] sm:$0xff]  }
  0x33   : > { %v590_v49 = vmax.f32 %v558_v39, 0.0  ;;  %v525_v50 = vadd.f32 %v493_v41, %v394_v40  ;;  %v794_v51 = vunpack.c.h.bf16 %v971_v30  ;;  %v361_v52 = vmul.f32 %v1088_v0, %v793_v42 }
  0x34   : > { %998 = vst [vmem:[%s1139_s16 + $0x30] sm:$0xff] %v916_v44   ;;  %v591_v53 = vmax.f32 %v559_v45, 0.0  ;;  %v526_v54 = vadd.f32 %v494_v47, %v395_v46  ;;  %v857_v55 = vunpack.c.l.bf16 %v986_v43  ;;  %v858_v56 = vunpack.c.h.bf16 %v986_v43  ;;  %v975_v46 = vld [vmem:[%s1077_s26 + $0x68] sm:$0xff]  }
  0x35   : > { %v560_v57 = vadd.f32 %v1119_v27, %v525_v50  ;;  %v362_v58 = vmul.f32 %v1088_v0, %v794_v51  ;;  %v396_v59 = vadd.f32 %v1101_v7, %v361_v52  ;;  %v797_v60 = vunpack.c.l.bf16 %v972_v48 }
  0x36   : > { %v921_v62 = vpack.c.bf16 %v591_v53, %v590_v49  ;;  %v561_v63 = vadd.f32 %v1119_v27, %v526_v54  ;;  %v495_v2 = vmul.f32 %v1093_v1, %v857_v55  ;;  %v496_v3 = vmul.f32 %v1093_v1, %v858_v56 }
  0x37   : > { %v592_v5 = vmax.f32 %v560_v57, 0.0  ;;  %v397_v6 = vadd.f32 %v1101_v7, %v362_v58  ;;  %v798_v8 = vunpack.c.h.bf16 %v972_v48  ;;  %v363_v9 = vmul.f32 %v1088_v0, %v797_v60 }
  0x38   : > { %999 = vst [vmem:[%s1139_s16 + $0x38] sm:$0xff] %v921_v62   ;;  %v593_v10 = vmax.f32 %v561_v63, 0.0  ;;  %v527_v11 = vadd.f32 %v495_v2, %v396_v59  ;;  %v861_v12 = vunpack.c.l.bf16 %v987_v61  ;;  %v862_v13 = vunpack.c.h.bf16 %v987_v61  ;;  %v990_v59 = vld [vmem:[%s1083_s29 + $0x68] sm:$0xff]   ;;  %v976_v2 = vld [vmem:[%s1077_s26 + $0x70] sm:$0xff]  }
  0x39   : > { %v528_v14 = vadd.f32 %v496_v3, %v397_v6  ;;  %v364_v15 = vmul.f32 %v1088_v0, %v798_v8  ;;  %v398_v16 = vadd.f32 %v1101_v7, %v363_v9  ;;  %v801_v17 = vunpack.c.l.bf16 %v973_v4 }
  0x3a   : > { %v926_v19 = vpack.c.bf16 %v593_v10, %v592_v5  ;;  %v562_v20 = vadd.f32 %v1119_v27, %v527_v11  ;;  %v497_v21 = vmul.f32 %v1093_v1, %v861_v12  ;;  %v498_v22 = vmul.f32 %v1093_v1, %v862_v13 }
  0x3b   : > { %v563_v23 = vadd.f32 %v1119_v27, %v528_v14  ;;  %v399_v24 = vadd.f32 %v1101_v7, %v364_v15  ;;  %v802_v25 = vunpack.c.h.bf16 %v973_v4  ;;  %v365_v26 = vmul.f32 %v1088_v0, %v801_v17 }
  0x3c   : > { %1000 = vst [vmem:[%s1139_s16 + $0x40] sm:$0xff] %v926_v19   ;;  %v594_v29 = vmax.f32 %v562_v20, 0.0  ;;  %v529_v30 = vadd.f32 %v497_v21, %v398_v16  ;;  %v865_v31 = vunpack.c.l.bf16 %v988_v18  ;;  %v866_v32 = vunpack.c.h.bf16 %v988_v18  ;;  %v991_v16 = vld [vmem:[%s1083_s29 + $0x70] sm:$0xff]   ;;  %v977_v21 = vld [vmem:[%s1077_s26 + $0x78] sm:$0xff]  }
  0x3d   : > { %v595_v33 = vmax.f32 %v563_v23, 0.0  ;;  %v530_v34 = vadd.f32 %v498_v22, %v399_v24  ;;  %v366_v35 = vmul.f32 %v1088_v0, %v802_v25  ;;  %v400_v36 = vadd.f32 %v1101_v7, %v365_v26 }
  0x3e   : > { %v564_v38 = vadd.f32 %v1119_v27, %v529_v30  ;;  %v499_v39 = vmul.f32 %v1093_v1, %v865_v31  ;;  %v500_v40 = vmul.f32 %v1093_v1, %v866_v32  ;;  %v805_v41 = vunpack.c.l.bf16 %v974_v28 }
  0x3f   : > { %v931_v42 = vpack.c.bf16 %v595_v33, %v594_v29  ;;  %v565_v43 = vadd.f32 %v1119_v27, %v530_v34  ;;  %v401_v44 = vadd.f32 %v1101_v7, %v366_v35  ;;  %v806_v45 = vunpack.c.h.bf16 %v974_v28  ;;  %v992_v35 = vld [vmem:[%s1083_s29 + $0x78] sm:$0xff]  }
  0x40   : > { %v596_v47 = vmax.f32 %v564_v38, 0.0  ;;  %v531_v48 = vadd.f32 %v499_v39, %v400_v36  ;;  %v367_v49 = vmul.f32 %v1088_v0, %v805_v41  ;;  %v869_v50 = vunpack.c.l.bf16 %v989_v37 }
  0x41   : > { %1001 = vst [vmem:[%s1139_s16 + $0x48] sm:$0xff] %v931_v42   ;;  %v597_v51 = vmax.f32 %v565_v43, 0.0  ;;  %v532_v52 = vadd.f32 %v500_v40, %v401_v44  ;;  %v368_v53 = vmul.f32 %v1088_v0, %v806_v45  ;;  %v870_v54 = vunpack.c.h.bf16 %v989_v37 }
  0x42   : > { %v566_v55 = vadd.f32 %v1119_v27, %v531_v48  ;;  %v402_v56 = vadd.f32 %v1101_v7, %v367_v49  ;;  %v501_v57 = vmul.f32 %v1093_v1, %v869_v50  ;;  %v809_v58 = vunpack.c.l.bf16 %v975_v46 }
  0x43   : > { %v936_v60 = vpack.c.bf16 %v597_v51, %v596_v47  ;;  %v567_v61 = vadd.f32 %v1119_v27, %v532_v52  ;;  %v403_v62 = vadd.f32 %v1101_v7, %v368_v53  ;;  %v502_v63 = vmul.f32 %v1093_v1, %v870_v54 }
  0x44   : > { %v598_v3 = vmax.f32 %v566_v55, 0.0  ;;  %v533_v4 = vadd.f32 %v501_v57, %v402_v56  ;;  %v810_v5 = vunpack.c.h.bf16 %v975_v46  ;;  %v369_v6 = vmul.f32 %v1088_v0, %v809_v58 }
  0x45   : > { %1002 = vst [vmem:[%s1139_s16 + $0x50] sm:$0xff] %v936_v60   ;;  %v599_v8 = vmax.f32 %v567_v61, 0.0  ;;  %v534_v9 = vadd.f32 %v502_v63, %v403_v62  ;;  %v873_v10 = vunpack.c.l.bf16 %v990_v59  ;;  %v874_v11 = vunpack.c.h.bf16 %v990_v59 }
  0x46   : > { %v568_v12 = vadd.f32 %v1119_v27, %v533_v4  ;;  %v370_v13 = vmul.f32 %v1088_v0, %v810_v5  ;;  %v404_v14 = vadd.f32 %v1101_v7, %v369_v6  ;;  %v813_v15 = vunpack.c.l.bf16 %v976_v2 }
  0x47   : > { %v941_v17 = vpack.c.bf16 %v599_v8, %v598_v3  ;;  %v569_v18 = vadd.f32 %v1119_v27, %v534_v9  ;;  %v503_v19 = vmul.f32 %v1093_v1, %v873_v10  ;;  %v504_v20 = vmul.f32 %v1093_v1, %v874_v11 }
  0x48   : > { %v600_v22 = vmax.f32 %v568_v12, 0.0  ;;  %v405_v23 = vadd.f32 %v1101_v7, %v370_v13  ;;  %v814_v24 = vunpack.c.h.bf16 %v976_v2  ;;  %v371_v25 = vmul.f32 %v1088_v0, %v813_v15 }
  0x49   : > { %1003 = vst [vmem:[%s1139_s16 + $0x58] sm:$0xff] %v941_v17   ;;  %v601_v26 = vmax.f32 %v569_v18, 0.0  ;;  %v535_v28 = vadd.f32 %v503_v19, %v404_v14  ;;  %v877_v29 = vunpack.c.l.bf16 %v991_v16  ;;  %v878_v30 = vunpack.c.h.bf16 %v991_v16 }
  0x4a   : > { %v536_v31 = vadd.f32 %v504_v20, %v405_v23  ;;  %v372_v32 = vmul.f32 %v1088_v0, %v814_v24  ;;  %v406_v33 = vadd.f32 %v1101_v7, %v371_v25  ;;  %v817_v34 = vunpack.c.l.bf16 %v977_v21 }
  0x4b   : > { %v946_v36 = vpack.c.bf16 %v601_v26, %v600_v22  ;;  %v570_v37 = vadd.f32 %v1119_v27, %v535_v28  ;;  %v505_v38 = vmul.f32 %v1093_v1, %v877_v29  ;;  %v506_v39 = vmul.f32 %v1093_v1, %v878_v30 }
  0x4c   : > { %v571_v40 = vadd.f32 %v1119_v27, %v536_v31  ;;  %v407_v41 = vadd.f32 %v1101_v7, %v372_v32  ;;  %v818_v42 = vunpack.c.h.bf16 %v977_v21  ;;  %v373_v43 = vmul.f32 %v1088_v0, %v817_v34 }
  0x4d   : > { %1004 = vst [vmem:[%s1139_s16 + $0x60] sm:$0xff] %v946_v36   ;;  %v602_v44 = vmax.f32 %v570_v37, 0.0  ;;  %v537_v45 = vadd.f32 %v505_v38, %v406_v33  ;;  %v881_v46 = vunpack.c.l.bf16 %v992_v35  ;;  %v882_v47 = vunpack.c.h.bf16 %v992_v35 }
  0x4e   : > { %v603_v48 = vmax.f32 %v571_v40, 0.0  ;;  %v538_v49 = vadd.f32 %v506_v39, %v407_v41  ;;  %v374_v50 = vmul.f32 %v1088_v0, %v818_v42  ;;  %v408_v51 = vadd.f32 %v1101_v7, %v373_v43 }
  0x4f   : > { %v572_v52 = vadd.f32 %v1119_v27, %v537_v45  ;;  %v507_v53 = vmul.f32 %v1093_v1, %v881_v46  ;;  %v508_v54 = vmul.f32 %v1093_v1, %v882_v47 }
  0x50   : > { %v951_v55 = vpack.c.bf16 %v603_v48, %v602_v44  ;;  %v573_v56 = vadd.f32 %v1119_v27, %v538_v49  ;;  %v409_v57 = vadd.f32 %v1101_v7, %v374_v50 }
  0x51   : > { %v604_v58 = vmax.f32 %v572_v52, 0.0  ;;  %v539_v59 = vadd.f32 %v507_v53, %v408_v51 }
  0x52   : > { %1005 = vst [vmem:[%s1139_s16 + $0x68] sm:$0xff] %v951_v55   ;;  %v605_v60 = vmax.f32 %v573_v56, 0.0  ;;  %v540_v0 = vadd.f32 %v508_v54, %v409_v57 }
  0x53   : > { %v574_v61 = vadd.f32 %v1119_v27, %v539_v59 }
  0x54   : > { %v956_v62 = vpack.c.bf16 %v605_v60, %v604_v58  ;;  %v575_v63 = vadd.f32 %v1119_v27, %v540_v0 }
  0x55   : > { %v606_v2 = vmax.f32 %v574_v61, 0.0 }
  0x56   : > { %1006 = vst [vmem:[%s1139_s16 + $0x70] sm:$0xff] %v956_v62   ;;  %v607_v3 = vmax.f32 %v575_v63, 0.0 }
  0x58   : > { %v961_v1 = vpack.c.bf16 %v607_v3, %v606_v2 }
  0x5a   : > { %1007 = vst [vmem:[%s1139_s16 + $0x78] sm:$0xff] %v961_v1  }
  0x5b PF: > { %s16_s21 = sadd.s32 1, %s1026_s21  }
  0x5c   : > { %p13_p4 = scmp.ge.s32.totalorder %s16_s21, 4  }
  0x5e   :  { %15 = sbr.rel (!%p13_p4) target bundleno = 1 (0x1), region = 77 }

// kernel: basic_block_forward.3
= control target key start
LH: loop header
LB: loop body
LE: loop exit
PB: predicated region body
PF: predicated region fallthrough
CT: control target
= control target key end

     0   :  { %s2432_s12 = smov 0   ;;  %s3629_s0 = inlined_call_operand.vmem [shape: bf16[2,1,18,18,16], index: 0, kind: input, shape index: {}]   ;;  %s3630_s1 = inlined_call_operand.vmem [shape: bf16[144,128], index: 1, kind: input, shape index: {}]   ;;  %s3631_s2 = inlined_call_operand.vmem [shape: bf16[2,16,16,128], index: 2, kind: output, shape index: {0}]   ;;  %s3632_s3 = inlined_call_operand.vmem [shape: f32[2,2,128], index: 3, kind: output, shape index: {1}]  }
   0x1 LB: > { %s2093_s13 = sadd.s32 4294967295, %s2403_s12   ;;  %p2097_p0 = scmp.ge.s32.totalorder %s2403_s12, 1  ;;  %s2403_s12 = sphi %s2432_s12, %s14_s12  }
   0x2   : > { %p140_p1 = scmp.lt.s32.totalorder %s2403_s12, 3 }
   0x4   : > { %p141_p2 = pnand %p2097_p0, %p140_p1 }
   0x5   : > { %p168_p3 = scmp.lt.s32.totalorder (!%p141_p2), %s2093_s13, 1  ;;  %s2405_s18 = smov (!%p141_p2), 48  }
   0x6   : > { %144 = sbr.rel (%p141_p2) target bundleno = 674 (0x2a2), region = 28  ;;  %s2406_s19 = smov (!%p141_p2), 96  }
   0x7   : > { %s2407_s20 = smov (!%p141_p2), 32   ;;  %s2408_s21 = smov (!%p141_p2), 64  }
   0x8   : > { %s2409_s22 = smov (!%p141_p2), 16   ;;  %s2410_s25 = smov (!%p141_p2), 112  }
   0x9   : > { %s2411_s26 = smov (!%p141_p2), 80  }
   0xb   : > { %s3638_s13 = smov (!%p168_p3, %s2093_s13), 1  ;;  %vm672_vm0 = vcmask 1042432   ;;  %vm673_vm1 = vcmask 1046532   ;;  %vm237_vm3 = vsmask.f32 3328  ;;  %vm1241_vm6 = vcmask 130048  }
   0xc   : > { %s2378_s14 = smul.u32 216, %s3638_s13  ;;  %vm2448_vm2 = vmor %vm672_vm0, %vm673_vm1  ;;  %vm238_vm4 = vsmask.f32 7440  ;;  %vm1290_vm7 = vcmask 261120   ;;  %vm1323_vm8 = vcmask 392192   ;;  %vm1356_vm9 = vcmask 523264  }
   0xd   : > { %vm2491_vm5 = vmor %vm237_vm3, %vm238_vm4  ;;  %vm1389_vm10 = vcmask 654336   ;;  %vm1422_vm11 = vcmask 785408   ;;  %vm1455_vm12 = vcmask 916480   ;;  %s2246_s24 = sshll.u32 %s3638_s13, 7 }
   0xe   : > { %s2446_s17 = scalar_lea.vmem %s3629_s0, %s2378_s14  ;;  %s3275_s29 = scalar_lea.vmem %s3631_s2, %s2246_s24 }
   0xf   : > { %v2453_v1 = vld [vmem:[%s2446_s17 + $0xc] sm:$0xff]  ;;  %v183_v2 = vld [vmem:[%s2446_s17] sm:$0xf]  ;;  %v184_v3 = vld [vmem:[%s2446_s17 + $0x4] sm:$0xf] }
  0x10   : > { %v185_v4 = vld [vmem:[%s2446_s17 + $0x8] sm:$0x1]  ;;  %v254_v5 = vshrl.u32 %v184_v3, 16  ;;  %v2102_v6 = vrot.slane %v183_v2, 9  ;;  %v677_v7 = vrot.slane %v184_v3, 5  ;;  %v241_v8 = vshrl.u32 %v183_v2, 16  ;;  %1066 = vrot.lane.b32.xlu1 %v2453_v1, %s2405_s18 }
  0x11   : > { %v260_v9 = vshll.u32 %v185_v4, 16  ;;  %v680_v10 = vrot.slane %v185_v4, 5  ;;  %v244_v11 = vshll.u32 %v183_v2, 16  ;;  %v2461_v12 = vld [vmem:[%s2446_s17 + $0xc] sm:$0xf]  ;;  %v250_v13 = vshll.u32 %v184_v3, 16 }
  0x12   : > { %v678_v14 = vsel %vm2448_vm2, %v2102_v6, %v677_v7  ;;  %v679_v15 = vrot.slane %v677_v7, 4  ;;  %v2466_v16 = vld [vmem:[%s2446_s17 + $0x10] sm:$0xf]  ;;  %v2469_v17 = vld [vmem:[%s2446_s17 + $0x14] sm:$0x1]  ;;  %v265_v18 = vshrl.u32 %v2461_v12, 16 }
  0x13   : > { %v983_v19 = vunpack.c.l.b16 %v678_v14  ;;  %v268_v20 = vshll.u32 %v2461_v12, 16  ;;  %v274_v21 = vshll.u32 %v2466_v16, 16  ;;  %v278_v22 = vshrl.u32 %v2466_v16, 16  ;;  %v2476_v23 = vld [vmem:[%s2446_s17 + $0x18] sm:$0xff]  ;;  %v2505_v57 = vld [vmem:[%s2446_s17 + $0x20] sm:$0x1] }
  0x14   : > { %v681_v24 = vsel %vm2448_vm2, %v679_v15, %v680_v10  ;;  %v267_v25 = vrot.slane %v265_v18, 4  ;;  %v284_v26 = vshll.u32 %v2469_v17, 16  ;;  %v243_v27 = vrot.slane %v241_v8, 4  ;;  %v2482_v32 = vld [vmem:[%s2446_s17 + $0x18] sm:$0xf]  ;;  %1171 = vrot.lane.b32.xlu2 %v2476_v23, %s2406_s19 }
  0x15   : > { %v984_v28 = vunpack.c.l.b16 %v681_v24  ;;  %v270_v29 = vrot.slane %v268_v20, 5  ;;  %v276_v30 = vrot.slane %v274_v21, 5  ;;  %v280_v31 = vrot.slane %v278_v22, 4  ;;  %v2487_v37 = vld [vmem:[%s2446_s17 + $0x1c] sm:$0xf] }
  0x16   : > { %v286_v33 = vrot.slane %v284_v26, 5  ;;  %v246_v34 = vrot.slane %v244_v11, 5  ;;  %v252_v35 = vrot.slane %v250_v13, 5  ;;  %v256_v36 = vrot.slane %v254_v5, 4  ;;  %v2508_v60 = vld [vmem:[%s2446_s17 + $0x24] sm:$0xf] }
  0x17   : > { %v1015_v38 = vpack.c.b16 %v984_v28, %v983_v19  ;;  %v271_v39 = vor.u32 %v270_v29, %v267_v25  ;;  %v281_v40 = vor.u32 %v280_v31, %v276_v30  ;;  %v262_v41 = vrot.slane %v260_v9, 5  ;;  %v2515_v3 = vld [vmem:[%s2446_s17 + $0x28] sm:$0xf]  ;;  %v2527_v25 = vld [vmem:[%s2446_s17 + $0x2c] sm:$0x1] }
  0x18   : > { %v247_v43 = vor.u32 %v246_v34, %v243_v27  ;;  %v257_v44 = vor.u32 %v256_v36, %v252_v35  ;;  %v289_v45 = vshrl.u32 %v2482_v32, 16  ;;  %v292_v46 = vshll.u32 %v2482_v32, 16  ;;  %v2533_v31 = vld [vmem:[%s2446_s17 + $0x64] sm:$0xf] }
  0x19   : > { %1031 = vrot.lane.b32.xlu0 %v1015_v38, %s2407_s20  ;;  %v272_v47 = vrot.slane %v271_v39, 4  ;;  %v282_v48 = vrot.slane %v281_v40, 4  ;;  %v298_v49 = vshll.u32 %v2487_v37, 16  ;;  %v302_v50 = vshrl.u32 %v2487_v37, 16 }
  0x1a   : > { %v248_v51 = vrot.slane %v247_v43, 4  ;;  %v258_v52 = vrot.slane %v257_v44, 4  ;;  %v291_v53 = vrot.slane %v289_v45, 4  ;;  %v294_v54 = vrot.slane %v292_v46, 5  ;;  %v207_v43 = vld [vmem:[%s2446_s17 + $0x60] sm:$0xf] }
  0x1b   : > { %v277_v55 = vsel %vm2491_vm5, %v272_v47, %v276_v30  ;;  %v287_v56 = vsel %vm2491_vm5, %v282_v48, %v286_v33  ;;  %v300_v58 = vrot.slane %v298_v49, 5  ;;  %v304_v59 = vrot.slane %v302_v50, 4  ;;  %v2545_v46 = vld [vmem:[%s2446_s17 + $0x68] sm:$0x1] }
  0x1c   : > { %v905_v61 = vunpack.c.l.b16 %v277_v55  ;;  %v906_v62 = vunpack.c.l.b16 %v287_v56  ;;  %v253_v63 = vsel %vm2491_vm5, %v248_v51, %v252_v35  ;;  %v263_v2 = vsel %vm2491_vm5, %v258_v52, %v262_v41  ;;  %v2273_v51 = vld [vmem:[%s3630_s1 + $0x40] sm:$0xff]  ;;  %v2558_v56 = vld [vmem:[%s2446_s17 + $0x6c] sm:$0xf] }
  0x1d   : > { %v903_v4 = vunpack.c.l.b16 %v253_v63  ;;  %v904_v5 = vunpack.c.l.b16 %v263_v2  ;;  %v295_v6 = vor.u32 %v294_v54, %v291_v53  ;;  %v305_v7 = vor.u32 %v304_v59, %v300_v58  ;;  %1720 = vmatpush.bf16.msra.mxu1 %v2273_v51  ;;  %2377 = vmatpush.bf16.msra.mxu3 %v2273_v51  ;;  %v2570_v63 = vld [vmem:[%s2446_s17 + $0x70] sm:$0xf] }
  0x1e   : > { %v936_v8 = vpack.c.b16 %v906_v62, %v905_v61  ;;  %v308_v9 = vshll.u32 %v2505_v57, 16  ;;  %v313_v10 = vshrl.u32 %v2508_v60, 16  ;;  %v316_v11 = vshll.u32 %v2508_v60, 16 }
  0x1f   : > { %v935_v13 = vpack.c.b16 %v904_v5, %v903_v4  ;;  %v296_v14 = vrot.slane %v295_v6, 4  ;;  %v306_v15 = vrot.slane %v305_v7, 4  ;;  %v322_v18 = vshll.u32 %v2515_v3, 16  ;;  %v2575_v4 = vld [vmem:[%s2446_s17 + $0x74] sm:$0x1] }
  0x20   : > { %1101 = vrot.lane.b32.xlu1 %v936_v8, %s2408_s21  ;;  %v310_v19 = vrot.slane %v308_v9, 5  ;;  %v315_v20 = vrot.slane %v313_v10, 4  ;;  %v318_v21 = vrot.slane %v316_v11, 5  ;;  %v326_v22 = vshrl.u32 %v2515_v3, 16 }
  0x21   : > { %951 = vrot.lane.b32.xlu0 %v935_v13, %s2409_s22  ;;  %v301_v24 = vsel %vm2491_vm5, %v296_v14, %v300_v58  ;;  %v324_v26 = vrot.slane %v322_v18, 5  ;;  %v2103_v27 = vrot.slane %v2461_v12, 9  ;;  %v684_v35 = vrot.slane %v2466_v16, 5  ;;  %v2584_v13 = vld [vmem:[%s2446_s17 + $0x78] sm:$0xf] }
  0x22   : > { %v311_v28 = vsel %vm2491_vm5, %v306_v15, %v310_v19  ;;  %v907_v29 = vunpack.c.l.b16 %v301_v24  ;;  %v328_v30 = vrot.slane %v326_v22, 4  ;;  %v319_v34 = vor.u32 %v318_v21, %v315_v20 }
  0x23   : > { %v908_v33 = vunpack.c.l.b16 %v311_v28  ;;  %v687_v36 = vrot.slane %v2469_v17, 5  ;;  %v332_v39 = vshll.u32 %v2527_v25, 16  ;;  %v685_v12 = vsel %vm2448_vm2, %v2103_v27, %v684_v35 }
  0x24   : > { %v329_v38 = vor.u32 %v328_v30, %v324_v26  ;;  %v686_v41 = vrot.slane %v684_v35, 4  ;;  %v733_v44 = vrot.slane %v2533_v31, 5  ;;  %v985_v45 = vunpack.c.l.b16 %v685_v12  ;;  %v2612_v12 = vld [vmem:[%s2446_s17 + $0x24] sm:$0xff] }
  0x25   : > { %v2538_v40 = vpack.c.b16 %v908_v33, %v907_v29  ;;  %v320_v47 = vrot.slane %v319_v34, 4  ;;  %v334_v48 = vrot.slane %v332_v39, 5  ;;  %v2110_v50 = vrot.slane %v207_v43, 9 }
  0x26   : > { %v688_v16 = vsel %vm2448_vm2, %v686_v41, %v687_v36  ;;  %v330_v17 = vrot.slane %v329_v38, 4  ;;  %v735_v52 = vrot.slane %v733_v44, 4  ;;  %v736_v53 = vrot.slane %v2545_v46, 5 }
  0x27   : > { %v986_v49 = vunpack.c.l.b16 %v688_v16  ;;  %v2104_v54 = vrot.slane %v2482_v32, 9  ;;  %v325_v58 = vsel %vm2491_vm5, %v320_v47, %v324_v26  ;;  %v691_v59 = vrot.slane %v2487_v37, 5  ;;  %v2599_v26 = vld [vmem:[%s2446_s17 + $0x7c] sm:$0xf] }
  0x28   : > { %953 = vrot.lane.b32.xlu1 %v936_v8, %s2409_s22  ;;  %v694_v61 = vrot.slane %v2505_v57, 5  ;;  %v335_v62 = vsel %vm2491_vm5, %v330_v17, %v334_v48  ;;  %v734_v32 = vsel %vm2448_vm2, %v2110_v50, %v733_v44  ;;  %v737_v2 = vsel %vm2448_vm2, %v735_v52, %v736_v53 }
  0x29   : > { %1206 = vrot.lane.b32.xlu0 %v2538_v40, %s2410_s25  ;;  %v1016_v55 = vpack.c.b16 %v986_v49, %v985_v45  ;;  %v2111_v37 = vrot.slane %v2558_v56, 9  ;;  %v692_v57 = vsel %vm2448_vm2, %v2104_v54, %v691_v59  ;;  %v693_v5 = vrot.slane %v691_v59, 4 }
  0x2a   : > { %v909_v6 = vunpack.c.l.b16 %v325_v58  ;;  %v987_v7 = vunpack.c.l.b16 %v692_v57  ;;  %v910_v8 = vunpack.c.l.b16 %v335_v62  ;;  %v999_v9 = vunpack.c.l.b16 %v734_v32 }
  0x2b   : > { %1136 = vrot.lane.b32.xlu2 %v1016_v55, %s2411_s26  ;;  %v740_v10 = vrot.slane %v2570_v63, 5  ;;  %v695_v11 = vsel %vm2448_vm2, %v693_v5, %v694_v61  ;;  %v1000_v14 = vunpack.c.l.b16 %v737_v2  ;;  %v743_v15 = vrot.slane %v2575_v4, 5  ;;  %v2642_v5 = vld [vmem:[%s2446_s17 + $0x6c] sm:$0xff] }
  0x2c   : > { %v988_v18 = vunpack.c.l.b16 %v695_v11  ;;  %v433_v19 = vshrl.u32 %v207_v43, 16  ;;  %v436_v21 = vshll.u32 %v207_v43, 16  ;;  %v442_v22 = vshll.u32 %v2533_v31, 16 }
  0x2d   : > { %v2593_v20 = vsel %vm2448_vm2, %v2111_v37, %v740_v10  ;;  %v481_v27 = vshrl.u32 %v2584_v13, 16  ;;  %v446_v29 = vshrl.u32 %v2533_v31, 16  ;;  %v452_v34 = vshll.u32 %v2545_v46, 16 }
  0x2e   : > { %v2596_v24 = vpack.c.b16 %v988_v18, %v987_v7  ;;  %v435_v28 = vrot.slane %v433_v19, 4  ;;  %v438_v30 = vrot.slane %v436_v21, 5  ;;  %v444_v33 = vrot.slane %v442_v22, 5 }
  0x2f   : > { %v2605_v35 = vpack.c.b16 %v910_v8, %v909_v6  ;;  %v742_v36 = vrot.slane %v740_v10, 4  ;;  %v448_v38 = vrot.slane %v446_v29, 4  ;;  %v698_v39 = vrot.slane %v2515_v3, 5 }
  0x30   : > { %1103 = vrot.lane.b32.xlu1 %v2538_v40, %s2408_s21  ;;  %2228 = vmatmul.msk.bf16.vlgmr.msra.gmra.mxu1 %vm1241_vm6, %v2596_v24  ;;  %v2614_v31 = vpack.c.b16 %v1000_v14, %v999_v9  ;;  %v490_v41 = vshll.u32 %v2599_v26, 16  ;;  %v494_v43 = vshrl.u32 %v2599_v26, 16  ;;  %v439_v44 = vor.u32 %v438_v30, %v435_v28 }
  0x31   : > { %1068 = vrot.lane.b32.xlu0 %v2476_v23, %s2405_s18  ;;  %v484_v23 = vshll.u32 %v2584_v13, 16  ;;  %v483_v45 = vrot.slane %v481_v27, 4  ;;  %v449_v46 = vor.u32 %v448_v38, %v444_v33  ;;  %v454_v47 = vrot.slane %v452_v34, 5  ;;  %v195_v38 = vld [vmem:[%s2446_s17 + $0x30] sm:$0xf] }
  0x32   : > { %v2105_v16 = vrot.slane %v2508_v60, 9  ;;  %v440_v48 = vrot.slane %v439_v44, 4  ;;  %v700_v49 = vrot.slane %v698_v39, 4  ;;  %v701_v3 = vrot.slane %v2527_v25, 5  ;;  %v2628_v60 = vld [vmem:[%s2446_s17 + $0x80] sm:$0x1] }
  0x33   : > { %1033 = vrot.lane.b32.xlu2 %v1016_v55, %s2407_s20  ;;  %v486_v17 = vrot.slane %v484_v23, 5  ;;  %v450_v50 = vrot.slane %v449_v46, 4  ;;  %v457_v51 = vshrl.u32 %v2558_v56, 16  ;;  %v460_v52 = vshll.u32 %v2558_v56, 16 }
  0x34   : > { %v466_v53 = vshll.u32 %v2570_v63, 16  ;;  %v492_v54 = vrot.slane %v490_v41, 5  ;;  %v496_v55 = vrot.slane %v494_v43, 4  ;;  %v445_v25 = vsel %vm2491_vm5, %v440_v48, %v444_v33 }
  0x35   : > { %v470_v58 = vshrl.u32 %v2570_v63, 16  ;;  %v744_v59 = vsel %vm2448_vm2, %v742_v36, %v743_v15  ;;  %v455_v56 = vsel %vm2491_vm5, %v450_v50, %v454_v47  ;;  %v699_v61 = vsel %vm2448_vm2, %v2105_v16, %v698_v39  ;;  %v2664_v39 = vld [vmem:[%s2446_s17 + $0x78] sm:$0xff] }
  0x36   : > { %v459_v62 = vrot.slane %v457_v51, 4  ;;  %v702_v32 = vsel %vm2448_vm2, %v700_v49, %v701_v3  ;;  %v462_v2 = vrot.slane %v460_v52, 5  ;;  %v468_v37 = vrot.slane %v466_v53, 5  ;;  %v197_v16 = vld [vmem:[%s2446_s17 + $0x38] sm:$0x1] }
  0x37   : > { %v472_v57 = vrot.slane %v470_v58, 4  ;;  %v500_v63 = vshll.u32 %v2628_v60, 16  ;;  %v919_v6 = vunpack.c.l.b16 %v445_v25  ;;  %v920_v7 = vunpack.c.l.b16 %v455_v56 }
  0x38   : > { %1208 = vrot.lane.b32.xlu1 %v2605_v35, %s2410_s25  ;;  %v476_v8 = vshll.u32 %v2575_v4, 16  ;;  %v487_v9 = vor.u32 %v486_v17, %v483_v45  ;;  %v497_v10 = vor.u32 %v496_v55, %v492_v54  ;;  %v463_v11 = vor.u32 %v462_v2, %v459_v62 }
  0x39   : > { %1173 = vrot.lane.b32.xlu0 %v2612_v12, %s2406_s19  ;;  %v473_v14 = vor.u32 %v472_v57, %v468_v37  ;;  %v989_v15 = vunpack.c.l.b16 %v699_v61  ;;  %v990_v18 = vunpack.c.l.b16 %v702_v32  ;;  %v1001_v27 = vunpack.c.l.b16 %v2593_v20  ;;  %v196_v20 = vld [vmem:[%s2446_s17 + $0x34] sm:$0xf] }
  0x3a   : > { %v478_v19 = vrot.slane %v476_v8, 5  ;;  %v464_v21 = vrot.slane %v463_v11, 4  ;;  %v1002_v28 = vunpack.c.l.b16 %v744_v59  ;;  %v502_v29 = vrot.slane %v500_v63, 5  ;;  %v2702_v11 = vld [vmem:[%s2446_s17 + $0x40] sm:$0xf] }
  0x3b   : > { %1138 = vrot.lane.b32.xlu2 %v2596_v24, %s2411_s26  ;;  %v474_v22 = vrot.slane %v473_v14, 4  ;;  %v2651_v4 = vpack.c.b16 %v920_v7, %v919_v6  ;;  %v488_v23 = vrot.slane %v487_v9, 4  ;;  %v498_v30 = vrot.slane %v497_v10, 4 }
  0x3c   : > { %v469_v33 = vsel %vm2491_vm5, %v464_v21, %v468_v37  ;;  %v2659_v36 = vpack.c.b16 %v990_v18, %v989_v15  ;;  %v2670_v44 = vpack.c.b16 %v1002_v28, %v1001_v27  ;;  %v705_v47 = vrot.slane %v196_v20, 5  ;;  %v2710_v18 = vld [vmem:[%s2446_s17 + $0x3c] sm:$0xf] }
  0x3d   : > { %v479_v34 = vsel %vm2491_vm5, %v474_v22, %v478_v19  ;;  %v921_v41 = vunpack.c.l.b16 %v469_v33  ;;  %v493_v45 = vsel %vm2491_vm5, %v488_v23, %v492_v54  ;;  %v503_v46 = vsel %vm2491_vm5, %v498_v30, %v502_v29  ;;  %v2713_v19 = vld [vmem:[%s2446_s17 + $0x44] sm:$0x1] }
  0x3e   : > { %v922_v43 = vunpack.c.l.b16 %v479_v34  ;;  %v337_v17 = vshrl.u32 %v195_v38, 16  ;;  %v340_v48 = vshll.u32 %v195_v38, 16  ;;  %v346_v49 = vshll.u32 %v196_v20, 16 }
  0x3f   : > { %v350_v3 = vshrl.u32 %v196_v20, 16  ;;  %v2106_v50 = vrot.slane %v195_v38, 9  ;;  %v707_v51 = vrot.slane %v705_v47, 4  ;;  %v708_v52 = vrot.slane %v197_v16, 5  ;;  %v2272_v20 = vld [vmem:[%s3630_s1 + $0x38] sm:$0xff] }
  0x40   : > { %1082 = vrot.lane.b32.xlu1 %v2642_v5, %s2405_s18  ;;  %2229 = vmatmul.msk.bf16.gmra.mxu1 %vm1241_vm6, %v2659_v36  ;;  %v2679_v53 = vpack.c.b16 %v922_v43, %v921_v41  ;;  %v923_v54 = vunpack.c.l.b16 %v493_v45  ;;  %v924_v55 = vunpack.c.l.b16 %v503_v46  ;;  %v339_v59 = vrot.slane %v337_v17, 4  ;;  %v216_v41 = vld [vmem:[%s2446_s17 + $0x84] sm:$0xf]  ;;  %v217_v43 = vld [vmem:[%s2446_s17 + $0x88] sm:$0xf]  ;;  %v2738_v45 = vld [vmem:[%s2446_s17 + $0x30] sm:$0xff] }
  0x41   : > { %1047 = vrot.lane.b32.xlu0 %v2614_v31, %s2407_s20  ;;  %v706_v25 = vsel %vm2448_vm2, %v2106_v50, %v705_v47  ;;  %v709_v58 = vsel %vm2448_vm2, %v707_v51, %v708_v52  ;;  %v342_v56 = vrot.slane %v340_v48, 5  ;;  %v348_v61 = vrot.slane %v346_v49, 5  ;;  %1624 = vmatpush.bf16.msra.mxu0 %v2272_v20  ;;  %v218_v52 = vld [vmem:[%s2446_s17 + $0x8c] sm:$0x1] }
  0x42   : > { %v352_v62 = vrot.slane %v350_v3, 4  ;;  %v991_v32 = vunpack.c.l.b16 %v706_v25  ;;  %v992_v2 = vunpack.c.l.b16 %v709_v58  ;;  %v2689_v37 = vpack.c.b16 %v924_v55, %v923_v54  ;;  %2369 = vmatpush.bf16.msra.mxu2 %v2272_v20 }
  0x43   : > { %967 = vrot.lane.b32.xlu2 %v2651_v4, %s2409_s22  ;;  %v343_v57 = vor.u32 %v342_v56, %v339_v59  ;;  %v356_v6 = vshll.u32 %v197_v16, 16  ;;  %v712_v14 = vrot.slane %v2702_v11, 5  ;;  %v715_v22 = vrot.slane %v2713_v19, 5  ;;  %v2763_v56 = vld [vmem:[%s2446_s17 + $0x48] sm:$0xf] }
  0x44   : > { %v353_v63 = vor.u32 %v352_v62, %v348_v61  ;;  %v2693_v7 = vpack.c.b16 %v992_v2, %v991_v32  ;;  %v747_v38 = vrot.slane %v2599_v26, 5  ;;  %v508_v47 = vshll.u32 %v216_v41, 16  ;;  %v2271_v26 = vld [vmem:[%s3630_s1 + $0x30] sm:$0xff]  ;;  %v2270_v62 = vld [vmem:[%s3630_s1 + $0x28] sm:$0xff] }
  0x45   : > { %v344_v8 = vrot.slane %v343_v57, 4  ;;  %v358_v10 = vrot.slane %v356_v6, 5  ;;  %v714_v21 = vrot.slane %v712_v14, 4  ;;  %v2112_v16 = vrot.slane %v2584_v13, 9  ;;  %v2755_v13 = vld [vmem:[%s2446_s17 + $0x4c] sm:$0xf]  ;;  %1625 = vmatpush.bf16.msra.mxu0 %v2271_v26 }
  0x46   : > { %v354_v9 = vrot.slane %v353_v63, 4  ;;  %v514_v17 = vshll.u32 %v217_v43, 16  ;;  %v518_v48 = vshrl.u32 %v217_v43, 16  ;;  %v749_v49 = vrot.slane %v747_v38, 4  ;;  %2370 = vmatpush.bf16.msra.mxu2 %v2271_v26 }
  0x47   : > { %v716_v23 = vsel %vm2448_vm2, %v714_v21, %v715_v22  ;;  %v750_v3 = vrot.slane %v2628_v60, 5  ;;  %v510_v51 = vrot.slane %v508_v47, 5  ;;  %v719_v25 = vrot.slane %v2755_v13, 5  ;;  %v2268_v47 = vld [vmem:[%s3630_s1 + $0x18] sm:$0xff] }
  0x48   : > { %1187 = vrot.lane.b32.xlu1 %v2664_v39, %s2406_s19  ;;  %v359_v15 = vsel %vm2491_vm5, %v354_v9, %v358_v10  ;;  %v994_v33 = vunpack.c.l.b16 %v716_v23  ;;  %v516_v54 = vrot.slane %v514_v17, 5  ;;  %v520_v55 = vrot.slane %v518_v48, 4  ;;  %v2269_v9 = vld [vmem:[%s3630_s1 + $0x20] sm:$0xff] }
  0x49   : > { %1152 = vrot.lane.b32.xlu0 %v2670_v44, %s2411_s26  ;;  %v912_v28 = vunpack.c.l.b16 %v359_v15  ;;  %v748_v60 = vsel %vm2448_vm2, %v2112_v16, %v747_v38  ;;  %v751_v58 = vsel %vm2448_vm2, %v749_v49, %v750_v3  ;;  %v524_v32 = vshll.u32 %v218_v52, 16  ;;  %1626 = vmatpush.bf16.msra.mxu0 %v2270_v62  ;;  %v2789_v38 = vld [vmem:[%s2446_s17 + $0x84] sm:$0xff] }
  0x4a   : > { %v2108_v2 = vrot.slane %v2763_v56, 9  ;;  %v721_v57 = vrot.slane %v719_v25, 4  ;;  %v521_v6 = vor.u32 %v520_v55, %v516_v54  ;;  %v1004_v15 = vunpack.c.l.b16 %v751_v58  ;;  %2371 = vmatpush.bf16.msra.mxu2 %v2270_v62  ;;  %v2827_v58 = vld [vmem:[%s2446_s17 + $0x54] sm:$0xf]  ;;  %v2266_v62 = vld [vmem:[%s3630_s1 + $0x8] sm:$0xff] }
  0x4b   : > { %1117 = vrot.lane.b32.xlu2 %v2679_v53, %s2408_s21  ;;  %v526_v22 = vrot.slane %v524_v32, 5  ;;  %v361_v49 = vshrl.u32 %v2710_v18, 16  ;;  %v364_v3 = vshll.u32 %v2710_v18, 16  ;;  %v2109_v32 = vrot.slane %v2827_v58, 9 }
  0x4c   : > { %v720_v10 = vsel %vm2448_vm2, %v2108_v2, %v719_v25 }
  0x4d   : > { %v995_v23 = vunpack.c.l.b16 %v720_v10  ;;  %1627 = vmatpush.bf16.msra.mxu0 %v2269_v9  ;;  %v366_v55 = vrot.slane %v364_v3, 5 }
  0x4e   : > { %2372 = vmatpush.bf16.msra.mxu2 %v2269_v9 }
  0x50   : > { %1035 = vrot.lane.b32.xlu1 %v2596_v24, %s2407_s20  ;;  %2230 = vmatmul.msk.bf16.gmra.mxu1 %vm1241_vm6, %v2693_v7  ;;  %v349_v24 = vsel %vm2491_vm5, %v344_v8, %v348_v61  ;;  %v2766_v61 = vld [vmem:[%s2446_s17 + $0x50] sm:$0x1]  ;;  %v754_v8 = vrot.slane %v217_v43, 5 }
  0x51   : > { %1222 = vrot.lane.b32.xlu0 %v2689_v37, %s2410_s25  ;;  %v911_v27 = vunpack.c.l.b16 %v349_v24  ;;  %v722_v63 = vrot.slane %v2766_v61, 5  ;;  %v1003_v24 = vunpack.c.l.b16 %v748_v60  ;;  %1628 = vmatpush.bf16.msra.mxu0 %v2268_v47 }
  0x52   : > { %2373 = vmatpush.bf16.msra.mxu2 %v2268_v47 }
  0x53   : > { %955 = vrot.lane.b32.xlu2 %v2538_v40, %s2409_s22  ;;  %v2107_v40 = vrot.slane %v2710_v18, 9  ;;  %v2727_v34 = vpack.c.b16 %v912_v28, %v911_v27  ;;  %v756_v27 = vrot.slane %v754_v8, 4  ;;  %v757_v28 = vrot.slane %v218_v52, 5  ;;  %v2824_v18 = vld [vmem:[%s2446_s17 + $0x58] sm:$0xf] }
  0x54   : > { %v726_v2 = vrot.slane %v2824_v18, 5 }
  0x55   : > { %v713_v29 = vsel %vm2448_vm2, %v2107_v40, %v712_v14  ;;  %v723_v14 = vsel %vm2448_vm2, %v721_v57, %v722_v63  ;;  %v2113_v40 = vrot.slane %v216_v41, 9  ;;  %v758_v20 = vsel %vm2448_vm2, %v756_v27, %v757_v28  ;;  %v2842_v63 = vld [vmem:[%s2446_s17 + $0x90] sm:$0xf]  ;;  %v2861_v28 = vld [vmem:[%s2446_s17 + $0x3c] sm:$0xff] }
  0x56   : > { %v993_v30 = vunpack.c.l.b16 %v713_v29  ;;  %v522_v29 = vrot.slane %v521_v6, 4  ;;  %v1006_v43 = vunpack.c.l.b16 %v758_v20  ;;  %v2845_v6 = vld [vmem:[%s2446_s17 + $0x94] sm:$0xf] }
  0x57   : > { %v542_v27 = vshrl.u32 %v2845_v6, 16 }
  0x58   : > { %1140 = vrot.lane.b32.xlu1 %v2659_v36, %s2411_s26  ;;  %v2740_v46 = vpack.c.b16 %v994_v33, %v993_v30  ;;  %v996_v30 = vunpack.c.l.b16 %v723_v14  ;;  %v755_v33 = vsel %vm2448_vm2, %v2113_v40, %v754_v8  ;;  %v527_v16 = vsel %vm2491_vm5, %v522_v29, %v526_v22 }
  0x59   : > { %1105 = vrot.lane.b32.xlu0 %v2605_v35, %s2408_s21  ;;  %v380_v14 = vshll.u32 %v2713_v19, 16  ;;  %v529_v40 = vshrl.u32 %v2842_v63, 16  ;;  %v538_v22 = vshll.u32 %v2845_v6, 16 }
  0x5a   : > { %v2804_v17 = vpack.c.b16 %v996_v30, %v995_v23 }
  0x5b   : > { %1070 = vrot.lane.b32.xlu2 %v2612_v12, %s2405_s18  ;;  %v505_v12 = vshrl.u32 %v216_v41, 16  ;;  %v1005_v41 = vunpack.c.l.b16 %v755_v33  ;;  %v382_v20 = vrot.slane %v380_v14, 5 }
  0x5d   : > { %v507_v50 = vrot.slane %v505_v12, 4  ;;  %v2793_v12 = vpack.c.b16 %v1004_v15, %v1003_v24  ;;  %v2806_v48 = vpack.c.b16 %v1006_v43, %v1005_v41  ;;  %v727_v24 = vsel %vm2448_vm2, %v2109_v32, %v726_v2 }
  0x5e   : > { %v728_v15 = vrot.slane %v726_v2, 4  ;;  %v997_v23 = vunpack.c.l.b16 %v727_v24  ;;  %v531_v43 = vrot.slane %v529_v40, 4  ;;  %v385_v24 = vshrl.u32 %v2763_v56, 16 }
  0x5f   : > { %v511_v59 = vor.u32 %v510_v51, %v507_v50  ;;  %v374_v50 = vshrl.u32 %v2702_v11, 16  ;;  %v2267_v51 = vld [vmem:[%s3630_s1 + $0x10] sm:$0xff]  ;;  %2237 = vmatmul.msk.bf16.vlgmr.msra.gmra.mxu3 %vm1241_vm6, %v2806_v48  ;;  %v394_v40 = vshll.u32 %v2755_v13, 16 }
  0x60   : > { %969 = vrot.lane.b32.xlu1 %v2679_v53, %s2409_s22  ;;  %2231 = vmatmul.msk.bf16.gmra.mxu1 %vm1241_vm6, %v2740_v46 }
  0x61   : > { %1210 = vrot.lane.b32.xlu0 %v2727_v34, %s2410_s25  ;;  %v512_v21 = vrot.slane %v511_v59, 4  ;;  %1629 = vmatpush.bf16.msra.mxu0 %v2267_v51  ;;  %v376_v60 = vrot.slane %v374_v50, 4  ;;  %v2830_v59 = vld [vmem:[%s2446_s17 + $0x5c] sm:$0x1] }
  0x62   : > { %2374 = vmatpush.bf16.msra.mxu2 %v2267_v51  ;;  %v729_v8 = vrot.slane %v2830_v59, 5 }
  0x63   : > { %1175 = vrot.lane.b32.xlu2 %v2738_v45, %s2406_s19  ;;  %v517_v26 = vsel %vm2491_vm5, %v512_v21, %v516_v54  ;;  %v926_v54 = vunpack.c.l.b16 %v527_v16  ;;  %v532_v21 = vshll.u32 %v2842_v63, 16  ;;  %v544_v16 = vrot.slane %v542_v27, 4 }
  0x64   : > { %v925_v52 = vunpack.c.l.b16 %v517_v26  ;;  %v730_v29 = vsel %vm2448_vm2, %v728_v15, %v729_v8  ;;  %v540_v26 = vrot.slane %v538_v22, 5  ;;  %v388_v15 = vshll.u32 %v2763_v56, 16 }
  0x65   : > { %1630 = vmatpush.bf16.msra.mxu0 %v2266_v62  ;;  %v998_v41 = vunpack.c.l.b16 %v730_v29  ;;  %v534_v47 = vrot.slane %v532_v21, 5  ;;  %v398_v21 = vshrl.u32 %v2755_v13, 16  ;;  %v387_v29 = vrot.slane %v385_v24, 4 }
  0x66   : > { %v2839_v57 = vpack.c.b16 %v926_v54, %v925_v52  ;;  %2375 = vmatpush.bf16.msra.mxu2 %v2266_v62  ;;  %v545_v52 = vor.u32 %v544_v16, %v540_v26  ;;  %v404_v16 = vshll.u32 %v2766_v61, 16 }
  0x67   : > { %v2872_v3 = vpack.c.b16 %v998_v41, %v997_v23  ;;  %v535_v51 = vor.u32 %v534_v47, %v531_v43  ;;  %v390_v23 = vrot.slane %v388_v15, 5  ;;  %v761_v41 = vrot.slane %v2845_v6, 5 }
  0x68   : > { %1119 = vrot.lane.b32.xlu1 %v2689_v37, %s2408_s21  ;;  %v546_v32 = vrot.slane %v545_v52, 4 }
  0x69   : > { %1084 = vrot.lane.b32.xlu0 %v2664_v39, %s2405_s18  ;;  %v536_v62 = vrot.slane %v535_v51, 4  ;;  %v391_v47 = vor.u32 %v390_v23, %v387_v29  ;;  %v763_v51 = vrot.slane %v761_v41, 4 }
  0x6b   : > { %1049 = vrot.lane.b32.xlu2 %v2670_v44, %s2407_s20 }
  0x6e   : > { %v2865_v19 = vpop.permute.xlu2 %1171 }
  0x70   : > { %957 = vrot.lane.b32.xlu1 %v2605_v35, %s2409_s22  ;;  %v370_v35 = vshll.u32 %v2702_v11, 16  ;;  %2232 = vmatmul.msk.bf16.gmra.mxu1 %vm1241_vm6, %v2804_v17  ;;  %v363_v11 = vrot.slane %v361_v49, 4  ;;  %v221_v49 = vld [vmem:[%s2446_s17 + $0x98] sm:$0x1] }
  0x71   : > { %1189 = vrot.lane.b32.xlu0 %v2789_v38, %s2406_s19  ;;  %v548_v54 = vshll.u32 %v221_v49, 16  ;;  %v764_v52 = vrot.slane %v221_v49, 5 }
  0x72   : > { %v372_v25 = vrot.slane %v370_v35, 5  ;;  %v367_v9 = vor.u32 %v366_v55, %v363_v11 }
  0x73   : > { %1154 = vrot.lane.b32.xlu2 %v2793_v12, %s2411_s26  ;;  %v550_v2 = vrot.slane %v548_v54, 5  ;;  %v765_v61 = vsel %vm2448_vm2, %v763_v51, %v764_v52 }
  0x74   : > { %v377_v10 = vor.u32 %v376_v60, %v372_v25  ;;  %v368_v30 = vrot.slane %v367_v9, 4 }
  0x75   : > { %v551_v14 = vsel %vm2491_vm5, %v546_v32, %v550_v2  ;;  %v1008_v32 = vunpack.c.l.b16 %v765_v61  ;;  %v392_v2 = vrot.slane %v391_v47, 4 }
  0x76   : > { %v378_v33 = vrot.slane %v377_v10, 4  ;;  %v373_v35 = vsel %vm2491_vm5, %v368_v30, %v372_v25  ;;  %v541_v10 = vsel %vm2491_vm5, %v536_v62, %v540_v26  ;;  %v928_v27 = vunpack.c.l.b16 %v551_v14 }
  0x77   : > { %v913_v11 = vunpack.c.l.b16 %v373_v35  ;;  %v396_v30 = vrot.slane %v394_v40, 5 }
  0x78   : > { %1072 = vrot.lane.b32.xlu1 %v2738_v45, %s2405_s18  ;;  %v383_v50 = vsel %vm2491_vm5, %v378_v33, %v382_v20  ;;  %v400_v33 = vrot.slane %v398_v21, 4 }
  0x79   : > { %1037 = vrot.lane.b32.xlu0 %v2659_v36, %s2407_s20  ;;  %v2265_v36 = vld [vmem:[%s3630_s1] sm:$0xff]  ;;  %v914_v55 = vunpack.c.l.b16 %v383_v50  ;;  %v2114_v50 = vrot.slane %v2842_v63, 9  ;;  %v2928_v63 = vld [vmem:[%s2446_s17 + $0x90] sm:$0xff] }
  0x7a   : > { %1631 = vmatpush.bf16.msra.mxu0 %v2265_v36  ;;  %2376 = vmatpush.bf16.msra.mxu2 %v2265_v36  ;;  %v2247_v36 = vld [vmem:[%s2446_s17] sm:$0xff]  ;;  %v401_v26 = vor.u32 %v400_v33, %v396_v30 }
  0x7b   : > { %1224 = vrot.lane.b32.xlu2 %v2839_v57, %s2410_s25  ;;  %v2886_v8 = vpack.c.b16 %v914_v55, %v913_v11  ;;  %v762_v55 = vsel %vm2448_vm2, %v2114_v50, %v761_v41  ;;  %v2958_v33 = vld [vmem:[%s2446_s17 + $0xa0] sm:$0xf] }
  0x7c   : > { %v1007_v49 = vunpack.c.l.b16 %v762_v55  ;;  %v562_v47 = vshll.u32 %v2958_v33, 16 }
  0x7e   : > { %v2932_v14 = vpack.c.b16 %v1008_v32, %v1007_v49 }
  0x80   : > { %1177 = vrot.lane.b32.xlu1 %v2861_v28, %s2406_s19  ;;  %2233 = vmatmul.msk.bf16.gmra.mxu1 %vm1241_vm6, %v2872_v3 }
  0x81   : > { %1142 = vrot.lane.b32.xlu0 %v2693_v7, %s2411_s26  ;;  %2238 = vmatmul.msk.bf16.gmra.mxu3 %vm1241_vm6, %v2932_v14 }
  0x82   : > { %v1067_v25 = vpop.permute.xlu1 %1066 }
  0x83   : > { %1107 = vrot.lane.b32.xlu2 %v2727_v34, %s2408_s21 }
  0x85   : > { %v1137_v60 = vpop.permute.xlu2 %1136 }
  0x88   : > { %1051 = vrot.lane.b32.xlu1 %v2793_v12, %s2407_s20 }
  0x89   : > { %971 = vrot.lane.b32.xlu0 %v2689_v37, %s2409_s22  ;;  %v927_v37 = vunpack.c.l.b16 %v541_v10 }
  0x8b   : > { %v1032_v9 = vpop.permute.xlu0 %1031  ;;  %1212 = vrot.lane.b32.xlu2 %v2886_v8, %s2410_s25  ;;  %v2905_v13 = vpack.c.b16 %v928_v27, %v927_v37 }
  0x8d   : > { %v1034_v22 = vpop.permute.xlu2 %1033 }
  0x90   : > { %1156 = vrot.lane.b32.xlu1 %v2806_v48, %s2411_s26  ;;  %2234 = vmatmul.msk.bf16.gmra.mxu1 %vm1241_vm6, %v2614_v31 }
  0x91   : > { %1121 = vrot.lane.b32.xlu0 %v2839_v57, %s2408_s21 }
  0x92   : > { %v1102_v20 = vpop.permute.xlu1 %1101 }
  0x93   : > { %v952_v56 = vpop.permute.xlu0 %951  ;;  %1086 = vrot.lane.b32.xlu2 %v2789_v38, %s2405_s18 }
  0x94   : > { %v1244_v43 = vsel %vm1241_vm6, %v2247_v36, %v952_v56  ;;  %v2968_v56 = vld [vmem:[%s2446_s17 + $0x48] sm:$0xff] }
  0x95   : > { %v1292_v35 = vsel %vm1290_vm7, %v1244_v43, %v1032_v9  ;;  %v2917_v54 = vpop.permute.xlu2 %1138  ;;  %v406_v9 = vrot.slane %v404_v16, 5  ;;  %v409_v16 = vshrl.u32 %v2827_v58, 16 }
  0x96   : > { %v1325_v6 = vsel %vm1323_vm8, %v1292_v35, %v1067_v25  ;;  %v402_v25 = vrot.slane %v401_v26, 4  ;;  %v566_v26 = vshrl.u32 %v2958_v33, 16  ;;  %v422_v35 = vshrl.u32 %v2824_v18, 16 }
  0x97   : > { %v1358_v11 = vsel %vm1356_vm9, %v1325_v6, %v1102_v20  ;;  %v411_v51 = vrot.slane %v409_v16, 4 }
  0x98   : > { %v1391_v62 = vsel %vm1389_vm10, %v1358_v11, %v1137_v60  ;;  %1226 = vrot.lane.b32.xlu1 %v2905_v13, %s2410_s25  ;;  %v407_v40 = vsel %vm2491_vm5, %v402_v25, %v406_v9  ;;  %v424_v11 = vrot.slane %v422_v35, 4  ;;  %v568_v49 = vrot.slane %v566_v26, 4  ;;  %v3012_v35 = vld [vmem:[%s2446_s17 + $0x9c] sm:$0xff] }
  0x99   : > { %959 = vrot.lane.b32.xlu0 %v2727_v34, %s2409_s22  ;;  %v1424_v60 = vsel %vm1422_vm11, %v1391_v62, %v2865_v19  ;;  %v397_v34 = vsel %vm2491_vm5, %v392_v2, %v396_v30  ;;  %v916_v27 = vunpack.c.l.b16 %v407_v40  ;;  %v2955_v30 = vld [vmem:[%s2446_s17 + $0x9c] sm:$0xf]  ;;  %v564_v62 = vrot.slane %v562_v47, 5  ;;  %v2988_v2 = vld [vmem:[%s2446_s17 + $0xa4] sm:$0x1] }
  0x9a   : > { %v954_v10 = vpop.permute.xlu1 %953  ;;  %v915_v37 = vunpack.c.l.b16 %v397_v34  ;;  %v556_v43 = vshll.u32 %v2955_v30, 16 }
  0x9b   : > { %v1207_v24 = vpop.permute.xlu0 %1206  ;;  %1191 = vrot.lane.b32.xlu2 %v2928_v63, %s2406_s19  ;;  %v1247_v19 = vsel %vm1241_vm6, %v2453_v1, %v954_v10  ;;  %v428_v10 = vshll.u32 %v2830_v59, 16 }
  0x9c   : > { %v1457_v15 = vsel %vm1455_vm12, %v1424_v60, %v1207_v24  ;;  %v1294_v36 = vsel %vm1290_vm7, %v1247_v19, %v1034_v22  ;;  %v2960_v20 = vpack.c.b16 %v916_v27, %v915_v37  ;;  %v553_v22 = vshrl.u32 %v2955_v30, 16 }
  0x9d   : > { %1632 = vmatmul.bf16.vlgmr.msra.gmra.mxu0 %v1457_v15  ;;  %v2945_v21 = vpop.permute.xlu2 %967  ;;  %v430_v40 = vrot.slane %v428_v10, 5  ;;  %v569_v37 = vor.u32 %v568_v49, %v564_v62  ;;  %v572_v27 = vshll.u32 %v2988_v2, 16 }
  0x9e   : > { %v555_v61 = vrot.slane %v553_v22, 4  ;;  %v3007_v22 = vld [vmem:[%s2446_s17 + $0x60] sm:$0xff] }
  0x9f   : > { %v570_v26 = vrot.slane %v569_v37, 4  ;;  %v574_v16 = vrot.slane %v572_v27, 5  ;;  %v768_v37 = vrot.slane %v2958_v33, 5 }
  0xa0   : > { %1109 = vrot.lane.b32.xlu1 %v2886_v8, %s2408_s21  ;;  %2235 = vmatmul.msk.bf16.gmra.mxu1 %vm1241_vm6, %v2670_v44  ;;  %v418_v44 = vshll.u32 %v2824_v18, 16 }
  0xa1   : > { %1074 = vrot.lane.b32.xlu0 %v2861_v28, %s2405_s18 }
  0xa2   : > { %v1104_v29 = vpop.permute.xlu1 %1103  ;;  %v420_v6 = vrot.slane %v418_v44, 5 }
  0xa3   : > { %v1069_v23 = vpop.permute.xlu0 %1068  ;;  %1039 = vrot.lane.b32.xlu2 %v2693_v7, %s2407_s20  ;;  %v412_v7 = vshll.u32 %v2827_v58, 16  ;;  %v558_v58 = vrot.slane %v556_v43, 5 }
  0xa4   : > { %v1327_v1 = vsel %vm1323_vm8, %v1294_v36, %v1069_v23  ;;  %v425_v9 = vor.u32 %v424_v11, %v420_v6 }
  0xa5   : > { %v2970_v41 = vpop.permute.xlu2 %1117  ;;  %v1360_v50 = vsel %vm1356_vm9, %v1327_v1, %v1104_v29  ;;  %v414_v52 = vrot.slane %v412_v7, 5  ;;  %v559_v19 = vor.u32 %v558_v58, %v555_v61 }
  0xa6   : > { %v1393_v18 = vsel %vm1389_vm10, %v1360_v50, %v2917_v54  ;;  %v426_v34 = vrot.slane %v425_v9, 4 }
  0xa7   : > { %v415_v25 = vor.u32 %v414_v52, %v411_v51  ;;  %v560_v47 = vrot.slane %v559_v19, 4  ;;  %v575_v51 = vsel %vm2491_vm5, %v570_v26, %v574_v16  ;;  %v3074_v26 = vld [vmem:[%s2446_s17 + $0x54] sm:$0xff] }
  0xa8   : > { %1214 = vrot.lane.b32.xlu1 %v2960_v20, %s2410_s25  ;;  %v431_v36 = vsel %vm2491_vm5, %v426_v34, %v430_v40 }
  0xa9   : > { %1179 = vrot.lane.b32.xlu0 %v2968_v56, %s2406_s19  ;;  %v416_v15 = vrot.slane %v415_v25, 4  ;;  %v918_v23 = vunpack.c.l.b16 %v431_v36  ;;  %v565_v50 = vsel %vm2491_vm5, %v560_v47, %v564_v62  ;;  %v770_v36 = vrot.slane %v768_v37, 4  ;;  %v226_v47 = vld [vmem:[%s2446_s17 + $0xac] sm:$0xf] }
  0xaa   : > { %v1209_v55 = vpop.permute.xlu1 %1208 }
  0xab   : > { %v1174_v32 = vpop.permute.xlu0 %1173  ;;  %1144 = vrot.lane.b32.xlu2 %v2740_v46, %s2411_s26  ;;  %v421_v59 = vsel %vm2491_vm5, %v416_v15, %v420_v6 }
  0xac   : > { %v1426_v24 = vsel %vm1422_vm11, %v1393_v18, %v1174_v32  ;;  %v917_v29 = vunpack.c.l.b16 %v421_v59  ;;  %v2115_v59 = vrot.slane %v2955_v30, 9 }
  0xad   : > { %v1460_v60 = vsel %vm1455_vm12, %v1426_v24, %v1209_v55  ;;  %v956_v54 = vpop.permute.xlu2 %955  ;;  %v3004_v1 = vpop.f32.mrf.mxu1 }
  0xae   : > { %1637 = vmatmul.bf16.gmra.mxu0 %v1460_v60  ;;  %v3009_v7 = vpack.c.b16 %v918_v23, %v917_v29  ;;  %v771_v29 = vrot.slane %v2988_v2, 5  ;;  %v769_v16 = vsel %vm2448_vm2, %v2115_v59, %v768_v37 }
  0xb0   : > { %1088 = vrot.lane.b32.xlu1 %v2928_v63, %s2405_s18  ;;  %2236 = vmatmul.msk.bf16.gmra.mxu1 %vm1241_vm6, %v2793_v12  ;;  %v929_v12 = vunpack.c.l.b16 %v565_v50  ;;  %v772_v33 = vsel %vm2448_vm2, %v770_v36, %v771_v29 }
  0xb1   : > { %1053 = vrot.lane.b32.xlu0 %v2806_v48, %s2407_s20  ;;  %v1268_v48 = vsel %vm1241_vm6, %v3007_v22, %v2945_v21  ;;  %v1010_v50 = vunpack.c.l.b16 %v772_v33 }
  0xb2   : > { %v1083_v43 = vpop.permute.xlu1 %1082 }
  0xb3   : > { %v1048_v44 = vpop.permute.xlu0 %1047  ;;  %973 = vrot.lane.b32.xlu2 %v2839_v57, %s2409_s22  ;;  %v930_v57 = vunpack.c.l.b16 %v575_v51  ;;  %v586_v51 = vshll.u32 %v226_v47, 16 }
  0xb4   : > { %v1308_v6 = vsel %vm1290_vm7, %v1268_v48, %v1048_v44  ;;  %v1009_v48 = vunpack.c.l.b16 %v769_v16 }
  0xb5   : > { %v1071_v52 = vpop.permute.xlu2 %1070  ;;  %v3030_v11 = vpop.f32.mrf.mxu1  ;;  %v1341_v61 = vsel %vm1323_vm8, %v1308_v6, %v1083_v43  ;;  %v3035_v58 = vpack.c.b16 %v930_v57, %v929_v12  ;;  %v225_v43 = vld [vmem:[%s2446_s17 + $0xa8] sm:$0xf] }
  0xb6   : > { %v1374_v49 = vsel %vm1356_vm9, %v1341_v61, %v2970_v41  ;;  %v2394_v41 = vld [vmem:[%s2446_s17 + $0x18] sm:$0xff]  ;;  %v577_v44 = vshrl.u32 %v225_v43, 16  ;;  %v580_v30 = vshll.u32 %v225_v43, 16  ;;  %v3085_v57 = vpack.c.b16 %v1010_v50, %v1009_v48 }
  0xb7   : > { %v1250_v60 = vsel %vm1241_vm6, %v2394_v41, %v956_v54 }
  0xb8   : > { %1193 = vrot.lane.b32.xlu1 %v3012_v35, %s2406_s19  ;;  %v582_v61 = vrot.slane %v580_v30, 5  ;;  %2239 = vmatmul.msk.bf16.gmra.mxu3 %vm1241_vm6, %v3085_v57 }
  0xb9   : > { %1158 = vrot.lane.b32.xlu0 %v2932_v14, %s2411_s26 }
  0xba   : > { %v1188_v21 = vpop.permute.xlu1 %1187 }
  0xbb   : > { %v1153_v55 = vpop.permute.xlu0 %1152  ;;  %1123 = vrot.lane.b32.xlu2 %v2905_v13, %s2408_s21 }
  0xbc   : > { %v1407_v18 = vsel %vm1389_vm10, %v1374_v49, %v1153_v55  ;;  %v579_v55 = vrot.slane %v577_v44, 4  ;;  %v588_v49 = vrot.slane %v586_v51, 5 }
  0xbd   : > { %v1176_v62 = vpop.permute.xlu2 %1175  ;;  %v3044_v32 = vpop.f32.mrf.mxu1  ;;  %v1440_v10 = vsel %vm1422_vm11, %v1407_v18, %v1188_v21 }
  0xc0   : > { %1041 = vrot.lane.b32.xlu1 %v2740_v46, %s2407_s20 }
  0xc1   : > { %1228 = vrot.lane.b32.xlu0 %v3035_v58, %s2410_s25 }
  0xc2   : > { %v1036_v25 = vpop.permute.xlu1 %1035 }
  0xc3   : > { %v1223_v9 = vpop.permute.xlu0 %1222  ;;  %961 = vrot.lane.b32.xlu2 %v2886_v8, %s2409_s22  ;;  %v1296_v46 = vsel %vm1290_vm7, %v1250_v60, %v1036_v25 }
  0xc4   : > { %v1481_v24 = vsel %vm1455_vm12, %v1440_v10, %v1223_v9  ;;  %v1329_v8 = vsel %vm1323_vm8, %v1296_v46, %v1071_v52  ;;  %v227_v9 = vld [vmem:[%s2446_s17 + $0xb0] sm:$0x1]  ;;  %v775_v10 = vrot.slane %v226_v47, 5 }
  0xc5   : > { %1672 = vmatmul.bf16.vlgmr.msra.gmra.mxu2 %v1481_v24  ;;  %v1050_v15 = vpop.permute.xlu2 %1049  ;;  %v3057_v34 = vpop.f32.mrf.mxu1  ;;  %v583_v24 = vor.u32 %v582_v61, %v579_v55  ;;  %v596_v46 = vshll.u32 %v227_v9, 16  ;;  %v778_v37 = vrot.slane %v227_v9, 5 }
  0xc7   : > { %v598_v16 = vrot.slane %v596_v46, 5 }
  0xc8   : > { %1146 = vrot.lane.b32.xlu1 %v2804_v17, %s2411_s26 }
  0xc9   : > { %1111 = vrot.lane.b32.xlu0 %v2960_v20, %s2408_s21 }
  0xca   : > { %v1141_v40 = vpop.permute.xlu1 %1140 }
  0xcb   : > { %v1106_v19 = vpop.permute.xlu0 %1105  ;;  %1076 = vrot.lane.b32.xlu2 %v2968_v56, %s2405_s18 }
  0xcc   : > { %v1362_v54 = vsel %vm1356_vm9, %v1329_v8, %v1106_v19  ;;  %v777_v8 = vrot.slane %v775_v10, 4 }
  0xcd   : > { %v3064_v27 = vpop.permute.xlu2 %1154  ;;  %v1395_v23 = vsel %vm1389_vm10, %v1362_v54, %v1141_v40  ;;  %v3082_v2 = vpop.f32.mrf.mxu1  ;;  %v2116_v40 = vrot.slane %v225_v43, 9  ;;  %v584_v43 = vrot.slane %v583_v24, 4 }
  0xce   : > { %v1428_v6 = vsel %vm1422_vm11, %v1395_v23, %v1176_v62  ;;  %v779_v36 = vsel %vm2448_vm2, %v777_v8, %v778_v37  ;;  %v3110_v23 = vld [vmem:[%s2446_s17 + $0xa8] sm:$0xff] }
  0xcf   : > { %v776_v59 = vsel %vm2448_vm2, %v2116_v40, %v775_v10  ;;  %v1012_v44 = vunpack.c.l.b16 %v779_v36  ;;  %v589_v48 = vsel %vm2491_vm5, %v584_v43, %v588_v49  ;;  %v229_v10 = vld [vmem:[%s2446_s17 + $0xb8] sm:$0xf]  ;;  %v230_v43 = vld [vmem:[%s2446_s17 + $0xbc] sm:$0x1] }
  0xd0   : > { %975 = vrot.lane.b32.xlu1 %v2905_v13, %s2409_s22  ;;  %v590_v13 = vshrl.u32 %v226_v47, 16  ;;  %v1011_v33 = vunpack.c.l.b16 %v776_v59  ;;  %v610_v40 = vshll.u32 %v229_v10, 16  ;;  %v614_v8 = vshrl.u32 %v229_v10, 16 }
  0xd1   : > { %1216 = vrot.lane.b32.xlu0 %v3009_v7, %s2410_s25 }
  0xd2   : > { %v970_v52 = vpop.permute.xlu1 %969  ;;  %v592_v18 = vrot.slane %v590_v13, 4  ;;  %v612_v59 = vrot.slane %v610_v40, 5  ;;  %v616_v36 = vrot.slane %v614_v8, 4  ;;  %v782_v40 = vrot.slane %v229_v10, 5 }
  0xd3   : > { %v1211_v12 = vpop.permute.xlu0 %1210  ;;  %1181 = vrot.lane.b32.xlu2 %v3074_v26, %s2406_s19  ;;  %v1271_v62 = vsel %vm1241_vm6, %v2642_v5, %v970_v52 }
  0xd4   : > { %v1463_v21 = vsel %vm1455_vm12, %v1428_v6, %v1211_v12  ;;  %v593_v60 = vor.u32 %v592_v18, %v588_v49  ;;  %v1310_v19 = vsel %vm1290_vm7, %v1271_v62, %v1050_v15  ;;  %v3125_v6 = vpack.c.b16 %v1012_v44, %v1011_v33  ;;  %v3140_v49 = vld [vmem:[%s2446_s17 + $0xb4] sm:$0xf]  ;;  %v2395_v18 = vld [vmem:[%s2446_s17 + $0x24] sm:$0xff] }
  0xd5   : > { %1642 = vmatmul.bf16.gmra.mxu0 %v1463_v21  ;;  %v1225_v25 = vpop.permute.xlu2 %1224  ;;  %v3099_v41 = vpop.f32.mrf.mxu1  ;;  %v931_v12 = vunpack.c.l.b16 %v589_v48 }
  0xd6   : > { %v594_v47 = vrot.slane %v593_v60, 4  ;;  %2240 = vmatmul.msk.bf16.gmra.mxu3 %vm1241_vm6, %v3125_v6  ;;  %v601_v60 = vshrl.u32 %v3140_v49, 16 }
  0xd8   : > { %1125 = vrot.lane.b32.xlu1 %v3035_v58, %s2408_s21  ;;  %v599_v50 = vsel %vm2491_vm5, %v594_v47, %v598_v16  ;;  %v603_v37 = vrot.slane %v601_v60, 4 }
  0xd9   : > { %1090 = vrot.lane.b32.xlu0 %v3012_v35, %s2405_s18  ;;  %v932_v21 = vunpack.c.l.b16 %v599_v50  ;;  %v617_v50 = vor.u32 %v616_v36, %v612_v59  ;;  %v785_v36 = vrot.slane %v230_v43, 5 }
  0xda   : > { %v1120_v54 = vpop.permute.xlu1 %1119 }
  0xdb   : > { %v1085_v5 = vpop.permute.xlu0 %1084  ;;  %1055 = vrot.lane.b32.xlu2 %v2932_v14, %s2407_s20 }
  0xdc   : > { %v1343_v29 = vsel %vm1323_vm8, %v1310_v19, %v1085_v5 }
  0xdd   : > { %v1108_v15 = vpop.permute.xlu2 %1107  ;;  %v1376_v30 = vsel %vm1356_vm9, %v1343_v29, %v1120_v54  ;;  %v3117_v14 = vpop.f32.mrf.mxu1 }
  0xde   : > { %v1409_v13 = vsel %vm1389_vm10, %v1376_v30, %v3064_v27  ;;  %v3135_v27 = vpack.c.b16 %v932_v21, %v931_v12 }
  0xe0   : > { %963 = vrot.lane.b32.xlu1 %v2960_v20, %s2409_s22 }
  0xe1   : > { %1195 = vrot.lane.b32.xlu0 %v3110_v23, %s2406_s19 }
  0xe2   : > { %v958_v51 = vpop.permute.xlu1 %957 }
  0xe3   : > { %v1190_v52 = vpop.permute.xlu0 %1189  ;;  %1160 = vrot.lane.b32.xlu2 %v3085_v57, %s2411_s26  ;;  %v1253_v9 = vsel %vm1241_vm6, %v2395_v18, %v958_v51  ;;  %v620_v51 = vshll.u32 %v230_v43, 16 }
  0xe4   : > { %v1442_v20 = vsel %vm1422_vm11, %v1409_v13, %v1190_v52 }
  0xe5   : > { %v1484_v55 = vsel %vm1455_vm12, %v1442_v20, %v1225_v25  ;;  %v1213_v61 = vpop.permute.xlu2 %1212  ;;  %v3144_v25 = vpop.f32.mrf.mxu1  ;;  %v618_v20 = vrot.slane %v617_v50, 4  ;;  %v622_v12 = vrot.slane %v620_v51, 5 }
  0xe6   : > { %1677 = vmatmul.bf16.gmra.mxu2 %v1484_v55 }
  0xe8   : > { %1078 = vrot.lane.b32.xlu1 %v3074_v26, %s2405_s18 }
  0xe9   : > { %1043 = vrot.lane.b32.xlu0 %v2804_v17, %s2407_s20  ;;  %v604_v17 = vshll.u32 %v3140_v49, 16 }
  0xea   : > { %v1073_v62 = vpop.permute.xlu1 %1072 }
  0xeb   : > { %v1038_v24 = vpop.permute.xlu0 %1037  ;;  %1230 = vrot.lane.b32.xlu2 %v3135_v27, %s2410_s25  ;;  %v606_v5 = vrot.slane %v604_v17, 5 }
  0xec   : > { %v1298_v46 = vsel %vm1290_vm7, %v1253_v9, %v1038_v24 }
  0xed   : > { %v1087_v19 = vpop.permute.xlu2 %1086  ;;  %v1331_v54 = vsel %vm1323_vm8, %v1298_v46, %v1073_v62  ;;  %v3162_v44 = vpop.f32.mrf.mxu1  ;;  %v607_v48 = vor.u32 %v606_v5, %v603_v37  ;;  %v2117_v5 = vrot.slane %v3140_v49, 9 }
  0xee   : > { %v1364_v47 = vsel %vm1356_vm9, %v1331_v54, %v1108_v15 }
  0xef   : > { %v608_v15 = vrot.slane %v607_v48, 4 }
  0xf0   : > { %1183 = vrot.lane.b32.xlu1 %v3007_v22, %s2406_s19 }
  0xf1   : > { %1148 = vrot.lane.b32.xlu0 %v2872_v3, %s2411_s26 }
  0xf2   : > { %v1178_v29 = vpop.permute.xlu1 %1177 }
  0xf3   : > { %v1143_v16 = vpop.permute.xlu0 %1142  ;;  %1113 = vrot.lane.b32.xlu2 %v3009_v7, %s2408_s21 }
  0xf4   : > { %v1397_v33 = vsel %vm1389_vm10, %v1364_v47, %v1143_v16 }
  0xf5   : > { %v1430_v30 = vsel %vm1422_vm11, %v1397_v33, %v1178_v29  ;;  %v1192_v52 = vpop.permute.xlu2 %1191  ;;  %v3178_v62 = vpop.f32.mrf.mxu1  ;;  %v3203_v33 = vld [vmem:[%s2446_s17 + $0xb4] sm:$0xff] }
  0xf6   : > { %v1466_v13 = vsel %vm1455_vm12, %v1430_v30, %v1213_v61  ;;  %v613_v61 = vsel %vm2491_vm5, %v608_v15, %v612_v59  ;;  %v784_v59 = vrot.slane %v782_v40, 4 }
  0xf7   : > { %1647 = vmatmul.bf16.gmra.mxu0 %v1466_v13  ;;  %v933_v24 = vunpack.c.l.b16 %v613_v61 }
  0xf8   : > { %1057 = vrot.lane.b32.xlu1 %v3085_v57, %s2407_s20  ;;  %v623_v57 = vsel %vm2491_vm5, %v618_v20, %v622_v12  ;;  %v786_v10 = vsel %vm2448_vm2, %v784_v59, %v785_v36  ;;  %v232_v12 = vld [vmem:[%s2446_s17 + $0xc4] sm:$0xf] }
  0xf9   : > { %977 = vrot.lane.b32.xlu0 %v3035_v58, %s2409_s22  ;;  %v934_v60 = vunpack.c.l.b16 %v623_v57  ;;  %v1014_v49 = vunpack.c.l.b16 %v786_v10  ;;  %v797_v36 = vshll.u32 %v232_v12, 16 }
  0xfa   : > { %v1052_v21 = vpop.permute.xlu1 %1051 }
  0xfb   : > { %v972_v55 = vpop.permute.xlu0 %971  ;;  %1218 = vrot.lane.b32.xlu2 %v2651_v4, %s2410_s25  ;;  %v3187_v54 = vpack.c.b16 %v934_v60, %v933_v24  ;;  %v2396_v60 = vld [vmem:[%s2446_s17 + $0x6c] sm:$0xff] }
  0xfc   : > { %v1274_v18 = vsel %vm1241_vm6, %v2664_v39, %v972_v55  ;;  %v816_v55 = vrot.slane %v232_v12, 5 }
  0xfd   : > { %v1040_v9 = vpop.permute.xlu2 %1039  ;;  %v1312_v58 = vsel %vm1290_vm7, %v1274_v18, %v1052_v21  ;;  %v3200_v16 = vpop.f32.mrf.mxu1  ;;  %v231_v18 = vld [vmem:[%s2446_s17 + $0xc0] sm:$0xf] }
  0xfe   : > { %v1345_v46 = vsel %vm1323_vm8, %v1312_v58, %v1087_v19  ;;  %v783_v19 = vsel %vm2448_vm2, %v2117_v5, %v782_v40  ;;  %v2118_v57 = vrot.slane %v231_v18, 9 }
  0xff   : > { %v1013_v30 = vunpack.c.l.b16 %v783_v19 }
 0x100   : > { %1162 = vrot.lane.b32.xlu1 %v3125_v6, %s2411_s26 }
 0x101   : > { %1127 = vrot.lane.b32.xlu0 %v3135_v27, %s2408_s21  ;;  %v3208_v51 = vpack.c.b16 %v1014_v49, %v1013_v30 }
 0x102   : > { %v1157_v39 = vpop.permute.xlu1 %1156 }
 0x103   : > { %v1122_v17 = vpop.permute.xlu0 %1121  ;;  %1092 = vrot.lane.b32.xlu2 %v3110_v23, %s2405_s18  ;;  %2241 = vmatmul.msk.bf16.gmra.mxu3 %vm1241_vm6, %v3208_v51 }
 0x104   : > { %v1378_v8 = vsel %vm1356_vm9, %v1345_v46, %v1122_v17 }
 0x105   : > { %v1411_v37 = vsel %vm1389_vm10, %v1378_v8, %v1157_v39  ;;  %v1145_v29 = vpop.permute.xlu2 %1144  ;;  %v3222_v15 = vpop.f32.mrf.mxu1  ;;  %v791_v39 = vshll.u32 %v231_v18, 16 }
 0x106   : > { %v1444_v47 = vsel %vm1422_vm11, %v1411_v37, %v1192_v52 }
 0x108   : > { %1232 = vrot.lane.b32.xlu1 %v3187_v54, %s2410_s25 }
 0x109   : > { %965 = vrot.lane.b32.xlu0 %v3009_v7, %s2409_s22 }
 0x10a   : > { %v1227_v43 = vpop.permute.xlu1 %1226 }
 0x10b   : > { %v1487_v48 = vsel %vm1455_vm12, %v1444_v47, %v1227_v43  ;;  %v960_v50 = vpop.permute.xlu0 %959  ;;  %1197 = vrot.lane.b32.xlu2 %v3203_v33, %s2406_s19  ;;  %v793_v43 = vrot.slane %v791_v39, 5 }
 0x10c   : > { %1682 = vmatmul.bf16.gmra.mxu2 %v1487_v48  ;;  %v1256_v7 = vsel %vm1241_vm6, %v2738_v45, %v960_v50  ;;  %v233_v45 = vld [vmem:[%s2446_s17 + $0xc8] sm:$0x1]  ;;  %v799_v48 = vrot.slane %v797_v36, 5 }
 0x10d   : > { %v3214_v13 = vpop.permute.xlu2 %973  ;;  %v1300_v21 = vsel %vm1290_vm7, %v1256_v7, %v1040_v9  ;;  %v819_v58 = vrot.slane %v233_v45, 5  ;;  %v817_v9 = vsel %vm2448_vm2, %v2118_v57, %v816_v55  ;;  %v3244_v10 = vpop.f32.mrf.mxu1  ;;  %v3270_v57 = vld [vmem:[%s2446_s17 + $0xd0] sm:$0xf] }
 0x10e   : > { %v1133_v17 = vunpack.c.l.b16 %v817_v9 }
 0x110   : > { %1115 = vrot.lane.b32.xlu1 %v2651_v4, %s2408_s21 }
 0x111   : > { %1080 = vrot.lane.b32.xlu0 %v3007_v22, %s2405_s18  ;;  %v818_v22 = vrot.slane %v816_v55, 4 }
 0x112   : > { %v1110_v52 = vpop.permute.xlu1 %1109 }
 0x113   : > { %v1075_v20 = vpop.permute.xlu0 %1074  ;;  %1045 = vrot.lane.b32.xlu2 %v2872_v3, %s2407_s20  ;;  %v788_v3 = vshrl.u32 %v231_v18, 16  ;;  %v820_v46 = vsel %vm2448_vm2, %v818_v22, %v819_v58  ;;  %v3267_v18 = vld [vmem:[%s2446_s17 + $0xcc] sm:$0xf] }
 0x114   : > { %v1333_v4 = vsel %vm1323_vm8, %v1300_v21, %v1075_v20  ;;  %v1134_v37 = vunpack.c.l.b16 %v820_v46  ;;  %v825_v9 = vshll.u32 %v3267_v18, 16 }
 0x115   : > { %v3230_v61 = vpop.permute.xlu2 %1123  ;;  %v1366_v24 = vsel %vm1356_vm9, %v1333_v4, %v1110_v52  ;;  %v790_v49 = vrot.slane %v788_v3, 4  ;;  %v807_v4 = vshll.u32 %v233_v45, 16  ;;  %v3287_v22 = vpop.f32.mrf.mxu1  ;;  %v835_v3 = vshrl.u32 %v3270_v57, 16 }
 0x116   : > { %v1399_v5 = vsel %vm1389_vm10, %v1366_v24, %v1145_v29  ;;  %v3248_v47 = vpack.c.b16 %v1134_v37, %v1133_v17  ;;  %v822_v24 = vshrl.u32 %v3267_v18, 16 }
 0x117   : > { %v809_v39 = vrot.slane %v807_v4, 5  ;;  %v837_v37 = vrot.slane %v835_v3, 4 }
 0x118   : > { %1220 = vrot.lane.b32.xlu1 %v2679_v53, %s2410_s25  ;;  %v801_v53 = vshrl.u32 %v232_v12, 16  ;;  %2242 = vmatmul.msk.bf16.gmra.mxu3 %vm1241_vm6, %v3248_v47  ;;  %v824_v17 = vrot.slane %v822_v24, 4 }
 0x119   : > { %1185 = vrot.lane.b32.xlu0 %v2396_v60, %s2406_s19  ;;  %v831_v60 = vshll.u32 %v3270_v57, 16 }
 0x11a   : > { %v1215_v40 = vpop.permute.xlu1 %1214  ;;  %v1633_v8 = vpop.f32.mrf.mxu0  ;;  %v803_v50 = vrot.slane %v801_v53, 4  ;;  %v3304_v53 = vld [vmem:[%s2446_s17 + $0xd4] sm:$0x1] }
 0x11b   : > { %v1180_v59 = vpop.permute.xlu0 %1179  ;;  %1150 = vrot.lane.b32.xlu2 %v2614_v31, %s2411_s26  ;;  %v794_v31 = vor.u32 %v793_v43, %v790_v49  ;;  %v3261_v20 = vadd.f32 %v3004_v1, %v1633_v8  ;;  %v1277_v1 = vsel %vm1241_vm6, %v2789_v38, %v3214_v13  ;;  %v833_v8 = vrot.slane %v831_v60, 5 }
 0x11c   : > { %v1432_v19 = vsel %vm1422_vm11, %v1399_v5, %v1180_v59  ;;  %v804_v55 = vor.u32 %v803_v50, %v799_v48 }
 0x11d   : > { %v1469_v30 = vsel %vm1455_vm12, %v1432_v19, %v1215_v40  ;;  %v3251_v29 = vpop.permute.xlu2 %961  ;;  %v795_v45 = vrot.slane %v794_v31, 4  ;;  %v827_v40 = vrot.slane %v825_v9, 5  ;;  %v838_v50 = vor.u32 %v837_v37, %v833_v8 }
 0x11e   : > { %1652 = vmatmul.bf16.gmra.mxu0 %v1469_v30  ;;  %v841_v31 = vshll.u32 %v3304_v53, 16 }
 0x11f   : > { %v800_v13 = vsel %vm2491_vm5, %v795_v45, %v799_v48  ;;  %v828_v48 = vor.u32 %v827_v40, %v824_v17 }
 0x120   : > { %1094 = vrot.lane.b32.xlu1 %v3203_v33, %s2405_s18  ;;  %v1098_v30 = vunpack.c.l.b16 %v800_v13  ;;  %v843_v45 = vrot.slane %v841_v31, 5 }
 0x121   : > { %1059 = vrot.lane.b32.xlu0 %v3125_v6, %s2407_s20  ;;  %v3278_v6 = vld [vmem:[%s2446_s17 + $0xc0] sm:$0xff] }
 0x122   : > { %v1089_v7 = vpop.permute.xlu1 %1088  ;;  %v1635_v52 = vpop.f32.mrf.mxu0 }
 0x123   : > { %v3264_v12 = vadd.f32 %v3030_v11, %v1635_v52  ;;  %v1054_v21 = vpop.permute.xlu0 %1053  ;;  %979 = vrot.lane.b32.xlu2 %v3135_v27, %s2409_s22  ;;  %v805_v27 = vrot.slane %v804_v55, 4  ;;  %v3315_v55 = vpop.f32.mrf.mxu1 }
 0x124   : > { %v1314_v38 = vsel %vm1290_vm7, %v1277_v1, %v1054_v21  ;;  %v829_v1 = vrot.slane %v828_v48, 4 }
 0x125   : > { %v2277_v11 = vpack.c.bf16 %v3264_v12, %v3261_v20  ;;  %v1077_v58 = vpop.permute.xlu2 %1076  ;;  %v810_v36 = vsel %vm2491_vm5, %v805_v27, %v809_v39  ;;  %v1347_v19 = vsel %vm1323_vm8, %v1314_v38, %v1089_v7 }
 0x126   : > { %v1099_v49 = vunpack.c.l.b16 %v810_v36  ;;  %v1380_v52 = vsel %vm1356_vm9, %v1347_v19, %v3230_v61  ;;  %v834_v39 = vsel %vm2491_vm5, %v829_v1, %v833_v8 }
 0x127   : > { %2278 = vst [vmem:[%s3275_s29] sm:$0xff] %v2277_v11   ;;  %v839_v11 = vrot.slane %v838_v50, 4 }
 0x128   : > { %1199 = vrot.lane.b32.xlu1 %v3278_v6, %s2406_s19  ;;  %v1100_v4 = vpack.c.b16 %v1099_v49, %v1098_v30 }
 0x129   : > { %1164 = vrot.lane.b32.xlu0 %v3208_v51, %s2411_s26 }
 0x12a   : > { %v1194_v46 = vpop.permute.xlu1 %1193 }
 0x12b   : > { %v1638_v5 = vpop.f32.mrf.mxu0  ;;  %v1159_v59 = vpop.permute.xlu0 %1158  ;;  %1129 = vrot.lane.b32.xlu2 %v3187_v54, %s2408_s21 }
 0x12c   : > { %v1413_v21 = vsel %vm1389_vm10, %v1380_v52, %v1159_v59  ;;  %v3321_v60 = vadd.f32 %v3044_v32, %v1638_v5  ;;  %v844_v32 = vsel %vm2491_vm5, %v839_v11, %v843_v45  ;;  %v2264_v5 = vld [vmem:[%s2446_s17 + $0xcc] sm:$0xff]  ;;  %s2101_s17 = sshll.u32 %s3638_s13, 1 }
 0x12d   : > { %v1182_v43 = vpop.permute.xlu2 %1181  ;;  %v1446_v61 = vsel %vm1422_vm11, %v1413_v21, %v1194_v46  ;;  %v3342_v46 = vpop.f32.mrf.mxu1 }
 0x130   : > { %1061 = vrot.lane.b32.xlu1 %v3208_v51, %s2407_s20  ;;  %s3556_s20 = scalar_lea.vmem %s3632_s3, %s2101_s17 }
 0x131   : > { %981 = vrot.lane.b32.xlu0 %v3187_v54, %s2409_s22  ;;  %v1259_v54 = vsel %vm1241_vm6, %v2861_v28, %v3251_v29  ;;  %v1203_v28 = vunpack.c.l.b16 %v834_v39  ;;  %v1204_v29 = vunpack.c.l.b16 %v844_v32 }
 0x132   : > { %v1042_v7 = vpop.permute.xlu1 %1041 }
 0x133   : > { %v1640_v24 = vpop.f32.mrf.mxu0  ;;  %v1229_v9 = vpop.permute.xlu0 %1228  ;;  %1234 = vrot.lane.b32.xlu2 %v1100_v4, %s2410_s25  ;;  %v1302_v38 = vsel %vm1290_vm7, %v1259_v54, %v1042_v7  ;;  %v1205_v8 = vpack.c.b16 %v1204_v29, %v1203_v28 }
 0x134   : > { %v3324_v51 = vadd.f32 %v3057_v34, %v1640_v24  ;;  %v1490_v3 = vsel %vm1455_vm12, %v1446_v61, %v1229_v9  ;;  %v1335_v40 = vsel %vm1323_vm8, %v1302_v38, %v1077_v58 }
 0x135   : > { %1687 = vmatmul.bf16.gmra.mxu2 %v1490_v3  ;;  %v1056_v34 = vpop.permute.xlu2 %1055  ;;  %v1762_v49 = vpop.f32.mrf.mxu1 }
 0x136   : > { %v2282_v27 = vpack.c.bf16 %v3324_v51, %v3321_v60 }
 0x138   : > { %2354 = vst [vmem:[%s3275_s29 + $0x8] sm:$0xff] %v2282_v27   ;;  %1166 = vrot.lane.b32.xlu1 %v3248_v47, %s2411_s26 }
 0x139   : > { %1131 = vrot.lane.b32.xlu0 %v1100_v4, %s2408_s21 }
 0x13a   : > { %v1147_v13 = vpop.permute.xlu1 %1146 }
 0x13b   : > { %v1112_v17 = vpop.permute.xlu0 %1111  ;;  %1096 = vrot.lane.b32.xlu2 %v3278_v6, %s2405_s18 }
 0x13c   : > { %v1368_v42 = vsel %vm1356_vm9, %v1335_v40, %v1112_v17 }
 0x13d   : > { %v1161_v37 = vpop.permute.xlu2 %1160  ;;  %v1401_v47 = vsel %vm1389_vm10, %v1368_v42, %v1147_v13 }
 0x13e   : > { %v1434_v36 = vsel %vm1422_vm11, %v1401_v47, %v1182_v43  ;;  %v1764_v43 = vpop.f32.mrf.mxu1 }
 0x141   : > { %1236 = vrot.lane.b32.xlu0 %v1205_v8, %s2410_s25 }
 0x142   : > { %v976_v59 = vpop.permute.xlu1 %975 }
 0x143   : > { %v1217_v19 = vpop.permute.xlu0 %1216  ;;  %1201 = vrot.lane.b32.xlu2 %v2264_v5, %s2406_s19  ;;  %v1280_v58 = vsel %vm1241_vm6, %v2928_v63, %v976_v59 }
 0x144   : > { %v1472_v30 = vsel %vm1455_vm12, %v1434_v36, %v1217_v19  ;;  %v1316_v50 = vsel %vm1290_vm7, %v1280_v58, %v1056_v34 }
 0x145   : > { %1657 = vmatmul.bf16.gmra.mxu0 %v1472_v30  ;;  %v1231_v6 = vpop.permute.xlu2 %1230 }
 0x148   : > { %v1673_v48 = vpop.f32.mrf.mxu2 }
 0x149   : > { %v3359_v11 = vadd.f32 %v1762_v49, %v1673_v48 }
 0x14a   : > { %v1126_v31 = vpop.permute.xlu1 %1125 }
 0x14b   : > { %v1091_v52 = vpop.permute.xlu0 %1090 }
 0x14c   : > { %v1349_v21 = vsel %vm1323_vm8, %v1316_v50, %v1091_v52 }
 0x14d   : > { %v1114_v7 = vpop.permute.xlu2 %1113  ;;  %v1382_v4 = vsel %vm1356_vm9, %v1349_v21, %v1126_v31 }
 0x14e   : > { %v1415_v63 = vsel %vm1389_vm10, %v1382_v4, %v1161_v37 }
 0x150   : > { %v1675_v1 = vpop.f32.mrf.mxu2 }
 0x151   : > { %v3361_v45 = vadd.f32 %v1764_v43, %v1675_v1 }
 0x152   : > { %v964_v24 = vpop.permute.xlu1 %963  ;;  %v1643_v9 = vpop.f32.mrf.mxu0 }
 0x153   : > { %v2317_v61 = vpack.c.bf16 %v3361_v45, %v3359_v11  ;;  %v1196_v3 = vpop.permute.xlu0 %1195  ;;  %v1262_v32 = vsel %vm1241_vm6, %v2968_v56, %v964_v24  ;;  %v3372_v28 = vadd.f32 %v3082_v2, %v1643_v9 }
 0x154   : > { %v1448_v54 = vsel %vm1422_vm11, %v1415_v63, %v1196_v3 }
 0x155   : > { %2361 = vst [vmem:[%s3275_s29 + $0x40] sm:$0xff] %v2317_v61   ;;  %v1493_v27 = vsel %vm1455_vm12, %v1448_v54, %v1231_v6  ;;  %v1219_v39 = vpop.permute.xlu2 %1218 }
 0x156   : > { %1692 = vmatmul.bf16.gmra.mxu2 %v1493_v27 }
 0x15a   : > { %v1079_v34 = vpop.permute.xlu1 %1078  ;;  %v1645_v38 = vpop.f32.mrf.mxu0 }
 0x15b   : > { %v3375_v29 = vadd.f32 %v3099_v41, %v1645_v38  ;;  %v1044_v13 = vpop.permute.xlu0 %1043  ;;  %v1767_v41 = vpop.f32.mrf.mxu3 }
 0x15c   : > { %v1304_v40 = vsel %vm1290_vm7, %v1262_v32, %v1044_v13 }
 0x15d   : > { %v2287_v17 = vpack.c.bf16 %v3375_v29, %v3372_v28  ;;  %v1093_v42 = vpop.permute.xlu2 %1092  ;;  %v1337_v8 = vsel %vm1323_vm8, %v1304_v40, %v1079_v34 }
 0x15e   : > { %v1370_v56 = vsel %vm1356_vm9, %v1337_v8, %v1114_v7 }
 0x15f   : > { %2355 = vst [vmem:[%s3275_s29 + $0x10] sm:$0xff] %v2287_v17  }
 0x162   : > { %v1184_v37 = vpop.permute.xlu1 %1183 }
 0x163   : > { %v1149_v47 = vpop.permute.xlu0 %1148  ;;  %v1769_v58 = vpop.f32.mrf.mxu3 }
 0x164   : > { %v1403_v2 = vsel %vm1389_vm10, %v1370_v56, %v1149_v47 }
 0x165   : > { %v1436_v5 = vsel %vm1422_vm11, %v1403_v2, %v1184_v37  ;;  %v1198_v36 = vpop.permute.xlu2 %1197  ;;  %v853_v2 = vrot.slane %v3304_v53, 5 }
 0x166   : > { %v1475_v59 = vsel %vm1455_vm12, %v1436_v5, %v1219_v39 }
 0x167   : > { %1662 = vmatmul.bf16.gmra.mxu0 %v1475_v59 }
 0x169   : > { %v1678_v19 = vpop.f32.mrf.mxu2 }
 0x16a   : > { %v1058_v30 = vpop.permute.xlu1 %1057  ;;  %v3389_v31 = vadd.f32 %v1767_v41, %v1678_v19 }
 0x16b   : > { %v978_v49 = vpop.permute.xlu0 %977  ;;  %v1772_v59 = vpop.f32.mrf.mxu3 }
 0x16c   : > { %v1283_v6 = vsel %vm1241_vm6, %v3012_v35, %v978_v49 }
 0x16d   : > { %v1318_v48 = vsel %vm1290_vm7, %v1283_v6, %v1058_v30  ;;  %v1046_v43 = vpop.permute.xlu2 %1045 }
 0x16e   : > { %v1351_v7 = vsel %vm1323_vm8, %v1318_v48, %v1093_v42 }
 0x171   : > { %v1680_v50 = vpop.f32.mrf.mxu2 }
 0x172   : > { %v1163_v52 = vpop.permute.xlu1 %1162  ;;  %v3391_v21 = vadd.f32 %v1769_v58, %v1680_v50 }
 0x173   : > { %v1128_v4 = vpop.permute.xlu0 %1127 }
 0x174   : > { %v2322_v1 = vpack.c.bf16 %v3391_v21, %v3389_v31  ;;  %v1384_v24 = vsel %vm1356_vm9, %v1351_v7, %v1128_v4  ;;  %v1648_v35 = vpop.f32.mrf.mxu0 }
 0x175   : > { %v1417_v9 = vsel %vm1389_vm10, %v1384_v24, %v1163_v52  ;;  %v1151_v39 = vpop.permute.xlu2 %1150  ;;  %v3402_v32 = vadd.f32 %v3117_v14, %v1648_v35  ;;  %v850_v14 = vrot.slane %v3270_v57, 5 }
 0x176   : > { %2362 = vst [vmem:[%s3275_s29 + $0x48] sm:$0xff] %v2322_v1   ;;  %v1450_v63 = vsel %vm1422_vm11, %v1417_v9, %v1198_v36 }
 0x177   : > { %v852_v47 = vrot.slane %v850_v14, 4 }
 0x179   : > { %v854_v19 = vsel %vm2448_vm2, %v852_v47, %v853_v2 }
 0x17a   : > { %v1233_v61 = vpop.permute.xlu1 %1232  ;;  %v1239_v49 = vunpack.c.l.b16 %v854_v19 }
 0x17b   : > { %v1496_v3 = vsel %vm1455_vm12, %v1450_v63, %v1233_v61  ;;  %v966_v54 = vpop.permute.xlu0 %965 }
 0x17c   : > { %1697 = vmatmul.bf16.gmra.mxu2 %v1496_v3  ;;  %v1650_v27 = vpop.f32.mrf.mxu0  ;;  %v1265_v13 = vsel %vm1241_vm6, %v3074_v26, %v966_v54 }
 0x17d   : > { %v3405_v34 = vadd.f32 %v3144_v25, %v1650_v27  ;;  %v1306_v42 = vsel %vm1290_vm7, %v1265_v13, %v1046_v43  ;;  %v980_v37 = vpop.permute.xlu2 %979  ;;  %v2119_v25 = vrot.slane %v3267_v18, 9  ;;  %v1774_v43 = vpop.f32.mrf.mxu3 }
 0x17e   : > { %v1286_v48 = vsel %vm1241_vm6, %v3110_v23, %v980_v37 }
 0x17f   : > { %v2292_v38 = vpack.c.bf16 %v3405_v34, %v3402_v32  ;;  %v851_v36 = vsel %vm2448_vm2, %v2119_v25, %v850_v14 }
 0x180   : > { %v1238_v30 = vunpack.c.l.b16 %v851_v36 }
 0x181   : > { %2356 = vst [vmem:[%s3275_s29 + $0x18] sm:$0xff] %v2292_v38  }
 0x182   : > { %v1116_v17 = vpop.permute.xlu1 %1115  ;;  %v1240_v6 = vpack.c.b16 %v1239_v49, %v1238_v30 }
 0x183   : > { %v1081_v40 = vpop.permute.xlu0 %1080 }
 0x184   : > { %v1339_v8 = vsel %vm1323_vm8, %v1306_v42, %v1081_v40  ;;  %2243 = vmatmul.msk.bf16.gmra.mxu3 %vm1241_vm6, %v1240_v6 }
 0x185   : > { %v1372_v56 = vsel %vm1356_vm9, %v1339_v8, %v1116_v17  ;;  %v1130_v58 = vpop.permute.xlu2 %1129 }
 0x186   : > { %v1405_v26 = vsel %vm1389_vm10, %v1372_v56, %v1151_v39 }
 0x18a   : > { %v1221_v5 = vpop.permute.xlu1 %1220 }
 0x18b   : > { %v1186_v41 = vpop.permute.xlu0 %1185 }
 0x18c   : > { %v1438_v57 = vsel %vm1422_vm11, %v1405_v26, %v1186_v41 }
 0x18d   : > { %v1478_v18 = vsel %vm1455_vm12, %v1438_v57, %v1221_v5  ;;  %v1235_v63 = vpop.permute.xlu2 %1234 }
 0x18e   : > { %1667 = vmatmul.bf16.gmra.mxu0 %v1478_v18 }
 0x18f   : > { %v1683_v53 = vpop.f32.mrf.mxu2 }
 0x190   : > { %v3429_v4 = vadd.f32 %v1772_v59, %v1683_v53  ;;  %v1777_v59 = vpop.f32.mrf.mxu3 }
 0x192   : > { %v1095_v50 = vpop.permute.xlu1 %1094 }
 0x193   : > { %v1060_v52 = vpop.permute.xlu0 %1059 }
 0x194   : > { %v1320_v0 = vsel %vm1290_vm7, %v1286_v48, %v1060_v52 }
 0x195   : > { %v1353_v1 = vsel %vm1323_vm8, %v1320_v0, %v1095_v50  ;;  %v1097_v14 = vpop.permute.xlu2 %1096 }
 0x196   : > { %v1386_v61 = vsel %vm1356_vm9, %v1353_v1, %v1130_v58 }
 0x197   : > { %v1685_v7 = vpop.f32.mrf.mxu2 }
 0x198   : > { %v3432_v24 = vadd.f32 %v1774_v43, %v1685_v7  ;;  %v1779_v19 = vpop.f32.mrf.mxu3 }
 0x19a   : > { %v2327_v35 = vpack.c.bf16 %v3432_v24, %v3429_v4  ;;  %v1200_v9 = vpop.permute.xlu1 %1199 }
 0x19b   : > { %v1653_v23 = vpop.f32.mrf.mxu0  ;;  %v1165_v3 = vpop.permute.xlu0 %1164 }
 0x19c   : > { %2363 = vst [vmem:[%s3275_s29 + $0x50] sm:$0xff] %v2327_v35   ;;  %v1419_v54 = vsel %vm1389_vm10, %v1386_v61, %v1165_v3  ;;  %v3442_v40 = vadd.f32 %v3162_v44, %v1653_v23  ;;  %v1802_v3 = vadd.f32 %v3264_v12, %v3261_v20 }
 0x19d   : > { %v1452_v27 = vsel %vm1422_vm11, %v1419_v54, %v1200_v9  ;;  %v1202_v5 = vpop.permute.xlu2 %1201 }
 0x19e   : > { %v1499_v39 = vsel %vm1455_vm12, %v1452_v27, %v1235_v63  ;;  %v1803_v27 = vadd.f32 %v1802_v3, %v3321_v60 }
 0x19f   : > { %1702 = vmatmul.bf16.gmra.mxu2 %v1499_v39 }
 0x1a0   : > { %v1782_v52 = vpop.f32.mrf.mxu3  ;;  %v1804_v39 = vadd.f32 %v1803_v27, %v3324_v51 }
 0x1a2   : > { %v1062_v38 = vpop.permute.xlu1 %1061 }
 0x1a3   : > { %v1655_v13 = vpop.f32.mrf.mxu0  ;;  %v982_v17 = vpop.permute.xlu0 %981 }
 0x1a4   : > { %v3445_v42 = vadd.f32 %v3178_v62, %v1655_v13  ;;  %v1289_v37 = vsel %vm1241_vm6, %v3203_v33, %v982_v17 }
 0x1a5   : > { %v1322_v56 = vsel %vm1290_vm7, %v1289_v37, %v1062_v38 }
 0x1a6   : > { %v2297_v8 = vpack.c.bf16 %v3445_v42, %v3442_v40  ;;  %v1355_v47 = vsel %vm1323_vm8, %v1322_v56, %v1097_v14 }
 0x1a8   : > { %2357 = vst [vmem:[%s3275_s29 + $0x20] sm:$0xff] %v2297_v8   ;;  %v1784_v43 = vpop.f32.mrf.mxu3 }
 0x1aa   : > { %v1167_v44 = vpop.permute.xlu1 %1166 }
 0x1ab   : > { %v1132_v25 = vpop.permute.xlu0 %1131 }
 0x1ac   : > { %v1388_v2 = vsel %vm1356_vm9, %v1355_v47, %v1132_v25 }
 0x1ad   : > { %v1421_v62 = vsel %vm1389_vm10, %v1388_v2, %v1167_v44 }
 0x1ae   : > { %v1454_v26 = vsel %vm1422_vm11, %v1421_v62, %v1202_v5 }
 0x1b0   : > { %v1787_v54 = vpop.f32.mrf.mxu3 }
 0x1b3   : > { %v1237_v41 = vpop.permute.xlu0 %1236 }
 0x1b4   : > { %v1502_v33 = vsel %vm1455_vm12, %v1454_v26, %v1237_v41 }
 0x1b5   : > { %1707 = vmatmul.bf16.gmra.mxu2 %v1502_v33 }
 0x1b8   : > { %v1688_v36 = vpop.f32.mrf.mxu2  ;;  %v1789_v17 = vpop.f32.mrf.mxu3 }
 0x1b9   : > { %v3458_v30 = vadd.f32 %v1777_v59, %v1688_v36 }
 0x1c0   : > { %v1690_v57 = vpop.f32.mrf.mxu2 }
 0x1c1   : > { %v3460_v49 = vadd.f32 %v1779_v19, %v1690_v57 }
 0x1c2   : > { %v1658_v18 = vpop.f32.mrf.mxu0 }
 0x1c3   : > { %v2332_v6 = vpack.c.bf16 %v3460_v49, %v3458_v30  ;;  %v3466_v58 = vadd.f32 %v3200_v16, %v1658_v18 }
 0x1c5   : > { %2364 = vst [vmem:[%s3275_s29 + $0x58] sm:$0xff] %v2332_v6  }
 0x1ca   : > { %v1660_v53 = vpop.f32.mrf.mxu0 }
 0x1cb   : > { %v3469_v48 = vadd.f32 %v3222_v15, %v1660_v53 }
 0x1cd   : > { %v2302_v50 = vpack.c.bf16 %v3469_v48, %v3466_v58 }
 0x1cf   : > { %2358 = vst [vmem:[%s3275_s29 + $0x28] sm:$0xff] %v2302_v50  }
 0x1d9   : > { %v1693_v0 = vpop.f32.mrf.mxu2 }
 0x1da   : > { %v3474_v1 = vadd.f32 %v1782_v52, %v1693_v0  ;;  %v1792_v0 = vpop.f32.mrf.mxu3 }
 0x1e1   : > { %v1695_v7 = vpop.f32.mrf.mxu2 }
 0x1e2   : > { %v3476_v35 = vadd.f32 %v1784_v43, %v1695_v7 }
 0x1e4   : > { %v2337_v16 = vpack.c.bf16 %v3476_v35, %v3474_v1  ;;  %v1663_v9 = vpop.f32.mrf.mxu0 }
 0x1e5   : > { %v3482_v63 = vadd.f32 %v3244_v10, %v1663_v9  ;;  %v1805_v10 = vadd.f32 %v1804_v39, %v3372_v28  ;;  %v1794_v9 = vpop.f32.mrf.mxu3 }
 0x1e6   : > { %2365 = vst [vmem:[%s3275_s29 + $0x60] sm:$0xff] %v2337_v16  }
 0x1e7   : > { %v1806_v13 = vadd.f32 %v1805_v10, %v3375_v29 }
 0x1ec   : > { %v1665_v15 = vpop.f32.mrf.mxu0 }
 0x1ed   : > { %v3485_v61 = vadd.f32 %v3287_v22, %v1665_v15  ;;  %v1807_v22 = vadd.f32 %v1806_v13, %v3402_v32 }
 0x1ef   : > { %v2307_v23 = vpack.c.bf16 %v3485_v61, %v3482_v63  ;;  %v1808_v8 = vadd.f32 %v1807_v22, %v3405_v34 }
 0x1f1   : > { %2359 = vst [vmem:[%s3275_s29 + $0x30] sm:$0xff] %v2307_v23   ;;  %v1809_v14 = vadd.f32 %v1808_v8, %v3442_v40 }
 0x1f3   : > { %v1810_v47 = vadd.f32 %v1809_v14, %v3445_v42 }
 0x1f5   : > { %v1811_v62 = vadd.f32 %v1810_v47, %v3466_v58 }
 0x1f7   : > { %v1812_v5 = vadd.f32 %v1811_v62, %v3469_v48 }
 0x1f9   : > { %v1813_v26 = vadd.f32 %v1812_v5, %v3482_v63 }
 0x1fb   : > { %v1814_v33 = vadd.f32 %v1813_v26, %v3485_v61 }
 0x1ff   : > { %v1698_v38 = vpop.f32.mrf.mxu2 }
 0x200   : > { %v3499_v56 = vadd.f32 %v1787_v54, %v1698_v38 }
 0x207   : > { %v1700_v37 = vpop.f32.mrf.mxu2  ;;  %v1797_v10 = vpop.f32.mrf.mxu3 }
 0x208   : > { %v3501_v25 = vadd.f32 %v1789_v17, %v1700_v37 }
 0x20a   : > { %v2342_v2 = vpack.c.bf16 %v3501_v25, %v3499_v56 }
 0x20b   : > { %v1668_v44 = vpop.f32.mrf.mxu0 }
 0x20c   : > { %2366 = vst [vmem:[%s3275_s29 + $0x68] sm:$0xff] %v2342_v2   ;;  %v3511_v41 = vadd.f32 %v3315_v55, %v1668_v44 }
 0x20e   : > { %v1815_v36 = vadd.f32 %v1814_v33, %v3511_v41 }
 0x20f   : > { %v1799_v14 = vpop.f32.mrf.mxu3 }
 0x213   : > { %v1670_v59 = vpop.f32.mrf.mxu0 }
 0x214   : > { %v3516_v19 = vadd.f32 %v3342_v46, %v1670_v59 }
 0x216   : > { %v1816_v57 = vadd.f32 %v1815_v36, %v3516_v19  ;;  %v2312_v18 = vpack.c.bf16 %v3516_v19, %v3511_v41 }
 0x218   : > { %v1817_v6 = vadd.f32 %v1816_v57, %v3359_v11  ;;  %2360 = vst [vmem:[%s3275_s29 + $0x38] sm:$0xff] %v2312_v18  }
 0x21a   : > { %v1818_v53 = vadd.f32 %v1817_v6, %v3361_v45 }
 0x21c   : > { %v1819_v55 = vadd.f32 %v1818_v53, %v3389_v31 }
 0x21e   : > { %v1820_v50 = vadd.f32 %v1819_v55, %v3391_v21 }
 0x220   : > { %v1821_v52 = vadd.f32 %v1820_v50, %v3429_v4 }
 0x222   : > { %v1822_v46 = vadd.f32 %v1821_v52, %v3432_v24  ;;  %v1703_v43 = vpop.f32.mrf.mxu2 }
 0x223   : > { %v3530_v23 = vadd.f32 %v1792_v0, %v1703_v43 }
 0x224   : > { %v1823_v7 = vadd.f32 %v1822_v46, %v3458_v30 }
 0x226   : > { %v1824_v16 = vadd.f32 %v1823_v7, %v3460_v49 }
 0x228   : > { %v1825_v3 = vadd.f32 %v1824_v16, %v3474_v1 }
 0x22a   : > { %v1705_v15 = vpop.f32.mrf.mxu2  ;;  %v1826_v39 = vadd.f32 %v1825_v3, %v3476_v35 }
 0x22b   : > { %v3533_v54 = vadd.f32 %v1794_v9, %v1705_v15 }
 0x22c   : > { %v1827_v38 = vadd.f32 %v1826_v39, %v3499_v56 }
 0x22d   : > { %v2347_v27 = vpack.c.bf16 %v3533_v54, %v3530_v23 }
 0x22e   : > { %v1828_v13 = vadd.f32 %v1827_v38, %v3501_v25 }
 0x22f   : > { %2367 = vst [vmem:[%s3275_s29 + $0x70] sm:$0xff] %v2347_v27  }
 0x230   : > { %v1829_v17 = vadd.f32 %v1828_v13, %v3530_v23 }
 0x232   : > { %v1830_v37 = vadd.f32 %v1829_v17, %v3533_v54 }
 0x238   : > { %v1708_v22 = vpop.f32.mrf.mxu2 }
 0x239   : > { %v3542_v8 = vadd.f32 %v1797_v10, %v1708_v22 }
 0x23b   : > { %v1831_v2 = vadd.f32 %v1830_v37, %v3542_v8 }
 0x240   : > { %v1710_v47 = vpop.f32.mrf.mxu2 }
 0x241   : > { %v3546_v44 = vadd.f32 %v1799_v14, %v1710_v47 }
 0x243   : > { %v1832_v62 = vadd.f32 %v1831_v2, %v3546_v44  ;;  %v2352_v5 = vpack.c.bf16 %v3546_v44, %v3542_v8 }
 0x245   : > { %v1833_v26 = vrot.slane %v1832_v62, 4  ;;  %2368 = vst [vmem:[%s3275_s29 + $0x78] sm:$0xff] %v2352_v5  }
 0x247   : > { %v1834_v33 = vadd.f32 %v1833_v26, %v1832_v62 }
 0x249   : > { %v1835_v59 = vrot.slane %v1834_v33, 2 }
 0x24b   : > { %v1836_v36 = vadd.f32 %v1835_v59, %v1834_v33 }
 0x24d   : > { %v1837_v57 = vrot.slane %v1836_v36, 1 }
 0x24f   : > { %v1838_v18 = vadd.f32 %v1837_v57, %v1836_v36 }
 0x251   : > { %1941 = vst [vmem:[%s3556_s20] sm:$0x1] %v1838_v18  ;;  %v3559_v6 = vmul.f32 0.00390625, %v1838_v18 }
 0x253   : > { %v1840_v53 = vsub.f32 %v3261_v20, %v3559_v6  ;;  %v1841_v55 = vsub.f32 %v3264_v12, %v3559_v6  ;;  %v1842_v50 = vsub.f32 %v3321_v60, %v3559_v6  ;;  %v1843_v46 = vsub.f32 %v3324_v51, %v3559_v6 }
 0x254   : > { %v1844_v43 = vsub.f32 %v3372_v28, %v3559_v6  ;;  %v1845_v9 = vsub.f32 %v3375_v29, %v3559_v6  ;;  %v1846_v12 = vsub.f32 %v3402_v32, %v3559_v6  ;;  %v1847_v27 = vsub.f32 %v3405_v34, %v3559_v6 }
 0x255   : > { %v1872_v52 = vmul.f32 %v1840_v53, %v1840_v53  ;;  %v1873_v0 = vmul.f32 %v1841_v55, %v1841_v55  ;;  %v1874_v7 = vmul.f32 %v1842_v50, %v1842_v50  ;;  %v1875_v20 = vmul.f32 %v1843_v46, %v1843_v46 }
 0x256   : > { %v1876_v3 = vmul.f32 %v1844_v43, %v1844_v43  ;;  %v1877_v39 = vmul.f32 %v1845_v9, %v1845_v9  ;;  %v1848_v28 = vsub.f32 %v3442_v40, %v3559_v6  ;;  %v1878_v38 = vmul.f32 %v1846_v12, %v1846_v12 }
 0x257   : > { %v1904_v16 = vadd.f32 %v1873_v0, %v1872_v52  ;;  %v1849_v29 = vsub.f32 %v3445_v42, %v3559_v6  ;;  %v1879_v13 = vmul.f32 %v1847_v27, %v1847_v27  ;;  %v1850_v32 = vsub.f32 %v3466_v58, %v3559_v6 }
 0x258   : > { %v1880_v17 = vmul.f32 %v1848_v28, %v1848_v28  ;;  %v1851_v34 = vsub.f32 %v3469_v48, %v3559_v6  ;;  %v1852_v40 = vsub.f32 %v3482_v63, %v3559_v6  ;;  %v1853_v42 = vsub.f32 %v3485_v61, %v3559_v6 }
 0x259   : > { %v1905_v15 = vadd.f32 %v1904_v16, %v1874_v7  ;;  %v1881_v14 = vmul.f32 %v1849_v29, %v1849_v29  ;;  %v1882_v2 = vmul.f32 %v1850_v32, %v1850_v32  ;;  %v1854_v58 = vsub.f32 %v3511_v41, %v3559_v6 }
 0x25a   : > { %v1883_v5 = vmul.f32 %v1851_v34, %v1851_v34  ;;  %v1884_v33 = vmul.f32 %v1852_v40, %v1852_v40  ;;  %v1855_v48 = vsub.f32 %v3516_v19, %v3559_v6  ;;  %v1885_v36 = vmul.f32 %v1853_v42, %v1853_v42 }
 0x25b   : > { %v1906_v60 = vadd.f32 %v1905_v15, %v1875_v20  ;;  %v1856_v63 = vsub.f32 %v3359_v11, %v3559_v6  ;;  %v1886_v18 = vmul.f32 %v1854_v58, %v1854_v58  ;;  %v1857_v61 = vsub.f32 %v3361_v45, %v3559_v6 }
 0x25c   : > { %v1887_v55 = vmul.f32 %v1855_v48, %v1855_v48  ;;  %v1858_v41 = vsub.f32 %v3389_v31, %v3559_v6  ;;  %v1859_v19 = vsub.f32 %v3391_v21, %v3559_v6  ;;  %v1860_v11 = vsub.f32 %v3429_v4, %v3559_v6 }
 0x25d   : > { %v1907_v51 = vadd.f32 %v1906_v60, %v1876_v3  ;;  %v1888_v52 = vmul.f32 %v1856_v63, %v1856_v63  ;;  %v1889_v46 = vmul.f32 %v1857_v61, %v1857_v61  ;;  %v1861_v45 = vsub.f32 %v3432_v24, %v3559_v6 }
 0x25e   : > { %v1890_v7 = vmul.f32 %v1858_v41, %v1858_v41  ;;  %v1891_v9 = vmul.f32 %v1859_v19, %v1859_v19  ;;  %v1862_v31 = vsub.f32 %v3458_v30, %v3559_v6  ;;  %v1892_v15 = vmul.f32 %v1860_v11, %v1860_v11 }
 0x25f   : > { %v1908_v10 = vadd.f32 %v1907_v51, %v1877_v39  ;;  %v1863_v21 = vsub.f32 %v3460_v49, %v3559_v6  ;;  %v1893_v3 = vmul.f32 %v1861_v45, %v1861_v45  ;;  %v1864_v4 = vsub.f32 %v3474_v1, %v3559_v6 }
 0x260   : > { %v1894_v27 = vmul.f32 %v1862_v31, %v1862_v31  ;;  %v1865_v24 = vsub.f32 %v3476_v35, %v3559_v6  ;;  %v1866_v30 = vsub.f32 %v3499_v56, %v3559_v6  ;;  %v1867_v49 = vsub.f32 %v3501_v25, %v3559_v6 }
 0x261   : > { %v1909_v22 = vadd.f32 %v1908_v10, %v1878_v38  ;;  %v1895_v51 = vmul.f32 %v1863_v21, %v1863_v21  ;;  %v1896_v38 = vmul.f32 %v1864_v4, %v1864_v4  ;;  %v1868_v1 = vsub.f32 %v3530_v23, %v3559_v6 }
 0x262   : > { %v1897_v29 = vmul.f32 %v1865_v24, %v1865_v24  ;;  %v1869_v35 = vsub.f32 %v3533_v54, %v3559_v6  ;;  %v1870_v56 = vsub.f32 %v3542_v8, %v3559_v6  ;;  %v1871_v25 = vsub.f32 %v3546_v44, %v3559_v6 }
 0x263   : > { %v1910_v37 = vadd.f32 %v1909_v22, %v1879_v13  ;;  %v1898_v22 = vmul.f32 %v1866_v30, %v1866_v30  ;;  %v1900_v34 = vmul.f32 %v1868_v1, %v1868_v1 }
 0x265   : > { %v1911_v47 = vadd.f32 %v1910_v37, %v1880_v17  ;;  %v1899_v17 = vmul.f32 %v1867_v49, %v1867_v49 }
 0x267   : > { %v1912_v62 = vadd.f32 %v1911_v47, %v1881_v14  ;;  %v1901_v47 = vmul.f32 %v1869_v35, %v1869_v35 }
 0x269   : > { %v1913_v26 = vadd.f32 %v1912_v62, %v1882_v2  ;;  %v1902_v2 = vmul.f32 %v1870_v56, %v1870_v56  ;;  %v1903_v62 = vmul.f32 %v1871_v25, %v1871_v25 }
 0x26b   : > { %v1914_v59 = vadd.f32 %v1913_v26, %v1883_v5 }
 0x26d   : > { %v1915_v57 = vadd.f32 %v1914_v59, %v1884_v33 }
 0x26f   : > { %v1916_v53 = vadd.f32 %v1915_v57, %v1885_v36 }
 0x271   : > { %v1917_v50 = vadd.f32 %v1916_v53, %v1886_v18 }
 0x273   : > { %v1918_v0 = vadd.f32 %v1917_v50, %v1887_v55 }
 0x275   : > { %v1919_v43 = vadd.f32 %v1918_v0, %v1888_v52 }
 0x277   : > { %v1920_v16 = vadd.f32 %v1919_v43, %v1889_v46 }
 0x279   : > { %v1921_v20 = vadd.f32 %v1920_v16, %v1890_v7 }
 0x27b   : > { %v1922_v12 = vadd.f32 %v1921_v20, %v1891_v9 }
 0x27d   : > { %v1923_v60 = vadd.f32 %v1922_v12, %v1892_v15 }
 0x27f   : > { %v1924_v39 = vadd.f32 %v1923_v60, %v1893_v3 }
 0x281   : > { %v1925_v28 = vadd.f32 %v1924_v39, %v1894_v27 }
 0x283   : > { %v1926_v10 = vadd.f32 %v1925_v28, %v1895_v51 }
 0x285   : > { %v1927_v13 = vadd.f32 %v1926_v10, %v1896_v38 }
 0x287   : > { %v1928_v32 = vadd.f32 %v1927_v13, %v1897_v29 }
 0x289   : > { %v1929_v37 = vadd.f32 %v1928_v32, %v1898_v22 }
 0x28b   : > { %v1930_v14 = vadd.f32 %v1929_v37, %v1899_v17 }
 0x28d   : > { %v1931_v40 = vadd.f32 %v1930_v14, %v1900_v34 }
 0x28f   : > { %v1932_v23 = vadd.f32 %v1931_v40, %v1901_v47 }
 0x291   : > { %v1933_v42 = vadd.f32 %v1932_v23, %v1902_v2 }
 0x293   : > { %v1934_v5 = vadd.f32 %v1933_v42, %v1903_v62 }
 0x295   : > { %v1935_v26 = vrot.slane %v1934_v5, 4 }
 0x297   : > { %v1936_v54 = vadd.f32 %v1935_v26, %v1934_v5 }
 0x299   : > { %v1937_v58 = vrot.slane %v1936_v54, 2 }
 0x29b   : > { %v1938_v33 = vadd.f32 %v1937_v58, %v1936_v54 }
 0x29d   : > { %v1939_v59 = vrot.slane %v1938_v33, 1 }
 0x29f   : > { %v1940_v48 = vadd.f32 %v1939_v59, %v1938_v33 }
 0x2a1   : > { %1942 = vst [vmem:[%s3556_s20 + $0x1] sm:$0x1] %v1940_v48 }
 0x2a2 PF: > { %s14_s12 = sadd.s32 1, %s2403_s12  }
 0x2a3   : > { %p11_p4 = scmp.ge.s32.totalorder %s14_s12, 4  }
 0x2a5   :  { %13 = sbr.rel (!%p11_p4) target bundleno = 1 (0x1), region = 70 }

// kernel: basic_block_forward.4
= control target key start
LH: loop header
LB: loop body
LE: loop exit
PB: predicated region body
PF: predicated region fallthrough
CT: control target
= control target key end

     0   :  { %s5999_s18 = smov 0   ;;  %s7984_s0 = inlined_call_operand.vmem [shape: bf16[2,16,16,128], index: 0, kind: input, shape index: {}]   ;;  %s7985_s1 = inlined_call_operand.vmem [shape: f32[1,128], index: 1, kind: input, shape index: {}]   ;;  %s7986_s2 = inlined_call_operand.vmem [shape: f32[1,128], index: 2, kind: input, shape index: {}]   ;;  %s7987_s3 = inlined_call_operand.vmem [shape: bf16[1152,128], index: 3, kind: input, shape index: {}]   ;;  %s7988_s4 = inlined_call_operand.vmem [shape: bf16[2,16,16,128], index: 4, kind: output, shape index: {0}]   ;;  %s7989_s5 = inlined_call_operand.vmem [shape: f32[2,2,128], index: 5, kind: output, shape index: {1}]  }
   0x1 LB: > { %s5055_s19 = sadd.s32 4294967295, %s5966_s18   ;;  %p5059_p0 = scmp.ge.s32.totalorder %s5966_s18, 1  ;;  %s5966_s18 = sphi %s5999_s18, %s16_s18  }
   0x2   : > { %p190_p1 = scmp.lt.s32.totalorder %s5966_s18, 3 }
   0x4   : > { %p191_p2 = pnand %p5059_p0, %p190_p1 }
   0x6   : > { %194 = sbr.rel (%p191_p2) target bundleno = 879 (0x36f), region = 36 }
   0xb   : > { %v5652_v0 = vld [vmem:[%s7987_s3 + $0x38] sm:$0xff]  ;;  %p222_p3 = scmp.lt.s32.totalorder %s5055_s19, 1  ;;  %v5968_v1 = vmov 0   ;;  %v5651_v2 = vld [vmem:[%s7987_s3 + $0x30] sm:$0xff]  ;;  %v6028_v3 = vld [vmem:[%s7985_s1] ss:$0 sm:$0xff] }
   0xc   : > { %449 = vst [vmem:[#allocation2 + $0x30] sm:$0xf] %v5968_v1  ;;  %5891 = vmatpush.bf16.msra.mxu1 %v5652_v0  ;;  %5892 = vmatpush.bf16.msra.mxu2 %v5652_v0  ;;  %v5650_v4 = vld [vmem:[%s7987_s3 + $0x28] sm:$0xff]  ;;  %v6040_v9 = vld [vmem:[%s7986_s2] ss:$0 sm:$0xff]  ;;  %v5648_v25 = vld [vmem:[%s7987_s3 + $0x18] sm:$0xff] }
   0xd   : > { %s8045_s19 = smov (!%p222_p3, %s5055_s19), 1  ;;  %5893 = vmatpush.bf16.msra.mxu3 %v5652_v0  ;;  %3963 = vmatpush.bf16.msra.mxu0 %v5652_v0  ;;  %450 = vst [vmem:[#allocation2 + $0x34] sm:$0xf] %v5968_v1  ;;  %v5649_v16 = vld [vmem:[%s7987_s3 + $0x20] sm:$0xff]  ;;  %vm491_vm0 = vsmask.f32 256 }
   0xe   : > { %s5595_s24 = sshll.u32 %s8045_s19, 7  ;;  %437 = vst [vmem:[#allocation2] sm:$0xf] %v5968_v1  ;;  %vm492_vm1 = vsmask.f32 4368  ;;  %vm815_vm2 = vcmask 1043456  }
   0xf   : > { %s6023_s27 = scalar_lea.vmem %s7984_s0, %s5595_s24  ;;  %438 = vst [vmem:[#allocation2 + $0x4] sm:$0xf] %v5968_v1  ;;  %vm816_vm3 = vsmask.f32 7938  ;;  %v5647_v36 = vld [vmem:[%s7987_s3 + $0x10] sm:$0xff]  ;;  %vm6076_vm4 = vmor %vm491_vm0, %vm492_vm1  ;;  %v5646_v49 = vld [vmem:[%s7987_s3 + $0x8] sm:$0xff]  ;;  %s7631_s30 = scalar_lea.vmem %s7988_s4, %s5595_s24 }
  0x10   : > { %5894 = vmatpush.bf16.msra.mxu1 %v5651_v2  ;;  %5895 = vmatpush.bf16.msra.mxu2 %v5651_v2  ;;  %v5863_v5 = vld [vmem:[%s6023_s27 + $0x18] sm:$0xff]   ;;  %439 = vst [vmem:[#allocation2 + $0x8] sm:$0x1] %v5968_v1  ;;  %vm6087_vm5 = vmand %vm815_vm2, %vm816_vm3  ;;  %v5645_v56 = vld [vmem:[%s7987_s3] sm:$0xff]  ;;  %vm822_vm6 = vcmask 1040384   ;;  %vm1431_vm11 = vcmask 1042432  }
  0x11   : > { %v5867_v6 = vld [vmem:[%s6023_s27 + $0x38] sm:$0xff]   ;;  %5896 = vmatpush.bf16.msra.mxu3 %v5651_v2  ;;  %3964 = vmatpush.bf16.msra.mxu0 %v5651_v2  ;;  %v5731_v7 = vunpack.c.l.bf16 %v5863_v5  ;;  %v5732_v8 = vunpack.c.h.bf16 %v5863_v5  ;;  %440 = vst [vmem:[#allocation2 + $0xc] sm:$0xf] %v5968_v1  ;;  %v5864_v61 = vld [vmem:[%s6023_s27 + $0x20] sm:$0xff]   ;;  %vm6474_vm7 = vmand %vm822_vm6, %vm491_vm0  ;;  %vm980_vm8 = vsmask.f32 3328 }
  0x12   : > { %v5747_v10 = vunpack.c.l.bf16 %v5867_v6  ;;  %v5748_v11 = vunpack.c.h.bf16 %v5867_v6  ;;  %441 = vst [vmem:[#allocation2 + $0x10] sm:$0xf] %v5968_v1  ;;  %v5871_v17 = vld [vmem:[%s6023_s27 + $0x58] sm:$0xff]   ;;  %v5868_v62 = vld [vmem:[%s6023_s27 + $0x40] sm:$0xff]   ;;  %v5736_v5 = vunpack.c.h.bf16 %v5864_v61  ;;  %vm981_vm9 = vsmask.f32 7440 }
  0x13   : > { %v311_v12 = vmul.f32 %v6028_v3, %v5731_v7  ;;  %v312_v13 = vmul.f32 %v6028_v3, %v5732_v8  ;;  %442 = vst [vmem:[#allocation2 + $0x14] sm:$0x1] %v5968_v1  ;;  %v5763_v22 = vunpack.c.l.bf16 %v5871_v17  ;;  %v5764_v26 = vunpack.c.h.bf16 %v5871_v17  ;;  %v841_v43 = vld [vmem:[#allocation2 + $0x30] sm:$0xf]  ;;  %v5872_v63 = vld [vmem:[%s6023_s27 + $0x60] sm:$0xff]   ;;  %vm6533_vm10 = vmor %vm980_vm8, %vm981_vm9  ;;  %s5064_s24 = sshll.u32 %s8045_s19, 1 }
  0x14   : > { %v319_v14 = vmul.f32 %v6028_v3, %v5747_v10  ;;  %v320_v15 = vmul.f32 %v6028_v3, %v5748_v11  ;;  %5897 = vmatpush.bf16.msra.mxu1 %v5650_v4  ;;  %5898 = vmatpush.bf16.msra.mxu2 %v5650_v4  ;;  %443 = vst [vmem:[#allocation2 + $0x18] sm:$0xf] %v5968_v1  ;;  %v5751_v7 = vunpack.c.l.bf16 %v5868_v62  ;;  %v5752_v8 = vunpack.c.h.bf16 %v5868_v62  ;;  %s7893_s8 = scalar_lea.vmem %s7989_s5, %s5064_s24 }
  0x15   : > { %5899 = vmatpush.bf16.msra.mxu3 %v5650_v4  ;;  %3965 = vmatpush.bf16.msra.mxu0 %v5650_v4  ;;  %v347_v18 = vadd.f32 %v6040_v9, %v311_v12  ;;  %v348_v19 = vadd.f32 %v6040_v9, %v312_v13  ;;  %444 = vst [vmem:[#allocation2 + $0x1c] sm:$0xf] %v5968_v1  ;;  %v5735_v4 = vunpack.c.l.bf16 %v5864_v61  ;;  %v5767_v10 = vunpack.c.l.bf16 %v5872_v63 }
  0x16   : > { %v355_v20 = vadd.f32 %v6040_v9, %v319_v14  ;;  %v356_v21 = vadd.f32 %v6040_v9, %v320_v15  ;;  %445 = vst [vmem:[#allocation2 + $0x20] sm:$0x1] %v5968_v1  ;;  %v327_v31 = vmul.f32 %v6028_v3, %v5763_v22  ;;  %v328_v37 = vmul.f32 %v6028_v3, %v5764_v26 }
  0x17   : > { %v379_v23 = vmax.f32 %v347_v18, 0.0  ;;  %v380_v24 = vmax.f32 %v348_v19, 0.0  ;;  %446 = vst [vmem:[#allocation2 + $0x24] sm:$0xf] %v5968_v1  ;;  %v313_v12 = vmul.f32 %v6028_v3, %v5735_v4  ;;  %v314_v13 = vmul.f32 %v6028_v3, %v5736_v5 }
  0x18   : > { %5900 = vmatpush.bf16.msra.mxu1 %v5649_v16  ;;  %5901 = vmatpush.bf16.msra.mxu2 %v5649_v16  ;;  %447 = vst [vmem:[#allocation2 + $0x28] sm:$0xf] %v5968_v1  ;;  %v387_v29 = vmax.f32 %v355_v20, 0.0  ;;  %v388_v30 = vmax.f32 %v356_v21, 0.0  ;;  %v363_v44 = vadd.f32 %v6040_v9, %v327_v31  ;;  %v364_v50 = vadd.f32 %v6040_v9, %v328_v37  ;;  %v5718_v20 = vld [vmem:[%s6023_s27] sm:$0xff]  }
  0x19   : > { %5902 = vmatpush.bf16.msra.mxu3 %v5649_v16  ;;  %3966 = vmatpush.bf16.msra.mxu0 %v5649_v16  ;;  %v411_v27 = vpack.c.bf16 %v379_v23, %v379_v23  ;;  %v412_v28 = vpack.c.bf16 %v380_v24, %v380_v24  ;;  %448 = vst [vmem:[#allocation2 + $0x2c] sm:$0x1] %v5968_v1  ;;  %v5768_v14 = vunpack.c.h.bf16 %v5872_v63  ;;  %v5667_v63 = vld [vmem:[%s7987_s3 + $0xb0] sm:$0xff]  ;;  %vm1432_vm12 = vcmask 1046532  }
  0x1a   : > { %451 = vst [vmem:[#allocation2 + $0x38] sm:$0x1] %v5968_v1  ;;  %v6083_v41 = vpack.c.bf16 %v387_v29, %v387_v29  ;;  %v420_v48 = vpack.c.bf16 %v388_v30, %v388_v30  ;;  %v395_v54 = vmax.f32 %v363_v44, 0.0  ;;  %v396_v57 = vmax.f32 %v364_v50, 0.0  ;;  %v5597_v50 = vld [vmem:[#allocation2] sm:$0xff]  ;;  %vm6557_vm13 = vmor %vm1431_vm11, %vm1432_vm12 }
  0x1b   : > { %v546_v32 = vshrl.u32 %v411_v27, 16  ;;  %v549_v33 = vshll.u32 %v411_v27, 16  ;;  %v554_v34 = vshrl.u32 %v412_v28, 16  ;;  %v557_v35 = vshll.u32 %v412_v28, 16  ;;  %452 = vst [vmem:[#allocation2 + $0x3c] sm:$0xf] %v5968_v1 }
  0x1c   : > { %5903 = vmatpush.bf16.msra.mxu1 %v5648_v25  ;;  %5904 = vmatpush.bf16.msra.mxu2 %v5648_v25  ;;  %453 = vst [vmem:[#allocation2 + $0x40] sm:$0xf] %v5968_v1  ;;  %v614_v53 = vshrl.u32 %v6083_v41, 16  ;;  %v622_v55 = vshrl.u32 %v420_v48, 16  ;;  %v617_v59 = vshll.u32 %v6083_v41, 16  ;;  %v6115_v60 = vpack.c.bf16 %v395_v54, %v395_v54 }
  0x1d   : > { %5905 = vmatpush.bf16.msra.mxu3 %v5648_v25  ;;  %3967 = vmatpush.bf16.msra.mxu0 %v5648_v25  ;;  %v548_v39 = vrot.slane %v546_v32, 7  ;;  %v6080_v40 = vrot.slane %v554_v34, 7  ;;  %454 = vst [vmem:[#allocation2 + $0x44] sm:$0x1] %v5968_v1  ;;  %v625_v2 = vshll.u32 %v420_v48, 16  ;;  %v6124_v6 = vpack.c.bf16 %v396_v57, %v396_v57 }
  0x1e   : > { %455 = vst [vmem:[#allocation2 + $0x48] sm:$0xf] %v5968_v1  ;;  %v6111_v58 = vrot.slane %v614_v53, 7  ;;  %v6121_v0 = vrot.slane %v622_v55, 7  ;;  %v682_v16 = vshrl.u32 %v6115_v60, 16  ;;  %v321_v17 = vmul.f32 %v6028_v3, %v5751_v7  ;;  %v5660_v55 = vld [vmem:[%s7987_s3 + $0x78] sm:$0xff] }
  0x1f   : > { %v551_v45 = vor.u32 %v549_v33, %v548_v39  ;;  %v552_v46 = vrot.slane %v548_v39, 4  ;;  %v559_v47 = vor.u32 %v557_v35, %v6080_v40  ;;  %456 = vst [vmem:[#allocation2 + $0x4c] sm:$0xf] %v5968_v1  ;;  %v322_v18 = vmul.f32 %v6028_v3, %v5752_v8  ;;  %v5675_v7 = vld [vmem:[%s7987_s3 + $0xf0] sm:$0xff] }
  0x20   : > { %5906 = vmatpush.bf16.msra.mxu1 %v5647_v36  ;;  %5907 = vmatpush.bf16.msra.mxu2 %v5647_v36  ;;  %457 = vst [vmem:[#allocation2 + $0x50] sm:$0x1] %v5968_v1  ;;  %v620_v11 = vrot.slane %v6111_v58, 4  ;;  %v329_v19 = vmul.f32 %v6028_v3, %v5767_v10  ;;  %v627_v21 = vor.u32 %v625_v2, %v6121_v0  ;;  %v690_v25 = vshrl.u32 %v6124_v6, 16  ;;  %v5684_v2 = vld [vmem:[%s7987_s3 + $0x138] sm:$0xff]  ;;  %v5659_v8 = vld [vmem:[%s7987_s3 + $0x70] sm:$0xff] }
  0x21   : > { %5908 = vmatpush.bf16.msra.mxu3 %v5647_v36  ;;  %3968 = vmatpush.bf16.msra.mxu0 %v5647_v36  ;;  %v560_v51 = vsel %vm6076_vm4, %v552_v46, %v559_v47  ;;  %v842_v52 = vsel %vm6087_vm5, %v551_v45, %v841_v43  ;;  %458 = vst [vmem:[#allocation2 + $0x54] sm:$0xf] %v5968_v1  ;;  %v5719_v32 = vunpack.c.l.bf16 %v5718_v20  ;;  %v6149_v33 = vrot.slane %v682_v16, 7 }
  0x22   : > { %843 = vst [vmem:[#allocation2 + $0x30] sm:$0xf] %v842_v52  ;;  %v349_v22 = vadd.f32 %v6040_v9, %v313_v12  ;;  %v350_v23 = vadd.f32 %v6040_v9, %v314_v13  ;;  %v330_v24 = vmul.f32 %v6028_v3, %v5768_v14  ;;  %v357_v26 = vadd.f32 %v6040_v9, %v321_v17 }
  0x23   : > { %844 = vst [vmem:[#allocation2 + $0x34] sm:$0xf] %v560_v51  ;;  %v358_v27 = vadd.f32 %v6040_v9, %v322_v18  ;;  %v365_v28 = vadd.f32 %v6040_v9, %v329_v19  ;;  %v685_v34 = vshll.u32 %v6115_v60, 16  ;;  %v693_v37 = vshll.u32 %v6124_v6, 16  ;;  %v5676_v51 = vld [vmem:[%s7987_s3 + $0xf8] sm:$0xff] }
  0x24   : > { %5909 = vmatpush.bf16.msra.mxu1 %v5646_v49  ;;  %5910 = vmatpush.bf16.msra.mxu2 %v5646_v49  ;;  %459 = vst [vmem:[#allocation2 + $0x58] sm:$0xf] %v5968_v1  ;;  %v381_v29 = vmax.f32 %v349_v22, 0.0  ;;  %v382_v30 = vmax.f32 %v350_v23, 0.0  ;;  %v366_v31 = vadd.f32 %v6040_v9, %v330_v24  ;;  %v389_v35 = vmax.f32 %v357_v26, 0.0 }
  0x25   : > { %5911 = vmatpush.bf16.msra.mxu3 %v5646_v49  ;;  %3969 = vmatpush.bf16.msra.mxu0 %v5646_v49  ;;  %460 = vst [vmem:[#allocation2 + $0x5c] sm:$0x1] %v5968_v1  ;;  %v390_v36 = vmax.f32 %v358_v27, 0.0  ;;  %v5720_v44 = vunpack.c.h.bf16 %v5718_v20  ;;  %v6155_v45 = vrot.slane %v690_v25, 7  ;;  %v397_v47 = vmax.f32 %v365_v28, 0.0  ;;  %v5668_v49 = vld [vmem:[%s7987_s3 + $0xb8] sm:$0xff] }
  0x26   : > { %461 = vst [vmem:[#allocation2 + $0x60] sm:$0xf] %v5968_v1  ;;  %v413_v39 = vpack.c.bf16 %v381_v29, %v381_v29  ;;  %v414_v43 = vpack.c.bf16 %v382_v30, %v382_v30  ;;  %v421_v46 = vpack.c.bf16 %v389_v35, %v389_v35  ;;  %v398_v48 = vmax.f32 %v366_v31, 0.0  ;;  %v6216_v22 = vld [vmem:[#allocation2 + $0x3c] sm:$0xf] }
  0x27   : > { %462 = vst [vmem:[#allocation2 + $0x64] sm:$0xf] %v5968_v1  ;;  %v305_v53 = vmul.f32 %v6028_v3, %v5719_v32  ;;  %v688_v54 = vrot.slane %v6149_v33, 4  ;;  %v6170_v57 = vpack.c.bf16 %v390_v36, %v390_v36  ;;  %v6172_v61 = vpack.c.bf16 %v397_v47, %v397_v47 }
  0x28   : > { %5912 = vmatpush.bf16.msra.mxu1 %v5645_v56  ;;  %5913 = vmatpush.bf16.msra.mxu2 %v5645_v56  ;;  %463 = vst [vmem:[#allocation2 + $0x68] sm:$0x1] %v5968_v1  ;;  %v563_v52 = vshrl.u32 %v413_v39, 16  ;;  %v6178_v62 = vor.u32 %v617_v59, %v6111_v58  ;;  %v571_v5 = vshrl.u32 %v414_v43, 16  ;;  %v306_v6 = vmul.f32 %v6028_v3, %v5720_v44 }
  0x29   : > { %5914 = vmatpush.bf16.msra.mxu3 %v5645_v56  ;;  %3970 = vmatpush.bf16.msra.mxu0 %v5645_v56  ;;  %464 = vst [vmem:[#allocation2 + $0x6c] sm:$0xf] %v5968_v1  ;;  %v566_v56 = vshll.u32 %v413_v39, 16  ;;  %v6192_v41 = vsel %vm6076_vm4, %v620_v11, %v627_v21  ;;  %v695_v59 = vor.u32 %v693_v37, %v6155_v45  ;;  %v574_v10 = vshll.u32 %v414_v43, 16  ;;  %v5869_v39 = vld [vmem:[%s6023_s27 + $0x48] sm:$0xff]  }
  0x2a   : > { %v5601_v15 = vld [vmem:[#allocation2 + $0x30] sm:$0xff]  ;;  %465 = vst [vmem:[#allocation2 + $0x70] sm:$0xf] %v5968_v1  ;;  %v565_v4 = vrot.slane %v563_v52, 7  ;;  %v631_v12 = vshrl.u32 %v421_v46, 16  ;;  %v6204_v11 = vrot.slane %v571_v5, 7  ;;  %v430_v14 = vpack.c.bf16 %v398_v48, %v398_v48 }
  0x2b   : > { %3991 = vmatmul.bf16.vlgmr.msra.gmra.mxu1 %v5601_v15  ;;  %466 = vst [vmem:[#allocation2 + $0x74] sm:$0x1] %v5968_v1  ;;  %v634_v13 = vshll.u32 %v421_v46, 16  ;;  %v341_v15 = vadd.f32 %v6040_v9, %v305_v53  ;;  %v639_v18 = vshrl.u32 %v6170_v57, 16  ;;  %v699_v19 = vshrl.u32 %v6172_v61, 16 }
  0x2c   : > { %467 = vst [vmem:[#allocation2 + $0x78] sm:$0xf] %v5968_v1  ;;  %4141 = vmatpush.bf16.msrb.mxu2 %v5668_v49  ;;  %3971 = vmatmul.bf16.vlgmr.msra.gmra.mxu0 %v5597_v50  ;;  %v6208_v16 = vor.u32 %v566_v56, %v565_v4  ;;  %v6210_v17 = vrot.slane %v631_v12, 7  ;;  %v569_v20 = vrot.slane %v565_v4, 4  ;;  %v576_v21 = vor.u32 %v574_v10, %v6204_v11  ;;  %v5873_v4 = vld [vmem:[%s6023_s27 + $0x68] sm:$0xff]  }
  0x2d   : > { %468 = vst [vmem:[#allocation2 + $0x7c] sm:$0xf] %v5968_v1  ;;  %4230 = vmatpush.bf16.msrb.mxu3 %v5676_v51  ;;  %4052 = vmatpush.bf16.msrb.mxu1 %v5660_v55  ;;  %v6202_v58 = vld [vmem:[#allocation2 + $0x60] sm:$0xf]  ;;  %v642_v23 = vshll.u32 %v6170_v57, 16  ;;  %v342_v24 = vadd.f32 %v6040_v9, %v306_v6  ;;  %v6224_v25 = vor.u32 %v685_v34, %v6149_v33  ;;  %v6229_v27 = vrot.slane %v639_v18, 7 }
  0x2e   : > { %469 = vst [vmem:[#allocation2 + $0x80] sm:$0x1] %v5968_v1  ;;  %4319 = vmatpush.bf16.msrb.mxu0 %v5684_v2  ;;  %v6227_v26 = vor.u32 %v634_v13, %v6210_v17  ;;  %v702_v29 = vshll.u32 %v6172_v61, 16  ;;  %v6237_v30 = vsel %vm6076_vm4, %v688_v54, %v695_v59  ;;  %v6239_v60 = vrot.slane %v699_v19, 7  ;;  %v5865_v33 = vld [vmem:[%s6023_s27 + $0x28] sm:$0xff]   ;;  %v5683_v19 = vld [vmem:[%s7987_s3 + $0x130] sm:$0xff] }
  0x2f   : > { %470 = vst [vmem:[#allocation2 + $0x84] sm:$0xf] %v5968_v1  ;;  %v707_v31 = vshrl.u32 %v430_v14, 16  ;;  %v373_v32 = vmax.f32 %v341_v15, 0.0  ;;  %v870_v34 = vsel %vm6087_vm5, %v6178_v62, %v6202_v58  ;;  %v849_v35 = vsel %vm6087_vm5, %v6208_v16, %v6216_v22  ;;  %v5666_v15 = vld [vmem:[%s7987_s3 + $0xa8] sm:$0xff] }
  0x30   : > { %471 = vst [vmem:[#allocation2 + $0x88] sm:$0xf] %v5968_v1  ;;  %4142 = vmatpush.bf16.msrb.mxu2 %v5667_v63  ;;  %v6231_v28 = vld [vmem:[#allocation2 + $0x6c] sm:$0xf]  ;;  %v637_v36 = vrot.slane %v6210_v17, 4  ;;  %v710_v37 = vshll.u32 %v430_v14, 16  ;;  %v6258_v44 = vsel %vm6076_vm4, %v569_v20, %v576_v21  ;;  %v644_v46 = vor.u32 %v642_v23, %v6229_v27 }
  0x31   : > { %472 = vst [vmem:[#allocation2 + $0x8c] sm:$0x1] %v5968_v1  ;;  %4231 = vmatpush.bf16.msrb.mxu3 %v5675_v7  ;;  %4053 = vmatpush.bf16.msrb.mxu1 %v5659_v8  ;;  %v6261_v47 = vrot.slane %v707_v31, 7  ;;  %v374_v48 = vmax.f32 %v342_v24, 0.0  ;;  %v877_v49 = vsel %vm6087_vm5, %v6227_v26, %v6231_v28  ;;  %v405_v50 = vpack.c.bf16 %v373_v32, %v373_v32  ;;  %v5674_v18 = vld [vmem:[%s7987_s3 + $0xe8] sm:$0xff] }
  0x32   : > { %473 = vst [vmem:[#allocation2 + $0x90] sm:$0xf] %v5968_v1  ;;  %v5739_v51 = vunpack.c.l.bf16 %v5865_v33  ;;  %v5740_v52 = vunpack.c.h.bf16 %v5865_v33  ;;  %v6270_v53 = vor.u32 %v702_v29, %v6239_v60  ;;  %v5755_v55 = vunpack.c.l.bf16 %v5869_v39  ;;  %v6311_v29 = vld [vmem:[#allocation2 + $0xc] sm:$0xf]  ;;  %4320 = vmatpush.bf16.msrb.mxu0 %v5683_v19 }
  0x33   : > { %474 = vst [vmem:[#allocation2 + $0x94] sm:$0xf] %v5968_v1  ;;  %v406_v54 = vpack.c.bf16 %v374_v48, %v374_v48  ;;  %v5756_v56 = vunpack.c.h.bf16 %v5869_v39  ;;  %v495_v61 = vshrl.u32 %v405_v50, 16  ;;  %v498_v63 = vshll.u32 %v405_v50, 16  ;;  %v5673_v39 = vld [vmem:[%s7987_s3 + $0xe0] sm:$0xff]  ;;  %v5682_v50 = vld [vmem:[%s7987_s3 + $0x128] sm:$0xff] }
  0x34   : > { %475 = vst [vmem:[#allocation2 + $0x98] sm:$0x1] %v5968_v1  ;;  %v315_v2 = vmul.f32 %v6028_v3, %v5739_v51  ;;  %v705_v5 = vrot.slane %v6239_v60, 4  ;;  %v712_v6 = vor.u32 %v710_v37, %v6261_v47  ;;  %v316_v12 = vmul.f32 %v6028_v3, %v5740_v52  ;;  %v5658_v60 = vld [vmem:[%s7987_s3 + $0x68] sm:$0xff]  ;;  %4143 = vmatpush.bf16.msrb.mxu2 %v5666_v15  ;;  %v5665_v37 = vld [vmem:[%s7987_s3 + $0xa0] sm:$0xff] }
  0x35   : > { %476 = vst [vmem:[#allocation2 + $0x9c] sm:$0xf] %v5968_v1  ;;  %v503_v59 = vshrl.u32 %v406_v54, 16  ;;  %v506_v7 = vshll.u32 %v406_v54, 16  ;;  %v6285_v10 = vrot.slane %v495_v61, 7  ;;  %v323_v14 = vmul.f32 %v6028_v3, %v5755_v55  ;;  %4232 = vmatpush.bf16.msrb.mxu3 %v5674_v18  ;;  %4054 = vmatpush.bf16.msrb.mxu1 %v5658_v60  ;;  %v5657_v51 = vld [vmem:[%s7987_s3 + $0x60] sm:$0xff] }
  0x36   : > { %477 = vst [vmem:[#allocation2 + $0xa0] sm:$0xf] %v5968_v1  ;;  %v351_v13 = vadd.f32 %v6040_v9, %v315_v2  ;;  %v324_v20 = vmul.f32 %v6028_v3, %v5756_v56  ;;  %v5771_v21 = vunpack.c.l.bf16 %v5873_v4  ;;  %v5772_v23 = vunpack.c.h.bf16 %v5873_v4  ;;  %4321 = vmatpush.bf16.msrb.mxu0 %v5682_v50 }
  0x37   : > { %478 = vst [vmem:[#allocation2 + $0xa4] sm:$0x1] %v5968_v1  ;;  %v6294_v17 = vrot.slane %v503_v59, 7  ;;  %v6306_v24 = vsel %vm6076_vm4, %v637_v36, %v644_v46  ;;  %v352_v31 = vadd.f32 %v6040_v9, %v316_v12  ;;  %v359_v32 = vadd.f32 %v6040_v9, %v323_v14 }
  0x38   : > { %479 = vst [vmem:[#allocation2 + $0xa8] sm:$0xf] %v5968_v1  ;;  %v501_v36 = vrot.slane %v6285_v10, 4  ;;  %v360_v46 = vadd.f32 %v6040_v9, %v324_v20  ;;  %v713_v48 = vsel %vm6076_vm4, %v705_v5, %v712_v6  ;;  %v331_v55 = vmul.f32 %v6028_v3, %v5771_v21  ;;  %4144 = vmatpush.bf16.msrb.mxu2 %v5665_v37 }
  0x39   : > { %480 = vst [vmem:[#allocation2 + $0xac] sm:$0xf] %v5968_v1  ;;  %v6254_v43 = vld [vmem:[#allocation2 + $0x90] sm:$0xf]  ;;  %v384_v52 = vmax.f32 %v352_v31, 0.0  ;;  %v391_v54 = vmax.f32 %v359_v32, 0.0  ;;  %4233 = vmatpush.bf16.msrb.mxu3 %v5673_v39  ;;  %4055 = vmatpush.bf16.msrb.mxu1 %v5657_v51 }
  0x3a   : > { %481 = vst [vmem:[#allocation2 + $0xb0] sm:$0x1] %v5968_v1  ;;  %v898_v57 = vsel %vm6087_vm5, %v6224_v25, %v6254_v43  ;;  %v6309_v25 = vor.u32 %v498_v63, %v6285_v10  ;;  %v383_v43 = vmax.f32 %v351_v13, 0.0  ;;  %v392_v61 = vmax.f32 %v360_v46, 0.0  ;;  %v855_v13 = vld [vmem:[#allocation2 + $0x48] sm:$0xf] }
  0x3b   : > { %482 = vst [vmem:[#allocation2 + $0xb4] sm:$0xf] %v5968_v1  ;;  %v332_v63 = vmul.f32 %v6028_v3, %v5772_v23  ;;  %v416_v4 = vpack.c.bf16 %v384_v52, %v384_v52  ;;  %v423_v5 = vpack.c.bf16 %v391_v54, %v391_v54  ;;  %v367_v6 = vadd.f32 %v6040_v9, %v331_v55  ;;  %v5870_v10 = vld [vmem:[%s6023_s27 + $0x50] sm:$0xff]  }
  0x3c   : > { %483 = vst [vmem:[#allocation2 + $0xb8] sm:$0xf] %v5968_v1  ;;  %v6283_v8 = vld [vmem:[#allocation2 + $0x9c] sm:$0xf]  ;;  %v415_v56 = vpack.c.bf16 %v383_v43, %v383_v43  ;;  %v819_v2 = vsel %vm6087_vm5, %v6309_v25, %v6311_v29  ;;  %v5866_v43 = vld [vmem:[%s6023_s27 + $0x30] sm:$0xff]  }
  0x3d   : > { %484 = vst [vmem:[#allocation2 + $0xbc] sm:$0x1] %v5968_v1  ;;  %v905_v33 = vsel %vm6087_vm5, %v6270_v53, %v6283_v8  ;;  %v368_v59 = vadd.f32 %v6040_v9, %v332_v63  ;;  %v591_v12 = vshll.u32 %v416_v4, 16  ;;  %v648_v14 = vshrl.u32 %v423_v5, 16 }
  0x3e   : > { %485 = vst [vmem:[#allocation2 + $0xc0] sm:$0xf] %v5968_v1  ;;  %v580_v62 = vshrl.u32 %v415_v56, 16  ;;  %v583_v58 = vshll.u32 %v415_v56, 16  ;;  %v651_v15 = vshll.u32 %v423_v5, 16  ;;  %v399_v20 = vmax.f32 %v367_v6, 0.0 }
  0x3f   : > { %486 = vst [vmem:[#allocation2 + $0xc4] sm:$0xf] %v5968_v1  ;;  %v650_v21 = vrot.slane %v648_v14, 7  ;;  %v400_v23 = vmax.f32 %v368_v59, 0.0  ;;  %v911_v55 = vld [vmem:[#allocation2 + $0xa8] sm:$0xf]  ;;  %v5743_v56 = vunpack.c.l.bf16 %v5866_v43 }
  0x40   : > { %487 = vst [vmem:[#allocation2 + $0xc8] sm:$0x1] %v5968_v1  ;;  %v431_v60 = vpack.c.bf16 %v399_v20, %v399_v20  ;;  %v5672_v6 = vld [vmem:[%s7987_s3 + $0xd8] sm:$0xff]  ;;  %v5874_v14 = vld [vmem:[%s6023_s27 + $0x70] sm:$0xff]  }
  0x41   : > { %488 = vst [vmem:[#allocation2 + $0xcc] sm:$0xf] %v5968_v1  ;;  %v653_v31 = vor.u32 %v651_v15, %v650_v21  ;;  %v654_v32 = vrot.slane %v650_v21, 4  ;;  %4234 = vmatpush.bf16.msrb.mxu3 %v5672_v6 }
  0x42   : > { %489 = vst [vmem:[#allocation2 + $0xd0] sm:$0xf] %v5968_v1  ;;  %v716_v8 = vshrl.u32 %v431_v60, 16 }
  0x43   : > { %490 = vst [vmem:[#allocation2 + $0xd4] sm:$0x1] %v5968_v1  ;;  %v508_v1 = vor.u32 %v506_v7, %v6294_v17  ;;  %v5861_v7 = vld [vmem:[%s6023_s27 + $0x8] sm:$0xff]  }
  0x44   : > { %871 = vst [vmem:[#allocation2 + $0x60] sm:$0xf] %v870_v34  ;;  %v424_v34 = vpack.c.bf16 %v392_v61, %v392_v61  ;;  %v5723_v25 = vunpack.c.l.bf16 %v5861_v7  ;;  %v5724_v37 = vunpack.c.h.bf16 %v5861_v7  ;;  %v5744_v61 = vunpack.c.h.bf16 %v5866_v43 }
  0x45   : > { %872 = vst [vmem:[#allocation2 + $0x64] sm:$0xf] %v6192_v41  ;;  %v588_v41 = vshrl.u32 %v416_v4, 16  ;;  %v509_v26 = vsel %vm6076_vm4, %v501_v36, %v508_v1 }
  0x46   : > { %899 = vst [vmem:[#allocation2 + $0x90] sm:$0xf] %v898_v57  ;;  %v582_v57 = vrot.slane %v580_v62, 7  ;;  %v656_v18 = vshrl.u32 %v424_v34, 16  ;;  %v659_v19 = vshll.u32 %v424_v34, 16  ;;  %v307_v54 = vmul.f32 %v6028_v3, %v5723_v25  ;;  %v5680_v25 = vld [vmem:[%s7987_s3 + $0x118] sm:$0xff] }
  0x47   : > { %900 = vst [vmem:[#allocation2 + $0x94] sm:$0xf] %v6237_v30  ;;  %v6363_v30 = vrot.slane %v588_v41, 7  ;;  %v308_v1 = vmul.f32 %v6028_v3, %v5724_v37  ;;  %v5759_v62 = vunpack.c.l.bf16 %v5870_v10  ;;  %v5681_v41 = vld [vmem:[%s7987_s3 + $0x120] sm:$0xff] }
  0x48   : > { %850 = vst [vmem:[#allocation2 + $0x3c] sm:$0xf] %v849_v35  ;;  %v585_v29 = vor.u32 %v583_v58, %v582_v57  ;;  %v586_v16 = vrot.slane %v582_v57, 4  ;;  %v6370_v22 = vrot.slane %v656_v18, 7  ;;  %v883_v35 = vld [vmem:[#allocation2 + $0x78] sm:$0xf]  ;;  %v343_v5 = vadd.f32 %v6040_v9, %v307_v54  ;;  %4322 = vmatpush.bf16.msrb.mxu0 %v5681_v41 }
  0x49   : > { %851 = vst [vmem:[#allocation2 + $0x40] sm:$0xf] %v6258_v44  ;;  %v593_v44 = vor.u32 %v591_v12, %v6363_v30  ;;  %v884_v53 = vsel %vm6087_vm5, %v653_v31, %v883_v35  ;;  %v5760_v58 = vunpack.c.h.bf16 %v5870_v10  ;;  %v344_v7 = vadd.f32 %v6040_v9, %v308_v1  ;;  %v5656_v12 = vld [vmem:[%s7987_s3 + $0x58] sm:$0xff]  ;;  %v5663_v18 = vld [vmem:[%s7987_s3 + $0x90] sm:$0xff] }
  0x4a   : > { %878 = vst [vmem:[#allocation2 + $0x6c] sm:$0xf] %v877_v49  ;;  %v856_v28 = vsel %vm6087_vm5, %v585_v29, %v855_v13  ;;  %v661_v49 = vor.u32 %v659_v19, %v6370_v22  ;;  %v317_v13 = vmul.f32 %v6028_v3, %v5743_v56  ;;  %v375_v57 = vmax.f32 %v343_v5, 0.0  ;;  %4056 = vmatpush.bf16.msrb.mxu1 %v5656_v12 }
  0x4b   : > { %879 = vst [vmem:[#allocation2 + $0x70] sm:$0xf] %v6306_v24  ;;  %v432_v24 = vpack.c.bf16 %v400_v23, %v400_v23  ;;  %v594_v46 = vsel %vm6076_vm4, %v586_v16, %v593_v44  ;;  %v318_v19 = vmul.f32 %v6028_v3, %v5744_v61  ;;  %v376_v21 = vmax.f32 %v344_v7, 0.0  ;;  %v5671_v23 = vld [vmem:[%s7987_s3 + $0xd0] sm:$0xff] }
  0x4c   : > { %v5605_v39 = vld [vmem:[#allocation2 + $0x60] sm:$0xff]  ;;  %906 = vst [vmem:[#allocation2 + $0x9c] sm:$0xf] %v905_v33  ;;  %v719_v33 = vshll.u32 %v431_v60, 16  ;;  %v662_v36 = vsel %vm6076_vm4, %v654_v32, %v661_v49  ;;  %v353_v29 = vadd.f32 %v6040_v9, %v317_v13  ;;  %v407_v35 = vpack.c.bf16 %v375_v57, %v375_v57  ;;  %v5655_v60 = vld [vmem:[%s7987_s3 + $0x50] sm:$0xff]  ;;  %4235 = vmatpush.bf16.msrb.mxu3 %v5671_v23 }
  0x4d   : > { %907 = vst [vmem:[#allocation2 + $0xa0] sm:$0xf] %v713_v48  ;;  %4011 = vmatmul.bf16.vlgmr.msra.gmra.mxu2 %v5605_v39  ;;  %v724_v51 = vshrl.u32 %v432_v24, 16  ;;  %v727_v52 = vshll.u32 %v432_v24, 16  ;;  %v718_v48 = vrot.slane %v716_v8, 7  ;;  %v354_v44 = vadd.f32 %v6040_v9, %v318_v19  ;;  %4323 = vmatpush.bf16.msrb.mxu0 %v5680_v25 }
  0x4e   : > { %v5609_v50 = vld [vmem:[#allocation2 + $0x90] sm:$0xff]  ;;  %820 = vst [vmem:[#allocation2 + $0xc] sm:$0xf] %v819_v2  ;;  %v5664_v2 = vld [vmem:[%s7987_s3 + $0x98] sm:$0xff]  ;;  %v5775_v31 = vunpack.c.l.bf16 %v5874_v14  ;;  %v408_v32 = vpack.c.bf16 %v376_v21, %v376_v21  ;;  %v385_v37 = vmax.f32 %v353_v29, 0.0  ;;  %v325_v39 = vmul.f32 %v6028_v3, %v5759_v62  ;;  %4057 = vmatpush.bf16.msrb.mxu1 %v5655_v60 }
  0x4f   : > { %821 = vst [vmem:[#allocation2 + $0x10] sm:$0xf] %v509_v26  ;;  %4031 = vmatmul.bf16.vlgmr.msra.gmra.mxu3 %v5609_v50  ;;  %v6396_v4 = vrot.slane %v724_v51, 7  ;;  %v721_v34 = vor.u32 %v719_v33, %v718_v48  ;;  %v722_v59 = vrot.slane %v718_v48, 4  ;;  %4145 = vmatpush.bf16.msrb.mxu2 %v5664_v2  ;;  %v326_v26 = vmul.f32 %v6028_v3, %v5760_v58  ;;  %v827_v48 = vld [vmem:[#allocation2 + $0x18] sm:$0xf] }
  0x50   : > { %v5602_v63 = vld [vmem:[#allocation2 + $0x3c] sm:$0xff]  ;;  %857 = vst [vmem:[#allocation2 + $0x48] sm:$0xf] %v856_v28  ;;  %v512_v49 = vshrl.u32 %v407_v35, 16  ;;  %v515_v24 = vshll.u32 %v407_v35, 16  ;;  %v386_v43 = vmax.f32 %v354_v44, 0.0  ;;  %v417_v33 = vpack.c.bf16 %v385_v37, %v385_v37 }
  0x51   : > { %858 = vst [vmem:[#allocation2 + $0x4c] sm:$0xf] %v594_v46  ;;  %3996 = vmatmul.bf16.gmra.mxu1 %v5602_v63  ;;  %v729_v15 = vor.u32 %v727_v52, %v6396_v4  ;;  %v912_v20 = vsel %vm6087_vm5, %v721_v34, %v911_v55  ;;  %v5776_v46 = vunpack.c.h.bf16 %v5874_v14  ;;  %v523_v8 = vshll.u32 %v408_v32, 16  ;;  %v862_v13 = vld [vmem:[#allocation2 + $0x54] sm:$0xf] }
  0x52   : > { %885 = vst [vmem:[#allocation2 + $0x78] sm:$0xf] %v884_v53  ;;  %v520_v53 = vshrl.u32 %v408_v32, 16  ;;  %v361_v10 = vadd.f32 %v6040_v9, %v325_v39  ;;  %v514_v50 = vrot.slane %v512_v49, 7  ;;  %v362_v51 = vadd.f32 %v6040_v9, %v326_v26  ;;  %v5606_v61 = vld [vmem:[#allocation2 + $0x6c] sm:$0xff] }
  0x53   : > { %886 = vst [vmem:[#allocation2 + $0x7c] sm:$0xf] %v662_v36  ;;  %v730_v16 = vsel %vm6076_vm4, %v722_v59, %v729_v15  ;;  %4146 = vmatpush.bf16.msrb.mxu2 %v5663_v18  ;;  %v418_v36 = vpack.c.bf16 %v386_v43, %v386_v43  ;;  %v333_v52 = vmul.f32 %v6028_v3, %v5775_v31  ;;  %v597_v55 = vshrl.u32 %v417_v33, 16  ;;  %v5862_v21 = vld [vmem:[%s6023_s27 + $0x10] sm:$0xff]   ;;  %v890_v32 = vld [vmem:[#allocation2 + $0x84] sm:$0xf] }
  0x54   : > { %913 = vst [vmem:[#allocation2 + $0xa8] sm:$0xf] %v912_v20  ;;  %v6439_v54 = vrot.slane %v520_v53, 7  ;;  %v600_v1 = vshll.u32 %v417_v33, 16  ;;  %v393_v56 = vmax.f32 %v361_v10, 0.0  ;;  %v517_v63 = vor.u32 %v515_v24, %v514_v50  ;;  %v5610_v7 = vld [vmem:[#allocation2 + $0x9c] sm:$0xff] }
  0x55   : > { %914 = vst [vmem:[#allocation2 + $0xac] sm:$0xf] %v730_v16  ;;  %v518_v2 = vrot.slane %v514_v50, 4  ;;  %v605_v5 = vshrl.u32 %v418_v36, 16  ;;  %v608_v6 = vshll.u32 %v418_v36, 16  ;;  %v599_v58 = vrot.slane %v597_v55, 7 }
  0x56   : > { %v5598_v28 = vld [vmem:[#allocation2 + $0xc] sm:$0xff]  ;;  %v525_v62 = vor.u32 %v523_v8, %v6439_v54  ;;  %v394_v34 = vmax.f32 %v362_v51, 0.0  ;;  %v334_v59 = vmul.f32 %v6028_v3, %v5776_v46  ;;  %v828_v41 = vsel %vm6087_vm5, %v517_v63, %v827_v48  ;;  %v5661_v48 = vld [vmem:[%s7987_s3 + $0x80] sm:$0xff] }
  0x57   : > { %3976 = vmatmul.bf16.gmra.mxu0 %v5598_v28  ;;  %v6445_v12 = vrot.slane %v605_v5, 7  ;;  %v425_v14 = vpack.c.bf16 %v393_v56, %v393_v56  ;;  %v369_v15 = vadd.f32 %v6040_v9, %v333_v52  ;;  %829 = vst [vmem:[#allocation2 + $0x18] sm:$0xf] %v828_v41  ;;  %v602_v18 = vor.u32 %v600_v1, %v599_v58  ;;  %v5662_v28 = vld [vmem:[%s7987_s3 + $0x88] sm:$0xff]  ;;  %v5679_v8 = vld [vmem:[%s7987_s3 + $0x110] sm:$0xff] }
  0x58   : > { %v526_v57 = vsel %vm6076_vm4, %v518_v2, %v525_v62  ;;  %v603_v19 = vrot.slane %v599_v58, 4  ;;  %v426_v20 = vpack.c.bf16 %v394_v34, %v394_v34  ;;  %v510_v23 = vrot.slane %v6294_v17, 4  ;;  %v5603_v25 = vld [vmem:[#allocation2 + $0x48] sm:$0xff]  ;;  %4147 = vmatpush.bf16.msrb.mxu2 %v5662_v28  ;;  %4324 = vmatpush.bf16.msrb.mxu0 %v5679_v8  ;;  %v824_v2 = vld [vmem:[#allocation2 + $0x14] sm:$0x1] }
  0x59   : > { %830 = vst [vmem:[#allocation2 + $0x1c] sm:$0xf] %v526_v57  ;;  %v610_v29 = vor.u32 %v608_v6, %v6445_v12  ;;  %v665_v16 = vshrl.u32 %v425_v14, 16  ;;  %v668_v35 = vshll.u32 %v425_v14, 16  ;;  %v863_v60 = vsel %vm6087_vm5, %v602_v18, %v862_v13  ;;  %v5670_v24 = vld [vmem:[%s7987_s3 + $0xc8] sm:$0xff] }
  0x5a   : > { %v673_v44 = vshrl.u32 %v426_v20, 16  ;;  %v676_v31 = vshll.u32 %v426_v20, 16  ;;  %v370_v37 = vadd.f32 %v6040_v9, %v334_v59  ;;  %864 = vst [vmem:[#allocation2 + $0x54] sm:$0xf] %v863_v60  ;;  %v401_v26 = vmax.f32 %v369_v15, 0.0  ;;  %v5654_v33 = vld [vmem:[%s7987_s3 + $0x48] sm:$0xff]  ;;  %4236 = vmatpush.bf16.msrb.mxu3 %v5670_v24 }
  0x5b   : > { %v611_v39 = vsel %vm6076_vm4, %v603_v19, %v610_v29  ;;  %v667_v17 = vrot.slane %v665_v16, 7  ;;  %v5727_v49 = vunpack.c.l.bf16 %v5862_v21  ;;  %v5728_v53 = vunpack.c.h.bf16 %v5862_v21  ;;  %v5678_v63 = vld [vmem:[%s7987_s3 + $0x108] sm:$0xff]  ;;  %4058 = vmatpush.bf16.msrb.mxu1 %v5654_v33  ;;  %v932_v34 = vld [vmem:[#allocation2] sm:$0xf]  ;;  %v918_v20 = vld [vmem:[#allocation2 + $0xb4] sm:$0xf] }
  0x5c   : > { %865 = vst [vmem:[#allocation2 + $0x58] sm:$0xf] %v611_v39  ;;  %v6464_v43 = vrot.slane %v673_v44, 7  ;;  %v402_v46 = vmax.f32 %v370_v37, 0.0  ;;  %v433_v51 = vpack.c.bf16 %v401_v26, %v401_v26  ;;  %4148 = vmatpush.bf16.msrb.mxu2 %v5661_v48  ;;  %v825_v18 = vsel %vm6474_vm7, %v510_v23, %v824_v2  ;;  %4325 = vmatpush.bf16.msrb.mxu0 %v5678_v63  ;;  %v6506_v60 = vld [vmem:[#allocation2 + $0x4] sm:$0xf] }
  0x5d   : > { %4016 = vmatmul.bf16.gmra.mxu2 %v5606_v61  ;;  %v670_v50 = vor.u32 %v668_v35, %v667_v17  ;;  %v671_v36 = vrot.slane %v667_v17, 4  ;;  %v309_v52 = vmul.f32 %v6028_v3, %v5727_v49  ;;  %v310_v56 = vmul.f32 %v6028_v3, %v5728_v53  ;;  %v5669_v61 = vld [vmem:[%s7987_s3 + $0xc0] sm:$0xff]  ;;  %826 = vst [vmem:[#allocation2 + $0x14] sm:$0x1] %v825_v18  ;;  %v5607_v37 = vld [vmem:[#allocation2 + $0x78] sm:$0xff]  ;;  %v5611_v24 = vld [vmem:[#allocation2 + $0xa8] sm:$0xff] }
  0x5e   : > { %v678_v55 = vor.u32 %v676_v31, %v6464_v43  ;;  %v434_v1 = vpack.c.bf16 %v402_v46, %v402_v46  ;;  %v733_v6 = vshrl.u32 %v433_v51, 16  ;;  %v736_v62 = vshll.u32 %v433_v51, 16  ;;  %v5653_v3 = vld [vmem:[%s7987_s3 + $0x40] sm:$0xff]  ;;  %4237 = vmatpush.bf16.msrb.mxu3 %v5669_v61  ;;  %v6511_v28 = vld [vmem:[#allocation2 + $0x8] sm:$0x1]  ;;  %v5716_v18 = vld [vmem:[%s7987_s3 + $0x238] sm:$0xff] }
  0x5f   : > { %4036 = vmatmul.bf16.gmra.mxu3 %v5610_v7  ;;  %v891_v5 = vsel %vm6087_vm5, %v670_v50, %v890_v32  ;;  %v345_v58 = vadd.f32 %v6040_v9, %v309_v52  ;;  %v346_v14 = vadd.f32 %v6040_v9, %v310_v56  ;;  %v984_v29 = vshrl.u32 %v932_v34, 16  ;;  %4059 = vmatpush.bf16.msrb.mxu1 %v5653_v3  ;;  %v834_v33 = vld [vmem:[#allocation2 + $0x24] sm:$0xf] }
  0x60   : > { %v5599_v59 = vld [vmem:[#allocation2 + $0x18] sm:$0xff]  ;;  %v679_v7 = vsel %vm6076_vm4, %v671_v36, %v678_v55  ;;  %892 = vst [vmem:[#allocation2 + $0x84] sm:$0xf] %v891_v5  ;;  %v741_v41 = vshrl.u32 %v434_v1, 16  ;;  %v744_v13 = vshll.u32 %v434_v1, 16  ;;  %v735_v15 = vrot.slane %v733_v6, 7 }
  0x61   : > { %4001 = vmatmul.bf16.gmra.mxu1 %v5603_v25  ;;  %893 = vst [vmem:[#allocation2 + $0x88] sm:$0xf] %v679_v7  ;;  %v377_v57 = vmax.f32 %v345_v58, 0.0  ;;  %v378_v21 = vmax.f32 %v346_v14, 0.0  ;;  %v5677_v25 = vld [vmem:[%s7987_s3 + $0x100] sm:$0xff]  ;;  %v987_v44 = vshll.u32 %v932_v34, 16 }
  0x62   : > { %v6501_v19 = vrot.slane %v741_v41, 7  ;;  %v738_v9 = vor.u32 %v736_v62, %v735_v15  ;;  %v739_v16 = vrot.slane %v735_v15, 4  ;;  %v986_v32 = vrot.slane %v984_v29, 4  ;;  %4326 = vmatpush.bf16.msrb.mxu0 %v5677_v25  ;;  %v1546_v5 = vld [vmem:[#allocation2 + $0xc] sm:$0xf]  ;;  %v5700_v34 = vld [vmem:[%s7987_s3 + $0x1b8] sm:$0xff] }
  0x63   : > { %v409_v35 = vpack.c.bf16 %v377_v57, %v377_v57  ;;  %v410_v31 = vpack.c.bf16 %v378_v21, %v378_v21  ;;  %v989_v49 = vrot.slane %v987_v44, 5  ;;  %v993_v50 = vshll.u32 %v6506_v60, 16  ;;  %v5604_v56 = vld [vmem:[#allocation2 + $0x54] sm:$0xff]  ;;  %4497 = vmatpush.bf16.msra.mxu2 %v5700_v34 }
  0x64   : > { %v746_v23 = vor.u32 %v744_v13, %v6501_v19  ;;  %v919_v39 = vsel %vm6087_vm5, %v738_v9, %v918_v20  ;;  %v997_v52 = vshrl.u32 %v6506_v60, 16  ;;  %v1003_v1 = vshll.u32 %v6511_v28, 16  ;;  %v5708_v7 = vld [vmem:[%s7987_s3 + $0x1f8] sm:$0xff]  ;;  %v1578_v21 = vld [vmem:[#allocation2 + $0x14] sm:$0x1] }
  0x65   : > { %v529_v17 = vshrl.u32 %v409_v35, 16  ;;  %v532_v26 = vshll.u32 %v409_v35, 16  ;;  %920 = vst [vmem:[#allocation2 + $0xb4] sm:$0xf] %v919_v39  ;;  %v537_v53 = vshrl.u32 %v410_v31, 16  ;;  %v540_v8 = vshll.u32 %v410_v31, 16  ;;  %4586 = vmatpush.bf16.msra.mxu3 %v5708_v7 }
  0x66   : > { %v747_v46 = vsel %vm6076_vm4, %v739_v16, %v746_v23  ;;  %v990_v51 = vor.u32 %v989_v49, %v986_v32  ;;  %v995_v55 = vrot.slane %v993_v50, 5  ;;  %v999_v2 = vrot.slane %v997_v52, 4  ;;  %v5692_v57 = vld [vmem:[%s7987_s3 + $0x178] sm:$0xff]  ;;  %4675 = vmatpush.bf16.msra.mxu0 %v5716_v18  ;;  %v934_v23 = vld [vmem:[#allocation2 + $0xc] sm:$0xf] }
  0x67   : > { %3981 = vmatmul.bf16.gmra.mxu0 %v5599_v59  ;;  %921 = vst [vmem:[#allocation2 + $0xb8] sm:$0xf] %v747_v46  ;;  %v531_v36 = vrot.slane %v529_v17, 7  ;;  %v6517_v48 = vrot.slane %v537_v53, 7  ;;  %v1547_v59 = vld [vmem:[#allocation2 + $0x10] sm:$0xf]  ;;  %4408 = vmatpush.bf16.msra.mxu1 %v5692_v57 }
  0x68   : > { %v991_v58 = vrot.slane %v990_v51, 4  ;;  %v1000_v3 = vor.u32 %v999_v2, %v995_v55  ;;  %v1005_v14 = vrot.slane %v1003_v1, 5  ;;  %v1595_v15 = vshrl.u32 %v1546_v5, 16  ;;  %v6547_v17 = vld [vmem:[#allocation2 + $0x10] sm:$0xf] }
  0x69   : > { %v534_v61 = vor.u32 %v532_v26, %v531_v36  ;;  %v535_v63 = vrot.slane %v531_v36, 4  ;;  %v542_v6 = vor.u32 %v540_v8, %v6517_v48  ;;  %v1598_v25 = vshll.u32 %v1546_v5, 16  ;;  %v1367_v50 = vld [vmem:[#allocation2] sm:$0xe]  ;;  %v831_v52 = vld [vmem:[#allocation2 + $0x20] sm:$0x1] }
  0x6a   : > { %v1001_v20 = vrot.slane %v1000_v3, 4  ;;  %v1597_v29 = vrot.slane %v1595_v15, 4  ;;  %v1604_v9 = vshll.u32 %v1547_v59, 16  ;;  %v1608_v16 = vshrl.u32 %v1547_v59, 16  ;;  %v6553_v2 = vld [vmem:[#allocation2 + $0x14] sm:$0x1] }
  0x6b   : > { %v835_v62 = vsel %vm6087_vm5, %v534_v61, %v834_v33  ;;  %v543_v41 = vsel %vm6076_vm4, %v535_v63, %v542_v6  ;;  %v996_v35 = vsel %vm6533_vm10, %v991_v58, %v995_v55  ;;  %v1600_v44 = vrot.slane %v1598_v25, 5  ;;  %v5608_v55 = vld [vmem:[#allocation2 + $0x84] sm:$0xff]  ;;  %v1548_v58 = vld [vmem:[#allocation2 + $0x18] sm:$0xf]  ;;  %v5929_v10 = vld [vmem:[#allocation2 + $0x14] sm:$0x1] }
  0x6c   : > { %836 = vst [vmem:[#allocation2 + $0x24] sm:$0xf] %v835_v62  ;;  %v1006_v31 = vsel %vm6533_vm10, %v1001_v20, %v1005_v14  ;;  %v1606_v32 = vrot.slane %v1604_v9, 5  ;;  %v1614_v39 = vshll.u32 %v1578_v21, 16  ;;  %v527_v26 = vrot.slane %v6439_v54, 4 }
  0x6d   : > { %4021 = vmatmul.bf16.gmra.mxu2 %v5607_v37  ;;  %837 = vst [vmem:[#allocation2 + $0x28] sm:$0xf] %v543_v41  ;;  %v1610_v37 = vrot.slane %v1608_v16, 4  ;;  %v1601_v49 = vor.u32 %v1600_v44, %v1597_v29  ;;  %v1008_v53 = vshrl.u32 %v934_v23, 16  ;;  %v2843_v8 = vunpack.c.l.b16 %v996_v35  ;;  %v1549_v21 = vld [vmem:[#allocation2 + $0x1c] sm:$0xf] }
  0x6e   : > { %v2844_v33 = vunpack.c.l.b16 %v1006_v31  ;;  %v1011_v36 = vshll.u32 %v934_v23, 16  ;;  %v1017_v51 = vshll.u32 %v6547_v17, 16  ;;  %v1616_v63 = vrot.slane %v1614_v39, 5  ;;  %v5612_v3 = vld [vmem:[#allocation2 + $0xb4] sm:$0xff] }
  0x6f   : > { %4041 = vmatmul.bf16.gmra.mxu3 %v5611_v24  ;;  %v1436_v24 = vrot.slane %v6506_v60, 5  ;;  %v1611_v46 = vor.u32 %v1610_v37, %v1606_v32  ;;  %v1021_v54 = vshrl.u32 %v6547_v17, 16  ;;  %v1010_v60 = vrot.slane %v1008_v53, 4  ;;  %v936_v31 = vld [vmem:[#allocation2 + $0x18] sm:$0xf] }
  0x70   : > { %v1013_v5 = vrot.slane %v1011_v36, 5  ;;  %v1019_v6 = vrot.slane %v1017_v51, 5  ;;  %v2875_v34 = vpack.c.b16 %v2844_v33, %v2843_v8  ;;  %v5065_v59 = vrot.slane %v1367_v50, 9  ;;  %v838_v33 = vld [vmem:[#allocation2 + $0x2c] sm:$0x1] }
  0x71   : > { %4006 = vmatmul.bf16.gmra.mxu1 %v5604_v56  ;;  %v1602_v56 = vrot.slane %v1601_v49, 4  ;;  %v1612_v61 = vrot.slane %v1611_v46, 4  ;;  %v1023_v62 = vrot.slane %v1021_v54, 4  ;;  %v1438_v7 = vrot.slane %v1436_v24, 4 }
  0x72   : > { %v1439_v41 = vrot.slane %v6511_v28, 5  ;;  %v1027_v18 = vshll.u32 %v6553_v2, 16  ;;  %v832_v20 = vsel %vm6474_vm7, %v527_v26, %v831_v52  ;;  %v1014_v25 = vor.u32 %v1013_v5, %v1010_v60 }
  0x73   : > { %v1607_v15 = vsel %vm6533_vm10, %v1602_v56, %v1606_v32  ;;  %v1617_v57 = vsel %vm6533_vm10, %v1612_v61, %v1616_v63  ;;  %v1024_v28 = vor.u32 %v1023_v62, %v1019_v6  ;;  %833 = vst [vmem:[#allocation2 + $0x20] sm:$0x1] %v832_v20  ;;  %v1619_v29 = vshrl.u32 %v1548_v58, 16  ;;  %v6571_v32 = vld [vmem:[#allocation2 + $0x1c] sm:$0xf] }
  0x74   : > { %v5600_v1 = vld [vmem:[#allocation2 + $0x24] sm:$0xff]  ;;  %v1622_v9 = vshll.u32 %v1548_v58, 16  ;;  %v544_v16 = vrot.slane %v6517_v48, 4  ;;  %v1437_v35 = vsel %vm6557_vm13, %v5065_v59, %v1436_v24  ;;  %v1628_v44 = vshll.u32 %v1549_v21, 16 }
  0x75   : > { %v1632_v23 = vshrl.u32 %v1549_v21, 16  ;;  %v1440_v37 = vsel %vm6557_vm13, %v1438_v7, %v1439_v41  ;;  %v3051_v39 = vunpack.c.l.b16 %v1607_v15  ;;  %v3052_v26 = vunpack.c.l.b16 %v1617_v57  ;;  %v1368_v21 = vld [vmem:[#allocation2 + $0xc] sm:$0xe] }
  0x76   : > { %v1029_v49 = vrot.slane %v1027_v18, 5  ;;  %v1015_v46 = vrot.slane %v1014_v25, 4  ;;  %v1025_v53 = vrot.slane %v1024_v28, 4  ;;  %v1621_v8 = vrot.slane %v1619_v29, 4 }
  0x77   : > { %3986 = vmatmul.bf16.gmra.mxu0 %v5600_v1  ;;  %v1624_v48 = vrot.slane %v1622_v9, 5  ;;  %v1032_v50 = vshrl.u32 %v936_v31, 16  ;;  %v1035_v36 = vshll.u32 %v936_v31, 16  ;;  %v1041_v24 = vshll.u32 %v6571_v32, 16 }
  0x78   : > { %v1630_v51 = vrot.slane %v1628_v44, 5  ;;  %v1634_v52 = vrot.slane %v1632_v23, 4  ;;  %v2907_v1 = vunpack.c.l.b16 %v1437_v35  ;;  %v2908_v56 = vunpack.c.l.b16 %v1440_v37  ;;  %v1550_v23 = vld [vmem:[#allocation2 + $0x24] sm:$0xf] }
  0x79   : > { %v839_v63 = vsel %vm6474_vm7, %v544_v16, %v838_v33  ;;  %v3083_v54 = vpack.c.b16 %v3052_v26, %v3051_v39  ;;  %v1020_v60 = vsel %vm6533_vm10, %v1015_v46, %v1019_v6  ;;  %v1030_v5 = vsel %vm6533_vm10, %v1025_v53, %v1029_v49  ;;  %v5613_v16 = vld [vmem:[#allocation2 + $0xc] sm:$0xff]  ;;  %v1551_v39 = vld [vmem:[#allocation2 + $0x28] sm:$0xf] }
  0x7a   : > { %v1579_v61 = vld [vmem:[#allocation2 + $0x20] sm:$0x1]  ;;  %v1625_v62 = vor.u32 %v1624_v48, %v1621_v8  ;;  %840 = vst [vmem:[#allocation2 + $0x2c] sm:$0x1] %v839_v63  ;;  %v1034_v58 = vrot.slane %v1032_v50, 4  ;;  %v1635_v7 = vor.u32 %v1634_v52, %v1630_v51  ;;  %v2939_v57 = vpack.c.b16 %v2908_v56, %v2907_v1  ;;  %v5715_v1 = vld [vmem:[%s7987_s3 + $0x230] sm:$0xff] }
  0x7b   : > { %v1638_v41 = vshll.u32 %v1579_v61, 16  ;;  %v6585_v15 = vld [vmem:[#allocation2 + $0x20] sm:$0x1]  ;;  %v2845_v18 = vunpack.c.l.b16 %v1020_v60  ;;  %v2846_v20 = vunpack.c.l.b16 %v1030_v5  ;;  %v1443_v6 = vrot.slane %v6547_v17, 5  ;;  %v845_v50 = vld [vmem:[#allocation2 + $0x38] sm:$0x1]  ;;  %4676 = vmatpush.bf16.msra.mxu0 %v5715_v1 }
  0x7c   : > { %v1626_v25 = vrot.slane %v1625_v62, 4  ;;  %v1051_v9 = vshll.u32 %v6585_v15, 16  ;;  %v1636_v35 = vrot.slane %v1635_v7, 4  ;;  %v561_v31 = vrot.slane %v6080_v40, 4  ;;  %v5699_v40 = vld [vmem:[%s7987_s3 + $0x1b0] sm:$0xff] }
  0x7d   : > { %4026 = vmatmul.bf16.gmra.mxu2 %v5608_v55  ;;  %v1045_v55 = vshrl.u32 %v6571_v32, 16  ;;  %v1640_v44 = vrot.slane %v1638_v41, 5  ;;  %v5066_v37 = vrot.slane %v1368_v21, 9  ;;  %v2876_v26 = vpack.c.b16 %v2846_v20, %v2845_v18  ;;  %v6614_v60 = vld [vmem:[#allocation2 + $0x28] sm:$0xf] }
  0x7e   : > { %v1445_v49 = vrot.slane %v1443_v6, 4  ;;  %v1446_v17 = vrot.slane %v6553_v2, 5  ;;  %v1631_v46 = vsel %vm6533_vm10, %v1626_v25, %v1630_v51  ;;  %v1053_v48 = vrot.slane %v1051_v9, 5  ;;  %v5707_v2 = vld [vmem:[%s7987_s3 + $0x1f0] sm:$0xff]  ;;  %4498 = vmatpush.bf16.msra.mxu2 %v5699_v40 }
  0x7f   : > { %4046 = vmatmul.bf16.gmra.mxu3 %v5612_v3  ;;  %v1037_v3 = vrot.slane %v1035_v36, 5  ;;  %v1047_v59 = vrot.slane %v1045_v55, 4  ;;  %v1643_v33 = vshrl.u32 %v1550_v23, 16  ;;  %v1641_v36 = vsel %vm6533_vm10, %v1636_v35, %v1640_v44  ;;  %v5691_v51 = vld [vmem:[%s7987_s3 + $0x170] sm:$0xff]  ;;  %v1369_v44 = vld [vmem:[#allocation2 + $0x18] sm:$0xe] }
  0x80   : > { %v1652_v52 = vshll.u32 %v1551_v39, 16  ;;  %v1656_v55 = vshrl.u32 %v1551_v39, 16  ;;  %v846_v56 = vsel %vm6474_vm7, %v561_v31, %v845_v50  ;;  %v1444_v61 = vsel %vm6557_vm13, %v5066_v37, %v1443_v6  ;;  %4587 = vmatpush.bf16.msra.mxu3 %v5707_v2  ;;  %4409 = vmatpush.bf16.msra.mxu1 %v5691_v51  ;;  %v1552_v50 = vld [vmem:[#allocation2 + $0x30] sm:$0xf] }
  0x81   : > { %4060 = vmatmul.bf16.vlgmr.msrb.gmra.mxu1 %v2875_v34  ;;  %v6583_v34 = vrot.slane %v1041_v24, 5  ;;  %v1038_v28 = vor.u32 %v1037_v3, %v1034_v58  ;;  %v1646_v24 = vshll.u32 %v1550_v23, 16  ;;  %v1447_v63 = vsel %vm6557_vm13, %v1445_v49, %v1446_v17  ;;  %847 = vst [vmem:[#allocation2 + $0x38] sm:$0x1] %v846_v56  ;;  %v1580_v18 = vld [vmem:[#allocation2 + $0x2c] sm:$0x1] }
  0x82   : > { %v3053_v5 = vunpack.c.l.b16 %v1631_v46  ;;  %v3054_v62 = vunpack.c.l.b16 %v1641_v36  ;;  %v1645_v3 = vrot.slane %v1643_v33, 4  ;;  %v1654_v41 = vrot.slane %v1652_v52, 5  ;;  %v5614_v36 = vld [vmem:[#allocation2 + $0x18] sm:$0xff] }
  0x83   : > { %v1048_v29 = vor.u32 %v1047_v59, %v6583_v34  ;;  %v1039_v53 = vrot.slane %v1038_v28, 4  ;;  %v1648_v7 = vrot.slane %v1646_v24, 5  ;;  %v1065_v6 = vshll.u32 %v6614_v60, 16 }
  0x84   : > { %v1069_v25 = vshrl.u32 %v6614_v60, 16  ;;  %v2909_v28 = vunpack.c.l.b16 %v1444_v61  ;;  %v1662_v37 = vshll.u32 %v1580_v18, 16  ;;  %v578_v46 = vrot.slane %v6204_v11, 4 }
  0x85   : > { %v1049_v8 = vrot.slane %v1048_v29, 4  ;;  %v1044_v58 = vsel %vm6533_vm10, %v1039_v53, %v6583_v34  ;;  %v2910_v34 = vunpack.c.l.b16 %v1447_v63  ;;  %v3084_v29 = vpack.c.b16 %v3054_v62, %v3053_v5  ;;  %v852_v5 = vld [vmem:[#allocation2 + $0x44] sm:$0x1] }
  0x86   : > { %v2847_v9 = vunpack.c.l.b16 %v1044_v58  ;;  %v1649_v23 = vor.u32 %v1648_v7, %v1645_v3  ;;  %v1067_v49 = vrot.slane %v1065_v6, 5  ;;  %v1071_v17 = vrot.slane %v1069_v25, 4 }
  0x87   : > { %4327 = vmatmul.bf16.vlgmr.msrb.gmra.mxu0 %v3083_v54  ;;  %v938_v54 = vld [vmem:[#allocation2 + $0x24] sm:$0xf]  ;;  %v1054_v59 = vsel %vm6533_vm10, %v1049_v8, %v1053_v48  ;;  %v2940_v53 = vpack.c.b16 %v2910_v34, %v2909_v28  ;;  %v6625_v8 = vld [vmem:[#allocation2 + $0x2c] sm:$0x1]  ;;  %v5067_v48 = vrot.slane %v1369_v44, 9  ;;  %v1453_v33 = vrot.slane %v6585_v15, 5 }
  0x88   : > { %v1056_v20 = vshrl.u32 %v938_v54, 16  ;;  %v1059_v21 = vshll.u32 %v938_v54, 16  ;;  %v2848_v35 = vunpack.c.l.b16 %v1054_v59  ;;  %v1650_v24 = vrot.slane %v1649_v23, 4  ;;  %v940_v34 = vld [vmem:[#allocation2 + $0x30] sm:$0xf] }
  0x89   : > { %v1072_v1 = vor.u32 %v1071_v17, %v1067_v49  ;;  %v1075_v56 = vshll.u32 %v6625_v8, 16  ;;  %v1667_v11 = vshrl.u32 %v1552_v50, 16  ;;  %v1670_v61 = vshll.u32 %v1552_v50, 16 }
  0x8a   : > { %v1058_v39 = vrot.slane %v1056_v20, 4  ;;  %v2877_v2 = vpack.c.b16 %v2848_v35, %v2847_v9  ;;  %v1655_v62 = vsel %vm6533_vm10, %v1650_v24, %v1654_v41  ;;  %v853_v3 = vsel %vm6474_vm7, %v578_v46, %v852_v5  ;;  %v1581_v9 = vld [vmem:[#allocation2 + $0x38] sm:$0x1] }
  0x8b   : > { %v1077_v18 = vrot.slane %v1075_v56, 5  ;;  %v1669_v20 = vrot.slane %v1667_v11, 4  ;;  %v3055_v28 = vunpack.c.l.b16 %v1655_v62  ;;  %854 = vst [vmem:[#allocation2 + $0x44] sm:$0x1] %v853_v3  ;;  %v6653_v56 = vld [vmem:[#allocation2 + $0x38] sm:$0x1] }
  0x8c   : > { %v595_v11 = vrot.slane %v6363_v30, 4 }
  0x8d   : > { %4149 = vmatmul.bf16.vlgmr.msrb.gmra.mxu2 %v2939_v57  ;;  %v1658_v57 = vrot.slane %v1656_v55, 4  ;;  %v1664_v55 = vrot.slane %v1662_v37, 5  ;;  %v1083_v37 = vshll.u32 %v940_v34, 16 }
  0x8f   : > { %4238 = vmatmul.bf16.vlgmr.msrb.gmra.mxu3 %v5613_v16  ;;  %v1450_v16 = vrot.slane %v6571_v32, 5  ;;  %v1659_v31 = vor.u32 %v1658_v57, %v1654_v41  ;;  %v1553_v32 = vld [vmem:[#allocation2 + $0x34] sm:$0xf]  ;;  %v1073_v57 = vrot.slane %v1072_v1, 4  ;;  %v1085_v24 = vrot.slane %v1083_v37, 5  ;;  %v5690_v37 = vld [vmem:[%s7987_s3 + $0x168] sm:$0xff] }
  0x90   : > { %v1676_v63 = vshll.u32 %v1553_v32, 16  ;;  %v1680_v54 = vshrl.u32 %v1553_v32, 16  ;;  %4410 = vmatpush.bf16.msra.mxu1 %v5690_v37 }
  0x91   : > { %4065 = vmatmul.bf16.gmra.mxu1 %v2876_v26  ;;  %v1061_v26 = vrot.slane %v1059_v21, 5  ;;  %v1452_v40 = vrot.slane %v1450_v16, 4  ;;  %v1660_v52 = vrot.slane %v1659_v31, 4  ;;  %v1451_v15 = vsel %vm6557_vm13, %v5067_v48, %v1450_v16 }
  0x92   : > { %v1672_v21 = vrot.slane %v1670_v61, 5  ;;  %v6639_v6 = vrot.slane %v1676_v63, 5  ;;  %v1682_v25 = vrot.slane %v1680_v54, 4  ;;  %v2911_v16 = vunpack.c.l.b16 %v1451_v15  ;;  %v5615_v61 = vld [vmem:[#allocation2 + $0x24] sm:$0xff]  ;;  %v1554_v63 = vld [vmem:[#allocation2 + $0x3c] sm:$0xf] }
  0x93   : > { %v1062_v51 = vor.u32 %v1061_v26, %v1058_v39  ;;  %v1665_v58 = vsel %vm6533_vm10, %v1660_v52, %v1664_v55  ;;  %v1454_v59 = vsel %vm6557_vm13, %v1452_v40, %v1453_v33  ;;  %v1078_v23 = vsel %vm6533_vm10, %v1073_v57, %v1077_v18  ;;  %v1555_v15 = vld [vmem:[#allocation2 + $0x40] sm:$0xf]  ;;  %v859_v18 = vld [vmem:[#allocation2 + $0x50] sm:$0x1] }
  0x94   : > { %v3056_v41 = vunpack.c.l.b16 %v1665_v58  ;;  %v2912_v35 = vunpack.c.l.b16 %v1454_v59  ;;  %v1080_v31 = vshrl.u32 %v940_v34, 16  ;;  %v1673_v46 = vor.u32 %v1672_v21, %v1669_v20 }
  0x95   : > { %v1063_v7 = vrot.slane %v1062_v51, 4  ;;  %v1686_v48 = vshll.u32 %v1581_v9, 16  ;;  %v2850_v32 = vunpack.c.l.b16 %v1078_v23  ;;  %v1099_v59 = vshll.u32 %v6653_v56, 16 }
  0x96   : > { %v3085_v17 = vpack.c.b16 %v3056_v41, %v3055_v28  ;;  %v2941_v33 = vpack.c.b16 %v2912_v35, %v2911_v16  ;;  %v1082_v40 = vrot.slane %v1080_v31, 4  ;;  %v1691_v57 = vshrl.u32 %v1554_v63, 16  ;;  %v5706_v28 = vld [vmem:[%s7987_s3 + $0x1e8] sm:$0xff] }
  0x97   : > { %4332 = vmatmul.bf16.gmra.mxu0 %v3084_v29  ;;  %v6641_v29 = vld [vmem:[#allocation2 + $0x34] sm:$0xf]  ;;  %v1068_v44 = vsel %vm6533_vm10, %v1063_v7, %v1067_v49  ;;  %v1370_v49 = vld [vmem:[#allocation2 + $0x24] sm:$0xe]  ;;  %v1688_v1 = vrot.slane %v1686_v48, 5  ;;  %v1694_v20 = vshll.u32 %v1554_v63, 16  ;;  %4588 = vmatpush.bf16.msra.mxu3 %v5706_v28 }
  0x98   : > { %v1089_v39 = vshll.u32 %v6641_v29, 16  ;;  %v1093_v26 = vshrl.u32 %v6641_v29, 16  ;;  %v2849_v50 = vunpack.c.l.b16 %v1068_v44  ;;  %v5068_v54 = vrot.slane %v1370_v49, 9  ;;  %v942_v44 = vld [vmem:[#allocation2 + $0x3c] sm:$0xf] }
  0x99   : > { %v1086_v58 = vor.u32 %v1085_v24, %v1082_v40  ;;  %v1700_v21 = vshll.u32 %v1555_v15, 16  ;;  %v1101_v35 = vrot.slane %v1099_v59, 5  ;;  %v1107_v49 = vshll.u32 %v942_v44, 16 }
  0x9a   : > { %v6651_v52 = vrot.slane %v1089_v39, 5  ;;  %v1095_v55 = vrot.slane %v1093_v26, 4  ;;  %v2878_v62 = vpack.c.b16 %v2850_v32, %v2849_v50  ;;  %v5714_v39 = vld [vmem:[%s7987_s3 + $0x228] sm:$0xff]  ;;  %v6682_v26 = vld [vmem:[#allocation2 + $0x40] sm:$0xf] }
  0x9b   : > { %v1087_v9 = vrot.slane %v1086_v58, 4  ;;  %v1582_v32 = vld [vmem:[#allocation2 + $0x44] sm:$0x1]  ;;  %4677 = vmatpush.bf16.msra.mxu0 %v5714_v39 }
  0x9c   : > { %v1096_v3 = vor.u32 %v1095_v55, %v6651_v52  ;;  %v1113_v55 = vshll.u32 %v6682_v26, 16 }
  0x9d   : > { %4154 = vmatmul.bf16.gmra.mxu2 %v2940_v53  ;;  %v1683_v53 = vor.u32 %v1682_v25, %v6639_v6  ;;  %v1704_v25 = vshrl.u32 %v1555_v15, 16  ;;  %v1092_v40 = vsel %vm6533_vm10, %v1087_v9, %v6651_v52  ;;  %v612_v52 = vrot.slane %v6445_v12, 4 }
  0x9e   : > { %v1097_v16 = vrot.slane %v1096_v3, 4  ;;  %v1115_v3 = vrot.slane %v1113_v55, 5 }
  0x9f   : > { %4243 = vmatmul.bf16.gmra.mxu3 %v5614_v36  ;;  %v1457_v36 = vrot.slane %v6614_v60, 5  ;;  %v1684_v51 = vrot.slane %v1683_v53, 4  ;;  %v1460_v60 = vrot.slane %v6625_v8, 5  ;;  %v5698_v8 = vld [vmem:[%s7987_s3 + $0x1a8] sm:$0xff]  ;;  %v6684_v53 = vrot.slane %v1700_v21, 5 }
  0xa0   : > { %4499 = vmatpush.bf16.msra.mxu2 %v5698_v8  ;;  %v1706_v48 = vrot.slane %v1704_v25, 4  ;;  %v1102_v24 = vsel %vm6533_vm10, %v1097_v16, %v1101_v35  ;;  %v1557_v8 = vld [vmem:[#allocation2 + $0x4c] sm:$0xf] }
  0xa1   : > { %4070 = vmatmul.bf16.gmra.mxu1 %v2877_v2  ;;  %v1674_v2 = vrot.slane %v1673_v46, 4  ;;  %v1459_v5 = vrot.slane %v1457_v36, 4  ;;  %v1689_v30 = vsel %vm6533_vm10, %v1684_v51, %v1688_v1  ;;  %v1458_v41 = vsel %vm6557_vm13, %v5068_v54, %v1457_v36  ;;  %v1371_v1 = vld [vmem:[#allocation2 + $0x30] sm:$0xe] }
  0xa2   : > { %v3058_v31 = vunpack.c.l.b16 %v1689_v30  ;;  %v1696_v46 = vrot.slane %v1694_v20, 5  ;;  %v1104_v36 = vshrl.u32 %v942_v44, 16  ;;  %v1707_v63 = vor.u32 %v1706_v48, %v6684_v53  ;;  %v5616_v20 = vld [vmem:[#allocation2 + $0x30] sm:$0xff] }
  0xa3   : > { %v1679_v7 = vsel %vm6533_vm10, %v1674_v2, %v6639_v6  ;;  %v860_v6 = vsel %vm6474_vm7, %v595_v11, %v859_v18  ;;  %v1461_v34 = vsel %vm6557_vm13, %v1459_v5, %v1460_v60  ;;  %v1117_v2 = vshrl.u32 %v6682_v26, 16  ;;  %v6699_v18 = vld [vmem:[#allocation2 + $0x44] sm:$0x1] }
  0xa4   : > { %861 = vst [vmem:[#allocation2 + $0x50] sm:$0x1] %v860_v6  ;;  %v3057_v23 = vunpack.c.l.b16 %v1679_v7  ;;  %v2914_v50 = vunpack.c.l.b16 %v1461_v34  ;;  %v1464_v11 = vrot.slane %v6641_v29, 5  ;;  %v1710_v54 = vshll.u32 %v1582_v32, 16  ;;  %v1556_v7 = vld [vmem:[#allocation2 + $0x48] sm:$0xf] }
  0xa5   : > { %v2851_v5 = vunpack.c.l.b16 %v1092_v40  ;;  %v2852_v60 = vunpack.c.l.b16 %v1102_v24  ;;  %v1106_v15 = vrot.slane %v1104_v36, 4  ;;  %v1119_v59 = vrot.slane %v1117_v2, 4 }
  0xa6   : > { %v3086_v51 = vpack.c.b16 %v3058_v31, %v3057_v23  ;;  %v1467_v29 = vrot.slane %v6653_v56, 5  ;;  %v1466_v21 = vrot.slane %v1464_v11, 4  ;;  %v1708_v28 = vrot.slane %v1707_v63, 4  ;;  %v866_v31 = vld [vmem:[#allocation2 + $0x5c] sm:$0x1] }
  0xa7   : > { %4337 = vmatmul.bf16.gmra.mxu0 %v3085_v17  ;;  %v1693_v17 = vrot.slane %v1691_v57, 4  ;;  %v5069_v57 = vrot.slane %v1371_v1, 9  ;;  %v1712_v6 = vrot.slane %v1710_v54, 5  ;;  %v1715_v34 = vshrl.u32 %v1556_v7, 16 }
  0xa8   : > { %v6696_v30 = vpop.f32.mrf.mxu1  ;;  %v1718_v9 = vshll.u32 %v1556_v7, 16  ;;  %v1120_v16 = vor.u32 %v1119_v59, %v1115_v3  ;;  %v1123_v35 = vshll.u32 %v6699_v18, 16  ;;  %v1724_v44 = vshll.u32 %v1557_v8, 16 }
  0xa9   : > { %v1728_v23 = vshrl.u32 %v1557_v8, 16  ;;  %v1465_v56 = vsel %vm6557_vm13, %v5069_v57, %v1464_v11  ;;  %v1713_v39 = vsel %vm6533_vm10, %v1708_v28, %v1712_v6  ;;  %v1468_v48 = vsel %vm6557_vm13, %v1466_v21, %v1467_v29  ;;  %v1372_v21 = vld [vmem:[#allocation2 + $0x3c] sm:$0xe] }
  0xaa   : > { %v1720_v32 = vrot.slane %v1718_v9, 5  ;;  %v1121_v36 = vrot.slane %v1120_v16, 4  ;;  %v3060_v2 = vunpack.c.l.b16 %v1713_v39  ;;  %v2915_v1 = vunpack.c.l.b16 %v1465_v56 }
  0xab   : > { %v1583_v40 = vld [vmem:[#allocation2 + $0x50] sm:$0x1]  ;;  %v1730_v24 = vrot.slane %v1728_v23, 4  ;;  %v2916_v11 = vunpack.c.l.b16 %v1468_v48  ;;  %v629_v9 = vrot.slane %v6121_v0, 4  ;;  %v5617_v23 = vld [vmem:[#allocation2 + $0x3c] sm:$0xff] }
  0xac   : > { %v6734_v56 = vld [vmem:[#allocation2 + $0x50] sm:$0x1] }
  0xad   : > { %4159 = vmatmul.bf16.gmra.mxu2 %v2941_v33  ;;  %v2913_v33 = vunpack.c.l.b16 %v1458_v41  ;;  %v2879_v41 = vpack.c.b16 %v2852_v60, %v2851_v5  ;;  %v1734_v60 = vshll.u32 %v1583_v40, 16  ;;  %v2943_v29 = vpack.c.b16 %v2916_v11, %v2915_v1 }
  0xae   : > { %v1147_v40 = vshll.u32 %v6734_v56, 16 }
  0xaf   : > { %4248 = vmatmul.bf16.gmra.mxu3 %v5615_v61  ;;  %v1697_v61 = vor.u32 %v1696_v46, %v1693_v17  ;;  %v2942_v58 = vpack.c.b16 %v2914_v50, %v2913_v33  ;;  %v867_v17 = vsel %vm6474_vm7, %v612_v52, %v866_v31  ;;  %v6711_v46 = vpop.f32.mrf.mxu0  ;;  %v1717_v50 = vrot.slane %v1715_v34, 4  ;;  %v1558_v34 = vld [vmem:[#allocation2 + $0x54] sm:$0xf] }
  0xb0   : > { %868 = vst [vmem:[#allocation2 + $0x5c] sm:$0x1] %v867_v17  ;;  %v6719_v63 = vpop.f32.mrf.mxu1  ;;  %v1736_v6 = vrot.slane %v1734_v60, 5  ;;  %v5070_v31 = vrot.slane %v1372_v21, 9  ;;  %v1474_v17 = vrot.slane %v6699_v18, 5  ;;  %v1739_v48 = vshrl.u32 %v1558_v34, 16 }
  0xb1   : > { %4075 = vmatmul.bf16.gmra.mxu1 %v2878_v62  ;;  %v1109_v62 = vrot.slane %v1107_v49, 5  ;;  %v1698_v25 = vrot.slane %v1697_v61, 4  ;;  %v1125_v49 = vrot.slane %v1123_v35, 5  ;;  %v6717_v61 = vld [vmem:[#allocation2 + $0x4c] sm:$0xf]  ;;  %v1721_v5 = vor.u32 %v1720_v32, %v1717_v50  ;;  %v5689_v21 = vld [vmem:[%s7987_s3 + $0x160] sm:$0xff] }
  0xb2   : > { %v1137_v7 = vshll.u32 %v6717_v61, 16  ;;  %v1141_v57 = vshrl.u32 %v6717_v61, 16  ;;  %v1742_v32 = vshll.u32 %v1558_v34, 16  ;;  %v873_v18 = vld [vmem:[#allocation2 + $0x68] sm:$0x1]  ;;  %4411 = vmatpush.bf16.msra.mxu1 %v5689_v21 }
  0xb3   : > { %v1110_v12 = vor.u32 %v1109_v62, %v1106_v15  ;;  %v1703_v37 = vsel %vm6533_vm10, %v1698_v25, %v6684_v53  ;;  %v6715_v53 = vrot.slane %v1724_v44, 5  ;;  %v1126_v15 = vsel %vm6533_vm10, %v1121_v36, %v1125_v49 }
  0xb4   : > { %v3059_v55 = vunpack.c.l.b16 %v1703_v37  ;;  %v1722_v25 = vrot.slane %v1721_v5, 4  ;;  %v6732_v35 = vrot.slane %v1137_v7, 5  ;;  %v1143_v44 = vrot.slane %v1141_v57, 4  ;;  %v1559_v37 = vld [vmem:[#allocation2 + $0x58] sm:$0xf] }
  0xb5   : > { %v1111_v33 = vrot.slane %v1110_v12, 4  ;;  %v1731_v62 = vor.u32 %v1730_v24, %v6715_v53  ;;  %v1748_v24 = vshll.u32 %v1559_v37, 16  ;;  %v1741_v5 = vrot.slane %v1739_v48, 4 }
  0xb6   : > { %v3087_v59 = vpack.c.b16 %v3060_v2, %v3059_v55  ;;  %v1727_v0 = vsel %vm6533_vm10, %v1722_v25, %v6715_v53  ;;  %v1144_v49 = vor.u32 %v1143_v44, %v6732_v35  ;;  %v1752_v55 = vshrl.u32 %v1559_v37, 16  ;;  %v5697_v2 = vld [vmem:[%s7987_s3 + $0x1a0] sm:$0xff] }
  0xb7   : > { %4342 = vmatmul.bf16.gmra.mxu0 %v3086_v51  ;;  %v944_v51 = vld [vmem:[#allocation2 + $0x48] sm:$0xf]  ;;  %v1116_v54 = vsel %vm6533_vm10, %v1111_v33, %v1115_v3  ;;  %v1471_v3 = vrot.slane %v6682_v26, 5  ;;  %v1732_v28 = vrot.slane %v1731_v62, 4  ;;  %v6730_v16 = vpop.f32.mrf.mxu0  ;;  %v5705_v53 = vld [vmem:[%s7987_s3 + $0x1e0] sm:$0xff]  ;;  %v3061_v60 = vunpack.c.l.b16 %v1727_v0  ;;  %4500 = vmatpush.bf16.msra.mxu2 %v5697_v2 }
  0xb8   : > { %v1128_v52 = vshrl.u32 %v944_v51, 16  ;;  %v2853_v8 = vunpack.c.l.b16 %v1116_v54  ;;  %v1145_v57 = vrot.slane %v1144_v49, 4  ;;  %4589 = vmatpush.bf16.msra.mxu3 %v5705_v53  ;;  %v1584_v25 = vld [vmem:[#allocation2 + $0x5c] sm:$0x1]  ;;  %v1560_v49 = vld [vmem:[#allocation2 + $0x60] sm:$0xf] }
  0xb9   : > { %v1473_v39 = vrot.slane %v1471_v3, 4  ;;  %v1737_v33 = vsel %vm6533_vm10, %v1732_v28, %v1736_v6  ;;  %v1472_v11 = vsel %vm6557_vm13, %v5070_v31, %v1471_v3  ;;  %v5713_v3 = vld [vmem:[%s7987_s3 + $0x220] sm:$0xff]  ;;  %v1758_v48 = vshll.u32 %v1584_v25, 16 }
  0xba   : > { %4678 = vmatpush.bf16.msra.mxu0 %v5713_v3 }
  0xbb   : > { %v1475_v54 = vsel %vm6557_vm13, %v1473_v39, %v1474_v17 }
  0xbc   : > { %v2918_v44 = vunpack.c.l.b16 %v1475_v54  ;;  %v1373_v54 = vld [vmem:[#allocation2 + $0x48] sm:$0xe] }
  0xbd   : > { %4164 = vmatmul.bf16.gmra.mxu2 %v2942_v58  ;;  %v1131_v58 = vshll.u32 %v944_v51, 16  ;;  %v874_v51 = vsel %vm6474_vm7, %v629_v9, %v873_v18  ;;  %v2917_v9 = vunpack.c.l.b16 %v1472_v11 }
  0xbe   : > { %875 = vst [vmem:[#allocation2 + $0x68] sm:$0x1] %v874_v51  ;;  %v1561_v51 = vld [vmem:[#allocation2 + $0x64] sm:$0xf] }
  0xbf   : > { %4253 = vmatmul.bf16.gmra.mxu3 %v5616_v20  ;;  %v2854_v20 = vunpack.c.l.b16 %v1126_v15  ;;  %v1133_v12 = vrot.slane %v1131_v58, 5  ;;  %v3062_v15 = vunpack.c.l.b16 %v1737_v33  ;;  %v946_v58 = vld [vmem:[#allocation2 + $0x54] sm:$0xf]  ;;  %v1776_v3 = vshrl.u32 %v1561_v51, 16 }
  0xc0   : > { %v1152_v28 = vshrl.u32 %v946_v58, 16  ;;  %v1155_v6 = vshll.u32 %v946_v58, 16  ;;  %v5618_v58 = vld [vmem:[#allocation2 + $0x48] sm:$0xff] }
  0xc1   : > { %4080 = vmatmul.bf16.gmra.mxu1 %v2879_v41  ;;  %v1130_v41 = vrot.slane %v1128_v52, 4  ;;  %v2880_v26 = vpack.c.b16 %v2854_v20, %v2853_v8  ;;  %v1744_v52 = vrot.slane %v1742_v32, 5  ;;  %v6764_v8 = vrot.slane %v1748_v24, 5 }
  0xc2   : > { %v1754_v20 = vrot.slane %v1752_v55, 4  ;;  %v1154_v0 = vrot.slane %v1152_v28, 4  ;;  %v1157_v33 = vrot.slane %v1155_v6, 5  ;;  %v2944_v24 = vpack.c.b16 %v2918_v44, %v2917_v9  ;;  %v6788_v55 = vld [vmem:[#allocation2 + $0x5c] sm:$0x1] }
  0xc3   : > { %v1134_v50 = vor.u32 %v1133_v12, %v1130_v41  ;;  %v1745_v31 = vor.u32 %v1744_v52, %v1741_v5  ;;  %v646_v52 = vrot.slane %v6229_v27, 4  ;;  %v5071_v28 = vrot.slane %v1373_v54, 9 }
  0xc4   : > { %v1755_v17 = vor.u32 %v1754_v20, %v6764_v8  ;;  %v1171_v20 = vshll.u32 %v6788_v55, 16 }
  0xc5   : > { %v1135_v62 = vrot.slane %v1134_v50, 4  ;;  %v1746_v53 = vrot.slane %v1745_v31, 4  ;;  %v880_v31 = vld [vmem:[#allocation2 + $0x74] sm:$0x1] }
  0xc6   : > { %v1756_v5 = vrot.slane %v1755_v17, 4  ;;  %v1173_v17 = vrot.slane %v1171_v20, 5 }
  0xc7   : > { %4347 = vmatmul.bf16.gmra.mxu0 %v3087_v59  ;;  %v6760_v59 = vld [vmem:[#allocation2 + $0x58] sm:$0xf]  ;;  %v1751_v27 = vsel %vm6533_vm10, %v1746_v53, %v6764_v8  ;;  %v1585_v8 = vld [vmem:[#allocation2 + $0x68] sm:$0x1] }
  0xc8   : > { %v1161_v41 = vshll.u32 %v6760_v59, 16  ;;  %v1165_v12 = vshrl.u32 %v6760_v59, 16 }
  0xca   : > { %v6784_v50 = vrot.slane %v1161_v41, 5  ;;  %v1167_v32 = vrot.slane %v1165_v12, 4  ;;  %v1481_v41 = vrot.slane %v6734_v56, 5 }
  0xcd   : > { %4169 = vmatmul.bf16.gmra.mxu2 %v2943_v29  ;;  %v1149_v29 = vrot.slane %v1147_v40, 5 }
  0xce   : > { %v6742_v36 = vpop.f32.mrf.mxu1 }
  0xcf   : > { %4258 = vmatmul.bf16.gmra.mxu3 %v5617_v23  ;;  %v3088_v23 = vpack.c.b16 %v3062_v15, %v3061_v60  ;;  %v1150_v39 = vsel %vm6533_vm10, %v1145_v57, %v1149_v29  ;;  %v1760_v60 = vrot.slane %v1758_v48, 5  ;;  %v1763_v15 = vshrl.u32 %v1560_v49, 16 }
  0xd0   : > { %v6754_v1 = vpop.f32.mrf.mxu2  ;;  %v2856_v2 = vunpack.c.l.b16 %v1150_v39  ;;  %v1158_v57 = vor.u32 %v1157_v33, %v1154_v0  ;;  %v1168_v29 = vor.u32 %v1167_v32, %v6784_v50  ;;  %v881_v48 = vsel %vm6474_vm7, %v646_v52, %v880_v31  ;;  %v948_v32 = vld [vmem:[#allocation2 + $0x60] sm:$0xf] }
  0xd1   : > { %4085 = vmatmul.bf16.gmra.mxu1 %v2880_v26  ;;  %v1140_v26 = vsel %vm6533_vm10, %v1135_v62, %v6732_v35  ;;  %v1478_v35 = vrot.slane %v6717_v61, 5  ;;  %v1766_v62 = vshll.u32 %v1560_v49, 16  ;;  %v1772_v61 = vshll.u32 %v1561_v51, 16  ;;  %882 = vst [vmem:[#allocation2 + $0x74] sm:$0x1] %v881_v48 }
  0xd2   : > { %v6762_v7 = vpop.f32.mrf.mxu3  ;;  %v2855_v18 = vunpack.c.l.b16 %v1140_v26  ;;  %v1761_v9 = vsel %vm6533_vm10, %v1756_v5, %v1760_v60  ;;  %v1765_v44 = vrot.slane %v1763_v15, 4  ;;  %v1159_v26 = vrot.slane %v1158_v57, 4  ;;  %v6818_v51 = vld [vmem:[#allocation2 + $0x64] sm:$0xf] }
  0xd3   : > { %8000 = vst [vmem:[#allocation3_spill] sm:$0xff] %v6762_v7  ;;  %v1480_v6 = vrot.slane %v1478_v35, 4  ;;  %v1169_v39 = vrot.slane %v1168_v29, 4  ;;  %v6810_v0 = vrot.slane %v1772_v61, 5  ;;  %v1778_v33 = vrot.slane %v1776_v3, 4 }
  0xd4   : > { %v6774_v34 = vpop.f32.mrf.mxu0  ;;  %v2881_v25 = vpack.c.b16 %v2856_v2, %v2855_v18  ;;  %v3063_v2 = vunpack.c.l.b16 %v1751_v27  ;;  %v3064_v53 = vunpack.c.l.b16 %v1761_v9  ;;  %v1164_v54 = vsel %vm6533_vm10, %v1159_v26, %v6784_v50 }
  0xd5   : > { %v1482_v18 = vsel %vm6557_vm13, %v1480_v6, %v1481_v41  ;;  %v1174_v5 = vsel %vm6533_vm10, %v1169_v39, %v1173_v17  ;;  %v1176_v52 = vshrl.u32 %v948_v32, 16  ;;  %v1185_v20 = vshll.u32 %v6818_v51, 16  ;;  %v1374_v6 = vld [vmem:[#allocation2 + $0x54] sm:$0xe] }
  0xd6   : > { %v6776_v37 = vpop.f32.mrf.mxu1  ;;  %v2920_v29 = vunpack.c.l.b16 %v1482_v18  ;;  %v1189_v61 = vshrl.u32 %v6818_v51, 16  ;;  %v3089_v3 = vpack.c.b16 %v3064_v53, %v3063_v2  ;;  %v2857_v50 = vunpack.c.l.b16 %v1164_v54  ;;  %v6840_v18 = vld [vmem:[#allocation2 + $0x68] sm:$0x1]  ;;  %v5619_v2 = vld [vmem:[#allocation2 + $0x54] sm:$0xff] }
  0xd7   : > { %4352 = vmatmul.bf16.gmra.mxu0 %v3088_v23  ;;  %v1768_v23 = vrot.slane %v1766_v62, 5  ;;  %v1779_v62 = vor.u32 %v1778_v33, %v6810_v0  ;;  %v1485_v41 = vrot.slane %v6760_v59, 5  ;;  %v1178_v31 = vrot.slane %v1176_v52, 4  ;;  %v1562_v33 = vld [vmem:[#allocation2 + $0x6c] sm:$0xf] }
  0xd8   : > { %v6786_v40 = vpop.f32.mrf.mxu2  ;;  %v6835_v17 = vrot.slane %v1185_v20, 5  ;;  %v1191_v48 = vrot.slane %v1189_v61, 4  ;;  %v1563_v59 = vld [vmem:[#allocation2 + $0x70] sm:$0xf]  ;;  %v1790_v52 = vshll.u32 %v1562_v33, 16 }
  0xd9   : > { %v1769_v60 = vor.u32 %v1768_v23, %v1765_v44  ;;  %v1780_v44 = vrot.slane %v1779_v62, 4  ;;  %v1487_v54 = vrot.slane %v1485_v41, 4  ;;  %v1796_v20 = vshll.u32 %v1563_v59, 16 }
  0xda   : > { %v6791_v11 = vpop.f32.mrf.mxu3  ;;  %v1800_v61 = vshrl.u32 %v1563_v59, 16 }
  0xdb   : > { %8001 = vst [vmem:[#allocation4_spill] sm:$0xff] %v6791_v11  ;;  %v1770_v27 = vrot.slane %v1769_v60, 4 }
  0xdc   : > { %v6796_v21 = vpop.f32.mrf.mxu0  ;;  %v1802_v59 = vrot.slane %v1800_v61, 4 }
  0xdd   : > { %4174 = vmatmul.bf16.gmra.mxu2 %v2944_v24  ;;  %v1479_v24 = vsel %vm6557_vm13, %v5071_v28, %v1478_v35  ;;  %v1782_v35 = vshll.u32 %v1585_v8, 16  ;;  %v2858_v28 = vunpack.c.l.b16 %v1174_v5  ;;  %v663_v8 = vrot.slane %v6370_v22, 4 }
  0xde   : > { %v6799_v12 = vpop.f32.mrf.mxu1  ;;  %v2919_v57 = vunpack.c.l.b16 %v1479_v24  ;;  %v5072_v24 = vrot.slane %v1374_v6, 9  ;;  %v1488_v5 = vrot.slane %v6788_v55, 5  ;;  %v1775_v60 = vsel %vm6533_vm10, %v1770_v27, %v6810_v0  ;;  %v5696_v6 = vld [vmem:[%s7987_s3 + $0x198] sm:$0xff] }
  0xdf   : > { %4263 = vmatmul.bf16.gmra.mxu3 %v5618_v58  ;;  %v1179_v58 = vshll.u32 %v948_v32, 16  ;;  %v1784_v23 = vrot.slane %v1782_v35, 5  ;;  %v2882_v53 = vpack.c.b16 %v2858_v28, %v2857_v50  ;;  %v1787_v35 = vshrl.u32 %v1562_v33, 16  ;;  %v5704_v27 = vld [vmem:[%s7987_s3 + $0x1d8] sm:$0xff]  ;;  %4501 = vmatpush.bf16.msra.mxu2 %v5696_v6 }
  0xe0   : > { %v6808_v56 = vpop.f32.mrf.mxu2  ;;  %v2945_v39 = vpack.c.b16 %v2920_v29, %v2919_v57  ;;  %v1192_v57 = vor.u32 %v1191_v48, %v6835_v17  ;;  %v1195_v29 = vshll.u32 %v6840_v18, 16  ;;  %v1486_v0 = vsel %vm6557_vm13, %v5072_v24, %v1485_v41  ;;  %4590 = vmatpush.bf16.msra.mxu3 %v5704_v27 }
  0xe1   : > { %4090 = vmatmul.bf16.gmra.mxu1 %v2881_v25  ;;  %v1181_v26 = vrot.slane %v1179_v58, 5  ;;  %v1785_v62 = vsel %vm6533_vm10, %v1780_v44, %v1784_v23  ;;  %v1489_v50 = vsel %vm6557_vm13, %v1487_v54, %v1488_v5  ;;  %v3065_v28 = vunpack.c.l.b16 %v1775_v60  ;;  %v1586_v54 = vld [vmem:[#allocation2 + $0x74] sm:$0x1]  ;;  %v950_v5 = vld [vmem:[#allocation2 + $0x6c] sm:$0xf]  ;;  %v5712_v60 = vld [vmem:[%s7987_s3 + $0x218] sm:$0xff] }
  0xe2   : > { %v6812_v49 = vpop.f32.mrf.mxu3  ;;  %v1789_v41 = vrot.slane %v1787_v35, 4  ;;  %v1193_v48 = vrot.slane %v1192_v57, 4  ;;  %v1197_v33 = vrot.slane %v1195_v29, 5  ;;  %v6868_v24 = vrot.slane %v1796_v20, 5  ;;  %4679 = vmatpush.bf16.msra.mxu0 %v5712_v60 }
  0xe3   : > { %8002 = vst [vmem:[#allocation5_spill] sm:$0xff] %v6812_v49  ;;  %v1182_v22 = vor.u32 %v1181_v26, %v1178_v31  ;;  %v3066_v31 = vunpack.c.l.b16 %v1785_v62  ;;  %v2921_v62 = vunpack.c.l.b16 %v1486_v0  ;;  %v1806_v61 = vshll.u32 %v1586_v54, 16 }
  0xe4   : > { %v6825_v15 = vpop.f32.mrf.mxu0  ;;  %v1198_v29 = vsel %vm6533_vm10, %v1193_v48, %v1197_v33  ;;  %v1803_v20 = vor.u32 %v1802_v59, %v6868_v24  ;;  %v1200_v6 = vshrl.u32 %v950_v5, 16  ;;  %v1203_v27 = vshll.u32 %v950_v5, 16 }
  0xe5   : > { %v1183_v26 = vrot.slane %v1182_v22, 4  ;;  %v2922_v22 = vunpack.c.l.b16 %v1489_v50  ;;  %v3090_v35 = vpack.c.b16 %v3066_v31, %v3065_v28  ;;  %v1808_v59 = vrot.slane %v1806_v61, 5 }
  0xe6   : > { %v6830_v25 = vpop.f32.mrf.mxu1  ;;  %v1804_v33 = vrot.slane %v1803_v20, 4  ;;  %v1202_v5 = vrot.slane %v1200_v6, 4  ;;  %v680_v49 = vrot.slane %v6464_v43, 4 }
  0xe7   : > { %4357 = vmatmul.bf16.gmra.mxu0 %v3089_v3  ;;  %v887_v3 = vld [vmem:[#allocation2 + $0x80] sm:$0x1]  ;;  %v1188_v57 = vsel %vm6533_vm10, %v1183_v26, %v6835_v17  ;;  %v2946_v17 = vpack.c.b16 %v2922_v22, %v2921_v62  ;;  %v1492_v26 = vrot.slane %v6818_v51, 5  ;;  %v6900_v22 = vld [vmem:[#allocation2 + $0x74] sm:$0x1] }
  0xe8   : > { %v6833_v9 = vpop.f32.mrf.mxu2  ;;  %v888_v44 = vsel %vm6474_vm7, %v663_v8, %v887_v3  ;;  %v5688_v8 = vld [vmem:[%s7987_s3 + $0x158] sm:$0xff]  ;;  %v2859_v31 = vunpack.c.l.b16 %v1188_v57  ;;  %v5620_v62 = vld [vmem:[#allocation2 + $0x60] sm:$0xff]  ;;  %v1809_v61 = vsel %vm6533_vm10, %v1804_v33, %v1808_v59 }
  0xe9   : > { %889 = vst [vmem:[#allocation2 + $0x80] sm:$0x1] %v888_v44  ;;  %4412 = vmatpush.bf16.msra.mxu1 %v5688_v8  ;;  %v1205_v8 = vrot.slane %v1203_v27, 5  ;;  %v1494_v57 = vrot.slane %v1492_v26, 4  ;;  %v3068_v59 = vunpack.c.l.b16 %v1809_v61 }
  0xea   : > { %v6838_v32 = vpop.f32.mrf.mxu3 }
  0xeb   : > { %8003 = vst [vmem:[#allocation6_spill] sm:$0xff] %v6838_v32  ;;  %v1564_v32 = vld [vmem:[#allocation2 + $0x78] sm:$0xf]  ;;  %v1206_v43 = vor.u32 %v1205_v8, %v1202_v5 }
  0xec   : > { %v6848_v58 = vpop.f32.mrf.mxu0  ;;  %v1811_v6 = vshrl.u32 %v1564_v32, 16  ;;  %v952_v8 = vld [vmem:[#allocation2 + $0x78] sm:$0xf] }
  0xed   : > { %4179 = vmatmul.bf16.gmra.mxu2 %v2945_v39  ;;  %v1792_v39 = vrot.slane %v1790_v52, 5 }
  0xee   : > { %v6852_v55 = vpop.f32.mrf.mxu1  ;;  %v1813_v5 = vrot.slane %v1811_v6, 4 }
  0xef   : > { %4268 = vmatmul.bf16.gmra.mxu3 %v5619_v2  ;;  %v1793_v52 = vor.u32 %v1792_v39, %v1789_v41  ;;  %v2860_v41 = vunpack.c.l.b16 %v1198_v29  ;;  %v1375_v39 = vld [vmem:[#allocation2 + $0x60] sm:$0xe]  ;;  %v1565_v29 = vld [vmem:[#allocation2 + $0x7c] sm:$0xf] }
  0xf0   : > { %v6866_v23 = vpop.f32.mrf.mxu2  ;;  %v5073_v51 = vrot.slane %v1375_v39, 9  ;;  %v1814_v39 = vshll.u32 %v1564_v32, 16 }
  0xf1   : > { %8004 = vst [vmem:[#allocation7_spill] sm:$0xff] %v6866_v23  ;;  %4095 = vmatmul.bf16.gmra.mxu1 %v2882_v53  ;;  %v6878_v53 = vld [vmem:[#allocation2 + $0x70] sm:$0xf]  ;;  %v1794_v48 = vrot.slane %v1793_v52, 4  ;;  %v1495_v52 = vrot.slane %v6840_v18, 5  ;;  %v2883_v20 = vpack.c.b16 %v2860_v41, %v2859_v31  ;;  %v1820_v31 = vshll.u32 %v1565_v29, 16 }
  0xf2   : > { %v6870_v2 = vpop.f32.mrf.mxu3  ;;  %v1209_v0 = vshll.u32 %v6878_v53, 16  ;;  %v1213_v50 = vshrl.u32 %v6878_v53, 16  ;;  %v894_v18 = vld [vmem:[#allocation2 + $0x8c] sm:$0x1]  ;;  %v1824_v41 = vshrl.u32 %v1565_v29, 16  ;;  %v1493_v33 = vsel %vm6557_vm13, %v5073_v51, %v1492_v26 }
  0xf3   : > { %8005 = vst [vmem:[#allocation8_spill] sm:$0xff] %v6870_v2  ;;  %v1207_v29 = vrot.slane %v1206_v43, 4  ;;  %v6926_v7 = vrot.slane %v1820_v31, 5  ;;  %v2923_v51 = vunpack.c.l.b16 %v1493_v33  ;;  %v1376_v33 = vld [vmem:[#allocation2 + $0x6c] sm:$0xe] }
  0xf4   : > { %v6890_v28 = vpop.f32.mrf.mxu0  ;;  %v6897_v60 = vrot.slane %v1209_v0, 5  ;;  %v1215_v2 = vrot.slane %v1213_v50, 4  ;;  %v1219_v50 = vshll.u32 %v6900_v22, 16  ;;  %v1826_v26 = vrot.slane %v1824_v41, 4  ;;  %v6949_v23 = vld [vmem:[#allocation2 + $0x80] sm:$0x1] }
  0xf6   : > { %v6886_v3 = vpop.f32.mrf.mxu1  ;;  %v1216_v0 = vor.u32 %v1215_v2, %v6897_v60  ;;  %v1496_v2 = vsel %vm6557_vm13, %v1494_v57, %v1495_v52  ;;  %v1221_v11 = vrot.slane %v1219_v50, 5  ;;  %v1227_v57 = vshll.u32 %v952_v8, 16 }
  0xf7   : > { %4362 = vmatmul.bf16.gmra.mxu0 %v3090_v35  ;;  %v1799_v35 = vsel %vm6533_vm10, %v1794_v48, %v6868_v24  ;;  %v895_v24 = vsel %vm6474_vm7, %v680_v49, %v894_v18  ;;  %v1816_v49 = vrot.slane %v1814_v39, 5  ;;  %v6924_v18 = vld [vmem:[#allocation2 + $0x7c] sm:$0xf]  ;;  %v1212_v43 = vsel %vm6533_vm10, %v1207_v29, %v6897_v60  ;;  %v1566_v29 = vld [vmem:[#allocation2 + $0x84] sm:$0xf] }
  0xf8   : > { %v6892_v44 = vpop.f32.mrf.mxu2  ;;  %896 = vst [vmem:[#allocation2 + $0x8c] sm:$0x1] %v895_v24  ;;  %v3067_v32 = vunpack.c.l.b16 %v1799_v35  ;;  %v1587_v24 = vld [vmem:[#allocation2 + $0x80] sm:$0x1]  ;;  %v1233_v35 = vshll.u32 %v6924_v18, 16  ;;  %v1237_v61 = vshrl.u32 %v6924_v18, 16 }
  0xf9   : > { %8006 = vst [vmem:[#allocation9_spill] sm:$0xff] %v6892_v44  ;;  %v1499_v50 = vrot.slane %v6878_v53, 5  ;;  %v1817_v39 = vor.u32 %v1816_v49, %v1813_v5  ;;  %v1229_v60 = vrot.slane %v1227_v57, 5  ;;  %v2861_v44 = vunpack.c.l.b16 %v1212_v43  ;;  %v1567_v5 = vld [vmem:[#allocation2 + $0x88] sm:$0xf] }
  0xfa   : > { %v6895_v54 = vpop.f32.mrf.mxu3  ;;  %v3091_v52 = vpack.c.b16 %v3068_v59, %v3067_v32  ;;  %v1830_v32 = vshll.u32 %v1587_v24, 16  ;;  %v1239_v53 = vrot.slane %v1237_v61, 4  ;;  %v1835_v43 = vshrl.u32 %v1566_v29, 16 }
  0xfb   : > { %8007 = vst [vmem:[#allocation10_spill] sm:$0xff] %v6895_v54  ;;  %v1217_v54 = vrot.slane %v1216_v0, 4  ;;  %v1818_v24 = vrot.slane %v1817_v39, 4  ;;  %v1844_v61 = vshll.u32 %v1567_v5, 16 }
  0xfc   : > { %v1832_v57 = vrot.slane %v1830_v32, 5  ;;  %v901_v32 = vld [vmem:[#allocation2 + $0x98] sm:$0x1] }
  0xfd   : > { %4184 = vmatmul.bf16.gmra.mxu2 %v2946_v17  ;;  %v6912_v17 = vpop.f32.mrf.mxu0  ;;  %v1222_v0 = vsel %vm6533_vm10, %v1217_v54, %v1221_v11  ;;  %v6944_v54 = vrot.slane %v1233_v35, 5 }
  0xfe   : > { %v6908_v27 = vpop.f32.mrf.mxu1  ;;  %v2862_v11 = vunpack.c.l.b16 %v1222_v0  ;;  %v1838_v0 = vshll.u32 %v1566_v29, 16 }
  0xff   : > { %4273 = vmatmul.bf16.gmra.mxu3 %v5620_v62 }
 0x100   : > { %v6916_v48 = vpop.f32.mrf.mxu2 }
 0x101   : > { %8008 = vst [vmem:[#allocation11_spill] sm:$0xff] %v6916_v48  ;;  %4100 = vmatmul.bf16.gmra.mxu1 %v2883_v20  ;;  %v2924_v20 = vunpack.c.l.b16 %v1496_v2  ;;  %v1224_v48 = vshrl.u32 %v952_v8, 16  ;;  %v1827_v2 = vor.u32 %v1826_v26, %v6926_v7  ;;  %v1502_v26 = vrot.slane %v6900_v22, 5 }
 0x102   : > { %v6922_v62 = vpop.f32.mrf.mxu3  ;;  %v4062_v22 = vadd.f32 %v6908_v27, %v6711_v46  ;;  %v5695_v27 = vld [vmem:[%s7987_s3 + $0x190] sm:$0xff] }
 0x103   : > { %8009 = vst [vmem:[#allocation12_spill] sm:$0xff] %v6922_v62  ;;  %v2947_v8 = vpack.c.b16 %v2924_v20, %v2923_v51  ;;  %v1226_v62 = vrot.slane %v1224_v48, 4  ;;  %v697_v48 = vrot.slane %v6155_v45, 4  ;;  %v5621_v51 = vld [vmem:[#allocation2 + $0x6c] sm:$0xff]  ;;  %v1828_v20 = vrot.slane %v1827_v2, 4  ;;  %4502 = vmatpush.bf16.msra.mxu2 %v5695_v27 }
 0x105   : > { %v6936_v31 = vpop.f32.mrf.mxu0  ;;  %v1230_v35 = vor.u32 %v1229_v60, %v1226_v62  ;;  %v1823_v62 = vsel %vm6533_vm10, %v1818_v24, %v6926_v7  ;;  %v1833_v46 = vsel %vm6533_vm10, %v1828_v20, %v1832_v57  ;;  %v5703_v60 = vld [vmem:[%s7987_s3 + $0x1d0] sm:$0xff]  ;;  %v902_v7 = vsel %vm6474_vm7, %v697_v48, %v901_v32  ;;  %v954_v48 = vld [vmem:[#allocation2 + $0x84] sm:$0xf] }
 0x106   : > { %v4063_v6 = vpop.f32.mrf.mxu1  ;;  %903 = vst [vmem:[#allocation2 + $0x98] sm:$0x1] %v902_v7  ;;  %v3069_v57 = vunpack.c.l.b16 %v1823_v62  ;;  %4591 = vmatpush.bf16.msra.mxu3 %v5703_v60  ;;  %v1251_v62 = vshll.u32 %v954_v48, 16 }
 0x107   : > { %v6939_v41 = vadd.f32 %v4063_v6, %v6730_v16  ;;  %4367 = vmatmul.bf16.gmra.mxu0 %v3091_v52  ;;  %v5074_v16 = vrot.slane %v1376_v33, 9  ;;  %v1501_v6 = vrot.slane %v1499_v50, 4  ;;  %v1240_v52 = vor.u32 %v1239_v53, %v6944_v54 }
 0x108   : > { %v6942_v59 = vpop.f32.mrf.mxu2  ;;  %v1243_v33 = vshll.u32 %v6949_v23, 16  ;;  %v1840_v53 = vrot.slane %v1838_v0, 5 }
 0x109   : > { %8010 = vst [vmem:[#allocation13_spill] sm:$0xff] %v6942_v59  ;;  %v1848_v59 = vshrl.u32 %v1567_v5, 16  ;;  %v1500_v45 = vsel %vm6557_vm13, %v5074_v16, %v1499_v50  ;;  %v1503_v2 = vsel %vm6557_vm13, %v1501_v6, %v1502_v26  ;;  %v1837_v50 = vrot.slane %v1835_v43, 4 }
 0x10a   : > { %v6946_v49 = vpop.f32.mrf.mxu3  ;;  %v1241_v6 = vrot.slane %v1240_v52, 4  ;;  %v1245_v26 = vrot.slane %v1243_v33, 5  ;;  %v2926_v20 = vunpack.c.l.b16 %v1503_v2  ;;  %v3070_v43 = vunpack.c.l.b16 %v1833_v46 }
 0x10b   : > { %8011 = vst [vmem:[#allocation14_spill] sm:$0xff] %v6946_v49  ;;  %v2884_v49 = vpack.c.b16 %v2862_v11, %v2861_v44  ;;  %v1231_v11 = vrot.slane %v1230_v35, 4  ;;  %v1850_v5 = vrot.slane %v1848_v59, 4  ;;  %v5687_v35 = vld [vmem:[%s7987_s3 + $0x150] sm:$0xff]  ;;  %v1841_v52 = vor.u32 %v1840_v53, %v1837_v50 }
 0x10c   : > { %v5711_v59 = vld [vmem:[%s7987_s3 + $0x210] sm:$0xff]  ;;  %4413 = vmatpush.bf16.msra.mxu1 %v5687_v35  ;;  %v1248_v2 = vshrl.u32 %v954_v48, 16  ;;  %v3092_v27 = vpack.c.b16 %v3070_v43, %v3069_v57  ;;  %v1506_v53 = vrot.slane %v6924_v18, 5 }
 0x10d   : > { %4189 = vmatmul.bf16.gmra.mxu2 %v2947_v8  ;;  %v6963_v44 = vpop.f32.mrf.mxu0  ;;  %v1236_v0 = vsel %vm6533_vm10, %v1231_v11, %v6944_v54  ;;  %4680 = vmatpush.bf16.msra.mxu0 %v5711_v59  ;;  %v1568_v48 = vld [vmem:[#allocation2 + $0x90] sm:$0xf]  ;;  %v5622_v59 = vld [vmem:[#allocation2 + $0x78] sm:$0xff] }
 0x10e   : > { %v4066_v39 = vpop.f32.mrf.mxu1  ;;  %v1250_v43 = vrot.slane %v1248_v2, 4 }
 0x10f   : > { %4278 = vmatmul.bf16.gmra.mxu3 %v5621_v51  ;;  %v6966_v8 = vadd.f32 %v4066_v39, %v6774_v34  ;;  %v6978_v34 = vrot.slane %v1844_v61, 5  ;;  %v2925_v51 = vunpack.c.l.b16 %v1500_v45  ;;  %v1588_v39 = vld [vmem:[#allocation2 + $0x8c] sm:$0x1]  ;;  %v1377_v61 = vld [vmem:[#allocation2 + $0x78] sm:$0xe] }
 0x110   : > { %v4150_v29 = vpop.f32.mrf.mxu2  ;;  %v1854_v45 = vshll.u32 %v1588_v39, 16  ;;  %v5075_v11 = vrot.slane %v1377_v61, 9  ;;  %v1253_v39 = vrot.slane %v1251_v62, 5  ;;  %v1508_v61 = vrot.slane %v1506_v53, 4 }
 0x111   : > { %v4151_v16 = vadd.f32 %v4150_v29, %v4062_v22  ;;  %4105 = vmatmul.bf16.gmra.mxu1 %v2884_v49  ;;  %v6986_v49 = vld [vmem:[#allocation2 + $0x88] sm:$0xf]  ;;  %v1851_v33 = vor.u32 %v1850_v5, %v6978_v34  ;;  %v1246_v22 = vsel %vm6533_vm10, %v1241_v6, %v1245_v26  ;;  %v2948_v46 = vpack.c.b16 %v2926_v20, %v2925_v51 }
 0x112   : > { %v4239_v24 = vpop.f32.mrf.mxu3  ;;  %v1257_v7 = vshll.u32 %v6986_v49, 16  ;;  %v1261_v29 = vshrl.u32 %v6986_v49, 16  ;;  %v2863_v6 = vunpack.c.l.b16 %v1236_v0  ;;  %v2864_v26 = vunpack.c.l.b16 %v1246_v22 }
 0x113   : > { %v4240_v32 = vadd.f32 %v4239_v24, %v4151_v16  ;;  %v1842_v24 = vrot.slane %v1841_v52, 4  ;;  %v1852_v51 = vrot.slane %v1851_v33, 4  ;;  %v1856_v57 = vrot.slane %v1854_v45, 5  ;;  %v7010_v52 = vld [vmem:[#allocation2 + $0x8c] sm:$0x1] }
 0x114   : > { %v7007_v18 = vrot.slane %v1257_v7, 5  ;;  %v1509_v0 = vrot.slane %v6949_v23, 5  ;;  %v1569_v33 = vld [vmem:[#allocation2 + $0x94] sm:$0xf]  ;;  %v1507_v22 = vsel %vm6557_vm13, %v5075_v11, %v1506_v53  ;;  %v1859_v45 = vshrl.u32 %v1568_v48, 16 }
 0x115   : > { %v6996_v54 = vpop.f32.mrf.mxu0  ;;  %v7003_v5 = vadd.f32 %v6936_v31, %v4240_v32  ;;  %v1263_v31 = vrot.slane %v1261_v29, 4  ;;  %v1857_v2 = vsel %vm6533_vm10, %v1852_v51, %v1856_v57  ;;  %v1254_v62 = vor.u32 %v1253_v39, %v1250_v43 }
 0x116   : > { %v4068_v60 = vpop.f32.mrf.mxu1  ;;  %v1267_v29 = vshll.u32 %v7010_v52, 16  ;;  %v1868_v11 = vshll.u32 %v1569_v33, 16  ;;  %v1872_v53 = vshrl.u32 %v1569_v33, 16  ;;  %v3072_v43 = vunpack.c.l.b16 %v1857_v2 }
 0x117   : > { %v6999_v50 = vadd.f32 %v4068_v60, %v6796_v21  ;;  %v714_v21 = vrot.slane %v6261_v47, 4  ;;  %4372 = vmatmul.bf16.gmra.mxu0 %v3092_v27  ;;  %v1847_v47 = vsel %vm6533_vm10, %v1842_v24, %v6978_v34  ;;  %v1862_v27 = vshll.u32 %v1568_v48, 16 }
 0x118   : > { %v4152_v16 = vpop.f32.mrf.mxu2  ;;  %v1264_v7 = vor.u32 %v1263_v31, %v7007_v18  ;;  %v2927_v24 = vunpack.c.l.b16 %v1507_v22  ;;  %v3071_v51 = vunpack.c.l.b16 %v1847_v47  ;;  %v1255_v39 = vrot.slane %v1254_v62, 4  ;;  %v1589_v22 = vld [vmem:[#allocation2 + $0x98] sm:$0x1] }
 0x119   : > { %v4153_v20 = vadd.f32 %v4152_v16, %v6939_v41  ;;  %v2885_v41 = vpack.c.b16 %v2864_v26, %v2863_v6  ;;  %v908_v16 = vld [vmem:[#allocation2 + $0xa4] sm:$0x1]  ;;  %v1864_v48 = vrot.slane %v1862_v27, 5  ;;  %v1874_v33 = vrot.slane %v1872_v53, 4  ;;  %v1378_v27 = vld [vmem:[#allocation2 + $0x84] sm:$0xe] }
 0x11a   : > { %v4241_v35 = vpop.f32.mrf.mxu3  ;;  %v909_v6 = vsel %vm6474_vm7, %v714_v21, %v908_v16  ;;  %v1265_v31 = vrot.slane %v1264_v7, 4  ;;  %v1269_v21 = vrot.slane %v1267_v29, 5  ;;  %v3093_v62 = vpack.c.b16 %v3072_v43, %v3071_v51 }
 0x11b   : > { %v4242_v32 = vadd.f32 %v4241_v35, %v4153_v20  ;;  %v1861_v20 = vrot.slane %v1859_v45, 4  ;;  %910 = vst [vmem:[#allocation2 + $0xa4] sm:$0x1] %v909_v6  ;;  %v956_v35 = vld [vmem:[#allocation2 + $0x90] sm:$0xf]  ;;  %v1260_v7 = vsel %vm6533_vm10, %v1255_v39, %v7007_v18  ;;  %v1878_v53 = vshll.u32 %v1589_v22, 16 }
 0x11c   : > { %v1272_v47 = vshrl.u32 %v956_v35, 16  ;;  %v1275_v45 = vshll.u32 %v956_v35, 16  ;;  %v1270_v29 = vsel %vm6533_vm10, %v1265_v31, %v1269_v21  ;;  %v5076_v43 = vrot.slane %v1378_v27, 9 }
 0x11d   : > { %4194 = vmatmul.bf16.gmra.mxu2 %v2948_v46  ;;  %v7020_v23 = vadd.f32 %v6963_v44, %v4242_v32  ;;  %v7024_v34 = vpop.f32.mrf.mxu0  ;;  %v1510_v44 = vsel %vm6557_vm13, %v1508_v61, %v1509_v0  ;;  %v7036_v32 = vrot.slane %v1868_v11, 5  ;;  %v2866_v31 = vunpack.c.l.b16 %v1270_v29 }
 0x11e   : > { %v4071_v60 = vpop.f32.mrf.mxu1  ;;  %v2928_v0 = vunpack.c.l.b16 %v1510_v44  ;;  %v1274_v44 = vrot.slane %v1272_v47, 4  ;;  %v1277_v51 = vrot.slane %v1275_v45, 5  ;;  %v1516_v21 = vrot.slane %v7010_v52, 5 }
 0x11f   : > { %8012 = vst [vmem:[#allocation15_spill] sm:$0xff] %v7020_v23  ;;  %4283 = vmatmul.bf16.gmra.mxu3 %v5622_v59  ;;  %v7027_v46 = vadd.f32 %v4071_v60, %v6825_v15  ;;  %v7034_v15 = vld [vmem:[#allocation2 + $0x94] sm:$0xf]  ;;  %v1865_v60 = vor.u32 %v1864_v48, %v1861_v20  ;;  %v1875_v11 = vor.u32 %v1874_v33, %v7036_v32  ;;  %v1570_v20 = vld [vmem:[#allocation2 + $0x9c] sm:$0xf]  ;;  %v1880_v47 = vrot.slane %v1878_v53, 5 }
 0x120   : > { %v4155_v26 = vpop.f32.mrf.mxu2  ;;  %v1285_v2 = vshrl.u32 %v7034_v15, 16  ;;  %v7056_v33 = vld [vmem:[#allocation2 + $0x98] sm:$0x1]  ;;  %v1883_v45 = vshrl.u32 %v1570_v20, 16  ;;  %v731_v27 = vrot.slane %v6396_v4, 4  ;;  %v1886_v23 = vshll.u32 %v1570_v20, 16 }
 0x121   : > { %v4156_v57 = vadd.f32 %v4155_v26, %v6966_v8  ;;  %4110 = vmatmul.bf16.gmra.mxu1 %v2885_v41  ;;  %v1513_v8 = vrot.slane %v6986_v49, 5  ;;  %v1281_v41 = vshll.u32 %v7034_v15, 16  ;;  %v2949_v49 = vpack.c.b16 %v2928_v0, %v2927_v24  ;;  %v1571_v24 = vld [vmem:[#allocation2 + $0xa0] sm:$0xf]  ;;  %v915_v20 = vld [vmem:[#allocation2 + $0xb0] sm:$0x1] }
 0x122   : > { %v4244_v59 = vpop.f32.mrf.mxu3  ;;  %v1287_v18 = vrot.slane %v1285_v2, 4  ;;  %v1866_v0 = vrot.slane %v1865_v60, 4  ;;  %v1876_v22 = vrot.slane %v1875_v11, 4  ;;  %v1278_v2 = vor.u32 %v1277_v51, %v1274_v44 }
 0x123   : > { %v4245_v61 = vadd.f32 %v4244_v59, %v4156_v57  ;;  %v1515_v48 = vrot.slane %v1513_v8, 4  ;;  %v7052_v35 = vrot.slane %v1281_v41, 5  ;;  %v2865_v59 = vunpack.c.l.b16 %v1260_v7 }
 0x124   : > { %v1291_v7 = vshll.u32 %v7056_v33, 16  ;;  %v1892_v52 = vshll.u32 %v1571_v24, 16  ;;  %v1896_v29 = vshrl.u32 %v1571_v24, 16  ;;  %v1871_v44 = vsel %vm6533_vm10, %v1866_v0, %v7036_v32  ;;  %v5702_v32 = vld [vmem:[%s7987_s3 + $0x1c8] sm:$0xff] }
 0x125   : > { %v7047_v6 = vpop.f32.mrf.mxu0  ;;  %v7064_v60 = vadd.f32 %v6996_v54, %v4245_v61  ;;  %v1517_v53 = vsel %vm6557_vm13, %v1515_v48, %v1516_v21  ;;  %v1885_v51 = vrot.slane %v1883_v45, 4  ;;  %v5694_v61 = vld [vmem:[%s7987_s3 + $0x188] sm:$0xff]  ;;  %v1888_v48 = vrot.slane %v1886_v23, 5  ;;  %v958_v23 = vld [vmem:[#allocation2 + $0x9c] sm:$0xf]  ;;  %4592 = vmatpush.bf16.msra.mxu3 %v5702_v32 }
 0x126   : > { %v4073_v16 = vpop.f32.mrf.mxu1  ;;  %v7089_v21 = vrot.slane %v1892_v52, 5  ;;  %v2930_v0 = vunpack.c.l.b16 %v1517_v53  ;;  %4503 = vmatpush.bf16.msra.mxu2 %v5694_v61  ;;  %v5686_v52 = vld [vmem:[%s7987_s3 + $0x148] sm:$0xff]  ;;  %v1523_v61 = vrot.slane %v7056_v33, 5 }
 0x127   : > { %v7050_v26 = vadd.f32 %v4073_v16, %v6848_v58  ;;  %4377 = vmatmul.bf16.gmra.mxu0 %v3093_v62  ;;  %v5623_v16 = vld [vmem:[#allocation2 + $0x84] sm:$0xff]  ;;  %v1514_v62 = vsel %vm6557_vm13, %v5076_v43, %v1513_v8  ;;  %4414 = vmatpush.bf16.msra.mxu1 %v5686_v52 }
 0x128   : > { %v4157_v57 = vpop.f32.mrf.mxu2  ;;  %v1590_v43 = vld [vmem:[#allocation2 + $0xa4] sm:$0x1] }
 0x129   : > { %v4158_v39 = vadd.f32 %v4157_v57, %v6999_v50  ;;  %v1288_v50 = vor.u32 %v1287_v18, %v7052_v35  ;;  %v2886_v57 = vpack.c.b16 %v2866_v31, %v2865_v59  ;;  %v916_v18 = vsel %vm6474_vm7, %v731_v27, %v915_v20  ;;  %v7093_v27 = vld [vmem:[#allocation2 + $0xa0] sm:$0xf]  ;;  %v7118_v52 = vld [vmem:[#allocation2 + $0xa4] sm:$0x1] }
 0x12a   : > { %v4246_v58 = vpop.f32.mrf.mxu3  ;;  %v1293_v31 = vrot.slane %v1291_v7, 5  ;;  %917 = vst [vmem:[#allocation2 + $0xb0] sm:$0x1] %v916_v18  ;;  %v1902_v7 = vshll.u32 %v1590_v43, 16  ;;  %v1572_v43 = vld [vmem:[#allocation2 + $0xa8] sm:$0xf] }
 0x12b   : > { %v4247_v41 = vadd.f32 %v4246_v58, %v4158_v39  ;;  %v1289_v59 = vrot.slane %v1288_v50, 4  ;;  %v2929_v58 = vunpack.c.l.b16 %v1514_v62  ;;  %v1379_v50 = vld [vmem:[#allocation2 + $0x90] sm:$0xe]  ;;  %v1296_v62 = vshrl.u32 %v958_v23, 16 }
 0x12c   : > { %v5077_v20 = vrot.slane %v1379_v50, 9 }
 0x12d   : > { %4199 = vmatmul.bf16.gmra.mxu2 %v2949_v49  ;;  %v7067_v4 = vadd.f32 %v7024_v34, %v4247_v41  ;;  %v1881_v49 = vsel %vm6533_vm10, %v1876_v22, %v1880_v47  ;;  %v7076_v8 = vpop.f32.mrf.mxu0  ;;  %v1279_v34 = vrot.slane %v1278_v2, 4  ;;  %v3073_v47 = vunpack.c.l.b16 %v1871_v44 }
 0x12e   : > { %v4076_v11 = vpop.f32.mrf.mxu1  ;;  %v3074_v45 = vunpack.c.l.b16 %v1881_v49  ;;  %v1520_v41 = vrot.slane %v7034_v15, 5  ;;  %v1294_v15 = vsel %vm6533_vm10, %v1289_v59, %v1293_v31  ;;  %v2950_v53 = vpack.c.b16 %v2930_v0, %v2929_v58  ;;  %v1573_v31 = vld [vmem:[#allocation2 + $0xac] sm:$0xf] }
 0x12f   : > { %4288 = vmatmul.bf16.gmra.mxu3 %v5623_v16  ;;  %v7079_v54 = vadd.f32 %v4076_v11, %v6890_v28  ;;  %v1898_v28 = vrot.slane %v1896_v29, 4  ;;  %v1284_v2 = vsel %vm6533_vm10, %v1279_v34, %v7052_v35  ;;  %v5710_v29 = vld [vmem:[%s7987_s3 + $0x208] sm:$0xff]  ;;  %v1299_v11 = vshll.u32 %v958_v23, 16 }
 0x130   : > { %v4160_v39 = vpop.f32.mrf.mxu2  ;;  %4681 = vmatpush.bf16.msra.mxu0 %v5710_v29  ;;  %v1305_v35 = vshll.u32 %v7093_v27, 16  ;;  %v1309_v44 = vshrl.u32 %v7093_v27, 16  ;;  %v3094_v49 = vpack.c.b16 %v3074_v45, %v3073_v47  ;;  %v1522_v34 = vrot.slane %v1520_v41, 4 }
 0x131   : > { %v4161_v24 = vadd.f32 %v4160_v39, %v7027_v46  ;;  %4115 = vmatmul.bf16.gmra.mxu1 %v2886_v57  ;;  %v1889_v46 = vor.u32 %v1888_v48, %v1885_v51  ;;  %v1899_v57 = vor.u32 %v1898_v28, %v7089_v21  ;;  %v2867_v18 = vunpack.c.l.b16 %v1284_v2 }
 0x132   : > { %v4249_v22 = vpop.f32.mrf.mxu3  ;;  %v2868_v39 = vunpack.c.l.b16 %v1294_v15  ;;  %v1904_v58 = vrot.slane %v1902_v7, 5  ;;  %v1298_v0 = vrot.slane %v1296_v62, 4  ;;  %v1301_v23 = vrot.slane %v1299_v11, 5 }
 0x133   : > { %v4250_v16 = vadd.f32 %v4249_v22, %v4161_v24  ;;  %v1890_v59 = vrot.slane %v1889_v46, 4  ;;  %v1900_v24 = vrot.slane %v1899_v57, 4  ;;  %v7116_v47 = vrot.slane %v1305_v35, 5  ;;  %v5624_v57 = vld [vmem:[#allocation2 + $0x90] sm:$0xff] }
 0x134   : > { %v1311_v33 = vrot.slane %v1309_v44, 4  ;;  %v1907_v45 = vshrl.u32 %v1572_v43, 16  ;;  %v1916_v2 = vshll.u32 %v1573_v31, 16  ;;  %v1920_v29 = vshrl.u32 %v1573_v31, 16  ;;  %v5875_v31 = vld [vmem:[%s6023_s27 + $0x78] sm:$0xff]  }
 0x135   : > { %v7110_v48 = vpop.f32.mrf.mxu0  ;;  %v748_v46 = vrot.slane %v6501_v19, 4  ;;  %v7123_v7 = vsel %vm6557_vm13, %v5077_v20, %v1520_v41  ;;  %v1895_v62 = vsel %vm6533_vm10, %v1890_v59, %v7089_v21  ;;  %v1905_v11 = vsel %vm6533_vm10, %v1900_v24, %v1904_v58  ;;  %v1591_v24 = vld [vmem:[#allocation2 + $0xb0] sm:$0x1] }
 0x136   : > { %v4078_v51 = vpop.f32.mrf.mxu1  ;;  %v1302_v35 = vor.u32 %v1301_v23, %v1298_v0  ;;  %v2887_v19 = vpack.c.b16 %v2868_v39, %v2867_v18  ;;  %v1312_v44 = vor.u32 %v1311_v33, %v7116_v47  ;;  %v7140_v21 = vadd.f32 %v7047_v6, %v4250_v16  ;;  %v1380_v23 = vld [vmem:[#allocation2 + $0x9c] sm:$0xe] }
 0x137   : > { %v7113_v32 = vadd.f32 %v4078_v51, %v6912_v17  ;;  %4382 = vmatmul.bf16.gmra.mxu0 %v3094_v49  ;;  %v1910_v17 = vshll.u32 %v1572_v43, 16  ;;  %v1315_v49 = vshll.u32 %v7118_v52, 16  ;;  %v1909_v51 = vrot.slane %v1907_v45, 4 }
 0x138   : > { %v4162_v28 = vpop.f32.mrf.mxu2  ;;  %v7136_v43 = vrot.slane %v1916_v2, 5  ;;  %v3075_v39 = vunpack.c.l.b16 %v1895_v62  ;;  %v1303_v0 = vrot.slane %v1302_v35, 4  ;;  %v5779_v2 = vunpack.c.l.bf16 %v5875_v31 }
 0x139   : > { %v4163_v22 = vadd.f32 %v4162_v28, %v7050_v26  ;;  %v1524_v26 = vsel %vm6557_vm13, %v1522_v34, %v1523_v61  ;;  %v1912_v20 = vrot.slane %v1910_v17, 5  ;;  %v1922_v34 = vrot.slane %v1920_v29, 4  ;;  %v922_v61 = vld [vmem:[#allocation2 + $0xbc] sm:$0x1]  ;;  %v7152_v17 = vld [vmem:[#allocation2 + $0xac] sm:$0xf] }
 0x13a   : > { %v4251_v50 = vpop.f32.mrf.mxu3  ;;  %v2932_v18 = vunpack.c.l.b16 %v1524_v26  ;;  %v3076_v28 = vunpack.c.l.b16 %v1905_v11  ;;  %v923_v33 = vsel %vm6474_vm7, %v748_v46, %v922_v61  ;;  %v1317_v45 = vrot.slane %v1315_v49, 5 }
 0x13b   : > { %v4252_v15 = vadd.f32 %v4251_v50, %v4163_v22  ;;  %v1527_v22 = vrot.slane %v7093_v27, 5  ;;  %v960_v50 = vld [vmem:[#allocation2 + $0xa8] sm:$0xf]  ;;  %v5780_v29 = vunpack.c.h.bf16 %v5875_v31  ;;  %v1913_v26 = vor.u32 %v1912_v20, %v1909_v51  ;;  %924 = vst [vmem:[#allocation2 + $0xbc] sm:$0x1] %v923_v33 }
 0x13c   : > { %v1923_v27 = vor.u32 %v1922_v34, %v7136_v43  ;;  %v1926_v62 = vshll.u32 %v1591_v24, 16  ;;  %v5078_v11 = vrot.slane %v1380_v23, 9  ;;  %v1333_v49 = vshrl.u32 %v7152_v17, 16  ;;  %v5926_v51 = vld [vmem:[%s7985_s1] ss:$0 sm:$0xff] }
 0x13d   : > { %4204 = vmatmul.bf16.gmra.mxu2 %v2950_v53  ;;  %v7142_v59 = vpop.f32.mrf.mxu0  ;;  %v2931_v53 = vunpack.c.l.b16 %v7123_v7  ;;  %v7149_v6 = vadd.f32 %v7076_v8, %v4252_v15  ;;  %v1313_v7 = vrot.slane %v1312_v44, 4  ;;  %v1320_v8 = vshrl.u32 %v960_v50, 16 }
 0x13e   : > { %v7134_v41 = vpop.f32.mrf.mxu1  ;;  %v1323_v15 = vshll.u32 %v960_v50, 16  ;;  %v1529_v35 = vrot.slane %v1527_v22, 4  ;;  %v3095_v61 = vpack.c.b16 %v3076_v28, %v3075_v39  ;;  %v1308_v44 = vsel %vm6533_vm10, %v1303_v0, %v7116_v47 }
 0x13f   : > { %4293 = vmatmul.bf16.gmra.mxu3 %v5624_v57  ;;  %8013 = vst [vmem:[#allocation16_spill] sm:$0xff] %v7149_v6  ;;  %v335_v20 = vmul.f32 %v5926_v51, %v5779_v2  ;;  %v336_v34 = vmul.f32 %v5926_v51, %v5780_v29  ;;  %v1914_v24 = vrot.slane %v1913_v26, 4  ;;  %v1928_v23 = vrot.slane %v1926_v62, 5 }
 0x140   : > { %v4165_v58 = vpop.f32.mrf.mxu2  ;;  %v2951_v39 = vpack.c.b16 %v2932_v18, %v2931_v53  ;;  %v1528_v47 = vsel %vm6557_vm13, %v5078_v11, %v1527_v22  ;;  %v1322_v28 = vrot.slane %v1320_v8, 4  ;;  %v1325_v0 = vrot.slane %v1323_v15, 5  ;;  %v5927_v53 = vld [vmem:[%s7986_s2] ss:$0 sm:$0xff] }
 0x141   : > { %v4166_v16 = vadd.f32 %v4165_v58, %v7079_v54  ;;  %4120 = vmatmul.bf16.gmra.mxu1 %v2887_v19  ;;  %v1530_v54 = vrot.slane %v7118_v52, 5  ;;  %v1329_v19 = vshll.u32 %v7152_v17, 16  ;;  %v1318_v52 = vsel %vm6533_vm10, %v1313_v7, %v1317_v45  ;;  %v1574_v45 = vld [vmem:[#allocation2 + $0xb4] sm:$0xf] }
 0x142   : > { %v4254_v57 = vpop.f32.mrf.mxu3  ;;  %v1924_v58 = vrot.slane %v1923_v27, 4  ;;  %v2869_v50 = vunpack.c.l.b16 %v1308_v44  ;;  %v2870_v26 = vunpack.c.l.b16 %v1318_v52  ;;  %v7177_v27 = vld [vmem:[#allocation2 + $0xb0] sm:$0x1]  ;;  %v371_v18 = vadd.f32 %v5927_v53, %v335_v20 }
 0x143   : > { %v4255_v46 = vadd.f32 %v4254_v57, %v4166_v16  ;;  %v1531_v2 = vsel %vm6557_vm13, %v1529_v35, %v1530_v54  ;;  %v7174_v29 = vrot.slane %v1329_v19, 5  ;;  %v1335_v57 = vrot.slane %v1333_v49, 4  ;;  %v1575_v54 = vld [vmem:[#allocation2 + $0xb8] sm:$0xf] }
 0x144   : > { %v372_v22 = vadd.f32 %v5927_v53, %v336_v34  ;;  %v1919_v11 = vsel %vm6533_vm10, %v1914_v24, %v7136_v43  ;;  %v1929_v8 = vsel %vm6533_vm10, %v1924_v58, %v1928_v23  ;;  %v1326_v35 = vor.u32 %v1325_v0, %v1322_v28 }
 0x145   : > { %v7168_v33 = vpop.f32.mrf.mxu0  ;;  %v1931_v19 = vshrl.u32 %v1574_v45, 16  ;;  %v1934_v49 = vshll.u32 %v1574_v45, 16  ;;  %v2933_v44 = vunpack.c.l.b16 %v1528_v47  ;;  %v2934_v51 = vunpack.c.l.b16 %v1531_v2 }
 0x146   : > { %v7164_v31 = vpop.f32.mrf.mxu1  ;;  %v1336_v20 = vor.u32 %v1335_v57, %v7174_v29  ;;  %v1339_v34 = vshll.u32 %v7177_v27, 16  ;;  %v2888_v43 = vpack.c.b16 %v2870_v26, %v2869_v50  ;;  %v403_v52 = vmax.f32 %v371_v18, 0.0  ;;  %v5701_v57 = vld [vmem:[%s7987_s3 + $0x1c0] sm:$0xff] }
 0x147   : > { %4387 = vmatmul.bf16.gmra.mxu0 %v3095_v61  ;;  %v4082_v61 = vadd.f32 %v7134_v41, %v6696_v30  ;;  %v404_v24 = vmax.f32 %v372_v22, 0.0  ;;  %v7193_v23 = vunpack.c.l.b16 %v1919_v11  ;;  %v7195_v28 = vunpack.c.l.b16 %v1929_v8  ;;  %v5693_v30 = vld [vmem:[%s7987_s3 + $0x180] sm:$0xff]  ;;  %v962_v22 = vld [vmem:[#allocation2 + $0xb4] sm:$0xf]  ;;  %4593 = vmatpush.bf16.msra.mxu3 %v5701_v57 }
 0x148   : > { %v4167_v16 = vpop.f32.mrf.mxu2  ;;  %v1940_v0 = vshll.u32 %v1575_v54, 16  ;;  %v7198_v47 = vadd.f32 %v7110_v48, %v4255_v46  ;;  %v1327_v2 = vrot.slane %v1326_v35, 4  ;;  %v1933_v41 = vrot.slane %v1931_v19, 4  ;;  %4504 = vmatpush.bf16.msra.mxu2 %v5693_v30  ;;  %v1381_v35 = vld [vmem:[#allocation2 + $0xa8] sm:$0xe] }
 0x149   : > { %v4168_v7 = vadd.f32 %v4167_v16, %v7113_v32  ;;  %v5625_v32 = vld [vmem:[#allocation2 + $0x9c] sm:$0xff]  ;;  %v1944_v50 = vshrl.u32 %v1575_v54, 16  ;;  %v1341_v26 = vrot.slane %v1339_v34, 5  ;;  %v435_v48 = vpack.c.bf16 %v403_v52, %v403_v52 }
 0x14a   : > { %v4256_v62 = vpop.f32.mrf.mxu3  ;;  %8014 = vst [vmem:[#allocation17_spill] sm:$0xff] %v7198_v47  ;;  %v7211_v18 = vpack.c.b16 %v2934_v51, %v2933_v44  ;;  %v4084_v8 = vadd.f32 %v7164_v31, %v6719_v63  ;;  %v1534_v54 = vrot.slane %v7152_v17, 5  ;;  %v7218_v19 = vrot.slane %v1940_v0, 5  ;;  %v5685_v44 = vld [vmem:[%s7987_s3 + $0x140] sm:$0xff]  ;;  %v1592_v34 = vld [vmem:[#allocation2 + $0xbc] sm:$0x1] }
 0x14b   : > { %v4257_v15 = vadd.f32 %v4256_v62, %v4168_v7  ;;  %v1337_v7 = vrot.slane %v1336_v20, 4  ;;  %v436_v62 = vpack.c.bf16 %v404_v24, %v404_v24  ;;  %v5709_v63 = vld [vmem:[%s7987_s3 + $0x200] sm:$0xff]  ;;  %v750_v31 = vshrl.u32 %v435_v48, 16  ;;  %4415 = vmatpush.bf16.msra.mxu1 %v5685_v44  ;;  %v5626_v47 = vld [vmem:[#allocation2 + $0xa8] sm:$0xff] }
 0x14c   : > { %v753_v51 = vshll.u32 %v435_v48, 16  ;;  %v1332_v17 = vsel %vm6533_vm10, %v1327_v2, %v7174_v29  ;;  %4682 = vmatpush.bf16.msra.mxu0 %v5709_v63  ;;  %v1347_v52 = vshll.u32 %v962_v22, 16  ;;  %v5079_v30 = vrot.slane %v1381_v35, 9 }
 0x14d   : > { %4209 = vmatmul.bf16.gmra.mxu2 %v2951_v39  ;;  %v7200_v16 = vpop.f32.mrf.mxu0  ;;  %v1936_v39 = vrot.slane %v1934_v49, 5  ;;  %v7209_v46 = vadd.f32 %v7142_v59, %v4257_v15  ;;  %v7220_v59 = vld [vmem:[#allocation2 + $0xb8] sm:$0xf]  ;;  %v1946_v49 = vrot.slane %v1944_v50, 4  ;;  %v1342_v20 = vsel %vm6533_vm10, %v1337_v7, %v1341_v26  ;;  %v925_v26 = vld [vmem:[#allocation2 + $0xc0] sm:$0xf] }
 0x14e   : > { %v7191_v58 = vpop.f32.mrf.mxu1  ;;  %v1353_v24 = vshll.u32 %v7220_v59, 16  ;;  %v1536_v50 = vrot.slane %v1534_v54, 4  ;;  %v1537_v57 = vrot.slane %v7177_v27, 5  ;;  %v1357_v29 = vshrl.u32 %v7220_v59, 16 }
 0x14f   : > { %4298 = vmatmul.bf16.gmra.mxu3 %v5625_v32  ;;  %8015 = vst [vmem:[#allocation18_spill] sm:$0xff] %v7209_v46  ;;  %v3096_v32 = vpack.c.b16 %v7195_v28, %v7193_v23  ;;  %v752_v23 = vrot.slane %v750_v31, 7  ;;  %v758_v28 = vshrl.u32 %v436_v62, 16  ;;  %v761_v44 = vshll.u32 %v436_v62, 16  ;;  %v7248_v62 = vld [vmem:[#allocation2 + $0xbc] sm:$0x1] }
 0x150   : > { %v4170_v45 = vpop.f32.mrf.mxu2  ;;  %v1349_v35 = vrot.slane %v1347_v52, 5  ;;  %v7241_v31 = vrot.slane %v1353_v24, 5  ;;  %v1359_v6 = vrot.slane %v1357_v29, 4  ;;  %v929_v52 = vld [vmem:[#allocation2 + $0xc8] sm:$0x1] }
 0x151   : > { %v4171_v53 = vadd.f32 %v4170_v45, %v4082_v61  ;;  %4125 = vmatmul.bf16.gmra.mxu1 %v2888_v43  ;;  %v1937_v61 = vor.u32 %v1936_v39, %v1933_v41  ;;  %v1344_v43 = vshrl.u32 %v962_v22, 16  ;;  %v2871_v45 = vunpack.c.l.b16 %v1332_v17 }
 0x152   : > { %v4259_v11 = vpop.f32.mrf.mxu3  ;;  %v1947_v41 = vor.u32 %v1946_v49, %v7218_v19  ;;  %v1950_v39 = vshll.u32 %v1592_v34, 16  ;;  %v755_v7 = vor.u32 %v753_v51, %v752_v23  ;;  %v760_v27 = vrot.slane %v758_v28, 7 }
 0x153   : > { %v4260_v15 = vadd.f32 %v4259_v11, %v4171_v53  ;;  %v2872_v53 = vunpack.c.l.b16 %v1342_v20  ;;  %v1938_v22 = vrot.slane %v1937_v61, 4  ;;  %v1346_v11 = vrot.slane %v1344_v43, 4 }
 0x154   : > { %v756_v17 = vrot.slane %v752_v23, 4  ;;  %v926_v49 = vsel %vm6087_vm5, %v755_v7, %v925_v26  ;;  %v1948_v34 = vrot.slane %v1947_v41, 4  ;;  %v1952_v61 = vrot.slane %v1950_v39, 5 }
 0x155   : > { %v7238_v2 = vpop.f32.mrf.mxu0  ;;  %v7246_v51 = vadd.f32 %v7168_v33, %v4260_v15  ;;  %927 = vst [vmem:[#allocation2 + $0xc0] sm:$0xf] %v926_v49  ;;  %v763_v43 = vor.u32 %v761_v44, %v760_v27  ;;  %v2889_v42 = vpack.c.b16 %v2872_v53, %v2871_v45  ;;  %v1350_v24 = vor.u32 %v1349_v35, %v1346_v11 }
 0x156   : > { %v7234_v0 = vpop.f32.mrf.mxu1  ;;  %v765_v33 = vrot.slane %v760_v27, 4  ;;  %v1943_v23 = vsel %vm6533_vm10, %v1938_v22, %v7218_v19  ;;  %v1363_v28 = vshll.u32 %v7248_v62, 16  ;;  %v2047_v44 = vrot.slane %v5929_v10, 5 }
 0x157   : > { %4392 = vmatmul.bf16.gmra.mxu0 %v3096_v32  ;;  %v1538_v32 = vsel %vm6557_vm13, %v1536_v50, %v1537_v57  ;;  %v5928_v57 = vld [vmem:[#allocation2 + $0x10] sm:$0xf]  ;;  %v1351_v39 = vrot.slane %v1350_v24, 4 }
 0x158   : > { %v4172_v48 = vpop.f32.mrf.mxu2  ;;  %v930_v19 = vsel %vm6474_vm7, %v765_v33, %v929_v52  ;;  %v2936_v41 = vunpack.c.l.b16 %v1538_v32  ;;  %v1365_v26 = vrot.slane %v1363_v28, 5  ;;  %v1541_v28 = vrot.slane %v7220_v59, 5 }
 0x159   : > { %v4173_v63 = vadd.f32 %v4172_v48, %v4084_v8  ;;  %v1535_v8 = vsel %vm6557_vm13, %v5079_v30, %v1534_v54  ;;  %v1360_v54 = vor.u32 %v1359_v6, %v7241_v31  ;;  %v764_v30 = vsel %vm6076_vm4, %v756_v17, %v763_v43  ;;  %931 = vst [vmem:[#allocation2 + $0xc8] sm:$0x1] %v930_v19 }
 0x15a   : > { %v4261_v46 = vpop.f32.mrf.mxu3  ;;  %928 = vst [vmem:[#allocation2 + $0xc4] sm:$0xf] %v764_v30  ;;  %v2044_v6 = vrot.slane %v5928_v57, 5  ;;  %v2935_v38 = vunpack.c.l.b16 %v1535_v8  ;;  %v4089_v43 = vadd.f32 %v7234_v0, %v6776_v37  ;;  %v1382_v57 = vld [vmem:[#allocation2 + $0xb4] sm:$0xe] }
 0x15b   : > { %v4262_v20 = vadd.f32 %v4261_v46, %v4173_v63  ;;  %v1361_v7 = vrot.slane %v1360_v54, 4  ;;  %v1356_v63 = vsel %vm6533_vm10, %v1351_v39, %v7241_v31 }
 0x15c   : > { %v1576_v48 = vld [vmem:[#allocation2 + $0xc0] sm:$0xf]  ;;  %v2046_v49 = vrot.slane %v2044_v6, 4  ;;  %v2873_v54 = vunpack.c.l.b16 %v1356_v63 }
 0x15d   : > { %4214 = vmatmul.bf16.gmra.mxu2 %v7211_v18  ;;  %v7256_v46 = vadd.f32 %v7200_v16, %v4262_v20  ;;  %v4087_v18 = vadd.f32 %v7191_v58, %v6742_v36  ;;  %v7269_v50 = vpop.f32.mrf.mxu0  ;;  %v1953_v16 = vsel %vm6533_vm10, %v1948_v34, %v1952_v61  ;;  %v3079_v58 = vunpack.c.l.b16 %v1943_v23  ;;  %v1978_v23 = vld [vmem:[#allocation2 + $0xc] sm:$0xe] }
 0x15e   : > { %v7258_v15 = vpop.f32.mrf.mxu1  ;;  %v1955_v22 = vshrl.u32 %v1576_v48, 16  ;;  %v1958_v11 = vshll.u32 %v1576_v48, 16  ;;  %v2953_v20 = vpack.c.b16 %v2936_v41, %v2935_v38  ;;  %v1366_v8 = vsel %vm6533_vm10, %v1361_v7, %v1365_v26 }
 0x15f   : > { %4303 = vmatmul.bf16.gmra.mxu3 %v5626_v47  ;;  %v3080_v47 = vunpack.c.l.b16 %v1953_v16  ;;  %v2874_v19 = vunpack.c.l.b16 %v1366_v8  ;;  %v2048_v41 = vsel %vm6557_vm13, %v2046_v49, %v2047_v44  ;;  %v5080_v7 = vrot.slane %v1382_v57, 9 }
 0x160   : > { %v4175_v29 = vpop.f32.mrf.mxu2  ;;  %v1957_v35 = vrot.slane %v1955_v22, 4  ;;  %v1960_v27 = vrot.slane %v1958_v11, 5  ;;  %v3116_v26 = vunpack.c.l.b16 %v2048_v41  ;;  %v1544_v22 = vrot.slane %v7248_v62, 5  ;;  %v2156_v62 = vld [vmem:[#allocation2 + $0x1c] sm:$0xf] }
 0x161   : > { %v4176_v45 = vadd.f32 %v4175_v29, %v4087_v18  ;;  %4130 = vmatmul.bf16.gmra.mxu1 %v2889_v42  ;;  %v3097_v34 = vpack.c.b16 %v3080_v47, %v3079_v58  ;;  %v1577_v32 = vld [vmem:[#allocation2 + $0xc4] sm:$0xf]  ;;  %v1593_v42 = vld [vmem:[#allocation2 + $0xc8] sm:$0x1]  ;;  %v5081_v18 = vrot.slane %v1978_v23, 9  ;;  %v2890_v48 = vpack.c.b16 %v2874_v19, %v2873_v54 }
 0x162   : > { %v4264_v36 = vpop.f32.mrf.mxu3  ;;  %v1961_v31 = vor.u32 %v1960_v27, %v1957_v35  ;;  %v1964_v24 = vshll.u32 %v1577_v32, 16  ;;  %v1968_v33 = vshrl.u32 %v1577_v32, 16  ;;  %v1974_v30 = vshll.u32 %v1593_v42, 16 }
 0x163   : > { %v4265_v53 = vadd.f32 %v4264_v36, %v4176_v45  ;;  %v2045_v0 = vsel %vm6557_vm13, %v5081_v18, %v2044_v6  ;;  %v5627_v36 = vld [vmem:[#allocation2 + $0xb4] sm:$0xff]  ;;  %v4092_v44 = vadd.f32 %v7258_v15, %v6799_v12  ;;  %v1542_v8 = vsel %vm6557_vm13, %v5080_v7, %v1541_v28 }
 0x164   : > { %v1966_v29 = vrot.slane %v1964_v24, 5  ;;  %v1970_v45 = vrot.slane %v1968_v33, 4  ;;  %v1962_v37 = vrot.slane %v1961_v31, 4  ;;  %v1976_v59 = vrot.slane %v1974_v30, 5  ;;  %v2155_v6 = vld [vmem:[#allocation2 + $0x18] sm:$0xf] }
 0x165   : > { %v7279_v17 = vadd.f32 %v7238_v2, %v4265_v53  ;;  %v4358_v52 = vpop.f32.mrf.mxu0  ;;  %v3115_v47 = vunpack.c.l.b16 %v2045_v0  ;;  %v1543_v53 = vrot.slane %v1541_v28, 4  ;;  %v2207_v12 = vshll.u32 %v2155_v6, 16 }
 0x166   : > { %v7281_v61 = vpop.f32.mrf.mxu1  ;;  %v1971_v58 = vor.u32 %v1970_v45, %v1966_v29  ;;  %v1967_v49 = vsel %vm6533_vm10, %v1962_v37, %v1966_v29  ;;  %v2213_v24 = vshll.u32 %v2156_v62, 16  ;;  %v2217_v33 = vshrl.u32 %v2156_v62, 16  ;;  %v2587_v37 = vld [vmem:[#allocation2 + $0x18] sm:$0xe] }
 0x167   : > { %4397 = vmatmul.bf16.gmra.mxu0 %v3097_v34  ;;  %v7293_v63 = vpack.c.b16 %v3116_v26, %v3115_v47  ;;  %v3081_v42 = vunpack.c.l.b16 %v1967_v49  ;;  %v2209_v19 = vrot.slane %v2207_v12, 5  ;;  %v4094_v45 = vadd.f32 %v7281_v61, %v6830_v25  ;;  %v2157_v25 = vld [vmem:[#allocation2 + $0x24] sm:$0xf]  ;;  %v7317_v61 = vld [vmem:[#allocation2 + $0x28] sm:$0xf] }
 0x168   : > { %v4177_v2 = vpop.f32.mrf.mxu2  ;;  %v1972_v11 = vrot.slane %v1971_v58, 4  ;;  %v7312_v57 = vrot.slane %v2213_v24, 5  ;;  %v2219_v29 = vrot.slane %v2217_v33, 4  ;;  %v2653_v0 = vrot.slane %v2156_v62, 5  ;;  %v5930_v62 = vld [vmem:[#allocation2 + $0x1c] sm:$0xf] }
 0x169   : > { %v4178_v16 = vadd.f32 %v4177_v2, %v4089_v43  ;;  %v2204_v43 = vshrl.u32 %v2155_v6, 16  ;;  %v2937_v2 = vunpack.c.l.b16 %v1542_v8  ;;  %v5097_v7 = vrot.slane %v2587_v37, 9 }
 0x16a   : > { %v4266_v38 = vpop.f32.mrf.mxu3  ;;  %v2220_v47 = vor.u32 %v2219_v29, %v7312_v57  ;;  %v2237_v24 = vshll.u32 %v7317_v61, 16  ;;  %v2241_v33 = vshrl.u32 %v7317_v61, 16 }
 0x16b   : > { %v4267_v39 = vadd.f32 %v4266_v38, %v4178_v16  ;;  %v2206_v30 = vrot.slane %v2204_v43, 4 }
 0x16d   : > { %4219 = vmatmul.bf16.gmra.mxu2 %v2953_v20  ;;  %v7296_v35 = vadd.f32 %v7269_v50, %v4267_v39  ;;  %v4360_v27 = vpop.f32.mrf.mxu0  ;;  %v1977_v20 = vsel %vm6533_vm10, %v1972_v11, %v1976_v59  ;;  %v1545_v50 = vsel %vm6557_vm13, %v1543_v53, %v1544_v22  ;;  %v2187_v39 = vld [vmem:[#allocation2 + $0x20] sm:$0x1]  ;;  %v2655_v22 = vrot.slane %v2653_v0, 4 }
 0x16e   : > { %v4096_v10 = vpop.f32.mrf.mxu1  ;;  %v3082_v31 = vunpack.c.l.b16 %v1977_v20  ;;  %v2938_v54 = vunpack.c.l.b16 %v1545_v50  ;;  %v2223_v53 = vshll.u32 %v2187_v39, 16  ;;  %v2656_v11 = vrot.slane %v2187_v39, 5 }
 0x16f   : > { %4308 = vmatmul.bf16.gmra.mxu3 %v5627_v36  ;;  %v2654_v20 = vsel %vm6557_vm13, %v5097_v7, %v2653_v0  ;;  %v4097_v8 = vadd.f32 %v4096_v10, %v6852_v55  ;;  %v2221_v50 = vrot.slane %v2220_v47, 4  ;;  %v7336_v39 = vrot.slane %v2237_v24, 5  ;;  %v2588_v7 = vld [vmem:[#allocation2 + $0x24] sm:$0xe] }
 0x170   : > { %v4180_v34 = vpop.f32.mrf.mxu2  ;;  %v3098_v16 = vpack.c.b16 %v3082_v31, %v3081_v42  ;;  %v2954_v58 = vpack.c.b16 %v2938_v54, %v2937_v2  ;;  %v2225_v43 = vrot.slane %v2223_v53, 5  ;;  %v2657_v12 = vsel %vm6557_vm13, %v2655_v22, %v2656_v11 }
 0x171   : > { %v4181_v32 = vadd.f32 %v4180_v34, %v4092_v44  ;;  %4135 = vmatmul.bf16.gmra.mxu1 %v2890_v48  ;;  %v5628_v48 = vld [vmem:[#allocation2 + $0xc0] sm:$0xff]  ;;  %v2051_v34 = vrot.slane %v5930_v62, 5  ;;  %v2228_v42 = vshrl.u32 %v2157_v25, 16  ;;  %v2231_v31 = vshll.u32 %v2157_v25, 16 }
 0x172   : > { %v4269_v15 = vpop.f32.mrf.mxu3  ;;  %v3323_v2 = vunpack.c.l.b16 %v2654_v20  ;;  %v3324_v10 = vunpack.c.l.b16 %v2657_v12  ;;  %v2226_v37 = vsel %vm6533_vm10, %v2221_v50, %v2225_v43  ;;  %v5098_v43 = vrot.slane %v2588_v7, 9  ;;  %v5933_v7 = vld [vmem:[#allocation2 + $0x2c] sm:$0x1] }
 0x173   : > { %v4270_v23 = vadd.f32 %v4269_v15, %v4181_v32  ;;  %v1979_v15 = vld [vmem:[#allocation2 + $0x18] sm:$0xe]  ;;  %v2230_v0 = vrot.slane %v2228_v42, 4  ;;  %v3260_v11 = vunpack.c.l.b16 %v2226_v37 }
 0x174   : > { %v5082_v54 = vrot.slane %v1979_v15, 9 }
 0x175   : > { %v7308_v18 = vadd.f32 %v4358_v52, %v4270_v23  ;;  %v4363_v38 = vpop.f32.mrf.mxu0  ;;  %v2210_v52 = vor.u32 %v2209_v19, %v2206_v30  ;;  %v2053_v30 = vrot.slane %v2051_v34, 4 }
 0x176   : > { %v7310_v28 = vpop.f32.mrf.mxu1  ;;  %v2052_v47 = vsel %vm6557_vm13, %v5082_v54, %v2051_v34 }
 0x177   : > { %4402 = vmatmul.bf16.gmra.mxu0 %v3098_v16  ;;  %v2211_v49 = vrot.slane %v2210_v52, 4  ;;  %v5931_v16 = vld [vmem:[#allocation2 + $0x20] sm:$0x1]  ;;  %v3117_v34 = vunpack.c.l.b16 %v2052_v47 }
 0x178   : > { %v4182_v41 = vpop.f32.mrf.mxu2  ;;  %v2054_v19 = vrot.slane %v5931_v16, 5 }
 0x179   : > { %v4183_v36 = vadd.f32 %v4182_v41, %v4094_v45  ;;  %v2216_v45 = vsel %vm6533_vm10, %v2211_v49, %v7312_v57  ;;  %v2233_v41 = vrot.slane %v2231_v31, 5 }
 0x17a   : > { %v4271_v59 = vpop.f32.mrf.mxu3  ;;  %v2055_v57 = vsel %vm6557_vm13, %v2053_v30, %v2054_v19  ;;  %v3259_v22 = vunpack.c.l.b16 %v2216_v45  ;;  %v2159_v30 = vld [vmem:[#allocation2 + $0x30] sm:$0xf]  ;;  %v2160_v45 = vld [vmem:[#allocation2 + $0x34] sm:$0xf] }
 0x17b   : > { %v4272_v26 = vadd.f32 %v4271_v59, %v4183_v36  ;;  %v2188_v36 = vld [vmem:[#allocation2 + $0x2c] sm:$0x1]  ;;  %v3355_v59 = vpack.c.b16 %v3324_v10, %v3323_v2  ;;  %v2234_v25 = vor.u32 %v2233_v41, %v2230_v0  ;;  %v3118_v50 = vunpack.c.l.b16 %v2055_v57  ;;  %v5932_v10 = vld [vmem:[#allocation2 + $0x28] sm:$0xf] }
 0x17c   : > { %v2247_v20 = vshll.u32 %v2188_v36, 16  ;;  %v3291_v42 = vpack.c.b16 %v3260_v11, %v3259_v22  ;;  %v2058_v54 = vrot.slane %v5932_v10, 5  ;;  %v2255_v47 = vshll.u32 %v2159_v30, 16 }
 0x17d   : > { %4224 = vmatmul.bf16.gmra.mxu2 %v2954_v58  ;;  %v7319_v6 = vadd.f32 %v4360_v27, %v4272_v26  ;;  %v4365_v32 = vpop.f32.mrf.mxu0  ;;  %v2660_v26 = vrot.slane %v7317_v61, 5  ;;  %v2663_v61 = vrot.slane %v2188_v36, 5  ;;  %v3148_v24 = vpack.c.b16 %v3118_v50, %v3117_v34 }
 0x17e   : > { %v7321_v44 = vpop.f32.mrf.mxu1  ;;  %v2249_v31 = vrot.slane %v2247_v20, 5  ;;  %v2265_v11 = vshrl.u32 %v2160_v45, 16  ;;  %v2257_v50 = vrot.slane %v2255_v47, 5  ;;  %v5934_v47 = vld [vmem:[#allocation2 + $0x34] sm:$0xf] }
 0x17f   : > { %4313 = vmatmul.bf16.gmra.mxu3 %v5628_v48  ;;  %v4099_v48 = vadd.f32 %v7310_v28, %v6886_v3  ;;  %v2662_v15 = vrot.slane %v2660_v26, 4  ;;  %v2235_v3 = vrot.slane %v2234_v25, 4  ;;  %v4102_v16 = vadd.f32 %v7321_v44, %v6754_v1 }
 0x180   : > { %v4185_v27 = vpop.f32.mrf.mxu2  ;;  %v2060_v44 = vrot.slane %v2058_v54, 4 }
 0x181   : > { %v4186_v23 = vadd.f32 %v4185_v27, %v4097_v8  ;;  %4416 = vmatmul.bf16.vlgmr.msra.gmra.mxu1 %v7293_v63  ;;  %v2243_v63 = vrot.slane %v2241_v33, 4  ;;  %v5629_v8 = vld [vmem:[#allocation2 + $0x18] sm:$0xff]  ;;  %v2661_v33 = vsel %vm6557_vm13, %v5098_v43, %v2660_v26  ;;  %v2061_v26 = vrot.slane %v5933_v7, 5 }
 0x182   : > { %v4274_v55 = vpop.f32.mrf.mxu3  ;;  %v3325_v41 = vunpack.c.l.b16 %v2661_v33 }
 0x183   : > { %v4275_v29 = vadd.f32 %v4274_v55, %v4186_v23  ;;  %v2244_v49 = vor.u32 %v2243_v63, %v7336_v39  ;;  %v2664_v55 = vsel %vm6557_vm13, %v2662_v15, %v2663_v61  ;;  %v2062_v34 = vsel %vm6557_vm13, %v2060_v44, %v2061_v26  ;;  %v2189_v61 = vld [vmem:[#allocation2 + $0x38] sm:$0x1] }
 0x184   : > { %v3326_v36 = vunpack.c.l.b16 %v2664_v55  ;;  %v3120_v33 = vunpack.c.l.b16 %v2062_v34 }
 0x185   : > { %v7338_v58 = vadd.f32 %v4363_v38, %v4275_v29  ;;  %v4368_v53 = vpop.f32.mrf.mxu0  ;;  %v2245_v28 = vrot.slane %v2244_v49, 4  ;;  %v1980_v29 = vld [vmem:[#allocation2 + $0x24] sm:$0xe] }
 0x186   : > { %v7340_v52 = vpop.f32.mrf.mxu1  ;;  %v5083_v1 = vrot.slane %v1980_v29, 9 }
 0x187   : > { %4683 = vmatmul.bf16.vlgmr.msra.gmra.mxu0 %v3355_v59  ;;  %v2250_v0 = vsel %vm6533_vm10, %v2245_v28, %v2249_v31  ;;  %v2252_v59 = vshrl.u32 %v2159_v30, 16  ;;  %v5630_v31 = vld [vmem:[#allocation2 + $0x24] sm:$0xff]  ;;  %v2271_v30 = vshll.u32 %v2189_v61, 16 }
 0x188   : > { %v4187_v38 = vpop.f32.mrf.mxu2  ;;  %v3262_v25 = vunpack.c.l.b16 %v2250_v0  ;;  %v2161_v0 = vld [vmem:[#allocation2 + $0x3c] sm:$0xf] }
 0x189   : > { %v4188_v62 = vadd.f32 %v4187_v38, %v4099_v48  ;;  %v2261_v48 = vshll.u32 %v2160_v45, 16  ;;  %v2254_v49 = vrot.slane %v2252_v59, 4  ;;  %v2273_v26 = vrot.slane %v2271_v30, 5 }
 0x18a   : > { %v4276_v12 = vpop.f32.mrf.mxu3 }
 0x18b   : > { %v4277_v27 = vadd.f32 %v4276_v12, %v4188_v62  ;;  %v7373_v43 = vrot.slane %v2261_v48, 5  ;;  %v4104_v12 = vadd.f32 %v7340_v52, %v6786_v40  ;;  %v2670_v52 = vrot.slane %v2189_v61, 5 }
 0x18d   : > { %4505 = vmatmul.bf16.vlgmr.msra.gmra.mxu2 %v5629_v8  ;;  %v7352_v23 = vadd.f32 %v4365_v32, %v4277_v27  ;;  %v4370_v19 = vpop.f32.mrf.mxu0  ;;  %v2240_v32 = vsel %vm6533_vm10, %v2235_v3, %v7336_v39  ;;  %v3356_v39 = vpack.c.b16 %v3326_v36, %v3325_v41  ;;  %v2059_v8 = vsel %vm6557_vm13, %v5083_v1, %v2058_v54 }
 0x18e   : > { %v7354_v2 = vpop.f32.mrf.mxu1  ;;  %v3261_v38 = vunpack.c.l.b16 %v2240_v32  ;;  %v2267_v27 = vrot.slane %v2265_v11, 4  ;;  %v2258_v54 = vor.u32 %v2257_v50, %v2254_v49  ;;  %v2276_v11 = vshrl.u32 %v2161_v0, 16 }
 0x18f   : > { %4594 = vmatmul.bf16.vlgmr.msra.gmra.mxu3 %v3291_v42  ;;  %v2589_v42 = vld [vmem:[#allocation2 + $0x30] sm:$0xe]  ;;  %v4107_v1 = vadd.f32 %v7354_v2, %v6808_v56 }
 0x190   : > { %v4190_v37 = vpop.f32.mrf.mxu2  ;;  %v3292_v10 = vpack.c.b16 %v3262_v25, %v3261_v38  ;;  %v2259_v36 = vrot.slane %v2258_v54, 4  ;;  %v2279_v38 = vshll.u32 %v2161_v0, 16 }
 0x191   : > { %v4191_v63 = vadd.f32 %v4190_v37, %v4102_v16  ;;  %4421 = vmatmul.bf16.gmra.mxu1 %v3148_v24  ;;  %v3119_v24 = vunpack.c.l.b16 %v2059_v8  ;;  %v5099_v16 = vrot.slane %v2589_v42, 9  ;;  %v2268_v37 = vor.u32 %v2267_v27, %v7373_v43 }
 0x192   : > { %v4279_v57 = vpop.f32.mrf.mxu3  ;;  %v2264_v42 = vsel %vm6533_vm10, %v2259_v36, %v7373_v43 }
 0x193   : > { %v4280_v22 = vadd.f32 %v4279_v57, %v4191_v63  ;;  %v3149_v32 = vpack.c.b16 %v3120_v33, %v3119_v24  ;;  %v2065_v57 = vrot.slane %v5934_v47, 5  ;;  %v2269_v7 = vrot.slane %v2268_v37, 4  ;;  %v2190_v33 = vld [vmem:[#allocation2 + $0x44] sm:$0x1] }
 0x195   : > { %v7365_v20 = vadd.f32 %v4368_v53, %v4280_v22  ;;  %v4373_v15 = vpop.f32.mrf.mxu0  ;;  %v2667_v53 = vrot.slane %v2160_v45, 5  ;;  %v7378_v45 = vld [vmem:[#allocation2 + $0x40] sm:$0xf]  ;;  %v2067_v50 = vrot.slane %v2065_v57, 4 }
 0x196   : > { %v7367_v62 = vpop.f32.mrf.mxu1  ;;  %v2285_v25 = vshll.u32 %v7378_v45, 16 }
 0x197   : > { %4688 = vmatmul.bf16.gmra.mxu0 %v3356_v39  ;;  %v2669_v40 = vrot.slane %v2667_v53, 4  ;;  %v2668_v59 = vsel %vm6557_vm13, %v5099_v16, %v2667_v53  ;;  %v2289_v39 = vshrl.u32 %v7378_v45, 16  ;;  %v2274_v53 = vsel %vm6533_vm10, %v2269_v7, %v2273_v26  ;;  %v2590_v16 = vld [vmem:[#allocation2 + $0x3c] sm:$0xe] }
 0x198   : > { %v4192_v3 = vpop.f32.mrf.mxu2  ;;  %v3327_v8 = vunpack.c.l.b16 %v2668_v59  ;;  %v4109_v37 = vadd.f32 %v7367_v62, %v6833_v9  ;;  %v2295_v59 = vshll.u32 %v2190_v33, 16  ;;  %v5100_v26 = vrot.slane %v2590_v16, 9 }
 0x199   : > { %v4193_v28 = vadd.f32 %v4192_v3, %v4104_v12  ;;  %v2671_v48 = vsel %vm6557_vm13, %v2669_v40, %v2670_v52  ;;  %v5935_v12 = vld [vmem:[#allocation2 + $0x38] sm:$0x1]  ;;  %v2278_v3 = vrot.slane %v2276_v11, 4  ;;  %v2291_v24 = vrot.slane %v2289_v39, 4 }
 0x19a   : > { %v4281_v55 = vpop.f32.mrf.mxu3  ;;  %v3328_v56 = vunpack.c.l.b16 %v2671_v48  ;;  %v2068_v61 = vrot.slane %v5935_v12, 5  ;;  %v3263_v52 = vunpack.c.l.b16 %v2264_v42  ;;  %v8016_v12 = vld [vmem:[#allocation7_spill] sm:$0xff] }
 0x19b   : > { %v4282_v29 = vadd.f32 %v4281_v55, %v4193_v28  ;;  %v2281_v28 = vrot.slane %v2279_v38, 5  ;;  %v2297_v38 = vrot.slane %v2295_v59, 5  ;;  %v1982_v42 = vld [vmem:[#allocation2 + $0x3c] sm:$0xe] }
 0x19c   : > { %v2069_v43 = vsel %vm6557_vm13, %v2067_v50, %v2068_v61  ;;  %v2163_v50 = vld [vmem:[#allocation2 + $0x48] sm:$0xf] }
 0x19d   : > { %4510 = vmatmul.bf16.gmra.mxu2 %v5630_v31  ;;  %v7380_v41 = vadd.f32 %v4370_v19, %v4282_v29  ;;  %v4375_v44 = vpop.f32.mrf.mxu0  ;;  %v1981_v19 = vld [vmem:[#allocation2 + $0x30] sm:$0xe]  ;;  %v7397_v31 = vrot.slane %v2285_v25, 5  ;;  %v2674_v29 = vrot.slane %v7378_v45, 5  ;;  %v2282_v0 = vor.u32 %v2281_v28, %v2278_v3 }
 0x19e   : > { %v7382_v63 = vpop.f32.mrf.mxu1  ;;  %v5084_v2 = vrot.slane %v1981_v19, 9  ;;  %v3122_v7 = vunpack.c.l.b16 %v2069_v43  ;;  %v2677_v45 = vrot.slane %v2190_v33, 5  ;;  %v2303_v43 = vshll.u32 %v2163_v50, 16 }
 0x19f   : > { %4599 = vmatmul.bf16.gmra.mxu3 %v3292_v10  ;;  %v3357_v10 = vpack.c.b16 %v3328_v56, %v3327_v8  ;;  %v2292_v36 = vor.u32 %v2291_v24, %v7397_v31  ;;  %v2676_v19 = vrot.slane %v2674_v29, 4  ;;  %v2283_v9 = vrot.slane %v2282_v0, 4  ;;  %v5936_v56 = vld [vmem:[#allocation2 + $0x40] sm:$0xf] }
 0x1a0   : > { %v4195_v22 = vpop.f32.mrf.mxu2  ;;  %v2066_v30 = vsel %vm6557_vm13, %v5084_v2, %v2065_v57  ;;  %v2675_v39 = vsel %vm6557_vm13, %v5100_v26, %v2674_v29  ;;  %v2072_v2 = vrot.slane %v5936_v56, 5  ;;  %v4112_v61 = vadd.f32 %v7382_v63, %v8016_v12 }
 0x1a1   : > { %v4196_v49 = vadd.f32 %v4195_v22, %v4107_v1  ;;  %4426 = vmatmul.bf16.gmra.mxu1 %v3149_v32  ;;  %v3264_v32 = vunpack.c.l.b16 %v2274_v53  ;;  %v5631_v1 = vld [vmem:[#allocation2 + $0x30] sm:$0xff]  ;;  %v3121_v57 = vunpack.c.l.b16 %v2066_v30  ;;  %v2293_v62 = vrot.slane %v2292_v36, 4  ;;  %v2164_v53 = vld [vmem:[#allocation2 + $0x4c] sm:$0xf] }
 0x1a2   : > { %v4284_v34 = vpop.f32.mrf.mxu3  ;;  %v3329_v24 = vunpack.c.l.b16 %v2675_v39  ;;  %v2300_v30 = vshrl.u32 %v2163_v50, 16  ;;  %v5085_v63 = vrot.slane %v1982_v42, 9  ;;  %v2074_v29 = vrot.slane %v2072_v2, 4 }
 0x1a3   : > { %v4285_v27 = vadd.f32 %v4284_v34, %v4196_v49  ;;  %v3293_v11 = vpack.c.b16 %v3264_v32, %v3263_v52  ;;  %v3150_v25 = vpack.c.b16 %v3122_v7, %v3121_v57  ;;  %v2678_v34 = vsel %vm6557_vm13, %v2676_v19, %v2677_v45  ;;  %v8017_v45 = vld [vmem:[#allocation9_spill] sm:$0xff] }
 0x1a4   : > { %v2298_v28 = vsel %vm6533_vm10, %v2293_v62, %v2297_v38  ;;  %v2309_v32 = vshll.u32 %v2164_v53, 16  ;;  %v2313_v0 = vshrl.u32 %v2164_v53, 16  ;;  %v2073_v7 = vsel %vm6557_vm13, %v5085_v63, %v2072_v2  ;;  %v2591_v38 = vld [vmem:[#allocation2 + $0x48] sm:$0xe] }
 0x1a5   : > { %v7399_v55 = vadd.f32 %v4373_v15, %v4285_v27  ;;  %v4378_v40 = vpop.f32.mrf.mxu0  ;;  %v3266_v59 = vunpack.c.l.b16 %v2298_v28  ;;  %v3123_v56 = vunpack.c.l.b16 %v2073_v7 }
 0x1a6   : > { %v7401_v54 = vpop.f32.mrf.mxu1  ;;  %v7434_v19 = vrot.slane %v2309_v32, 5  ;;  %v2315_v62 = vrot.slane %v2313_v0, 4 }
 0x1a7   : > { %4693 = vmatmul.bf16.gmra.mxu0 %v3357_v10  ;;  %v3330_v10 = vunpack.c.l.b16 %v2678_v34  ;;  %v5632_v34 = vld [vmem:[#allocation2 + $0x3c] sm:$0xff] }
 0x1a8   : > { %v4197_v15 = vpop.f32.mrf.mxu2  ;;  %v2316_v28 = vor.u32 %v2315_v62, %v7434_v19 }
 0x1a9   : > { %v4198_v47 = vadd.f32 %v4197_v15, %v4109_v37  ;;  %v5937_v37 = vld [vmem:[#allocation2 + $0x44] sm:$0x1] }
 0x1aa   : > { %v4286_v48 = vpop.f32.mrf.mxu3  ;;  %v2075_v52 = vrot.slane %v5937_v37, 5  ;;  %v2317_v0 = vrot.slane %v2316_v28, 4 }
 0x1ab   : > { %v4287_v22 = vadd.f32 %v4286_v48, %v4198_v47  ;;  %v2302_v47 = vrot.slane %v2300_v30, 4  ;;  %v2305_v48 = vrot.slane %v2303_v43, 5 }
 0x1ac   : > { %v2076_v26 = vsel %vm6557_vm13, %v2074_v29, %v2075_v52  ;;  %v5938_v29 = vld [vmem:[#allocation2 + $0x4c] sm:$0xf]  ;;  %v8018_v52 = vld [vmem:[#allocation11_spill] sm:$0xff] }
 0x1ad   : > { %4515 = vmatmul.bf16.gmra.mxu2 %v5631_v1  ;;  %v7413_v49 = vadd.f32 %v4375_v44, %v4287_v22  ;;  %v4380_v27 = vpop.f32.mrf.mxu0  ;;  %v2288_v44 = vsel %vm6533_vm10, %v2283_v9, %v7397_v31  ;;  %v3358_v31 = vpack.c.b16 %v3330_v10, %v3329_v24  ;;  %v4114_v22 = vadd.f32 %v7401_v54, %v8017_v45  ;;  %v2191_v9 = vld [vmem:[#allocation2 + $0x50] sm:$0x1]  ;;  %v2165_v10 = vld [vmem:[#allocation2 + $0x54] sm:$0xf] }
 0x1ae   : > { %v7415_v8 = vpop.f32.mrf.mxu1  ;;  %v3265_v36 = vunpack.c.l.b16 %v2288_v44  ;;  %v3124_v50 = vunpack.c.l.b16 %v2076_v26  ;;  %v2319_v42 = vshll.u32 %v2191_v9, 16  ;;  %v2684_v24 = vrot.slane %v2191_v9, 5 }
 0x1af   : > { %4604 = vmatmul.bf16.gmra.mxu3 %v3293_v11  ;;  %v2079_v37 = vrot.slane %v5938_v29, 5  ;;  %v4117_v32 = vadd.f32 %v7415_v8, %v8018_v52  ;;  %v2327_v7 = vshll.u32 %v2165_v10, 16 }
 0x1b0   : > { %v4200_v3 = vpop.f32.mrf.mxu2  ;;  %v3294_v12 = vpack.c.b16 %v3266_v59, %v3265_v36  ;;  %v2321_v36 = vrot.slane %v2319_v42, 5  ;;  %v2192_v42 = vld [vmem:[#allocation2 + $0x5c] sm:$0x1] }
 0x1b1   : > { %v4201_v33 = vadd.f32 %v4200_v3, %v4112_v61  ;;  %4431 = vmatmul.bf16.gmra.mxu1 %v3150_v25  ;;  %v2306_v61 = vor.u32 %v2305_v48, %v2302_v47  ;;  %v5101_v3 = vrot.slane %v2591_v38, 9  ;;  %v2324_v47 = vshrl.u32 %v2165_v10, 16  ;;  %v8019_v10 = vld [vmem:[#allocation13_spill] sm:$0xff] }
 0x1b2   : > { %v4289_v16 = vpop.f32.mrf.mxu3  ;;  %v2081_v38 = vrot.slane %v2079_v37, 4 }
 0x1b3   : > { %v4290_v15 = vadd.f32 %v4289_v16, %v4201_v33  ;;  %v3151_v33 = vpack.c.b16 %v3124_v50, %v3123_v56  ;;  %v2307_v16 = vrot.slane %v2306_v61, 4  ;;  %v2322_v56 = vsel %vm6533_vm10, %v2317_v0, %v2321_v36 }
 0x1b4   : > { %v2326_v50 = vrot.slane %v2324_v47, 4  ;;  %v3268_v52 = vunpack.c.l.b16 %v2322_v56  ;;  %v2343_v36 = vshll.u32 %v2192_v42, 16  ;;  %v2167_v56 = vld [vmem:[#allocation2 + $0x60] sm:$0xf] }
 0x1b5   : > { %v7426_v1 = vadd.f32 %v4378_v40, %v4290_v15  ;;  %v4383_v11 = vpop.f32.mrf.mxu0  ;;  %v2681_v40 = vrot.slane %v2164_v53, 5  ;;  %v7439_v53 = vld [vmem:[#allocation2 + $0x58] sm:$0xf] }
 0x1b6   : > { %v7428_v57 = vpop.f32.mrf.mxu1  ;;  %v2333_v26 = vshll.u32 %v7439_v53, 16  ;;  %v2337_v48 = vshrl.u32 %v7439_v53, 16 }
 0x1b7   : > { %4698 = vmatmul.bf16.gmra.mxu0 %v3358_v31  ;;  %v2683_v54 = vrot.slane %v2681_v40, 4  ;;  %v2682_v63 = vsel %vm6557_vm13, %v5101_v3, %v2681_v40  ;;  %v5939_v40 = vld [vmem:[#allocation2 + $0x50] sm:$0x1] }
 0x1b8   : > { %v4202_v25 = vpop.f32.mrf.mxu2  ;;  %v2339_v61 = vrot.slane %v2337_v48, 4 }
 0x1b9   : > { %v4203_v39 = vadd.f32 %v4202_v25, %v4114_v22  ;;  %v2685_v59 = vsel %vm6557_vm13, %v2683_v54, %v2684_v24  ;;  %v3331_v22 = vunpack.c.l.b16 %v2682_v63  ;;  %v2082_v25 = vrot.slane %v5939_v40, 5  ;;  %v2592_v24 = vld [vmem:[#allocation2 + $0x54] sm:$0xe] }
 0x1ba   : > { %v4291_v2 = vpop.f32.mrf.mxu3  ;;  %v3332_v8 = vunpack.c.l.b16 %v2685_v59  ;;  %v5102_v47 = vrot.slane %v2592_v24, 9 }
 0x1bb   : > { %v4292_v44 = vadd.f32 %v4291_v2, %v4203_v39  ;;  %v2329_v2 = vrot.slane %v2327_v7, 5 }
 0x1bd   : > { %4520 = vmatmul.bf16.gmra.mxu2 %v5632_v34  ;;  %v7441_v30 = vadd.f32 %v4380_v27, %v4292_v44  ;;  %v4385_v15 = vpop.f32.mrf.mxu0  ;;  %v1983_v27 = vld [vmem:[#allocation2 + $0x48] sm:$0xe]  ;;  %v2312_v34 = vsel %vm6533_vm10, %v2307_v16, %v7434_v19  ;;  %v3359_v44 = vpack.c.b16 %v3332_v8, %v3331_v22  ;;  %v2083_v19 = vsel %vm6557_vm13, %v2081_v38, %v2082_v25 }
 0x1be   : > { %v7443_v43 = vpop.f32.mrf.mxu1  ;;  %v5086_v62 = vrot.slane %v1983_v27, 9  ;;  %v4119_v16 = vadd.f32 %v7428_v57, %v8019_v10  ;;  %v3267_v29 = vunpack.c.l.b16 %v2312_v34  ;;  %v5633_v27 = vld [vmem:[#allocation2 + $0x48] sm:$0xff] }
 0x1bf   : > { %4609 = vmatmul.bf16.gmra.mxu3 %v3294_v12  ;;  %v7458_v12 = vrot.slane %v2333_v26, 5 }
 0x1c0   : > { %v4205_v31 = vpop.f32.mrf.mxu2  ;;  %v2080_v54 = vsel %vm6557_vm13, %v5086_v62, %v2079_v37 }
 0x1c1   : > { %v4206_v45 = vadd.f32 %v4205_v31, %v4117_v32  ;;  %4436 = vmatmul.bf16.gmra.mxu1 %v3151_v33  ;;  %v2688_v33 = vrot.slane %v7439_v53, 5  ;;  %v2330_v32 = vor.u32 %v2329_v2, %v2326_v50  ;;  %v2340_v0 = vor.u32 %v2339_v61, %v7458_v12  ;;  %v8020_v50 = vld [vmem:[#allocation3_spill] sm:$0xff] }
 0x1c2   : > { %v4294_v9 = vpop.f32.mrf.mxu3  ;;  %v3125_v37 = vunpack.c.l.b16 %v2080_v54  ;;  %v3126_v31 = vunpack.c.l.b16 %v2083_v19  ;;  %v2691_v53 = vrot.slane %v2192_v42, 5  ;;  %v4122_v2 = vadd.f32 %v7443_v43, %v8020_v50  ;;  %v1984_v42 = vld [vmem:[#allocation2 + $0x54] sm:$0xe] }
 0x1c3   : > { %v4295_v39 = vadd.f32 %v4294_v9, %v4206_v45  ;;  %v2690_v26 = vrot.slane %v2688_v33, 4  ;;  %v3295_v45 = vpack.c.b16 %v3268_v52, %v3267_v29  ;;  %v2331_v57 = vrot.slane %v2330_v32, 4  ;;  %v5941_v32 = vld [vmem:[#allocation2 + $0x5c] sm:$0x1] }
 0x1c4   : > { %v2341_v22 = vrot.slane %v2340_v0, 4  ;;  %v2345_v9 = vrot.slane %v2343_v36, 5  ;;  %v3152_v8 = vpack.c.b16 %v3126_v31, %v3125_v37  ;;  %v2689_v62 = vsel %vm6557_vm13, %v5102_v47, %v2688_v33 }
 0x1c5   : > { %v7460_v3 = vadd.f32 %v4383_v11, %v4295_v39  ;;  %v4388_v63 = vpop.f32.mrf.mxu0  ;;  %v2692_v25 = vsel %vm6557_vm13, %v2690_v26, %v2691_v53  ;;  %v5940_v39 = vld [vmem:[#allocation2 + $0x58] sm:$0xf]  ;;  %v3333_v24 = vunpack.c.l.b16 %v2689_v62  ;;  %v2351_v29 = vshll.u32 %v2167_v56, 16  ;;  %v2193_v62 = vld [vmem:[#allocation2 + $0x68] sm:$0x1] }
 0x1c6   : > { %v7462_v28 = vpop.f32.mrf.mxu1  ;;  %v2086_v34 = vrot.slane %v5940_v39, 5  ;;  %v2346_v19 = vsel %vm6533_vm10, %v2341_v22, %v2345_v9  ;;  %v3334_v10 = vunpack.c.l.b16 %v2692_v25  ;;  %v5087_v43 = vrot.slane %v1984_v42, 9  ;;  %v8021_v22 = vld [vmem:[#allocation4_spill] sm:$0xff] }
 0x1c7   : > { %4703 = vmatmul.bf16.gmra.mxu0 %v3359_v44  ;;  %v2168_v44 = vld [vmem:[#allocation2 + $0x64] sm:$0xf]  ;;  %v2089_v0 = vrot.slane %v5941_v32, 5  ;;  %v3270_v31 = vunpack.c.l.b16 %v2346_v19  ;;  %v4124_v9 = vadd.f32 %v7462_v28, %v8021_v22  ;;  %v2593_v39 = vld [vmem:[#allocation2 + $0x60] sm:$0xe] }
 0x1c8   : > { %v4207_v11 = vpop.f32.mrf.mxu2  ;;  %v2357_v36 = vshll.u32 %v2168_v44, 16  ;;  %v2087_v53 = vsel %vm6557_vm13, %v5087_v43, %v2086_v34  ;;  %v2169_v43 = vld [vmem:[#allocation2 + $0x6c] sm:$0xf] }
 0x1c9   : > { %v4208_v59 = vadd.f32 %v4207_v11, %v4119_v16  ;;  %v2348_v16 = vshrl.u32 %v2167_v56, 16  ;;  %v2088_v11 = vrot.slane %v2086_v34, 4  ;;  %v3127_v42 = vunpack.c.l.b16 %v2087_v53 }
 0x1ca   : > { %v4296_v7 = vpop.f32.mrf.mxu3  ;;  %v2372_v22 = vshrl.u32 %v2169_v43, 16 }
 0x1cb   : > { %v4297_v48 = vadd.f32 %v4296_v7, %v4208_v59  ;;  %v2350_v47 = vrot.slane %v2348_v16, 4 }
 0x1cd   : > { %4525 = vmatmul.bf16.gmra.mxu2 %v5633_v27  ;;  %v7474_v38 = vadd.f32 %v4385_v15, %v4297_v48  ;;  %v4390_v61 = vpop.f32.mrf.mxu0  ;;  %v2336_v15 = vsel %vm6533_vm10, %v2331_v57, %v7458_v12  ;;  %v2361_v27 = vshrl.u32 %v2168_v44, 16  ;;  %v3360_v12 = vpack.c.b16 %v3334_v10, %v3333_v24 }
 0x1ce   : > { %v7476_v40 = vpop.f32.mrf.mxu1  ;;  %v3269_v37 = vunpack.c.l.b16 %v2336_v15  ;;  %v2090_v48 = vsel %vm6557_vm13, %v2088_v11, %v2089_v0  ;;  %v7495_v57 = vrot.slane %v2357_v36, 5  ;;  %v2367_v24 = vshll.u32 %v2193_v62, 16 }
 0x1cf   : > { %4614 = vmatmul.bf16.gmra.mxu3 %v3295_v45  ;;  %v2353_v45 = vrot.slane %v2351_v29, 5  ;;  %v2363_v25 = vrot.slane %v2361_v27, 4  ;;  %v2698_v29 = vrot.slane %v2193_v62, 5 }
 0x1d0   : > { %v4210_v54 = vpop.f32.mrf.mxu2  ;;  %v3296_v15 = vpack.c.b16 %v3270_v31, %v3269_v37  ;;  %v8022_v37 = vld [vmem:[#allocation5_spill] sm:$0xff]  ;;  %v2369_v53 = vrot.slane %v2367_v24, 5  ;;  %v2374_v24 = vrot.slane %v2372_v22, 4 }
 0x1d1   : > { %v4211_v33 = vadd.f32 %v4210_v54, %v4122_v2  ;;  %4441 = vmatmul.bf16.gmra.mxu1 %v3152_v8  ;;  %v5634_v2 = vld [vmem:[#allocation2 + $0x54] sm:$0xff]  ;;  %v3128_v54 = vunpack.c.l.b16 %v2090_v48  ;;  %v2354_v19 = vor.u32 %v2353_v45, %v2350_v47  ;;  %v2364_v16 = vor.u32 %v2363_v25, %v7495_v57 }
 0x1d2   : > { %v4299_v52 = vpop.f32.mrf.mxu3  ;;  %v4127_v31 = vadd.f32 %v7476_v40, %v8022_v37  ;;  %v8024_v37 = vld [vmem:[#allocation6_spill] sm:$0xff] }
 0x1d3   : > { %v4300_v59 = vadd.f32 %v4299_v52, %v4211_v33  ;;  %v5103_v33 = vrot.slane %v2593_v39, 9  ;;  %v3153_v52 = vpack.c.b16 %v3128_v54, %v3127_v42  ;;  %v2355_v0 = vrot.slane %v2354_v19, 4  ;;  %v5943_v42 = vld [vmem:[#allocation2 + $0x68] sm:$0x1] }
 0x1d4   : > { %v2365_v47 = vrot.slane %v2364_v16, 4  ;;  %v2096_v54 = vrot.slane %v5943_v42, 5 }
 0x1d5   : > { %v7487_v7 = vadd.f32 %v4388_v63, %v4300_v59  ;;  %v4393_v8 = vpop.f32.mrf.mxu0  ;;  %v2695_v63 = vrot.slane %v2168_v44, 5  ;;  %v7500_v44 = vld [vmem:[#allocation2 + $0x70] sm:$0xf]  ;;  %v5942_v59 = vld [vmem:[#allocation2 + $0x64] sm:$0xf] }
 0x1d6   : > { %v7489_v26 = vpop.f32.mrf.mxu1  ;;  %v2093_v27 = vrot.slane %v5942_v59, 5  ;;  %v2381_v62 = vshll.u32 %v7500_v44, 16  ;;  %v2385_v25 = vshrl.u32 %v7500_v44, 16  ;;  %v2370_v19 = vsel %vm6533_vm10, %v2365_v47, %v2369_v53 }
 0x1d7   : > { %4708 = vmatmul.bf16.gmra.mxu0 %v3360_v12  ;;  %v2697_v28 = vrot.slane %v2695_v63, 4  ;;  %v2696_v36 = vsel %vm6557_vm13, %v5103_v33, %v2695_v63  ;;  %v2702_v59 = vrot.slane %v7500_v44, 5 }
 0x1d8   : > { %v4212_v56 = vpop.f32.mrf.mxu2  ;;  %v3335_v63 = vunpack.c.l.b16 %v2696_v36  ;;  %v2387_v16 = vrot.slane %v2385_v25, 4 }
 0x1d9   : > { %v4213_v50 = vadd.f32 %v4212_v56, %v4124_v9  ;;  %v2699_v48 = vsel %vm6557_vm13, %v2697_v28, %v2698_v29  ;;  %v2375_v9 = vshll.u32 %v2169_v43, 16  ;;  %v2194_v28 = vld [vmem:[#allocation2 + $0x74] sm:$0x1] }
 0x1da   : > { %v4301_v34 = vpop.f32.mrf.mxu3  ;;  %v3336_v40 = vunpack.c.l.b16 %v2699_v48  ;;  %v3272_v48 = vunpack.c.l.b16 %v2370_v19  ;;  %v2391_v22 = vshll.u32 %v2194_v28, 16  ;;  %v2705_v44 = vrot.slane %v2194_v28, 5  ;;  %v2171_v28 = vld [vmem:[#allocation2 + $0x78] sm:$0xf] }
 0x1db   : > { %v4302_v10 = vadd.f32 %v4301_v34, %v4213_v50  ;;  %v2377_v33 = vrot.slane %v2375_v9, 5 }
 0x1dc   : > { %v2393_v42 = vrot.slane %v2391_v22, 5 }
 0x1dd   : > { %4530 = vmatmul.bf16.gmra.mxu2 %v5634_v2  ;;  %v7502_v11 = vadd.f32 %v4390_v61, %v4302_v10  ;;  %v4395_v12 = vpop.f32.mrf.mxu0  ;;  %v1985_v61 = vld [vmem:[#allocation2 + $0x60] sm:$0xe]  ;;  %v2095_v2 = vrot.slane %v2093_v27, 4  ;;  %v7519_v10 = vrot.slane %v2381_v62, 5 }
 0x1de   : > { %v7504_v32 = vpop.f32.mrf.mxu1  ;;  %v5088_v50 = vrot.slane %v1985_v61, 9  ;;  %v2378_v61 = vor.u32 %v2377_v33, %v2374_v24  ;;  %v5635_v62 = vld [vmem:[#allocation2 + $0x60] sm:$0xff]  ;;  %v5944_v33 = vld [vmem:[#allocation2 + $0x70] sm:$0xf] }
 0x1df   : > { %4619 = vmatmul.bf16.gmra.mxu3 %v3296_v15  ;;  %v2360_v15 = vsel %vm6533_vm10, %v2355_v0, %v7495_v57  ;;  %v2097_v57 = vsel %vm6557_vm13, %v2095_v2, %v2096_v54  ;;  %v2594_v0 = vld [vmem:[#allocation2 + $0x6c] sm:$0xe] }
 0x1e0   : > { %v4215_v45 = vpop.f32.mrf.mxu2  ;;  %v2094_v36 = vsel %vm6557_vm13, %v5088_v50, %v2093_v27  ;;  %v3271_v53 = vunpack.c.l.b16 %v2360_v15  ;;  %v3130_v25 = vunpack.c.l.b16 %v2097_v57 }
 0x1e1   : > { %v4216_v39 = vadd.f32 %v4215_v45, %v4127_v31  ;;  %4446 = vmatmul.bf16.gmra.mxu1 %v3153_v52  ;;  %v3361_v52 = vpack.c.b16 %v3336_v40, %v3335_v63  ;;  %v4129_v31 = vadd.f32 %v7489_v26, %v8024_v37  ;;  %v2388_v45 = vor.u32 %v2387_v16, %v7519_v10  ;;  %v2172_v37 = vld [vmem:[#allocation2 + $0x7c] sm:$0xf] }
 0x1e2   : > { %v4304_v56 = vpop.f32.mrf.mxu3  ;;  %v3129_v27 = vunpack.c.l.b16 %v2094_v36  ;;  %v3297_v50 = vpack.c.b16 %v3272_v48, %v3271_v53  ;;  %v2379_v26 = vrot.slane %v2378_v61, 4  ;;  %v2100_v16 = vrot.slane %v5944_v33, 5 }
 0x1e3   : > { %v4305_v34 = vadd.f32 %v4304_v56, %v4216_v39  ;;  %v5104_v39 = vrot.slane %v2594_v0, 9  ;;  %v2704_v56 = vrot.slane %v2702_v59, 4  ;;  %v2389_v2 = vrot.slane %v2388_v45, 4  ;;  %v1986_v0 = vld [vmem:[#allocation2 + $0x6c] sm:$0xe] }
 0x1e4   : > { %v3154_v54 = vpack.c.b16 %v3130_v25, %v3129_v27  ;;  %v2396_v61 = vshrl.u32 %v2171_v28, 16  ;;  %v2399_v45 = vshll.u32 %v2171_v28, 16  ;;  %v2405_v25 = vshll.u32 %v2172_v37, 16 }
 0x1e5   : > { %v7521_v29 = vadd.f32 %v4393_v8, %v4305_v34  ;;  %v4398_v47 = vpop.f32.mrf.mxu0  ;;  %v2703_v34 = vsel %vm6557_vm13, %v5104_v39, %v2702_v59  ;;  %v2706_v24 = vsel %vm6557_vm13, %v2704_v56, %v2705_v44  ;;  %v2394_v59 = vsel %vm6533_vm10, %v2389_v2, %v2393_v42 }
 0x1e6   : > { %v7523_v43 = vpop.f32.mrf.mxu1  ;;  %v3337_v53 = vunpack.c.l.b16 %v2703_v34  ;;  %v3274_v44 = vunpack.c.l.b16 %v2394_v59  ;;  %v7556_v34 = vrot.slane %v2405_v25, 5  ;;  %v5636_v59 = vld [vmem:[#allocation2 + $0x6c] sm:$0xff]  ;;  %v2173_v25 = vld [vmem:[#allocation2 + $0x84] sm:$0xf] }
 0x1e7   : > { %8023 = vst [vmem:[#allocation7_spill] sm:$0xff] %v7521_v29  ;;  %4713 = vmatmul.bf16.gmra.mxu0 %v3361_v52  ;;  %v8026_v52 = vld [vmem:[#allocation8_spill] sm:$0xff] }
 0x1e8   : > { %v4217_v8 = vpop.f32.mrf.mxu2  ;;  %v4132_v36 = vadd.f32 %v7504_v32, %v8026_v52  ;;  %v5089_v32 = vrot.slane %v1986_v0, 9  ;;  %v2195_v52 = vld [vmem:[#allocation2 + $0x80] sm:$0x1]  ;;  %v2595_v0 = vld [vmem:[#allocation2 + $0x78] sm:$0xe] }
 0x1e9   : > { %v4218_v9 = vadd.f32 %v4217_v8, %v4129_v31  ;;  %v3338_v8 = vunpack.c.l.b16 %v2706_v24  ;;  %v8028_v24 = vld [vmem:[#allocation10_spill] sm:$0xff] }
 0x1ea   : > { %v4306_v63 = vpop.f32.mrf.mxu3  ;;  %v2101_v2 = vsel %vm6557_vm13, %v5089_v32, %v2100_v16  ;;  %v4134_v33 = vadd.f32 %v7523_v43, %v8028_v24 }
 0x1eb   : > { %v4307_v40 = vadd.f32 %v4306_v63, %v4218_v9  ;;  %v2102_v9 = vrot.slane %v2100_v16, 4  ;;  %v2409_v63 = vshrl.u32 %v2172_v37, 16 }
 0x1ed   : > { %4535 = vmatmul.bf16.gmra.mxu2 %v5635_v62  ;;  %v7535_v15 = vadd.f32 %v4395_v12, %v4307_v40  ;;  %v4400_v57 = vpop.f32.mrf.mxu0  ;;  %v2384_v12 = vsel %vm6533_vm10, %v2379_v26, %v7519_v10  ;;  %v5945_v62 = vld [vmem:[#allocation2 + $0x74] sm:$0x1]  ;;  %v3362_v10 = vpack.c.b16 %v3338_v8, %v3337_v53  ;;  %v2398_v40 = vrot.slane %v2396_v61, 4 }
 0x1ee   : > { %v7537_v19 = vpop.f32.mrf.mxu1  ;;  %v2103_v27 = vrot.slane %v5945_v62, 5  ;;  %v3273_v56 = vunpack.c.l.b16 %v2384_v12  ;;  %v3131_v53 = vunpack.c.l.b16 %v2101_v2  ;;  %v2712_v62 = vrot.slane %v2195_v52, 5 }
 0x1ef   : > { %8025 = vst [vmem:[#allocation9_spill] sm:$0xff] %v7535_v15  ;;  %4624 = vmatmul.bf16.gmra.mxu3 %v3297_v50 }
 0x1f0   : > { %v4220_v31 = vpop.f32.mrf.mxu2  ;;  %v2104_v42 = vsel %vm6557_vm13, %v2102_v9, %v2103_v27  ;;  %v3298_v8 = vpack.c.b16 %v3274_v44, %v3273_v56  ;;  %v5946_v44 = vld [vmem:[#allocation2 + $0x7c] sm:$0xf] }
 0x1f1   : > { %v4221_v48 = vadd.f32 %v4220_v31, %v4132_v36  ;;  %4451 = vmatmul.bf16.gmra.mxu1 %v3154_v54  ;;  %v2401_v54 = vrot.slane %v2399_v45, 5  ;;  %v2411_v36 = vrot.slane %v2409_v63, 4  ;;  %v2415_v45 = vshll.u32 %v2195_v52, 16 }
 0x1f2   : > { %v4309_v22 = vpop.f32.mrf.mxu3 }
 0x1f3   : > { %v4310_v39 = vadd.f32 %v4309_v22, %v4221_v48  ;;  %v3132_v48 = vunpack.c.l.b16 %v2104_v42  ;;  %v2402_v61 = vor.u32 %v2401_v54, %v2398_v40  ;;  %v5105_v22 = vrot.slane %v2595_v0, 9  ;;  %v8030_v40 = vld [vmem:[#allocation12_spill] sm:$0xff] }
 0x1f4   : > { %v2412_v9 = vor.u32 %v2411_v36, %v7556_v34  ;;  %v4137_v42 = vadd.f32 %v7537_v19, %v8030_v40  ;;  %v2420_v0 = vshrl.u32 %v2173_v25, 16 }
 0x1f5   : > { %v7548_v50 = vadd.f32 %v4398_v47, %v4310_v39  ;;  %v4403_v28 = vpop.f32.mrf.mxu0  ;;  %v2709_v47 = vrot.slane %v2172_v37, 5  ;;  %v3155_v27 = vpack.c.b16 %v3132_v48, %v3131_v53  ;;  %v7561_v37 = vld [vmem:[#allocation2 + $0x88] sm:$0xf]  ;;  %v2403_v2 = vrot.slane %v2402_v61, 4  ;;  %v5947_v61 = vld [vmem:[#allocation2 + $0x80] sm:$0x1] }
 0x1f6   : > { %v7550_v26 = vpop.f32.mrf.mxu1  ;;  %v2413_v24 = vrot.slane %v2412_v9, 4 }
 0x1f7   : > { %8027 = vst [vmem:[#allocation11_spill] sm:$0xff] %v7548_v50  ;;  %4718 = vmatmul.bf16.gmra.mxu0 %v3362_v10  ;;  %v2711_v43 = vrot.slane %v2709_v47, 4  ;;  %v2710_v56 = vsel %vm6557_vm13, %v5105_v22, %v2709_v47  ;;  %v2107_v10 = vrot.slane %v5946_v44, 5  ;;  %v2433_v47 = vshrl.u32 %v7561_v37, 16 }
 0x1f8   : > { %v4222_v31 = vpop.f32.mrf.mxu2  ;;  %v3339_v53 = vunpack.c.l.b16 %v2710_v56 }
 0x1f9   : > { %v4223_v12 = vadd.f32 %v4222_v31, %v4134_v33  ;;  %v2417_v33 = vrot.slane %v2415_v45, 5  ;;  %v2713_v52 = vsel %vm6557_vm13, %v2711_v43, %v2712_v62  ;;  %v2423_v31 = vshll.u32 %v2173_v25, 16 }
 0x1fa   : > { %v4311_v16 = vpop.f32.mrf.mxu3  ;;  %v3340_v19 = vunpack.c.l.b16 %v2713_v52  ;;  %v2110_v45 = vrot.slane %v5947_v61, 5  ;;  %v2422_v43 = vrot.slane %v2420_v0, 4  ;;  %v2596_v0 = vld [vmem:[#allocation2 + $0x84] sm:$0xe] }
 0x1fb   : > { %v4312_v32 = vadd.f32 %v4311_v16, %v4223_v12  ;;  %v2429_v12 = vshll.u32 %v7561_v37, 16  ;;  %v2418_v9 = vsel %vm6533_vm10, %v2413_v24, %v2417_v33  ;;  %v2425_v62 = vrot.slane %v2423_v31, 5  ;;  %v8032_v24 = vld [vmem:[#allocation14_spill] sm:$0xff] }
 0x1fc   : > { %v3363_v44 = vpack.c.b16 %v3340_v19, %v3339_v53  ;;  %v4139_v33 = vadd.f32 %v7550_v26, %v8032_v24 }
 0x1fd   : > { %4540 = vmatmul.bf16.gmra.mxu2 %v5636_v59  ;;  %v7563_v39 = vadd.f32 %v4400_v57, %v4312_v32  ;;  %v4405_v54 = vpop.f32.mrf.mxu0  ;;  %v1987_v57 = vld [vmem:[#allocation2 + $0x78] sm:$0xe]  ;;  %v2408_v32 = vsel %vm6533_vm10, %v2403_v2, %v7556_v34  ;;  %v7580_v25 = vrot.slane %v2429_v12, 5  ;;  %v2196_v34 = vld [vmem:[#allocation2 + $0x8c] sm:$0x1]  ;;  %v2716_v2 = vrot.slane %v7561_v37, 5 }
 0x1fe   : > { %v7565_v63 = vpop.f32.mrf.mxu1  ;;  %v5090_v16 = vrot.slane %v1987_v57, 9  ;;  %v2426_v12 = vor.u32 %v2425_v62, %v2422_v43  ;;  %v2439_v19 = vshll.u32 %v2196_v34, 16  ;;  %v5106_v37 = vrot.slane %v2596_v0, 9  ;;  %v2175_v43 = vld [vmem:[#allocation2 + $0x90] sm:$0xf] }
 0x1ff   : > { %8029 = vst [vmem:[#allocation13_spill] sm:$0xff] %v7563_v39  ;;  %4629 = vmatmul.bf16.gmra.mxu3 %v3298_v8  ;;  %v2109_v8 = vrot.slane %v2107_v10, 4  ;;  %v2719_v61 = vrot.slane %v2196_v34, 5 }
 0x200   : > { %v4225_v36 = vpop.f32.mrf.mxu2  ;;  %v2441_v24 = vrot.slane %v2439_v19, 5  ;;  %v5949_v19 = vld [vmem:[#allocation2 + $0x8c] sm:$0x1] }
 0x201   : > { %v4226_v59 = vadd.f32 %v4225_v36, %v4137_v42  ;;  %4456 = vmatmul.bf16.gmra.mxu1 %v3155_v27  ;;  %v2435_v27 = vrot.slane %v2433_v47, 4  ;;  %v2108_v42 = vsel %vm6557_vm13, %v5090_v16, %v2107_v10  ;;  %v2111_v52 = vsel %vm6557_vm13, %v2109_v8, %v2110_v45  ;;  %v5637_v10 = vld [vmem:[#allocation2 + $0x78] sm:$0xff] }
 0x202   : > { %v4314_v48 = vpop.f32.mrf.mxu3  ;;  %v3275_v36 = vunpack.c.l.b16 %v2408_v32  ;;  %v3133_v53 = vunpack.c.l.b16 %v2108_v42  ;;  %v2718_v8 = vrot.slane %v2716_v2, 4  ;;  %v2717_v42 = vsel %vm6557_vm13, %v5106_v37, %v2716_v2 }
 0x203   : > { %v4315_v22 = vadd.f32 %v4314_v48, %v4226_v59  ;;  %v2436_v47 = vor.u32 %v2435_v27, %v7580_v25  ;;  %v3134_v48 = vunpack.c.l.b16 %v2111_v52  ;;  %v5948_v52 = vld [vmem:[#allocation2 + $0x88] sm:$0xf] }
 0x204   : > { %v2114_v34 = vrot.slane %v5948_v52, 5 }
 0x205   : > { %v7582_v56 = vadd.f32 %v4403_v28, %v4315_v22  ;;  %v7593_v57 = vpop.f32.mrf.mxu0  ;;  %v3276_v28 = vunpack.c.l.b16 %v2418_v9  ;;  %v2427_v22 = vrot.slane %v2426_v12, 4  ;;  %v3156_v32 = vpack.c.b16 %v3134_v48, %v3133_v53 }
 0x206   : > { %v7584_v40 = vpop.f32.mrf.mxu1  ;;  %v2437_v9 = vrot.slane %v2436_v47, 4  ;;  %v2447_v12 = vshll.u32 %v2175_v43, 16  ;;  %v3341_v47 = vunpack.c.l.b16 %v2717_v42  ;;  %v2116_v48 = vrot.slane %v2114_v34, 4 }
 0x207   : > { %8031 = vst [vmem:[#allocation3_spill] sm:$0xff] %v7582_v56  ;;  %4723 = vmatmul.bf16.gmra.mxu0 %v3363_v44  ;;  %v3299_v45 = vpack.c.b16 %v3276_v28, %v3275_v36  ;;  %v2720_v44 = vsel %vm6557_vm13, %v2718_v8, %v2719_v61  ;;  %v1988_v36 = vld [vmem:[#allocation2 + $0x84] sm:$0xe]  ;;  %v2176_v28 = vld [vmem:[#allocation2 + $0x94] sm:$0xf]  ;;  %v4418_v8 = vadd.f32 %v7565_v63, %v7003_v5 }
 0x208   : > { %v4227_v31 = vpop.f32.mrf.mxu2  ;;  %v2442_v2 = vsel %vm6533_vm10, %v2437_v9, %v2441_v24  ;;  %v5091_v53 = vrot.slane %v1988_v36, 9  ;;  %v2453_v37 = vshll.u32 %v2176_v28, 16  ;;  %v2457_v61 = vshrl.u32 %v2176_v28, 16  ;;  %v2197_v63 = vld [vmem:[#allocation2 + $0x98] sm:$0x1] }
 0x209   : > { %v4228_v59 = vadd.f32 %v4227_v31, %v4139_v33  ;;  %v2444_v31 = vshrl.u32 %v2175_v43, 16  ;;  %v2726_v56 = vrot.slane %v2197_v63, 5 }
 0x20a   : > { %v4316_v16 = vpop.f32.mrf.mxu3  ;;  %v2115_v9 = vsel %vm6557_vm13, %v5091_v53, %v2114_v34  ;;  %v2455_v42 = vrot.slane %v2453_v37, 5 }
 0x20b   : > { %v4317_v26 = vadd.f32 %v4316_v16, %v4228_v59  ;;  %v3342_v59 = vunpack.c.l.b16 %v2720_v44  ;;  %v2117_v16 = vrot.slane %v5949_v19, 5  ;;  %v8034_v44 = vld [vmem:[#allocation15_spill] sm:$0xff]  ;;  %v5638_v19 = vld [vmem:[#allocation2 + $0x84] sm:$0xff] }
 0x20c   : > { %v4420_v36 = vadd.f32 %v7584_v40, %v8034_v44 }
 0x20d   : > { %4545 = vmatmul.bf16.gmra.mxu2 %v5637_v10  ;;  %v7596_v62 = vadd.f32 %v4405_v54, %v4317_v26  ;;  %v4686_v33 = vpop.f32.mrf.mxu0  ;;  %v2432_v54 = vsel %vm6533_vm10, %v2427_v22, %v7580_v25  ;;  %v2446_v26 = vrot.slane %v2444_v31, 4  ;;  %v3278_v25 = vunpack.c.l.b16 %v2442_v2 }
 0x20e   : > { %v7598_v27 = vpop.f32.mrf.mxu1  ;;  %v3277_v43 = vunpack.c.l.b16 %v2432_v54  ;;  %v3364_v22 = vpack.c.b16 %v3342_v59, %v3341_v47  ;;  %v2118_v24 = vsel %vm6557_vm13, %v2116_v48, %v2117_v16  ;;  %v2459_v31 = vrot.slane %v2457_v61, 4 }
 0x20f   : > { %8033 = vst [vmem:[#allocation4_spill] sm:$0xff] %v7596_v62  ;;  %4634 = vmatmul.bf16.gmra.mxu3 %v3299_v45  ;;  %v2449_v45 = vrot.slane %v2447_v12, 5  ;;  %v2723_v12 = vrot.slane %v2176_v28, 5  ;;  %v3136_v34 = vunpack.c.l.b16 %v2118_v24  ;;  %v2463_v16 = vshll.u32 %v2197_v63, 16  ;;  %v1989_v63 = vld [vmem:[#allocation2 + $0x90] sm:$0xe] }
 0x210   : > { %v4506_v0 = vpop.f32.mrf.mxu2  ;;  %v3300_v48 = vpack.c.b16 %v3278_v25, %v3277_v43  ;;  %v2460_v44 = vor.u32 %v2459_v31, %v2455_v42 }
 0x211   : > { %4461 = vmatmul.bf16.gmra.mxu1 %v3156_v32  ;;  %v4507_v32 = vadd.f32 %v4506_v0, %v4418_v8  ;;  %v2597_v0 = vld [vmem:[#allocation2 + $0x90] sm:$0xe]  ;;  %v2450_v2 = vor.u32 %v2449_v45, %v2446_v26  ;;  %v3135_v8 = vunpack.c.l.b16 %v2115_v9  ;;  %v2725_v62 = vrot.slane %v2723_v12, 4  ;;  %v2177_v45 = vld [vmem:[#allocation2 + $0x9c] sm:$0xf] }
 0x212   : > { %v4595_v10 = vpop.f32.mrf.mxu3  ;;  %v5107_v37 = vrot.slane %v2597_v0, 9  ;;  %v2461_v9 = vrot.slane %v2460_v44, 4  ;;  %v2465_v24 = vrot.slane %v2463_v16, 5  ;;  %v2178_v0 = vld [vmem:[#allocation2 + $0xa0] sm:$0xf] }
 0x213   : > { %v4596_v47 = vadd.f32 %v4595_v10, %v4507_v32  ;;  %v3157_v10 = vpack.c.b16 %v3136_v34, %v3135_v8  ;;  %v2451_v26 = vrot.slane %v2450_v2, 4  ;;  %v2471_v2 = vshll.u32 %v2177_v45, 16 }
 0x214   : > { %v2724_v43 = vsel %vm6557_vm13, %v5107_v37, %v2723_v12  ;;  %v5092_v8 = vrot.slane %v1989_v63, 9  ;;  %v2477_v16 = vshll.u32 %v2178_v0, 16  ;;  %v2481_v37 = vshrl.u32 %v2178_v0, 16  ;;  %v2598_v63 = vld [vmem:[#allocation2 + $0x9c] sm:$0xe] }
 0x215   : > { %v7619_v5 = vpop.f32.mrf.mxu0  ;;  %v7622_v61 = vadd.f32 %v7593_v57, %v4596_v47  ;;  %v5950_v57 = vld [vmem:[#allocation2 + $0x94] sm:$0xf]  ;;  %v2456_v12 = vsel %vm6533_vm10, %v2451_v26, %v2455_v42  ;;  %v3343_v47 = vunpack.c.l.b16 %v2724_v43  ;;  %v2473_v44 = vrot.slane %v2471_v2, 5 }
 0x216   : > { %v7611_v52 = vpop.f32.mrf.mxu1  ;;  %v2121_v25 = vrot.slane %v5950_v57, 5 }
 0x217   : > { %4728 = vmatmul.bf16.gmra.mxu0 %v3364_v22 }
 0x218   : > { %v4508_v54 = vpop.f32.mrf.mxu2  ;;  %v2123_v34 = vrot.slane %v2121_v25, 4  ;;  %v2122_v57 = vsel %vm6557_vm13, %v5092_v8, %v2121_v25 }
 0x219   : > { %v4509_v59 = vadd.f32 %v4508_v54, %v4420_v36  ;;  %v2727_v36 = vsel %vm6557_vm13, %v2725_v62, %v2726_v56  ;;  %v2468_v54 = vshrl.u32 %v2177_v45, 16  ;;  %v4423_v56 = vadd.f32 %v7598_v27, %v7064_v60  ;;  %v2198_v60 = vld [vmem:[#allocation2 + $0xa4] sm:$0x1] }
 0x21a   : > { %v4597_v53 = vpop.f32.mrf.mxu3  ;;  %v2466_v62 = vsel %vm6533_vm10, %v2461_v9, %v2465_v24  ;;  %v3279_v45 = vunpack.c.l.b16 %v2456_v12  ;;  %v4425_v27 = vadd.f32 %v7611_v52, %v7067_v4  ;;  %v2479_v24 = vrot.slane %v2477_v16, 5 }
 0x21b   : > { %v4598_v40 = vadd.f32 %v4597_v53, %v4509_v59  ;;  %v5951_v53 = vld [vmem:[#allocation2 + $0x98] sm:$0x1]  ;;  %v3280_v42 = vunpack.c.l.b16 %v2466_v62  ;;  %v2733_v39 = vrot.slane %v2198_v60, 5 }
 0x21d   : > { %v7624_v28 = vadd.f32 %v4686_v33, %v4598_v40  ;;  %4550 = vmatmul.bf16.gmra.mxu2 %v5638_v19  ;;  %v4691_v22 = vpop.f32.mrf.mxu0  ;;  %v3344_v19 = vunpack.c.l.b16 %v2727_v36  ;;  %v2470_v40 = vrot.slane %v2468_v54, 4  ;;  %v2483_v36 = vrot.slane %v2481_v37, 4 }
 0x21e   : > { %v7633_v32 = vpop.f32.mrf.mxu1 }
 0x21f   : > { %v5784_v33 = vpack.c.bf16 %v7624_v28, %v7622_v61  ;;  %4639 = vmatmul.bf16.gmra.mxu3 %v3300_v48  ;;  %v2124_v48 = vrot.slane %v5951_v53, 5  ;;  %v3365_v26 = vpack.c.b16 %v3344_v19, %v3343_v47  ;;  %v2474_v2 = vor.u32 %v2473_v44, %v2470_v40  ;;  %v5639_v19 = vld [vmem:[#allocation2 + $0x90] sm:$0xff]  ;;  %v2179_v40 = vld [vmem:[#allocation2 + $0xa8] sm:$0xf] }
 0x220   : > { %v4511_v31 = vpop.f32.mrf.mxu2  ;;  %v3137_v53 = vunpack.c.l.b16 %v2122_v57  ;;  %v2484_v4 = vor.u32 %v2483_v36, %v2479_v24  ;;  %v2180_v36 = vld [vmem:[#allocation2 + $0xac] sm:$0xf] }
 0x221   : > { %5785 = vst [vmem:[%s7631_s30] sm:$0xff] %v5784_v33   ;;  %4466 = vmatmul.bf16.gmra.mxu1 %v3157_v10  ;;  %v4512_v10 = vadd.f32 %v4511_v31, %v4423_v56  ;;  %v2125_v33 = vsel %vm6557_vm13, %v2123_v34, %v2124_v48  ;;  %v2730_v31 = vrot.slane %v2178_v0, 5  ;;  %v3301_v56 = vpack.c.b16 %v3280_v42, %v3279_v45  ;;  %v5952_v45 = vld [vmem:[#allocation2 + $0xa0] sm:$0xf] }
 0x222   : > { %v4600_v59 = vpop.f32.mrf.mxu3  ;;  %v3138_v25 = vunpack.c.l.b16 %v2125_v33  ;;  %v2487_v34 = vshll.u32 %v2198_v60, 16  ;;  %v5108_v48 = vrot.slane %v2598_v63, 9  ;;  %v2475_v37 = vrot.slane %v2474_v2, 4  ;;  %v1990_v60 = vld [vmem:[#allocation2 + $0x9c] sm:$0xe] }
 0x223   : > { %v4601_v12 = vadd.f32 %v4600_v59, %v4512_v10  ;;  %v2732_v52 = vrot.slane %v2730_v31, 4  ;;  %v2128_v42 = vrot.slane %v5952_v45, 5  ;;  %v2485_v57 = vrot.slane %v2484_v4, 4 }
 0x224   : > { %v3158_v59 = vpack.c.b16 %v3138_v25, %v3137_v53  ;;  %v2731_v10 = vsel %vm6557_vm13, %v5108_v48, %v2730_v31  ;;  %v2492_v63 = vshrl.u32 %v2179_v40, 16  ;;  %v2480_v31 = vsel %vm6533_vm10, %v2475_v37, %v2479_v24  ;;  %v5953_v25 = vld [vmem:[#allocation2 + $0xa4] sm:$0x1] }
 0x225   : > { %v7656_v9 = vpop.f32.mrf.mxu0  ;;  %v7659_v16 = vadd.f32 %v7619_v5, %v4601_v12  ;;  %v2734_v33 = vsel %vm6557_vm13, %v2732_v52, %v2733_v39  ;;  %v3345_v2 = vunpack.c.l.b16 %v2731_v10  ;;  %v2130_v53 = vrot.slane %v2128_v42, 4 }
 0x226   : > { %v7648_v43 = vpop.f32.mrf.mxu1  ;;  %v4428_v39 = vadd.f32 %v7633_v32, %v7140_v21  ;;  %v2505_v48 = vshrl.u32 %v2180_v36, 16  ;;  %v2199_v21 = vld [vmem:[#allocation2 + $0xb0] sm:$0x1]  ;;  %v8035_v32 = vld [vmem:[#allocation16_spill] sm:$0xff] }
 0x227   : > { %4733 = vmatmul.bf16.gmra.mxu0 %v3365_v26  ;;  %v2740_v50 = vrot.slane %v2199_v21, 5 }
 0x228   : > { %v4513_v54 = vpop.f32.mrf.mxu2 }
 0x229   : > { %v4514_v47 = vadd.f32 %v4513_v54, %v4425_v27  ;;  %v2495_v54 = vshll.u32 %v2179_v40, 16 }
 0x22a   : > { %v4602_v8 = vpop.f32.mrf.mxu3 }
 0x22b   : > { %v4603_v62 = vadd.f32 %v4602_v8, %v4514_v47  ;;  %v3346_v47 = vunpack.c.l.b16 %v2734_v33  ;;  %v2131_v8 = vrot.slane %v5953_v25, 5  ;;  %v2497_v4 = vrot.slane %v2495_v54, 5 }
 0x22c   : > { %v2507_v33 = vrot.slane %v2505_v48, 4 }
 0x22d   : > { %v7661_v0 = vadd.f32 %v4691_v22, %v4603_v62  ;;  %4555 = vmatmul.bf16.gmra.mxu2 %v5639_v19  ;;  %v4696_v5 = vpop.f32.mrf.mxu0  ;;  %v2489_v22 = vrot.slane %v2487_v34, 5  ;;  %v5093_v19 = vrot.slane %v1990_v60, 9  ;;  %v2501_v34 = vshll.u32 %v2180_v36, 16  ;;  %v2599_v60 = vld [vmem:[#allocation2 + $0xa8] sm:$0xe] }
 0x22e   : > { %v7663_v44 = vpop.f32.mrf.mxu1  ;;  %v2494_v62 = vrot.slane %v2492_v63, 4  ;;  %v3366_v37 = vpack.c.b16 %v3346_v47, %v3345_v2  ;;  %v2132_v45 = vsel %vm6557_vm13, %v2130_v53, %v2131_v8  ;;  %v5640_v47 = vld [vmem:[#allocation2 + $0x9c] sm:$0xff]  ;;  %v2511_v53 = vshll.u32 %v2199_v21, 16  ;;  %v1991_v21 = vld [vmem:[#allocation2 + $0xa8] sm:$0xe] }
 0x22f   : > { %v5789_v26 = vpack.c.bf16 %v7661_v0, %v7659_v16  ;;  %4644 = vmatmul.bf16.gmra.mxu3 %v3301_v56  ;;  %v2490_v56 = vsel %vm6533_vm10, %v2485_v57, %v2489_v22  ;;  %v2129_v10 = vsel %vm6557_vm13, %v5093_v19, %v2128_v42  ;;  %v2503_v22 = vrot.slane %v2501_v34, 5 }
 0x230   : > { %v4516_v27 = vpop.f32.mrf.mxu2  ;;  %v3282_v24 = vunpack.c.l.b16 %v2490_v56  ;;  %v2498_v54 = vor.u32 %v2497_v4, %v2494_v62  ;;  %v3139_v25 = vunpack.c.l.b16 %v2129_v10  ;;  %v3140_v42 = vunpack.c.l.b16 %v2132_v45  ;;  %v2181_v62 = vld [vmem:[#allocation2 + $0xb4] sm:$0xf] }
 0x231   : > { %5876 = vst [vmem:[%s7631_s30 + $0x8] sm:$0xff] %v5789_v26   ;;  %4471 = vmatmul.bf16.gmra.mxu1 %v3158_v59  ;;  %v4517_v52 = vadd.f32 %v4516_v27, %v4428_v39  ;;  %v3281_v59 = vunpack.c.l.b16 %v2480_v31  ;;  %v4430_v26 = vadd.f32 %v7648_v43, %v8035_v32  ;;  %v2737_v27 = vrot.slane %v2180_v36, 5 }
 0x232   : > { %v4605_v12 = vpop.f32.mrf.mxu3  ;;  %v5109_v8 = vrot.slane %v2599_v60, 9  ;;  %v2508_v43 = vor.u32 %v2507_v33, %v2503_v22  ;;  %v2499_v48 = vrot.slane %v2498_v54, 4  ;;  %v2182_v33 = vld [vmem:[#allocation2 + $0xb8] sm:$0xf]  ;;  %v2516_v60 = vshrl.u32 %v2181_v62, 16 }
 0x233   : > { %v4606_v31 = vadd.f32 %v4605_v12, %v4517_v52  ;;  %v3302_v39 = vpack.c.b16 %v3282_v24, %v3281_v59  ;;  %v2739_v32 = vrot.slane %v2737_v27, 4  ;;  %v3159_v12 = vpack.c.b16 %v3140_v42, %v3139_v25  ;;  %v5954_v59 = vld [vmem:[#allocation2 + $0xac] sm:$0xf]  ;;  %v5955_v42 = vld [vmem:[#allocation2 + $0xb0] sm:$0x1] }
 0x234   : > { %v2738_v52 = vsel %vm6557_vm13, %v5109_v8, %v2737_v27  ;;  %v2135_v24 = vrot.slane %v5954_v59, 5  ;;  %v2509_v10 = vrot.slane %v2508_v43, 4  ;;  %v2504_v27 = vsel %vm6533_vm10, %v2499_v48, %v2503_v22 }
 0x235   : > { %v7686_v57 = vpop.f32.mrf.mxu0  ;;  %v7689_v34 = vadd.f32 %v7656_v9, %v4606_v31  ;;  %v2741_v45 = vsel %vm6557_vm13, %v2739_v32, %v2740_v50  ;;  %v3347_v54 = vunpack.c.l.b16 %v2738_v52  ;;  %v2525_v8 = vshll.u32 %v2182_v33, 16 }
 0x236   : > { %v7678_v40 = vpop.f32.mrf.mxu1  ;;  %v2137_v25 = vrot.slane %v2135_v24, 4  ;;  %v2518_v43 = vrot.slane %v2516_v60, 4 }
 0x237   : > { %4738 = vmatmul.bf16.gmra.mxu0 %v3366_v37 }
 0x238   : > { %v4518_v63 = vpop.f32.mrf.mxu2 }
 0x239   : > { %v4519_v2 = vadd.f32 %v4518_v63, %v4430_v26  ;;  %v2519_v63 = vshll.u32 %v2181_v62, 16  ;;  %v3283_v62 = vunpack.c.l.b16 %v2504_v27 }
 0x23a   : > { %v4607_v19 = vpop.f32.mrf.mxu3 }
 0x23b   : > { %v4608_v56 = vadd.f32 %v4607_v19, %v4519_v2  ;;  %v3348_v2 = vunpack.c.l.b16 %v2741_v45  ;;  %v2138_v19 = vrot.slane %v5955_v42, 5  ;;  %v2521_v32 = vrot.slane %v2519_v63, 5  ;;  %v8037_v45 = vld [vmem:[#allocation18_spill] sm:$0xff] }
 0x23c   : > { %v2744_v63 = vrot.slane %v2182_v33, 5 }
 0x23d   : > { %v7691_v36 = vadd.f32 %v4696_v5, %v4608_v56  ;;  %4560 = vmatmul.bf16.gmra.mxu2 %v5640_v47  ;;  %v4701_v9 = vpop.f32.mrf.mxu0  ;;  %v2513_v5 = vrot.slane %v2511_v53, 5  ;;  %v5094_v47 = vrot.slane %v1991_v21, 9  ;;  %v2529_v56 = vshrl.u32 %v2182_v33, 16 }
 0x23e   : > { %v7693_v4 = vpop.f32.mrf.mxu1  ;;  %v3367_v48 = vpack.c.b16 %v3348_v2, %v3347_v54  ;;  %v2527_v21 = vrot.slane %v2525_v8, 5  ;;  %v2522_v54 = vor.u32 %v2521_v32, %v2518_v43  ;;  %v2183_v43 = vld [vmem:[#allocation2 + $0xc0] sm:$0xf] }
 0x23f   : > { %v5794_v37 = vpack.c.bf16 %v7691_v36, %v7689_v34  ;;  %4649 = vmatmul.bf16.gmra.mxu3 %v3302_v39  ;;  %v8036_v39 = vld [vmem:[#allocation17_spill] sm:$0xff]  ;;  %v2514_v53 = vsel %vm6533_vm10, %v2509_v10, %v2513_v5  ;;  %v2136_v59 = vsel %vm6557_vm13, %v5094_v47, %v2135_v24  ;;  %v4435_v10 = vadd.f32 %v7678_v40, %v8037_v45 }
 0x240   : > { %v4521_v26 = vpop.f32.mrf.mxu2  ;;  %v4433_v50 = vadd.f32 %v7663_v44, %v8036_v39  ;;  %v3284_v22 = vunpack.c.l.b16 %v2514_v53  ;;  %v2200_v44 = vld [vmem:[#allocation2 + $0xbc] sm:$0x1]  ;;  %v2531_v60 = vrot.slane %v2529_v56, 4  ;;  %v5641_v39 = vld [vmem:[#allocation2 + $0xa8] sm:$0xff]  ;;  %v2746_v45 = vrot.slane %v2744_v63, 4 }
 0x241   : > { %5877 = vst [vmem:[%s7631_s30 + $0x10] sm:$0xff] %v5794_v37   ;;  %4476 = vmatmul.bf16.gmra.mxu1 %v3159_v12  ;;  %v2139_v37 = vsel %vm6557_vm13, %v2137_v25, %v2138_v19  ;;  %v2535_v25 = vshll.u32 %v2200_v44, 16  ;;  %v2747_v29 = vrot.slane %v2200_v44, 5  ;;  %v2523_v56 = vrot.slane %v2522_v54, 4 }
 0x242   : > { %v4610_v31 = vpop.f32.mrf.mxu3  ;;  %v4522_v12 = vadd.f32 %v4521_v26, %v4433_v50  ;;  %v2600_v26 = vld [vmem:[#allocation2 + $0xb4] sm:$0xe]  ;;  %v3141_v50 = vunpack.c.l.b16 %v2136_v59  ;;  %v3142_v24 = vunpack.c.l.b16 %v2139_v37  ;;  %v3303_v53 = vpack.c.b16 %v3284_v22, %v3283_v62  ;;  %v5956_v62 = vld [vmem:[#allocation2 + $0xb8] sm:$0xf] }
 0x243   : > { %v5110_v19 = vrot.slane %v2600_v26, 9  ;;  %v2532_v40 = vor.u32 %v2531_v60, %v2527_v21  ;;  %v2142_v22 = vrot.slane %v5956_v62, 5  ;;  %v1992_v37 = vld [vmem:[#allocation2 + $0xb4] sm:$0xe]  ;;  %v2540_v60 = vshrl.u32 %v2183_v43, 16 }
 0x244   : > { %v4611_v2 = vadd.f32 %v4610_v31, %v4522_v12  ;;  %v3160_v31 = vpack.c.b16 %v3142_v24, %v3141_v50  ;;  %v2543_v26 = vshll.u32 %v2183_v43, 16  ;;  %v5957_v50 = vld [vmem:[#allocation2 + $0xbc] sm:$0x1] }
 0x245   : > { %v7716_v5 = vpop.f32.mrf.mxu0  ;;  %v2745_v12 = vsel %vm6557_vm13, %v5110_v19, %v2744_v63  ;;  %v2533_v59 = vrot.slane %v2532_v40, 4  ;;  %v2528_v63 = vsel %vm6533_vm10, %v2523_v56, %v2527_v21  ;;  %v2145_v24 = vrot.slane %v5957_v50, 5 }
 0x246   : > { %v7708_v52 = vpop.f32.mrf.mxu1  ;;  %v7719_v8 = vadd.f32 %v7686_v57, %v4611_v2  ;;  %v2542_v19 = vrot.slane %v2540_v60, 4  ;;  %v2545_v40 = vrot.slane %v2543_v26, 5 }
 0x247   : > { %4743 = vmatmul.bf16.gmra.mxu0 %v3367_v48 }
 0x248   : > { %v4523_v27 = vpop.f32.mrf.mxu2  ;;  %v2546_v60 = vor.u32 %v2545_v40, %v2542_v19 }
 0x249   : > { %v4524_v42 = vadd.f32 %v4523_v27, %v4435_v10  ;;  %v2184_v10 = vld [vmem:[#allocation2 + $0xc4] sm:$0xf]  ;;  %v3349_v27 = vunpack.c.l.b16 %v2745_v12 }
 0x24a   : > { %v4612_v47 = vpop.f32.mrf.mxu3 }
 0x24b   : > { %v4613_v15 = vadd.f32 %v4612_v47, %v4524_v42  ;;  %v5095_v42 = vrot.slane %v1992_v37, 9  ;;  %v2751_v37 = vrot.slane %v2184_v10, 5 }
 0x24d   : > { %v7721_v33 = vadd.f32 %v4701_v9, %v4613_v15  ;;  %4565 = vmatmul.bf16.gmra.mxu2 %v5641_v39  ;;  %v4706_v57 = vpop.f32.mrf.mxu0  ;;  %v2537_v15 = vrot.slane %v2535_v25, 5  ;;  %v2748_v9 = vsel %vm6557_vm13, %v2746_v45, %v2747_v29  ;;  %v2144_v39 = vrot.slane %v2142_v22, 4 }
 0x24e   : > { %v7723_v32 = vpop.f32.mrf.mxu1  ;;  %v3350_v2 = vunpack.c.l.b16 %v2748_v9  ;;  %v4438_v29 = vadd.f32 %v7693_v4, %v7246_v51  ;;  %v2553_v25 = vshrl.u32 %v2184_v10, 16  ;;  %v2143_v12 = vsel %vm6557_vm13, %v5095_v42, %v2142_v22  ;;  %v2201_v51 = vld [vmem:[#allocation2 + $0xc8] sm:$0x1]  ;;  %v2601_v9 = vld [vmem:[#allocation2 + $0xc0] sm:$0xe] }
 0x24f   : > { %v5799_v48 = vpack.c.bf16 %v7721_v33, %v7719_v8  ;;  %4654 = vmatmul.bf16.gmra.mxu3 %v3303_v53  ;;  %v2538_v47 = vsel %vm6533_vm10, %v2533_v59, %v2537_v15  ;;  %v2549_v53 = vshll.u32 %v2184_v10, 16  ;;  %v2146_v62 = vsel %vm6557_vm13, %v2144_v39, %v2145_v24 }
 0x250   : > { %v4526_v44 = vpop.f32.mrf.mxu2  ;;  %v3286_v21 = vunpack.c.l.b16 %v2538_v47  ;;  %v3368_v56 = vpack.c.b16 %v3350_v2, %v3349_v27  ;;  %v4440_v4 = vadd.f32 %v7708_v52, %v7256_v46  ;;  %v2555_v15 = vrot.slane %v2553_v25, 4  ;;  %v5642_v27 = vld [vmem:[#allocation2 + $0xb4] sm:$0xff] }
 0x251   : > { %5878 = vst [vmem:[%s7631_s30 + $0x18] sm:$0xff] %v5799_v48   ;;  %4481 = vmatmul.bf16.gmra.mxu1 %v3160_v31  ;;  %v4527_v45 = vadd.f32 %v4526_v44, %v4438_v29  ;;  %v3285_v31 = vunpack.c.l.b16 %v2528_v63  ;;  %v2551_v59 = vrot.slane %v2549_v53, 5  ;;  %v3143_v2 = vunpack.c.l.b16 %v2143_v12 }
 0x252   : > { %v4615_v54 = vpop.f32.mrf.mxu3  ;;  %v3144_v22 = vunpack.c.l.b16 %v2146_v62  ;;  %v2559_v39 = vshll.u32 %v2201_v51, 16  ;;  %v5111_v24 = vrot.slane %v2601_v9, 9  ;;  %v2753_v52 = vrot.slane %v2751_v37, 4  ;;  %v1993_v62 = vld [vmem:[#allocation2 + $0xc0] sm:$0xe] }
 0x253   : > { %v4616_v26 = vadd.f32 %v4615_v54, %v4527_v45  ;;  %v3304_v50 = vpack.c.b16 %v3286_v21, %v3285_v31  ;;  %v2556_v46 = vor.u32 %v2555_v15, %v2551_v59  ;;  %v2754_v47 = vrot.slane %v2201_v51, 5  ;;  %v5958_v45 = vld [vmem:[#allocation2 + $0xc4] sm:$0xf]  ;;  %v2185_v9 = vld [vmem:[#allocation2 + $0xcc] sm:$0xf] }
 0x254   : > { %v3161_v54 = vpack.c.b16 %v3144_v22, %v3143_v2  ;;  %v2547_v25 = vrot.slane %v2546_v60, 4  ;;  %v2752_v40 = vsel %vm6557_vm13, %v5111_v24, %v2751_v37  ;;  %v2149_v31 = vrot.slane %v5958_v45, 5  ;;  %v2186_v37 = vld [vmem:[#allocation2 + $0xd0] sm:$0xf] }
 0x255   : > { %v7746_v48 = vpop.f32.mrf.mxu0  ;;  %v7749_v53 = vadd.f32 %v7716_v5, %v4616_v26  ;;  %v2557_v5 = vrot.slane %v2556_v46, 4  ;;  %v2561_v12 = vrot.slane %v2559_v39, 5  ;;  %v3351_v15 = vunpack.c.l.b16 %v2752_v40 }
 0x256   : > { %v7738_v43 = vpop.f32.mrf.mxu1  ;;  %v5096_v26 = vrot.slane %v1993_v62, 9  ;;  %v4443_v22 = vadd.f32 %v7723_v32, %v7279_v17  ;;  %v2567_v39 = vshll.u32 %v2185_v9, 16  ;;  %v2573_v24 = vshll.u32 %v2186_v37, 16 }
 0x257   : > { %4748 = vmatmul.bf16.gmra.mxu0 %v3368_v56  ;;  %v4445_v17 = vadd.f32 %v7738_v43, %v7296_v35  ;;  %v2758_v45 = vrot.slane %v2186_v37, 5 }
 0x258   : > { %v4528_v44 = vpop.f32.mrf.mxu2 }
 0x259   : > { %v4529_v63 = vadd.f32 %v4528_v44, %v4440_v4  ;;  %v2552_v4 = vsel %vm6533_vm10, %v2547_v25, %v2551_v59  ;;  %v2150_v25 = vsel %vm6557_vm13, %v5096_v26, %v2149_v31  ;;  %v2760_v35 = vrot.slane %v2758_v45, 4 }
 0x25a   : > { %v4617_v42 = vpop.f32.mrf.mxu3  ;;  %v3287_v46 = vunpack.c.l.b16 %v2552_v4 }
 0x25b   : > { %v4618_v29 = vadd.f32 %v4617_v42, %v4529_v63  ;;  %v2151_v63 = vrot.slane %v2149_v31, 4  ;;  %v2562_v42 = vsel %vm6533_vm10, %v2557_v5, %v2561_v12  ;;  %v2569_v12 = vrot.slane %v2567_v39, 5  ;;  %v2202_v31 = vld [vmem:[#allocation2 + $0xd4] sm:$0x1] }
 0x25c   : > { %v2761_v43 = vrot.slane %v2202_v31, 5 }
 0x25d   : > { %v7751_v10 = vadd.f32 %v4706_v57, %v4618_v29  ;;  %4570 = vmatmul.bf16.gmra.mxu2 %v5642_v27  ;;  %v4711_v56 = vpop.f32.mrf.mxu0  ;;  %v2755_v57 = vsel %vm6557_vm13, %v2753_v52, %v2754_v47  ;;  %v5959_v27 = vld [vmem:[#allocation2 + $0xc8] sm:$0x1]  ;;  %v2577_v29 = vshrl.u32 %v2186_v37, 16  ;;  %v3288_v52 = vunpack.c.l.b16 %v2562_v42 }
 0x25e   : > { %v7753_v19 = vpop.f32.mrf.mxu1  ;;  %v3352_v60 = vunpack.c.l.b16 %v2755_v57  ;;  %v2152_v2 = vrot.slane %v5959_v27, 5  ;;  %v2575_v57 = vrot.slane %v2573_v24, 5 }
 0x25f   : > { %v5804_v21 = vpack.c.bf16 %v7751_v10, %v7749_v53  ;;  %4659 = vmatmul.bf16.gmra.mxu3 %v3304_v50  ;;  %v2564_v50 = vshrl.u32 %v2185_v9, 16  ;;  %v2579_v62 = vrot.slane %v2577_v29, 4  ;;  %v5643_v9 = vld [vmem:[#allocation2 + $0xc0] sm:$0xff] }
 0x260   : > { %v4531_v51 = vpop.f32.mrf.mxu2  ;;  %v3369_v47 = vpack.c.b16 %v3352_v60, %v3351_v15  ;;  %v2153_v40 = vsel %vm6557_vm13, %v2151_v63, %v2152_v2  ;;  %v3145_v60 = vunpack.c.l.b16 %v2150_v25 }
 0x261   : > { %5879 = vst [vmem:[%s7631_s30 + $0x20] sm:$0xff] %v5804_v21   ;;  %4486 = vmatmul.bf16.gmra.mxu1 %v3161_v54  ;;  %v4532_v59 = vadd.f32 %v4531_v51, %v4443_v22  ;;  %v2566_v5 = vrot.slane %v2564_v50, 4  ;;  %v2602_v51 = vld [vmem:[#allocation2 + $0xcc] sm:$0xe]  ;;  %v3146_v27 = vunpack.c.l.b16 %v2153_v40  ;;  %v3305_v22 = vpack.c.b16 %v3288_v52, %v3287_v46 }
 0x262   : > { %v4620_v44 = vpop.f32.mrf.mxu3  ;;  %v5112_v2 = vrot.slane %v2602_v51, 9  ;;  %v2580_v42 = vor.u32 %v2579_v62, %v2575_v57  ;;  %v2583_v50 = vshll.u32 %v2202_v31, 16 }
 0x263   : > { %v4621_v4 = vadd.f32 %v4620_v44, %v4532_v59  ;;  %v2570_v37 = vor.u32 %v2569_v12, %v2566_v5  ;;  %v3162_v24 = vpack.c.b16 %v3146_v27, %v3145_v60  ;;  %v4448_v12 = vadd.f32 %v7753_v19, %v7308_v18 }
 0x264   : > { %v2759_v52 = vsel %vm6557_vm13, %v5112_v2, %v2758_v45 }
 0x265   : > { %v4714_v32 = vpop.f32.mrf.mxu0  ;;  %v7775_v39 = vadd.f32 %v7746_v48, %v4621_v4  ;;  %v2571_v40 = vrot.slane %v2570_v37, 4  ;;  %v2581_v48 = vrot.slane %v2580_v42, 4 }
 0x266   : > { %v4449_v54 = vpop.f32.mrf.mxu1 }
 0x267   : > { %4753 = vmatmul.bf16.gmra.mxu0 %v3369_v47  ;;  %v2762_v47 = vsel %vm6557_vm13, %v2760_v35, %v2761_v43  ;;  %v2576_v62 = vsel %vm6533_vm10, %v2571_v40, %v2575_v57 }
 0x268   : > { %v4533_v21 = vpop.f32.mrf.mxu2  ;;  %v3354_v5 = vunpack.c.l.b16 %v2762_v47  ;;  %v3289_v60 = vunpack.c.l.b16 %v2576_v62 }
 0x269   : > { %v4534_v15 = vadd.f32 %v4533_v21, %v4445_v17  ;;  %v2585_v17 = vrot.slane %v2583_v50, 5  ;;  %v3353_v21 = vunpack.c.l.b16 %v2759_v52 }
 0x26a   : > { %v4622_v26 = vpop.f32.mrf.mxu3 }
 0x26b   : > { %v4623_v63 = vadd.f32 %v4622_v26, %v4534_v15  ;;  %v2586_v45 = vsel %vm6533_vm10, %v2581_v48, %v2585_v17  ;;  %v3370_v51 = vpack.c.b16 %v3354_v5, %v3353_v21  ;;  %v4450_v15 = vadd.f32 %v4449_v54, %v7319_v6 }
 0x26c   : > { %v3290_v27 = vunpack.c.l.b16 %v2586_v45 }
 0x26d   : > { %v7777_v44 = vadd.f32 %v4711_v56, %v4623_v63  ;;  %4575 = vmatmul.bf16.gmra.mxu2 %v5643_v9  ;;  %v4716_v46 = vpop.f32.mrf.mxu0  ;;  %v5644_v63 = vld [vmem:[#allocation2 + $0xcc] sm:$0xff] }
 0x26e   : > { %v4452_v29 = vpop.f32.mrf.mxu1  ;;  %v3306_v57 = vpack.c.b16 %v3290_v27, %v3289_v60 }
 0x26f   : > { %v5809_v59 = vpack.c.bf16 %v7777_v44, %v7775_v39  ;;  %4664 = vmatmul.bf16.gmra.mxu3 %v3305_v22  ;;  %v4453_v42 = vadd.f32 %v4452_v29, %v7338_v58 }
 0x270   : > { %v4536_v25 = vpop.f32.mrf.mxu2 }
 0x271   : > { %5880 = vst [vmem:[%s7631_s30 + $0x28] sm:$0xff] %v5809_v59   ;;  %4491 = vmatmul.bf16.gmra.mxu1 %v3162_v24  ;;  %v4537_v14 = vadd.f32 %v4536_v25, %v4448_v12 }
 0x272   : > { %v4625_v56 = vpop.f32.mrf.mxu3 }
 0x273   : > { %v4626_v26 = vadd.f32 %v4625_v56, %v4537_v14 }
 0x275   : > { %v4719_v9 = vpop.f32.mrf.mxu0  ;;  %v7793_v2 = vadd.f32 %v4714_v32, %v4626_v26 }
 0x276   : > { %v4454_v4 = vpop.f32.mrf.mxu1 }
 0x277   : > { %4758 = vmatmul.bf16.gmra.mxu0 %v3370_v51  ;;  %v4455_v32 = vadd.f32 %v4454_v4, %v7352_v23 }
 0x278   : > { %v4538_v31 = vpop.f32.mrf.mxu2 }
 0x279   : > { %v4539_v22 = vadd.f32 %v4538_v31, %v4450_v15 }
 0x27a   : > { %v4627_v18 = vpop.f32.mrf.mxu3 }
 0x27b   : > { %v4628_v19 = vadd.f32 %v4627_v18, %v4539_v22 }
 0x27d   : > { %v7795_v13 = vadd.f32 %v4716_v46, %v4628_v19  ;;  %4580 = vmatmul.bf16.gmra.mxu2 %v5644_v63  ;;  %v4721_v54 = vpop.f32.mrf.mxu0 }
 0x27e   : > { %v4457_v35 = vpop.f32.mrf.mxu1 }
 0x27f   : > { %v5814_v6 = vpack.c.bf16 %v7795_v13, %v7793_v2  ;;  %4669 = vmatmul.bf16.gmra.mxu3 %v3306_v57  ;;  %v4458_v23 = vadd.f32 %v4457_v35, %v7365_v20 }
 0x280   : > { %v4541_v43 = vpop.f32.mrf.mxu2 }
 0x281   : > { %5881 = vst [vmem:[%s7631_s30 + $0x30] sm:$0xff] %v5814_v6   ;;  %v4542_v50 = vadd.f32 %v4541_v43, %v4453_v42 }
 0x282   : > { %v4630_v37 = vpop.f32.mrf.mxu3 }
 0x283   : > { %v4631_v52 = vadd.f32 %v4630_v37, %v4542_v50 }
 0x285   : > { %v4724_v59 = vpop.f32.mrf.mxu0  ;;  %v7802_v48 = vadd.f32 %v4719_v9, %v4631_v52 }
 0x286   : > { %v4459_v24 = vpop.f32.mrf.mxu1 }
 0x287   : > { %v4460_v45 = vadd.f32 %v4459_v24, %v7380_v41 }
 0x288   : > { %v4543_v46 = vpop.f32.mrf.mxu2 }
 0x289   : > { %v4544_v47 = vadd.f32 %v4543_v46, %v4455_v32 }
 0x28a   : > { %v4632_v25 = vpop.f32.mrf.mxu3 }
 0x28b   : > { %v4633_v40 = vadd.f32 %v4632_v25, %v4544_v47 }
 0x28d   : > { %v7804_v17 = vadd.f32 %v4721_v54, %v4633_v40  ;;  %v4726_v58 = vpop.f32.mrf.mxu0 }
 0x28e   : > { %v4462_v56 = vpop.f32.mrf.mxu1 }
 0x28f   : > { %v5819_v21 = vpack.c.bf16 %v7804_v17, %v7802_v48  ;;  %v4463_v41 = vadd.f32 %v4462_v56, %v7399_v55 }
 0x290   : > { %v4546_v29 = vpop.f32.mrf.mxu2 }
 0x291   : > { %5882 = vst [vmem:[%s7631_s30 + $0x38] sm:$0xff] %v5819_v21   ;;  %v4547_v12 = vadd.f32 %v4546_v29, %v4458_v23 }
 0x292   : > { %v4635_v5 = vpop.f32.mrf.mxu3 }
 0x293   : > { %v4636_v4 = vadd.f32 %v4635_v5, %v4547_v12  ;;  %v4764_v12 = vadd.f32 %v7624_v28, %v7622_v61 }
 0x295   : > { %v4729_v14 = vpop.f32.mrf.mxu0  ;;  %v7811_v27 = vadd.f32 %v4724_v59, %v4636_v4 }
 0x296   : > { %v4464_v62 = vpop.f32.mrf.mxu1 }
 0x297   : > { %v4465_v35 = vadd.f32 %v4464_v62, %v7413_v49 }
 0x298   : > { %v4548_v51 = vpop.f32.mrf.mxu2 }
 0x299   : > { %v4549_v15 = vadd.f32 %v4548_v51, %v4460_v45  ;;  %v4765_v45 = vadd.f32 %v4764_v12, %v7659_v16 }
 0x29a   : > { %v4637_v9 = vpop.f32.mrf.mxu3 }
 0x29b   : > { %v4638_v60 = vadd.f32 %v4637_v9, %v4549_v15  ;;  %v4766_v4 = vadd.f32 %v4765_v45, %v7661_v0 }
 0x29d   : > { %v7813_v31 = vadd.f32 %v4726_v58, %v4638_v60  ;;  %v4731_v20 = vpop.f32.mrf.mxu0  ;;  %v4767_v60 = vadd.f32 %v4766_v4, %v7689_v34 }
 0x29e   : > { %v4467_v26 = vpop.f32.mrf.mxu1 }
 0x29f   : > { %v5824_v22 = vpack.c.bf16 %v7813_v31, %v7811_v27  ;;  %v4468_v49 = vadd.f32 %v4467_v26, %v7426_v1 }
 0x2a0   : > { %v4551_v63 = vpop.f32.mrf.mxu2 }
 0x2a1   : > { %5883 = vst [vmem:[%s7631_s30 + $0x40] sm:$0xff] %v5824_v22   ;;  %v4552_v19 = vadd.f32 %v4551_v63, %v4463_v41  ;;  %v4768_v22 = vadd.f32 %v4767_v60, %v7691_v36 }
 0x2a2   : > { %v4640_v18 = vpop.f32.mrf.mxu3 }
 0x2a3   : > { %v4641_v43 = vadd.f32 %v4640_v18, %v4552_v19  ;;  %v4769_v63 = vadd.f32 %v4768_v22, %v7719_v8 }
 0x2a5   : > { %v4734_v6 = vpop.f32.mrf.mxu0  ;;  %v7820_v24 = vadd.f32 %v4729_v14, %v4641_v43  ;;  %v4770_v41 = vadd.f32 %v4769_v63, %v7721_v33 }
 0x2a6   : > { %v4469_v57 = vpop.f32.mrf.mxu1 }
 0x2a7   : > { %v4470_v56 = vadd.f32 %v4469_v57, %v7441_v30 }
 0x2a8   : > { %v4553_v54 = vpop.f32.mrf.mxu2 }
 0x2a9   : > { %v4554_v37 = vadd.f32 %v4553_v54, %v4465_v35  ;;  %v4771_v54 = vadd.f32 %v4770_v41, %v7749_v53 }
 0x2aa   : > { %v4642_v42 = vpop.f32.mrf.mxu3 }
 0x2ab   : > { %v4643_v50 = vadd.f32 %v4642_v42, %v4554_v37 }
 0x2ad   : > { %v7822_v32 = vadd.f32 %v4731_v20, %v4643_v50  ;;  %v4736_v55 = vpop.f32.mrf.mxu0  ;;  %v4772_v50 = vadd.f32 %v4771_v54, %v7751_v10 }
 0x2ae   : > { %v4472_v59 = vpop.f32.mrf.mxu1 }
 0x2af   : > { %v5829_v46 = vpack.c.bf16 %v7822_v32, %v7820_v24  ;;  %v4473_v20 = vadd.f32 %v4472_v59, %v7460_v3  ;;  %v4773_v3 = vadd.f32 %v4772_v50, %v7775_v39 }
 0x2b0   : > { %v4556_v52 = vpop.f32.mrf.mxu2 }
 0x2b1   : > { %5884 = vst [vmem:[%s7631_s30 + $0x48] sm:$0xff] %v5829_v46   ;;  %v4557_v25 = vadd.f32 %v4556_v52, %v4468_v49 }
 0x2b2   : > { %v4645_v47 = vpop.f32.mrf.mxu3 }
 0x2b3   : > { %v4646_v29 = vadd.f32 %v4645_v47, %v4557_v25 }
 0x2b5   : > { %v4739_v21 = vpop.f32.mrf.mxu0  ;;  %v7832_v14 = vadd.f32 %v4734_v6, %v4646_v29 }
 0x2b6   : > { %v4474_v40 = vpop.f32.mrf.mxu1 }
 0x2b7   : > { %v4475_v19 = vadd.f32 %v4474_v40, %v7474_v38  ;;  %v4774_v38 = vadd.f32 %v4773_v3, %v7777_v44  ;;  %v8039_v3 = vld [vmem:[#allocation9_spill] sm:$0xff] }
 0x2b8   : > { %v4558_v58 = vpop.f32.mrf.mxu2 }
 0x2b9   : > { %v4559_v5 = vadd.f32 %v4558_v58, %v4470_v56  ;;  %v4775_v25 = vadd.f32 %v4774_v38, %v7793_v2 }
 0x2ba   : > { %v4647_v23 = vpop.f32.mrf.mxu3 }
 0x2bb   : > { %v4648_v62 = vadd.f32 %v4647_v23, %v4559_v5  ;;  %v4776_v58 = vadd.f32 %v4775_v25, %v7795_v13 }
 0x2bd   : > { %v7834_v51 = vadd.f32 %v4736_v55, %v4648_v62  ;;  %v4741_v15 = vpop.f32.mrf.mxu0 }
 0x2be   : > { %v4477_v1 = vpop.f32.mrf.mxu1 }
 0x2bf   : > { %v5834_v30 = vpack.c.bf16 %v7834_v51, %v7832_v14  ;;  %v4478_v29 = vadd.f32 %v4477_v1, %v7487_v7 }
 0x2c0   : > { %v4561_v9 = vpop.f32.mrf.mxu2 }
 0x2c1   : > { %5885 = vst [vmem:[%s7631_s30 + $0x50] sm:$0xff] %v5834_v30   ;;  %v4562_v18 = vadd.f32 %v4561_v9, %v4473_v20 }
 0x2c2   : > { %v4650_v26 = vpop.f32.mrf.mxu3 }
 0x2c3   : > { %v4651_v43 = vadd.f32 %v4650_v26, %v4562_v18  ;;  %v8038_v18 = vld [vmem:[#allocation7_spill] sm:$0xff] }
 0x2c5   : > { %v4744_v57 = vpop.f32.mrf.mxu0  ;;  %v7849_v59 = vadd.f32 %v4739_v21, %v4651_v43  ;;  %v4777_v21 = vadd.f32 %v4776_v58, %v7802_v48 }
 0x2c6   : > { %v4479_v6 = vpop.f32.mrf.mxu1 }
 0x2c7   : > { %v4778_v23 = vadd.f32 %v4777_v21, %v7804_v17  ;;  %v4480_v12 = vadd.f32 %v4479_v6, %v7502_v11 }
 0x2c8   : > { %v4563_v35 = vpop.f32.mrf.mxu2 }
 0x2c9   : > { %v4564_v37 = vadd.f32 %v4563_v35, %v4475_v19  ;;  %v4779_v45 = vadd.f32 %v4778_v23, %v7811_v27 }
 0x2ca   : > { %v4652_v42 = vpop.f32.mrf.mxu3 }
 0x2cb   : > { %v4653_v46 = vadd.f32 %v4652_v42, %v4564_v37  ;;  %v4780_v60 = vadd.f32 %v4779_v45, %v7813_v31 }
 0x2cd   : > { %v7851_v55 = vadd.f32 %v4741_v15, %v4653_v46  ;;  %v4746_v49 = vpop.f32.mrf.mxu0  ;;  %v4781_v7 = vadd.f32 %v4780_v60, %v7820_v24 }
 0x2ce   : > { %v4482_v56 = vpop.f32.mrf.mxu1 }
 0x2cf   : > { %v5839_v52 = vpack.c.bf16 %v7851_v55, %v7849_v59  ;;  %v4782_v11 = vadd.f32 %v4781_v7, %v7822_v32  ;;  %v4483_v41 = vadd.f32 %v4482_v56, %v8038_v18  ;;  %v8041_v7 = vld [vmem:[#allocation13_spill] sm:$0xff] }
 0x2d0   : > { %v4566_v47 = vpop.f32.mrf.mxu2 }
 0x2d1   : > { %5886 = vst [vmem:[%s7631_s30 + $0x58] sm:$0xff] %v5839_v52   ;;  %v4567_v5 = vadd.f32 %v4566_v47, %v4478_v29  ;;  %v4783_v35 = vadd.f32 %v4782_v11, %v7832_v14 }
 0x2d2   : > { %v4655_v40 = vpop.f32.mrf.mxu3 }
 0x2d3   : > { %v4656_v4 = vadd.f32 %v4655_v40, %v4567_v5  ;;  %v4784_v43 = vadd.f32 %v4783_v35, %v7834_v51 }
 0x2d5   : > { %v4749_v9 = vpop.f32.mrf.mxu0  ;;  %v7866_v1 = vadd.f32 %v4744_v57, %v4656_v4  ;;  %v4785_v57 = vadd.f32 %v4784_v43, %v7849_v59 }
 0x2d6   : > { %v4484_v22 = vpop.f32.mrf.mxu1 }
 0x2d7   : > { %v4786_v46 = vadd.f32 %v4785_v57, %v7851_v55  ;;  %v4485_v38 = vadd.f32 %v4484_v22, %v8039_v3  ;;  %v8042_v57 = vld [vmem:[#allocation3_spill] sm:$0xff] }
 0x2d8   : > { %v4568_v62 = vpop.f32.mrf.mxu2 }
 0x2d9   : > { %v4569_v30 = vadd.f32 %v4568_v62, %v4480_v12  ;;  %v4787_v47 = vadd.f32 %v4786_v46, %v7866_v1  ;;  %v8040_v62 = vld [vmem:[#allocation11_spill] sm:$0xff] }
 0x2da   : > { %v4657_v15 = vpop.f32.mrf.mxu3 }
 0x2db   : > { %v4658_v26 = vadd.f32 %v4657_v15, %v4569_v30 }
 0x2dd   : > { %v7868_v20 = vadd.f32 %v4746_v49, %v4658_v26  ;;  %v4751_v37 = vpop.f32.mrf.mxu0 }
 0x2de   : > { %v4487_v50 = vpop.f32.mrf.mxu1 }
 0x2df   : > { %v5844_v63 = vpack.c.bf16 %v7868_v20, %v7866_v1  ;;  %v4788_v56 = vadd.f32 %v4787_v47, %v7868_v20  ;;  %v4488_v45 = vadd.f32 %v4487_v50, %v8040_v62 }
 0x2e0   : > { %v4571_v19 = vpop.f32.mrf.mxu2 }
 0x2e1   : > { %5887 = vst [vmem:[%s7631_s30 + $0x60] sm:$0xff] %v5844_v63   ;;  %v4572_v6 = vadd.f32 %v4571_v19, %v4483_v41 }
 0x2e2   : > { %v4660_v54 = vpop.f32.mrf.mxu3 }
 0x2e3   : > { %v4661_v42 = vadd.f32 %v4660_v54, %v4572_v6 }
 0x2e5   : > { %v4750_v49 = vadd.f32 %v4749_v9, %v4661_v42  ;;  %v4754_v5 = vpop.f32.mrf.mxu0 }
 0x2e6   : > { %v4489_v30 = vpop.f32.mrf.mxu1 }
 0x2e7   : > { %v4789_v29 = vadd.f32 %v4788_v56, %v4750_v49  ;;  %v4490_v11 = vadd.f32 %v4489_v30, %v8041_v7  ;;  %v8043_v56 = vld [vmem:[#allocation4_spill] sm:$0xff] }
 0x2e8   : > { %v4573_v52 = vpop.f32.mrf.mxu2 }
 0x2e9   : > { %v4574_v25 = vadd.f32 %v4573_v52, %v4485_v38 }
 0x2ea   : > { %v4662_v40 = vpop.f32.mrf.mxu3 }
 0x2eb   : > { %v4663_v58 = vadd.f32 %v4662_v40, %v4574_v25 }
 0x2ed   : > { %v4752_v21 = vadd.f32 %v4751_v37, %v4663_v58  ;;  %v4756_v63 = vpop.f32.mrf.mxu0 }
 0x2ee   : > { %v4492_v35 = vpop.f32.mrf.mxu1 }
 0x2ef   : > { %v4790_v23 = vadd.f32 %v4789_v29, %v4752_v21  ;;  %v5849_v12 = vpack.c.bf16 %v4752_v21, %v4750_v49  ;;  %v4493_v42 = vadd.f32 %v4492_v35, %v8042_v57 }
 0x2f0   : > { %v4576_v4 = vpop.f32.mrf.mxu2 }
 0x2f1   : > { %5888 = vst [vmem:[%s7631_s30 + $0x68] sm:$0xff] %v5849_v12   ;;  %v4577_v15 = vadd.f32 %v4576_v4, %v4488_v45 }
 0x2f2   : > { %v4665_v60 = vpop.f32.mrf.mxu3 }
 0x2f3   : > { %v4666_v26 = vadd.f32 %v4665_v60, %v4577_v15 }
 0x2f5   : > { %v4755_v9 = vadd.f32 %v4754_v5, %v4666_v26  ;;  %v4759_v3 = vpop.f32.mrf.mxu0 }
 0x2f6   : > { %v4494_v47 = vpop.f32.mrf.mxu1 }
 0x2f7   : > { %v4791_v22 = vadd.f32 %v4790_v23, %v4755_v9  ;;  %v4495_v58 = vadd.f32 %v4494_v47, %v8043_v56 }
 0x2f8   : > { %v4578_v18 = vpop.f32.mrf.mxu2 }
 0x2f9   : > { %v4579_v41 = vadd.f32 %v4578_v18, %v4490_v11 }
 0x2fa   : > { %v4667_v19 = vpop.f32.mrf.mxu3 }
 0x2fb   : > { %v4668_v6 = vadd.f32 %v4667_v19, %v4579_v41 }
 0x2fd   : > { %v4757_v54 = vadd.f32 %v4756_v63, %v4668_v6  ;;  %v4761_v62 = vpop.f32.mrf.mxu0 }
 0x2ff   : > { %v4792_v43 = vadd.f32 %v4791_v22, %v4757_v54  ;;  %v5854_v37 = vpack.c.bf16 %v4757_v54, %v4755_v9 }
 0x300   : > { %v4581_v50 = vpop.f32.mrf.mxu2 }
 0x301   : > { %5889 = vst [vmem:[%s7631_s30 + $0x70] sm:$0xff] %v5854_v37   ;;  %v4582_v46 = vadd.f32 %v4581_v50, %v4493_v42 }
 0x302   : > { %v4670_v38 = vpop.f32.mrf.mxu3 }
 0x303   : > { %v4671_v52 = vadd.f32 %v4670_v38, %v4582_v46 }
 0x305   : > { %v4760_v25 = vadd.f32 %v4759_v3, %v4671_v52 }
 0x307   : > { %v4793_v40 = vadd.f32 %v4792_v43, %v4760_v25 }
 0x308   : > { %v4583_v29 = vpop.f32.mrf.mxu2 }
 0x309   : > { %v4584_v5 = vadd.f32 %v4583_v29, %v4495_v58 }
 0x30a   : > { %v4672_v23 = vpop.f32.mrf.mxu3 }
 0x30b   : > { %v4673_v12 = vadd.f32 %v4672_v23, %v4584_v5 }
 0x30d   : > { %v4762_v45 = vadd.f32 %v4761_v62, %v4673_v12 }
 0x30f   : > { %v4794_v4 = vadd.f32 %v4793_v40, %v4762_v45  ;;  %v5859_v30 = vpack.c.bf16 %v4762_v45, %v4760_v25 }
 0x311   : > { %v4795_v15 = vrot.slane %v4794_v4, 4  ;;  %5890 = vst [vmem:[%s7631_s30 + $0x78] sm:$0xff] %v5859_v30  }
 0x313   : > { %v4796_v60 = vadd.f32 %v4795_v15, %v4794_v4 }
 0x315   : > { %v4797_v26 = vrot.slane %v4796_v60, 2 }
 0x317   : > { %v4798_v22 = vadd.f32 %v4797_v26, %v4796_v60 }
 0x319   : > { %v4799_v7 = vrot.slane %v4798_v22, 1 }
 0x31b   : > { %v4800_v11 = vadd.f32 %v4799_v7, %v4798_v22 }
 0x31d   : > { %4903 = vst [vmem:[%s7893_s8] sm:$0x1] %v4800_v11  ;;  %v7896_v63 = vmul.f32 0.00390625, %v4800_v11 }
 0x31f   : > { %v7899_v18 = vsub.f32 %v4750_v49, %v7896_v63  ;;  %v7902_v41 = vsub.f32 %v4752_v21, %v7896_v63  ;;  %v7905_v19 = vsub.f32 %v4755_v9, %v7896_v63  ;;  %v7908_v35 = vsub.f32 %v4757_v54, %v7896_v63 }
 0x320   : > { %v7911_v6 = vsub.f32 %v4760_v25, %v7896_v63  ;;  %v7914_v43 = vsub.f32 %v4762_v45, %v7896_v63  ;;  %v4802_v37 = vsub.f32 %v7622_v61, %v7896_v63  ;;  %v4803_v49 = vsub.f32 %v7624_v28, %v7896_v63 }
 0x321   : > { %v4804_v21 = vsub.f32 %v7659_v16, %v7896_v63  ;;  %v4805_v54 = vsub.f32 %v7661_v0, %v7896_v63  ;;  %v4806_v42 = vsub.f32 %v7689_v34, %v7896_v63  ;;  %v4807_v3 = vsub.f32 %v7691_v36, %v7896_v63 }
 0x322   : > { %v4834_v9 = vmul.f32 %v4802_v37, %v4802_v37  ;;  %v4835_v57 = vmul.f32 %v4803_v49, %v4803_v49  ;;  %v4808_v28 = vsub.f32 %v7719_v8, %v7896_v63  ;;  %v4809_v47 = vsub.f32 %v7721_v33, %v7896_v63 }
 0x323   : > { %v4836_v50 = vmul.f32 %v4804_v21, %v4804_v21  ;;  %v4837_v61 = vmul.f32 %v4805_v54, %v4805_v54  ;;  %v4838_v52 = vmul.f32 %v4806_v42, %v4806_v42  ;;  %v4839_v25 = vmul.f32 %v4807_v3, %v4807_v3 }
 0x324   : > { %v4866_v46 = vadd.f32 %v4835_v57, %v4834_v9  ;;  %v4810_v34 = vsub.f32 %v7749_v53, %v7896_v63  ;;  %v4840_v40 = vmul.f32 %v4808_v28, %v4808_v28  ;;  %v4811_v36 = vsub.f32 %v7751_v10, %v7896_v63 }
 0x325   : > { %v4841_v58 = vmul.f32 %v4809_v47, %v4809_v47  ;;  %v4812_v8 = vsub.f32 %v7775_v39, %v7896_v63  ;;  %v4813_v33 = vsub.f32 %v7777_v44, %v7896_v63  ;;  %v4814_v53 = vsub.f32 %v7793_v2, %v7896_v63 }
 0x326   : > { %v4867_v38 = vadd.f32 %v4866_v46, %v4836_v50  ;;  %v4842_v5 = vmul.f32 %v4810_v34, %v4810_v34  ;;  %v4843_v12 = vmul.f32 %v4811_v36, %v4811_v36  ;;  %v4815_v10 = vsub.f32 %v7795_v13, %v7896_v63 }
 0x327   : > { %v4844_v45 = vmul.f32 %v4812_v8, %v4812_v8  ;;  %v4845_v30 = vmul.f32 %v4813_v33, %v4813_v33  ;;  %v4816_v39 = vsub.f32 %v7802_v48, %v7896_v63  ;;  %v4846_v60 = vmul.f32 %v4814_v53, %v4814_v53 }
 0x328   : > { %v4868_v16 = vadd.f32 %v4867_v38, %v4837_v61  ;;  %v4817_v44 = vsub.f32 %v7804_v17, %v7896_v63  ;;  %v4847_v22 = vmul.f32 %v4815_v10, %v4815_v10  ;;  %v4818_v2 = vsub.f32 %v7811_v27, %v7896_v63 }
 0x329   : > { %v4848_v11 = vmul.f32 %v4816_v39, %v4816_v39  ;;  %v4819_v13 = vsub.f32 %v7813_v31, %v7896_v63  ;;  %v4820_v48 = vsub.f32 %v7820_v24, %v7896_v63  ;;  %v4821_v17 = vsub.f32 %v7822_v32, %v7896_v63 }
 0x32a   : > { %v4869_v0 = vadd.f32 %v4868_v16, %v4838_v52  ;;  %v4849_v49 = vmul.f32 %v4817_v44, %v4817_v44  ;;  %v4850_v9 = vmul.f32 %v4818_v2, %v4818_v2  ;;  %v4822_v27 = vsub.f32 %v7832_v14, %v7896_v63 }
 0x32b   : > { %v4851_v54 = vmul.f32 %v4819_v13, %v4819_v13  ;;  %v4852_v50 = vmul.f32 %v4820_v48, %v4820_v48  ;;  %v4823_v31 = vsub.f32 %v7834_v51, %v7896_v63  ;;  %v4853_v3 = vmul.f32 %v4821_v17, %v4821_v17 }
 0x32c   : > { %v4870_v56 = vadd.f32 %v4869_v0, %v4839_v25  ;;  %v4824_v24 = vsub.f32 %v7849_v59, %v7896_v63  ;;  %v4854_v38 = vmul.f32 %v4822_v27, %v4822_v27  ;;  %v4825_v32 = vsub.f32 %v7851_v55, %v7896_v63 }
 0x32d   : > { %v4855_v52 = vmul.f32 %v4823_v31, %v4823_v31  ;;  %v4826_v14 = vsub.f32 %v7866_v1, %v7896_v63  ;;  %v4827_v51 = vsub.f32 %v7868_v20, %v7896_v63  ;;  %v4862_v1 = vmul.f32 %v7905_v19, %v7905_v19 }
 0x32e   : > { %v4871_v29 = vadd.f32 %v4870_v56, %v4840_v40  ;;  %v4856_v47 = vmul.f32 %v4824_v24, %v4824_v24  ;;  %v4857_v0 = vmul.f32 %v4825_v32, %v4825_v32  ;;  %v4863_v20 = vmul.f32 %v7908_v35, %v7908_v35 }
 0x32f   : > { %v4858_v40 = vmul.f32 %v4826_v14, %v4826_v14  ;;  %v4859_v59 = vmul.f32 %v4827_v51, %v4827_v51 }
 0x330   : > { %v4872_v23 = vadd.f32 %v4871_v29, %v4841_v58  ;;  %v4860_v58 = vmul.f32 %v7899_v18, %v7899_v18  ;;  %v4861_v29 = vmul.f32 %v7902_v41, %v7902_v41  ;;  %v4865_v18 = vmul.f32 %v7914_v43, %v7914_v43 }
 0x332   : > { %v4873_v62 = vadd.f32 %v4872_v23, %v4842_v5  ;;  %v4864_v23 = vmul.f32 %v7911_v6, %v7911_v6 }
 0x334   : > { %v4874_v4 = vadd.f32 %v4873_v62, %v4843_v12 }
 0x336   : > { %v4875_v15 = vadd.f32 %v4874_v4, %v4844_v45 }
 0x338   : > { %v4876_v26 = vadd.f32 %v4875_v15, %v4845_v30 }
 0x33a   : > { %v4877_v7 = vadd.f32 %v4876_v26, %v4846_v60 }
 0x33c   : > { %v4878_v37 = vadd.f32 %v4877_v7, %v4847_v22 }
 0x33e   : > { %v4879_v21 = vadd.f32 %v4878_v37, %v4848_v11 }
 0x340   : > { %v4880_v57 = vadd.f32 %v4879_v21, %v4849_v49 }
 0x342   : > { %v4881_v42 = vadd.f32 %v4880_v57, %v4850_v9 }
 0x344   : > { %v4882_v46 = vadd.f32 %v4881_v42, %v4851_v54 }
 0x346   : > { %v4883_v61 = vadd.f32 %v4882_v46, %v4852_v50 }
 0x348   : > { %v4884_v28 = vadd.f32 %v4883_v61, %v4853_v3 }
 0x34a   : > { %v4885_v16 = vadd.f32 %v4884_v28, %v4854_v38 }
 0x34c   : > { %v4886_v25 = vadd.f32 %v4885_v16, %v4855_v52 }
 0x34e   : > { %v4887_v34 = vadd.f32 %v4886_v25, %v4856_v47 }
 0x350   : > { %v4888_v56 = vadd.f32 %v4887_v34, %v4857_v0 }
 0x352   : > { %v4889_v36 = vadd.f32 %v4888_v56, %v4858_v40 }
 0x354   : > { %v4890_v55 = vadd.f32 %v4889_v36, %v4859_v59 }
 0x356   : > { %v4891_v8 = vadd.f32 %v4890_v55, %v4860_v58 }
 0x358   : > { %v4892_v5 = vadd.f32 %v4891_v8, %v4861_v29 }
 0x35a   : > { %v4893_v63 = vadd.f32 %v4892_v5, %v4862_v1 }
 0x35c   : > { %v4894_v33 = vadd.f32 %v4893_v63, %v4863_v20 }
 0x35e   : > { %v4895_v12 = vadd.f32 %v4894_v33, %v4864_v23 }
 0x360   : > { %v4896_v62 = vadd.f32 %v4895_v12, %v4865_v18 }
 0x362   : > { %v4897_v41 = vrot.slane %v4896_v62, 4 }
 0x364   : > { %v4898_v53 = vadd.f32 %v4897_v41, %v4896_v62 }
 0x366   : > { %v4899_v45 = vrot.slane %v4898_v53, 2 }
 0x368   : > { %v4900_v4 = vadd.f32 %v4899_v45, %v4898_v53 }
 0x36a   : > { %v4901_v10 = vrot.slane %v4900_v4, 1 }
 0x36c   : > { %v4902_v19 = vadd.f32 %v4901_v10, %v4900_v4 }
 0x36e   : > { %4904 = vst [vmem:[%s7893_s8 + $0x1] sm:$0x1] %v4902_v19 }
 0x36f PF: > { %s16_s18 = sadd.s32 1, %s5966_s18  }
 0x370   : > { %p13_p4 = scmp.ge.s32.totalorder %s16_s18, 4  }
 0x372   :  { %15 = sbr.rel (!%p13_p4) target bundleno = 1 (0x1), region = 80 }

</bundles_post_ra>
